<compile_context>
chip_gen: v7x
topology: tpu7x:2x2x1
jax: 0.10.0
libtpu: 0.0.40
codegen_flags: <defaults>
</compile_context>

<pallas_src>
import functools

import jax
import jax.numpy as jnp
from jax.experimental import pallas as pl
from jax.experimental.pallas import tpu as pltpu

NEG_SLOPE = 0.1


def _leaky(x):
    return jnp.where(x >= 0, x, NEG_SLOPE * x)


# ----------------------------------------------------------------------------
# In-kernel building blocks (operate on per-batch (C, L) VMEM values)
# ----------------------------------------------------------------------------
def _conv_fused(xs, w2d, *, K, dil, pad, in_act, out_tanh=False):
    """Dilated Conv1d as a single MXU matmul; bias folded into the weight."""
    C, L = xs[0].shape
    Lout = L + 2 * pad - (K - 1) * dil
    nb = len(xs)
    cols = []
    for x in xs:
        if in_act:
            x = _leaky(x)
        if pad:
            z = jnp.zeros((C, pad), jnp.float32)
            x = jnp.concatenate([z, x, z], axis=1)
        taps = [x[:, k * dil: k * dil + Lout] for k in range(K)]
        taps.append(jnp.ones((1, Lout), jnp.float32))          # bias row
        cols.append(jnp.concatenate(taps, axis=0))             # (K*C+1, Lout)
    op = jnp.concatenate(cols, axis=1)                          # (K*C+1, nb*Lout)
    acc = jnp.dot(w2d, op.astype(jnp.bfloat16),
                  preferred_element_type=jnp.float32)           # (Cout, nb*Lout)
    if out_tanh:
        acc = jnp.tanh(acc)
    return [acc[:, b * Lout:(b + 1) * Lout] for b in range(nb)]


def _phase_plan(K, stride, pad):
    """Static polyphase tap offsets (into the un-upsampled input) per phase."""
    base = K - 1 - pad
    plan = []
    for r in range(stride):
        plan.append([(r + k - base) // stride
                     for k in range(K) if (r + k - base) % stride == 0])
    return plan


def _conv_transpose_fused(xs, wphases, *, K, stride, pad):
    """Polyphase ConvTranspose1d (torch semantics) with fused input LeakyReLU."""
    C, L = xs[0].shape
    nb = len(xs)
    Lout = (L - 1) * stride - 2 * pad + K
    phase_offs = _phase_plan(K, stride, pad)
    lqs = [(Lout - r + stride - 1) // stride for r in range(stride)]

    pad_l, pad_r = 0, 0
    for offs, lq in zip(phase_offs, lqs):
        if offs:
            pad_l = max(pad_l, -min(offs))
            pad_r = max(pad_r, (lq - 1 + max(offs)) - (L - 1))
    pad_l, pad_r = max(0, pad_l), max(0, pad_r)

    xs_act = []
    for x in xs:
        x = _leaky(x)
        if pad_l or pad_r:
            x = jnp.concatenate(
                [jnp.zeros((C, pad_l), jnp.float32), x,
                 jnp.zeros((C, pad_r), jnp.float32)], axis=1)
        xs_act.append(x)

    phase_out = []                                              # each (Cout, nb*lq)
    for r in range(stride):
        offs, lq = phase_offs[r], lqs[r]
        cols = []
        for xp in xs_act:
            rows = [xp[:, pad_l + o: pad_l + o + lq] for o in offs]
            rows.append(jnp.ones((1, lq), jnp.float32))         # bias row
            cols.append(jnp.concatenate(rows, axis=0))
        op = jnp.concatenate(cols, axis=1)
        phase_out.append(jnp.dot(wphases[r], op.astype(jnp.bfloat16),
                                 preferred_element_type=jnp.float32))

    # 0/1 selection matrix interleaving phases into time order (MXU, exact).
    sel = []
    for r in range(stride):
        lq = lqs[r]
        q = jax.lax.broadcasted_iota(jnp.int32, (lq, Lout), 0)
        t = jax.lax.broadcasted_iota(jnp.int32, (lq, Lout), 1)
        sel.append((t == q * stride + r).astype(jnp.float32))
    S = jnp.concatenate(sel, axis=0)                            # (Lout, Lout)

    outs = []
    for b in range(nb):
        P = jnp.concatenate(
            [phase_out[r][:, b * lqs[r]:(b + 1) * lqs[r]] for r in range(stride)],
            axis=1)                                             # (Cout, Lout)
        outs.append(jnp.dot(P, S, preferred_element_type=jnp.float32))
    return outs


# ----------------------------------------------------------------------------
# The single fused generator kernel
# ----------------------------------------------------------------------------
def _generator_kernel(*refs, B, L, conv_tr_ks, kernel_sizes, dilation):
    x_ref = refs[0]
    o_ref = refs[-1]
    w_refs = refs[1:-1]
    idx = [0]

    def next_w():
        w = w_refs[idx[0]][...]
        idx[0] += 1
        return w

    x2d = x_ref[...].astype(jnp.float32)                        # (Cin, B*L)
    ys = [x2d[:, b * L:(b + 1) * L] for b in range(B)]

    # conv_begin (K=7, pad=3), no preceding activation.
    ys = _conv_fused(ys, next_w(), K=7, dil=1, pad=3, in_act=False)

    for ks_t in conv_tr_ks:
        stride = ks_t // 2
        pad_t = (ks_t - stride) // 2
        wph = [next_w() for _ in range(stride)]
        # GeneratorBlock: LeakyReLU (fused) -> upsampling
        ys = _conv_transpose_fused(ys, wph, K=ks_t, stride=stride, pad=pad_t)

        # MRF: average of ResBlocks, all VMEM-resident.
        acc = None
        for ksz in kernel_sizes:
            h = ys
            for (d0, d1) in dilation:                           # ResBlock sub-blocks
                w1, w2 = next_w(), next_w()
                t = _conv_fused(h, w1, K=ksz, dil=d0,
                                pad=(ksz - 1) * d0 // 2, in_act=True)
                t = _conv_fused(t, w2, K=ksz, dil=d1,
                                pad=(ksz - 1) * d1 // 2, in_act=True)
                h = [a + c for a, c in zip(t, h)]               # residual add
            acc = h if acc is None else [a + c for a, c in zip(acc, h)]
        inv = 1.0 / float(len(kernel_sizes))
        ys = [a * inv for a in acc]

    # LeakyReLU -> conv_end (K=7, pad=3) -> tanh, all fused.
    ys = _conv_fused(ys, next_w(), K=7, dil=1, pad=3, in_act=True, out_tanh=True)
    o_ref[...] = jnp.concatenate(ys, axis=1)                    # (1, B*Lf) lane-dense


# ----------------------------------------------------------------------------
# Wrapper: weight packing + pallas_call
# ----------------------------------------------------------------------------
def _pack_conv(w, b):
    """(Cout, Cin, K) + (Cout,) -> (Cout, K*Cin + 1) bf16, bias as last column."""
    Cout, Cin, K = w.shape
    w2d = jnp.transpose(w, (0, 2, 1)).reshape(Cout, K * Cin)
    return jnp.concatenate([w2d, b.reshape(Cout, 1)], axis=1).astype(jnp.bfloat16)


def _pack_conv_transpose(w, b, stride, pad):
    """Torch (Cin, Cout, K) ConvTranspose1d weight -> per-phase packed bf16 mats."""
    Cin, Cout, K = w.shape
    base = K - 1 - pad
    packed = []
    for r in range(stride):
        taps = [k for k in range(K) if (r + k - base) % stride == 0]
        cols = [jnp.transpose(w[:, :, K - 1 - k]) for k in taps]      # (Cout, Cin)
        wr = (jnp.concatenate(cols, axis=1) if cols
              else jnp.zeros((Cout, 0), w.dtype))
        wr = jnp.concatenate([wr, b.reshape(Cout, 1)], axis=1)
        packed.append(wr.astype(jnp.bfloat16))
    return packed


def _pack_params(params, conv_tr_ks, kernel_sizes, dilation):
    flat = []
    w, b = params["conv_begin"]
    flat.append(_pack_conv(w, b))
    for i, bp in enumerate(params["blocks"]):
        ks_t = conv_tr_ks[i]
        stride = ks_t // 2
        pad_t = (ks_t - stride) // 2
        flat.extend(_pack_conv_transpose(bp["up_w"], bp["up_b"], stride, pad_t))
        for res_params in bp["mrf"]:
            for (p1, p2) in res_params:
                flat.append(_pack_conv(*p1))
                flat.append(_pack_conv(*p2))
    w, b = params["conv_end"]
    flat.append(_pack_conv(w, b))
    return flat


def generator_forward(params, x, *, conv_tr_ks, kernel_sizes, dilation):
    B, Cin, L = x.shape
    flat_w = _pack_params(params, conv_tr_ks, kernel_sizes, dilation)

    Lf = L
    for ks_t in conv_tr_ks:
        s = ks_t // 2
        p = (ks_t - s) // 2
        Lf = (Lf - 1) * s - 2 * p + ks_t

    # Fold batch into the lane axis for lane-dense loads/matmuls/stores.
    x2d = jnp.transpose(x, (1, 0, 2)).reshape(Cin, B * L).astype(jnp.float32)

    kern = functools.partial(_generator_kernel, B=B, L=L, conv_tr_ks=conv_tr_ks,
                             kernel_sizes=kernel_sizes, dilation=dilation)
    in_specs = [pl.BlockSpec(x2d.shape, lambda i: (0, 0))]
    in_specs += [pl.BlockSpec(w_.shape, lambda i: (0, 0)) for w_ in flat_w]

    out = pl.pallas_call(
        kern,
        out_shape=jax.ShapeDtypeStruct((1, B * Lf), jnp.float32),
        grid=(1,),
        in_specs=in_specs,
        out_specs=pl.BlockSpec((1, B * Lf), lambda i: (0, 0)),
        compiler_params=pltpu.CompilerParams(
            dimension_semantics=("arbitrary",)),
    )(x2d, *flat_w)
    return out.reshape(B, Lf)[:, None, :]


# ----------------------------------------------------------------------------
# Pure-JAX reference (f32 math, weights bf16-rounded to match kernel storage)
# ----------------------------------------------------------------------------
def _q(a):
    return a.astype(jnp.bfloat16).astype(jnp.float32)


def _ref_conv1d(x, w, b, dilation, padding, in_act=False, out_tanh=False):
    w = _q(w)
    b = _q(b)
    if in_act:
        x = _leaky(x)
    B, Cin, L = x.shape
    Cout, _, K = w.shape
    Lout = L + 2 * padding - (K - 1) * dilation
    xp = jnp.pad(x, ((0, 0), (0, 0), (padding, padding)))
    y = jnp.zeros((B, Cout, Lout), jnp.float32)
    for k in range(K):
        xs = xp[:, :, k * dilation: k * dilation + Lout]
        y = y + jnp.einsum('oc,bcl->bol', w[:, :, k], xs)
    y = y + b[None, :, None]
    if out_tanh:
        y = jnp.tanh(y)
    return y


def _ref_forward(params, x, *, conv_tr_ks, kernel_sizes, dilation):
    w, b = params["conv_begin"]
    y = _ref_conv1d(x, w, b, 1, 3)
    for i, bp in enumerate(params["blocks"]):
        K = conv_tr_ks[i]
        s = K // 2
        p = (K - s) // 2
        y = _leaky(y)
        B_, C_, L_ = y.shape
        y_up = jnp.zeros((B_, C_, (L_ - 1) * s + 1), y.dtype).at[:, :, ::s].set(y)
        w_t = jnp.transpose(jnp.flip(bp["up_w"], axis=-1), (1, 0, 2))
        y = _ref_conv1d(y_up, w_t, bp["up_b"], 1, K - 1 - p)
        acc = jnp.zeros_like(y)
        for res_params, ksz in zip(bp["mrf"], kernel_sizes):
            h = y
            for (p1, p2), (d0, d1) in zip(res_params, dilation):
                t = _ref_conv1d(h, p1[0], p1[1], d0, (ksz - 1) * d0 // 2, in_act=True)
                t = _ref_conv1d(t, p2[0], p2[1], d1, (ksz - 1) * d1 // 2, in_act=True)
                h = t + h
            acc = acc + h
        y = acc / float(len(kernel_sizes))
    w, b = params["conv_end"]
    return _ref_conv1d(y, w, b, 1, 3, in_act=True, out_tanh=True)


# ----------------------------------------------------------------------------
# Deterministic synthetic parameter init
# ----------------------------------------------------------------------------
def _init_conv(key, cout, cin, k, scale=0.05):
    kw, kb = jax.random.split(key)
    w = jax.random.normal(kw, (cout, cin, k), jnp.float32) * scale
    b = jax.random.normal(kb, (cout,), jnp.float32) * scale
    return w, b


def init_generator_params(key, n_blocks, start_channels, conv_tr_ks,
                          kernel_sizes, dilation, scale=0.05):
    params = {}
    key, k0 = jax.random.split(key)
    params["conv_begin"] = _init_conv(k0, start_channels, 80, 7, scale)
    blocks = []
    ch = start_channels
    for i in range(n_blocks):
        out_ch = start_channels // 2 ** (i + 1)
        key, kt = jax.random.split(key)
        kw, kb = jax.random.split(kt)
        # ConvTranspose1d weight layout: (Cin, Cout, K)
        up_w = jax.random.normal(kw, (ch, out_ch, conv_tr_ks[i]), jnp.float32) * scale
        up_b = jax.random.normal(kb, (out_ch,), jnp.float32) * scale
        mrf = []
        for ksz in kernel_sizes:
            res = []
            for _pair in dilation:
                key, k1 = jax.random.split(key)
                key, k2 = jax.random.split(key)
                res.append((_init_conv(k1, out_ch, out_ch, ksz, scale),
                            _init_conv(k2, out_ch, out_ch, ksz, scale)))
            mrf.append(res)
        blocks.append({"up_w": up_w, "up_b": up_b, "mrf": mrf})
        ch = out_ch
    params["blocks"] = blocks
    key, ke = jax.random.split(key)
    params["conv_end"] = _init_conv(ke, 1, ch, 7, scale)
    return params


if __name__ == "__main__":
    key = jax.random.PRNGKey(0)

    # Small, consistent config (HiFi-GAN style).
    n_blocks = 2
    start_channels = 32
    conv_tr_ks = (4, 4)                 # strides are conv_tr_ks[i] // 2 = 2
    kernel_sizes = (3, 5)
    dilation = ((1, 1), (3, 1), (5, 1))

    pkey, xkey = jax.random.split(key)
    params = init_generator_params(pkey, n_blocks, start_channels, conv_tr_ks,
                                   kernel_sizes, dilation)

    # Input mel-spectrogram: (batch=2, mel_channels=80, frames=16)
    x = jax.random.normal(xkey, (2, 80, 16), jnp.float32)

    fwd = jax.jit(functools.partial(generator_forward,
                                    conv_tr_ks=conv_tr_ks,
                                    kernel_sizes=kernel_sizes,
                                    dilation=dilation))
    y = fwd(params, x)
    jax.block_until_ready(y)

    # Two x2 upsampling blocks: 16 -> 32 -> 64 samples, 1 output channel.
    assert y.shape == (2, 1, 64), y.shape
    assert bool(jnp.all(jnp.isfinite(y)))
    assert bool(jnp.all(jnp.abs(y) <= 1.0))     # tanh output range

    # Numerical check against a pure-JAX reference (bf16-rounded weights).
    y_ref = _ref_forward(params, x, conv_tr_ks=conv_tr_ks,
                         kernel_sizes=kernel_sizes, dilation=dilation)
    rel = float(jnp.linalg.norm(y - y_ref) / (jnp.linalg.norm(y_ref) + 1e-12))
    assert rel < 5e-2, f"relative L2 error too large: {rel}"

    print("KERNEL_OK")
</pallas_src>

<mosaic_0001>
module attributes {stable_mosaic.version = 11 : i64} {
  func.func @_generator_kernel(%arg0: i32, %arg1: memref<80x32xf32, #tpu.memory_space<vmem>>, %arg2: memref<32x561xbf16, #tpu.memory_space<vmem>>, %arg3: memref<16x65xbf16, #tpu.memory_space<vmem>>, %arg4: memref<16x65xbf16, #tpu.memory_space<vmem>>, %arg5: memref<16x49xbf16, #tpu.memory_space<vmem>>, %arg6: memref<16x49xbf16, #tpu.memory_space<vmem>>, %arg7: memref<16x49xbf16, #tpu.memory_space<vmem>>, %arg8: memref<16x49xbf16, #tpu.memory_space<vmem>>, %arg9: memref<16x49xbf16, #tpu.memory_space<vmem>>, %arg10: memref<16x49xbf16, #tpu.memory_space<vmem>>, %arg11: memref<16x81xbf16, #tpu.memory_space<vmem>>, %arg12: memref<16x81xbf16, #tpu.memory_space<vmem>>, %arg13: memref<16x81xbf16, #tpu.memory_space<vmem>>, %arg14: memref<16x81xbf16, #tpu.memory_space<vmem>>, %arg15: memref<16x81xbf16, #tpu.memory_space<vmem>>, %arg16: memref<16x81xbf16, #tpu.memory_space<vmem>>, %arg17: memref<8x33xbf16, #tpu.memory_space<vmem>>, %arg18: memref<8x33xbf16, #tpu.memory_space<vmem>>, %arg19: memref<8x25xbf16, #tpu.memory_space<vmem>>, %arg20: memref<8x25xbf16, #tpu.memory_space<vmem>>, %arg21: memref<8x25xbf16, #tpu.memory_space<vmem>>, %arg22: memref<8x25xbf16, #tpu.memory_space<vmem>>, %arg23: memref<8x25xbf16, #tpu.memory_space<vmem>>, %arg24: memref<8x25xbf16, #tpu.memory_space<vmem>>, %arg25: memref<8x41xbf16, #tpu.memory_space<vmem>>, %arg26: memref<8x41xbf16, #tpu.memory_space<vmem>>, %arg27: memref<8x41xbf16, #tpu.memory_space<vmem>>, %arg28: memref<8x41xbf16, #tpu.memory_space<vmem>>, %arg29: memref<8x41xbf16, #tpu.memory_space<vmem>>, %arg30: memref<8x41xbf16, #tpu.memory_space<vmem>>, %arg31: memref<1x57xbf16, #tpu.memory_space<vmem>>, %arg32: memref<1x128xf32, #tpu.memory_space<vmem>>) attributes {dimension_semantics = [#tpu.dimension_semantics<arbitrary>], iteration_bounds = array<i64: 1>, scalar_prefetch = 0 : i64, scratch_operands = 0 : i64, tpu.core_type = #tpu.core_type<tc>, window_params = [{pipeline_mode = #tpu.pipeline_mode<synchronous>, transform_indices = @transform_0, window_bounds = array<i64: 80, 32>}, {pipeline_mode = #tpu.pipeline_mode<synchronous>, transform_indices = @transform_1, window_bounds = array<i64: 32, 561>}, {pipeline_mode = #tpu.pipeline_mode<synchronous>, transform_indices = @transform_2, window_bounds = array<i64: 16, 65>}, {pipeline_mode = #tpu.pipeline_mode<synchronous>, transform_indices = @transform_3, window_bounds = array<i64: 16, 65>}, {pipeline_mode = #tpu.pipeline_mode<synchronous>, transform_indices = @transform_4, window_bounds = array<i64: 16, 49>}, {pipeline_mode = #tpu.pipeline_mode<synchronous>, transform_indices = @transform_5, window_bounds = array<i64: 16, 49>}, {pipeline_mode = #tpu.pipeline_mode<synchronous>, transform_indices = @transform_6, window_bounds = array<i64: 16, 49>}, {pipeline_mode = #tpu.pipeline_mode<synchronous>, transform_indices = @transform_7, window_bounds = array<i64: 16, 49>}, {pipeline_mode = #tpu.pipeline_mode<synchronous>, transform_indices = @transform_8, window_bounds = array<i64: 16, 49>}, {pipeline_mode = #tpu.pipeline_mode<synchronous>, transform_indices = @transform_9, window_bounds = array<i64: 16, 49>}, {pipeline_mode = #tpu.pipeline_mode<synchronous>, transform_indices = @transform_10, window_bounds = array<i64: 16, 81>}, {pipeline_mode = #tpu.pipeline_mode<synchronous>, transform_indices = @transform_11, window_bounds = array<i64: 16, 81>}, {pipeline_mode = #tpu.pipeline_mode<synchronous>, transform_indices = @transform_12, window_bounds = array<i64: 16, 81>}, {pipeline_mode = #tpu.pipeline_mode<synchronous>, transform_indices = @transform_13, window_bounds = array<i64: 16, 81>}, {pipeline_mode = #tpu.pipeline_mode<synchronous>, transform_indices = @transform_14, window_bounds = array<i64: 16, 81>}, {pipeline_mode = #tpu.pipeline_mode<synchronous>, transform_indices = @transform_15, window_bounds = array<i64: 16, 81>}, {pipeline_mode = #tpu.pipeline_mode<synchronous>, transform_indices = @transform_16, window_bounds = array<i64: 8, 33>}, {pipeline_mode = #tpu.pipeline_mode<synchronous>, transform_indices = @transform_17, window_bounds = array<i64: 8, 33>}, {pipeline_mode = #tpu.pipeline_mode<synchronous>, transform_indices = @transform_18, window_bounds = array<i64: 8, 25>}, {pipeline_mode = #tpu.pipeline_mode<synchronous>, transform_indices = @transform_19, window_bounds = array<i64: 8, 25>}, {pipeline_mode = #tpu.pipeline_mode<synchronous>, transform_indices = @transform_20, window_bounds = array<i64: 8, 25>}, {pipeline_mode = #tpu.pipeline_mode<synchronous>, transform_indices = @transform_21, window_bounds = array<i64: 8, 25>}, {pipeline_mode = #tpu.pipeline_mode<synchronous>, transform_indices = @transform_22, window_bounds = array<i64: 8, 25>}, {pipeline_mode = #tpu.pipeline_mode<synchronous>, transform_indices = @transform_23, window_bounds = array<i64: 8, 25>}, {pipeline_mode = #tpu.pipeline_mode<synchronous>, transform_indices = @transform_24, window_bounds = array<i64: 8, 41>}, {pipeline_mode = #tpu.pipeline_mode<synchronous>, transform_indices = @transform_25, window_bounds = array<i64: 8, 41>}, {pipeline_mode = #tpu.pipeline_mode<synchronous>, transform_indices = @transform_26, window_bounds = array<i64: 8, 41>}, {pipeline_mode = #tpu.pipeline_mode<synchronous>, transform_indices = @transform_27, window_bounds = array<i64: 8, 41>}, {pipeline_mode = #tpu.pipeline_mode<synchronous>, transform_indices = @transform_28, window_bounds = array<i64: 8, 41>}, {pipeline_mode = #tpu.pipeline_mode<synchronous>, transform_indices = @transform_29, window_bounds = array<i64: 8, 41>}, {pipeline_mode = #tpu.pipeline_mode<synchronous>, transform_indices = @transform_30, window_bounds = array<i64: 1, 57>}, {pipeline_mode = #tpu.pipeline_mode<synchronous>, transform_indices = @transform_31, window_bounds = array<i64: 1, 128>}]} {
    %c0 = arith.constant 0 : index
    %c0_0 = arith.constant 0 : index
    %0 = vector.load %arg1[%c0, %c0_0] : memref<80x32xf32, #tpu.memory_space<vmem>>, vector<80x32xf32>
    %1 = vector.extract_strided_slice %0 {offsets = [0, 0], sizes = [80, 16], strides = [1, 1]} : vector<80x32xf32> to vector<80x16xf32>
    %2 = vector.extract_strided_slice %0 {offsets = [0, 16], sizes = [80, 16], strides = [1, 1]} : vector<80x32xf32> to vector<80x16xf32>
    %c0_1 = arith.constant 0 : index
    %c0_2 = arith.constant 0 : index
    %3 = vector.load %arg2[%c0_1, %c0_2] : memref<32x561xbf16, #tpu.memory_space<vmem>>, vector<32x561xbf16>
    %cst = arith.constant 0.000000e+00 : f32
    %4 = vector.broadcast %cst : f32 to vector<80x3xf32>
    %5 = tpu.concatenate %4, %1, %4 in 1 : vector<80x3xf32>, vector<80x16xf32>, vector<80x3xf32> -> vector<80x22xf32>
    %6 = vector.extract_strided_slice %5 {offsets = [0, 0], sizes = [80, 16], strides = [1, 1]} : vector<80x22xf32> to vector<80x16xf32>
    %7 = vector.extract_strided_slice %5 {offsets = [0, 1], sizes = [80, 16], strides = [1, 1]} : vector<80x22xf32> to vector<80x16xf32>
    %8 = vector.extract_strided_slice %5 {offsets = [0, 2], sizes = [80, 16], strides = [1, 1]} : vector<80x22xf32> to vector<80x16xf32>
    %9 = vector.extract_strided_slice %5 {offsets = [0, 3], sizes = [80, 16], strides = [1, 1]} : vector<80x22xf32> to vector<80x16xf32>
    %10 = vector.extract_strided_slice %5 {offsets = [0, 4], sizes = [80, 16], strides = [1, 1]} : vector<80x22xf32> to vector<80x16xf32>
    %11 = vector.extract_strided_slice %5 {offsets = [0, 5], sizes = [80, 16], strides = [1, 1]} : vector<80x22xf32> to vector<80x16xf32>
    %12 = vector.extract_strided_slice %5 {offsets = [0, 6], sizes = [80, 16], strides = [1, 1]} : vector<80x22xf32> to vector<80x16xf32>
    %cst_3 = arith.constant 1.000000e+00 : f32
    %13 = vector.broadcast %cst_3 : f32 to vector<1x16xf32>
    %14 = tpu.concatenate %6, %7, %8, %9, %10, %11, %12, %13 in 0 : vector<80x16xf32>, vector<80x16xf32>, vector<80x16xf32>, vector<80x16xf32>, vector<80x16xf32>, vector<80x16xf32>, vector<80x16xf32>, vector<1x16xf32> -> vector<561x16xf32>
    %cst_4 = arith.constant 0.000000e+00 : f32
    %15 = vector.broadcast %cst_4 : f32 to vector<80x3xf32>
    %16 = tpu.concatenate %15, %2, %15 in 1 : vector<80x3xf32>, vector<80x16xf32>, vector<80x3xf32> -> vector<80x22xf32>
    %17 = vector.extract_strided_slice %16 {offsets = [0, 0], sizes = [80, 16], strides = [1, 1]} : vector<80x22xf32> to vector<80x16xf32>
    %18 = vector.extract_strided_slice %16 {offsets = [0, 1], sizes = [80, 16], strides = [1, 1]} : vector<80x22xf32> to vector<80x16xf32>
    %19 = vector.extract_strided_slice %16 {offsets = [0, 2], sizes = [80, 16], strides = [1, 1]} : vector<80x22xf32> to vector<80x16xf32>
    %20 = vector.extract_strided_slice %16 {offsets = [0, 3], sizes = [80, 16], strides = [1, 1]} : vector<80x22xf32> to vector<80x16xf32>
    %21 = vector.extract_strided_slice %16 {offsets = [0, 4], sizes = [80, 16], strides = [1, 1]} : vector<80x22xf32> to vector<80x16xf32>
    %22 = vector.extract_strided_slice %16 {offsets = [0, 5], sizes = [80, 16], strides = [1, 1]} : vector<80x22xf32> to vector<80x16xf32>
    %23 = vector.extract_strided_slice %16 {offsets = [0, 6], sizes = [80, 16], strides = [1, 1]} : vector<80x22xf32> to vector<80x16xf32>
    %cst_5 = arith.constant 1.000000e+00 : f32
    %24 = vector.broadcast %cst_5 : f32 to vector<1x16xf32>
    %25 = tpu.concatenate %17, %18, %19, %20, %21, %22, %23, %24 in 0 : vector<80x16xf32>, vector<80x16xf32>, vector<80x16xf32>, vector<80x16xf32>, vector<80x16xf32>, vector<80x16xf32>, vector<80x16xf32>, vector<1x16xf32> -> vector<561x16xf32>
    %26 = tpu.concatenate %14, %25 in 1 : vector<561x16xf32>, vector<561x16xf32> -> vector<561x32xf32>
    %27 = arith.truncf %26 : vector<561x32xf32> to vector<561x32xbf16>
    %cst_6 = arith.constant dense<0.000000e+00> : vector<32x32xf32>
    %28 = tpu.matmul %3, %27, %cst_6 {dimension_numbers = #tpu.dot_dimension_numbers<[1], [0], [0], [1], [0, 0, 1, 1], [], []>} : vector<32x561xbf16>, vector<561x32xbf16>, vector<32x32xf32> -> vector<32x32xf32>
    %29 = vector.extract_strided_slice %28 {offsets = [0, 0], sizes = [32, 16], strides = [1, 1]} : vector<32x32xf32> to vector<32x16xf32>
    %30 = vector.extract_strided_slice %28 {offsets = [0, 16], sizes = [32, 16], strides = [1, 1]} : vector<32x32xf32> to vector<32x16xf32>
    %c0_7 = arith.constant 0 : index
    %c0_8 = arith.constant 0 : index
    %31 = vector.load %arg3[%c0_7, %c0_8] : memref<16x65xbf16, #tpu.memory_space<vmem>>, vector<16x65xbf16>
    %c0_9 = arith.constant 0 : index
    %c0_10 = arith.constant 0 : index
    %32 = vector.load %arg4[%c0_9, %c0_10] : memref<16x65xbf16, #tpu.memory_space<vmem>>, vector<16x65xbf16>
    %cst_11 = arith.constant 0.000000e+00 : f32
    %33 = vector.broadcast %cst_11 : f32 to vector<32x16xf32>
    %34 = arith.cmpf oge, %29, %33 : vector<32x16xf32>
    %cst_12 = arith.constant 1.000000e-01 : f32
    %35 = vector.broadcast %cst_12 : f32 to vector<32x16xf32>
    %36 = arith.mulf %35, %29 : vector<32x16xf32>
    %37 = arith.select %34, %29, %36 : vector<32x16xi1>, vector<32x16xf32>
    %cst_13 = arith.constant 0.000000e+00 : f32
    %38 = vector.broadcast %cst_13 : f32 to vector<32x1xf32>
    %cst_14 = arith.constant 0.000000e+00 : f32
    %39 = vector.broadcast %cst_14 : f32 to vector<32x1xf32>
    %40 = tpu.concatenate %38, %37, %39 in 1 : vector<32x1xf32>, vector<32x16xf32>, vector<32x1xf32> -> vector<32x18xf32>
    %cst_15 = arith.constant 0.000000e+00 : f32
    %41 = vector.broadcast %cst_15 : f32 to vector<32x16xf32>
    %42 = arith.cmpf oge, %30, %41 : vector<32x16xf32>
    %cst_16 = arith.constant 1.000000e-01 : f32
    %43 = vector.broadcast %cst_16 : f32 to vector<32x16xf32>
    %44 = arith.mulf %43, %30 : vector<32x16xf32>
    %45 = arith.select %42, %30, %44 : vector<32x16xi1>, vector<32x16xf32>
    %cst_17 = arith.constant 0.000000e+00 : f32
    %46 = vector.broadcast %cst_17 : f32 to vector<32x1xf32>
    %cst_18 = arith.constant 0.000000e+00 : f32
    %47 = vector.broadcast %cst_18 : f32 to vector<32x1xf32>
    %48 = tpu.concatenate %46, %45, %47 in 1 : vector<32x1xf32>, vector<32x16xf32>, vector<32x1xf32> -> vector<32x18xf32>
    %49 = vector.extract_strided_slice %40 {offsets = [0, 0], sizes = [32, 16], strides = [1, 1]} : vector<32x18xf32> to vector<32x16xf32>
    %50 = vector.extract_strided_slice %40 {offsets = [0, 1], sizes = [32, 16], strides = [1, 1]} : vector<32x18xf32> to vector<32x16xf32>
    %cst_19 = arith.constant 1.000000e+00 : f32
    %51 = vector.broadcast %cst_19 : f32 to vector<1x16xf32>
    %52 = tpu.concatenate %49, %50, %51 in 0 : vector<32x16xf32>, vector<32x16xf32>, vector<1x16xf32> -> vector<65x16xf32>
    %53 = vector.extract_strided_slice %48 {offsets = [0, 0], sizes = [32, 16], strides = [1, 1]} : vector<32x18xf32> to vector<32x16xf32>
    %54 = vector.extract_strided_slice %48 {offsets = [0, 1], sizes = [32, 16], strides = [1, 1]} : vector<32x18xf32> to vector<32x16xf32>
    %cst_20 = arith.constant 1.000000e+00 : f32
    %55 = vector.broadcast %cst_20 : f32 to vector<1x16xf32>
    %56 = tpu.concatenate %53, %54, %55 in 0 : vector<32x16xf32>, vector<32x16xf32>, vector<1x16xf32> -> vector<65x16xf32>
    %57 = tpu.concatenate %52, %56 in 1 : vector<65x16xf32>, vector<65x16xf32> -> vector<65x32xf32>
    %58 = arith.truncf %57 : vector<65x32xf32> to vector<65x32xbf16>
    %cst_21 = arith.constant dense<0.000000e+00> : vector<16x32xf32>
    %59 = tpu.matmul %31, %58, %cst_21 {dimension_numbers = #tpu.dot_dimension_numbers<[1], [0], [0], [1], [0, 0, 1, 1], [], []>} : vector<16x65xbf16>, vector<65x32xbf16>, vector<16x32xf32> -> vector<16x32xf32>
    %60 = vector.extract_strided_slice %40 {offsets = [0, 1], sizes = [32, 16], strides = [1, 1]} : vector<32x18xf32> to vector<32x16xf32>
    %61 = vector.extract_strided_slice %40 {offsets = [0, 2], sizes = [32, 16], strides = [1, 1]} : vector<32x18xf32> to vector<32x16xf32>
    %cst_22 = arith.constant 1.000000e+00 : f32
    %62 = vector.broadcast %cst_22 : f32 to vector<1x16xf32>
    %63 = tpu.concatenate %60, %61, %62 in 0 : vector<32x16xf32>, vector<32x16xf32>, vector<1x16xf32> -> vector<65x16xf32>
    %64 = vector.extract_strided_slice %48 {offsets = [0, 1], sizes = [32, 16], strides = [1, 1]} : vector<32x18xf32> to vector<32x16xf32>
    %65 = vector.extract_strided_slice %48 {offsets = [0, 2], sizes = [32, 16], strides = [1, 1]} : vector<32x18xf32> to vector<32x16xf32>
    %cst_23 = arith.constant 1.000000e+00 : f32
    %66 = vector.broadcast %cst_23 : f32 to vector<1x16xf32>
    %67 = tpu.concatenate %64, %65, %66 in 0 : vector<32x16xf32>, vector<32x16xf32>, vector<1x16xf32> -> vector<65x16xf32>
    %68 = tpu.concatenate %63, %67 in 1 : vector<65x16xf32>, vector<65x16xf32> -> vector<65x32xf32>
    %69 = arith.truncf %68 : vector<65x32xf32> to vector<65x32xbf16>
    %cst_24 = arith.constant dense<0.000000e+00> : vector<16x32xf32>
    %70 = tpu.matmul %32, %69, %cst_24 {dimension_numbers = #tpu.dot_dimension_numbers<[1], [0], [0], [1], [0, 0, 1, 1], [], []>} : vector<16x65xbf16>, vector<65x32xbf16>, vector<16x32xf32> -> vector<16x32xf32>
    %71 = tpu.iota {dimensions = array<i32: 0>} : vector<16x32xi32>
    %72 = tpu.iota {dimensions = array<i32: 1>} : vector<16x32xi32>
    %c2_i32 = arith.constant 2 : i32
    %73 = vector.broadcast %c2_i32 : i32 to vector<16x32xi32>
    %74 = arith.muli %71, %73 : vector<16x32xi32>
    %c0_i32 = arith.constant 0 : i32
    %75 = vector.broadcast %c0_i32 : i32 to vector<16x32xi32>
    %76 = arith.addi %74, %75 : vector<16x32xi32>
    %77 = arith.cmpi eq, %72, %76 : vector<16x32xi32>
    %78 = arith.extui %77 : vector<16x32xi1> to vector<16x32xi32>
    %79 = arith.sitofp %78 : vector<16x32xi32> to vector<16x32xf32>
    %80 = tpu.iota {dimensions = array<i32: 0>} : vector<16x32xi32>
    %81 = tpu.iota {dimensions = array<i32: 1>} : vector<16x32xi32>
    %c2_i32_25 = arith.constant 2 : i32
    %82 = vector.broadcast %c2_i32_25 : i32 to vector<16x32xi32>
    %83 = arith.muli %80, %82 : vector<16x32xi32>
    %c1_i32 = arith.constant 1 : i32
    %84 = vector.broadcast %c1_i32 : i32 to vector<16x32xi32>
    %85 = arith.addi %83, %84 : vector<16x32xi32>
    %86 = arith.cmpi eq, %81, %85 : vector<16x32xi32>
    %87 = arith.extui %86 : vector<16x32xi1> to vector<16x32xi32>
    %88 = arith.sitofp %87 : vector<16x32xi32> to vector<16x32xf32>
    %89 = tpu.concatenate %79, %88 in 0 : vector<16x32xf32>, vector<16x32xf32> -> vector<32x32xf32>
    %90 = vector.extract_strided_slice %59 {offsets = [0, 0], sizes = [16, 16], strides = [1, 1]} : vector<16x32xf32> to vector<16x16xf32>
    %91 = vector.extract_strided_slice %70 {offsets = [0, 0], sizes = [16, 16], strides = [1, 1]} : vector<16x32xf32> to vector<16x16xf32>
    %92 = tpu.concatenate %90, %91 in 1 : vector<16x16xf32>, vector<16x16xf32> -> vector<16x32xf32>
    %cst_26 = arith.constant dense<0.000000e+00> : vector<16x32xf32>
    %93 = tpu.matmul %92, %89, %cst_26 {dimension_numbers = #tpu.dot_dimension_numbers<[1], [0], [0], [1], [0, 0, 1, 1], [], []>} : vector<16x32xf32>, vector<32x32xf32>, vector<16x32xf32> -> vector<16x32xf32>
    %94 = vector.extract_strided_slice %59 {offsets = [0, 16], sizes = [16, 16], strides = [1, 1]} : vector<16x32xf32> to vector<16x16xf32>
    %95 = vector.extract_strided_slice %70 {offsets = [0, 16], sizes = [16, 16], strides = [1, 1]} : vector<16x32xf32> to vector<16x16xf32>
    %96 = tpu.concatenate %94, %95 in 1 : vector<16x16xf32>, vector<16x16xf32> -> vector<16x32xf32>
    %cst_27 = arith.constant dense<0.000000e+00> : vector<16x32xf32>
    %97 = tpu.matmul %96, %89, %cst_27 {dimension_numbers = #tpu.dot_dimension_numbers<[1], [0], [0], [1], [0, 0, 1, 1], [], []>} : vector<16x32xf32>, vector<32x32xf32>, vector<16x32xf32> -> vector<16x32xf32>
    %c0_28 = arith.constant 0 : index
    %c0_29 = arith.constant 0 : index
    %98 = vector.load %arg5[%c0_28, %c0_29] : memref<16x49xbf16, #tpu.memory_space<vmem>>, vector<16x49xbf16>
    %c0_30 = arith.constant 0 : index
    %c0_31 = arith.constant 0 : index
    %99 = vector.load %arg6[%c0_30, %c0_31] : memref<16x49xbf16, #tpu.memory_space<vmem>>, vector<16x49xbf16>
    %cst_32 = arith.constant 0.000000e+00 : f32
    %100 = vector.broadcast %cst_32 : f32 to vector<16x32xf32>
    %101 = arith.cmpf oge, %93, %100 : vector<16x32xf32>
    %cst_33 = arith.constant 1.000000e-01 : f32
    %102 = vector.broadcast %cst_33 : f32 to vector<16x32xf32>
    %103 = arith.mulf %102, %93 : vector<16x32xf32>
    %104 = arith.select %101, %93, %103 : vector<16x32xi1>, vector<16x32xf32>
    %cst_34 = arith.constant 0.000000e+00 : f32
    %105 = vector.broadcast %cst_34 : f32 to vector<16x1xf32>
    %106 = tpu.concatenate %105, %104, %105 in 1 : vector<16x1xf32>, vector<16x32xf32>, vector<16x1xf32> -> vector<16x34xf32>
    %107 = vector.extract_strided_slice %106 {offsets = [0, 0], sizes = [16, 32], strides = [1, 1]} : vector<16x34xf32> to vector<16x32xf32>
    %108 = vector.extract_strided_slice %106 {offsets = [0, 1], sizes = [16, 32], strides = [1, 1]} : vector<16x34xf32> to vector<16x32xf32>
    %109 = vector.extract_strided_slice %106 {offsets = [0, 2], sizes = [16, 32], strides = [1, 1]} : vector<16x34xf32> to vector<16x32xf32>
    %cst_35 = arith.constant 1.000000e+00 : f32
    %110 = vector.broadcast %cst_35 : f32 to vector<1x32xf32>
    %111 = tpu.concatenate %107, %108, %109, %110 in 0 : vector<16x32xf32>, vector<16x32xf32>, vector<16x32xf32>, vector<1x32xf32> -> vector<49x32xf32>
    %cst_36 = arith.constant 0.000000e+00 : f32
    %112 = vector.broadcast %cst_36 : f32 to vector<16x32xf32>
    %113 = arith.cmpf oge, %97, %112 : vector<16x32xf32>
    %cst_37 = arith.constant 1.000000e-01 : f32
    %114 = vector.broadcast %cst_37 : f32 to vector<16x32xf32>
    %115 = arith.mulf %114, %97 : vector<16x32xf32>
    %116 = arith.select %113, %97, %115 : vector<16x32xi1>, vector<16x32xf32>
    %cst_38 = arith.constant 0.000000e+00 : f32
    %117 = vector.broadcast %cst_38 : f32 to vector<16x1xf32>
    %118 = tpu.concatenate %117, %116, %117 in 1 : vector<16x1xf32>, vector<16x32xf32>, vector<16x1xf32> -> vector<16x34xf32>
    %119 = vector.extract_strided_slice %118 {offsets = [0, 0], sizes = [16, 32], strides = [1, 1]} : vector<16x34xf32> to vector<16x32xf32>
    %120 = vector.extract_strided_slice %118 {offsets = [0, 1], sizes = [16, 32], strides = [1, 1]} : vector<16x34xf32> to vector<16x32xf32>
    %121 = vector.extract_strided_slice %118 {offsets = [0, 2], sizes = [16, 32], strides = [1, 1]} : vector<16x34xf32> to vector<16x32xf32>
    %cst_39 = arith.constant 1.000000e+00 : f32
    %122 = vector.broadcast %cst_39 : f32 to vector<1x32xf32>
    %123 = tpu.concatenate %119, %120, %121, %122 in 0 : vector<16x32xf32>, vector<16x32xf32>, vector<16x32xf32>, vector<1x32xf32> -> vector<49x32xf32>
    %124 = tpu.concatenate %111, %123 in 1 : vector<49x32xf32>, vector<49x32xf32> -> vector<49x64xf32>
    %125 = arith.truncf %124 : vector<49x64xf32> to vector<49x64xbf16>
    %cst_40 = arith.constant dense<0.000000e+00> : vector<16x64xf32>
    %126 = tpu.matmul %98, %125, %cst_40 {dimension_numbers = #tpu.dot_dimension_numbers<[1], [0], [0], [1], [0, 0, 1, 1], [], []>} : vector<16x49xbf16>, vector<49x64xbf16>, vector<16x64xf32> -> vector<16x64xf32>
    %127 = vector.extract_strided_slice %126 {offsets = [0, 0], sizes = [16, 32], strides = [1, 1]} : vector<16x64xf32> to vector<16x32xf32>
    %128 = vector.extract_strided_slice %126 {offsets = [0, 32], sizes = [16, 32], strides = [1, 1]} : vector<16x64xf32> to vector<16x32xf32>
    %cst_41 = arith.constant 0.000000e+00 : f32
    %129 = vector.broadcast %cst_41 : f32 to vector<16x32xf32>
    %130 = arith.cmpf oge, %127, %129 : vector<16x32xf32>
    %cst_42 = arith.constant 1.000000e-01 : f32
    %131 = vector.broadcast %cst_42 : f32 to vector<16x32xf32>
    %132 = arith.mulf %131, %127 : vector<16x32xf32>
    %133 = arith.select %130, %127, %132 : vector<16x32xi1>, vector<16x32xf32>
    %cst_43 = arith.constant 0.000000e+00 : f32
    %134 = vector.broadcast %cst_43 : f32 to vector<16x1xf32>
    %135 = tpu.concatenate %134, %133, %134 in 1 : vector<16x1xf32>, vector<16x32xf32>, vector<16x1xf32> -> vector<16x34xf32>
    %136 = vector.extract_strided_slice %135 {offsets = [0, 0], sizes = [16, 32], strides = [1, 1]} : vector<16x34xf32> to vector<16x32xf32>
    %137 = vector.extract_strided_slice %135 {offsets = [0, 1], sizes = [16, 32], strides = [1, 1]} : vector<16x34xf32> to vector<16x32xf32>
    %138 = vector.extract_strided_slice %135 {offsets = [0, 2], sizes = [16, 32], strides = [1, 1]} : vector<16x34xf32> to vector<16x32xf32>
    %cst_44 = arith.constant 1.000000e+00 : f32
    %139 = vector.broadcast %cst_44 : f32 to vector<1x32xf32>
    %140 = tpu.concatenate %136, %137, %138, %139 in 0 : vector<16x32xf32>, vector<16x32xf32>, vector<16x32xf32>, vector<1x32xf32> -> vector<49x32xf32>
    %cst_45 = arith.constant 0.000000e+00 : f32
    %141 = vector.broadcast %cst_45 : f32 to vector<16x32xf32>
    %142 = arith.cmpf oge, %128, %141 : vector<16x32xf32>
    %cst_46 = arith.constant 1.000000e-01 : f32
    %143 = vector.broadcast %cst_46 : f32 to vector<16x32xf32>
    %144 = arith.mulf %143, %128 : vector<16x32xf32>
    %145 = arith.select %142, %128, %144 : vector<16x32xi1>, vector<16x32xf32>
    %cst_47 = arith.constant 0.000000e+00 : f32
    %146 = vector.broadcast %cst_47 : f32 to vector<16x1xf32>
    %147 = tpu.concatenate %146, %145, %146 in 1 : vector<16x1xf32>, vector<16x32xf32>, vector<16x1xf32> -> vector<16x34xf32>
    %148 = vector.extract_strided_slice %147 {offsets = [0, 0], sizes = [16, 32], strides = [1, 1]} : vector<16x34xf32> to vector<16x32xf32>
    %149 = vector.extract_strided_slice %147 {offsets = [0, 1], sizes = [16, 32], strides = [1, 1]} : vector<16x34xf32> to vector<16x32xf32>
    %150 = vector.extract_strided_slice %147 {offsets = [0, 2], sizes = [16, 32], strides = [1, 1]} : vector<16x34xf32> to vector<16x32xf32>
    %cst_48 = arith.constant 1.000000e+00 : f32
    %151 = vector.broadcast %cst_48 : f32 to vector<1x32xf32>
    %152 = tpu.concatenate %148, %149, %150, %151 in 0 : vector<16x32xf32>, vector<16x32xf32>, vector<16x32xf32>, vector<1x32xf32> -> vector<49x32xf32>
    %153 = tpu.concatenate %140, %152 in 1 : vector<49x32xf32>, vector<49x32xf32> -> vector<49x64xf32>
    %154 = arith.truncf %153 : vector<49x64xf32> to vector<49x64xbf16>
    %cst_49 = arith.constant dense<0.000000e+00> : vector<16x64xf32>
    %155 = tpu.matmul %99, %154, %cst_49 {dimension_numbers = #tpu.dot_dimension_numbers<[1], [0], [0], [1], [0, 0, 1, 1], [], []>} : vector<16x49xbf16>, vector<49x64xbf16>, vector<16x64xf32> -> vector<16x64xf32>
    %156 = vector.extract_strided_slice %155 {offsets = [0, 0], sizes = [16, 32], strides = [1, 1]} : vector<16x64xf32> to vector<16x32xf32>
    %157 = vector.extract_strided_slice %155 {offsets = [0, 32], sizes = [16, 32], strides = [1, 1]} : vector<16x64xf32> to vector<16x32xf32>
    %158 = arith.addf %156, %93 : vector<16x32xf32>
    %159 = arith.addf %157, %97 : vector<16x32xf32>
    %c0_50 = arith.constant 0 : index
    %c0_51 = arith.constant 0 : index
    %160 = vector.load %arg7[%c0_50, %c0_51] : memref<16x49xbf16, #tpu.memory_space<vmem>>, vector<16x49xbf16>
    %c0_52 = arith.constant 0 : index
    %c0_53 = arith.constant 0 : index
    %161 = vector.load %arg8[%c0_52, %c0_53] : memref<16x49xbf16, #tpu.memory_space<vmem>>, vector<16x49xbf16>
    %cst_54 = arith.constant 0.000000e+00 : f32
    %162 = vector.broadcast %cst_54 : f32 to vector<16x32xf32>
    %163 = arith.cmpf oge, %158, %162 : vector<16x32xf32>
    %cst_55 = arith.constant 1.000000e-01 : f32
    %164 = vector.broadcast %cst_55 : f32 to vector<16x32xf32>
    %165 = arith.mulf %164, %158 : vector<16x32xf32>
    %166 = arith.select %163, %158, %165 : vector<16x32xi1>, vector<16x32xf32>
    %cst_56 = arith.constant 0.000000e+00 : f32
    %167 = vector.broadcast %cst_56 : f32 to vector<16x3xf32>
    %168 = tpu.concatenate %167, %166, %167 in 1 : vector<16x3xf32>, vector<16x32xf32>, vector<16x3xf32> -> vector<16x38xf32>
    %169 = vector.extract_strided_slice %168 {offsets = [0, 0], sizes = [16, 32], strides = [1, 1]} : vector<16x38xf32> to vector<16x32xf32>
    %170 = vector.extract_strided_slice %168 {offsets = [0, 3], sizes = [16, 32], strides = [1, 1]} : vector<16x38xf32> to vector<16x32xf32>
    %171 = vector.extract_strided_slice %168 {offsets = [0, 6], sizes = [16, 32], strides = [1, 1]} : vector<16x38xf32> to vector<16x32xf32>
    %cst_57 = arith.constant 1.000000e+00 : f32
    %172 = vector.broadcast %cst_57 : f32 to vector<1x32xf32>
    %173 = tpu.concatenate %169, %170, %171, %172 in 0 : vector<16x32xf32>, vector<16x32xf32>, vector<16x32xf32>, vector<1x32xf32> -> vector<49x32xf32>
    %cst_58 = arith.constant 0.000000e+00 : f32
    %174 = vector.broadcast %cst_58 : f32 to vector<16x32xf32>
    %175 = arith.cmpf oge, %159, %174 : vector<16x32xf32>
    %cst_59 = arith.constant 1.000000e-01 : f32
    %176 = vector.broadcast %cst_59 : f32 to vector<16x32xf32>
    %177 = arith.mulf %176, %159 : vector<16x32xf32>
    %178 = arith.select %175, %159, %177 : vector<16x32xi1>, vector<16x32xf32>
    %cst_60 = arith.constant 0.000000e+00 : f32
    %179 = vector.broadcast %cst_60 : f32 to vector<16x3xf32>
    %180 = tpu.concatenate %179, %178, %179 in 1 : vector<16x3xf32>, vector<16x32xf32>, vector<16x3xf32> -> vector<16x38xf32>
    %181 = vector.extract_strided_slice %180 {offsets = [0, 0], sizes = [16, 32], strides = [1, 1]} : vector<16x38xf32> to vector<16x32xf32>
    %182 = vector.extract_strided_slice %180 {offsets = [0, 3], sizes = [16, 32], strides = [1, 1]} : vector<16x38xf32> to vector<16x32xf32>
    %183 = vector.extract_strided_slice %180 {offsets = [0, 6], sizes = [16, 32], strides = [1, 1]} : vector<16x38xf32> to vector<16x32xf32>
    %cst_61 = arith.constant 1.000000e+00 : f32
    %184 = vector.broadcast %cst_61 : f32 to vector<1x32xf32>
    %185 = tpu.concatenate %181, %182, %183, %184 in 0 : vector<16x32xf32>, vector<16x32xf32>, vector<16x32xf32>, vector<1x32xf32> -> vector<49x32xf32>
    %186 = tpu.concatenate %173, %185 in 1 : vector<49x32xf32>, vector<49x32xf32> -> vector<49x64xf32>
    %187 = arith.truncf %186 : vector<49x64xf32> to vector<49x64xbf16>
    %cst_62 = arith.constant dense<0.000000e+00> : vector<16x64xf32>
    %188 = tpu.matmul %160, %187, %cst_62 {dimension_numbers = #tpu.dot_dimension_numbers<[1], [0], [0], [1], [0, 0, 1, 1], [], []>} : vector<16x49xbf16>, vector<49x64xbf16>, vector<16x64xf32> -> vector<16x64xf32>
    %189 = vector.extract_strided_slice %188 {offsets = [0, 0], sizes = [16, 32], strides = [1, 1]} : vector<16x64xf32> to vector<16x32xf32>
    %190 = vector.extract_strided_slice %188 {offsets = [0, 32], sizes = [16, 32], strides = [1, 1]} : vector<16x64xf32> to vector<16x32xf32>
    %cst_63 = arith.constant 0.000000e+00 : f32
    %191 = vector.broadcast %cst_63 : f32 to vector<16x32xf32>
    %192 = arith.cmpf oge, %189, %191 : vector<16x32xf32>
    %cst_64 = arith.constant 1.000000e-01 : f32
    %193 = vector.broadcast %cst_64 : f32 to vector<16x32xf32>
    %194 = arith.mulf %193, %189 : vector<16x32xf32>
    %195 = arith.select %192, %189, %194 : vector<16x32xi1>, vector<16x32xf32>
    %cst_65 = arith.constant 0.000000e+00 : f32
    %196 = vector.broadcast %cst_65 : f32 to vector<16x1xf32>
    %197 = tpu.concatenate %196, %195, %196 in 1 : vector<16x1xf32>, vector<16x32xf32>, vector<16x1xf32> -> vector<16x34xf32>
    %198 = vector.extract_strided_slice %197 {offsets = [0, 0], sizes = [16, 32], strides = [1, 1]} : vector<16x34xf32> to vector<16x32xf32>
    %199 = vector.extract_strided_slice %197 {offsets = [0, 1], sizes = [16, 32], strides = [1, 1]} : vector<16x34xf32> to vector<16x32xf32>
    %200 = vector.extract_strided_slice %197 {offsets = [0, 2], sizes = [16, 32], strides = [1, 1]} : vector<16x34xf32> to vector<16x32xf32>
    %cst_66 = arith.constant 1.000000e+00 : f32
    %201 = vector.broadcast %cst_66 : f32 to vector<1x32xf32>
    %202 = tpu.concatenate %198, %199, %200, %201 in 0 : vector<16x32xf32>, vector<16x32xf32>, vector<16x32xf32>, vector<1x32xf32> -> vector<49x32xf32>
    %cst_67 = arith.constant 0.000000e+00 : f32
    %203 = vector.broadcast %cst_67 : f32 to vector<16x32xf32>
    %204 = arith.cmpf oge, %190, %203 : vector<16x32xf32>
    %cst_68 = arith.constant 1.000000e-01 : f32
    %205 = vector.broadcast %cst_68 : f32 to vector<16x32xf32>
    %206 = arith.mulf %205, %190 : vector<16x32xf32>
    %207 = arith.select %204, %190, %206 : vector<16x32xi1>, vector<16x32xf32>
    %cst_69 = arith.constant 0.000000e+00 : f32
    %208 = vector.broadcast %cst_69 : f32 to vector<16x1xf32>
    %209 = tpu.concatenate %208, %207, %208 in 1 : vector<16x1xf32>, vector<16x32xf32>, vector<16x1xf32> -> vector<16x34xf32>
    %210 = vector.extract_strided_slice %209 {offsets = [0, 0], sizes = [16, 32], strides = [1, 1]} : vector<16x34xf32> to vector<16x32xf32>
    %211 = vector.extract_strided_slice %209 {offsets = [0, 1], sizes = [16, 32], strides = [1, 1]} : vector<16x34xf32> to vector<16x32xf32>
    %212 = vector.extract_strided_slice %209 {offsets = [0, 2], sizes = [16, 32], strides = [1, 1]} : vector<16x34xf32> to vector<16x32xf32>
    %cst_70 = arith.constant 1.000000e+00 : f32
    %213 = vector.broadcast %cst_70 : f32 to vector<1x32xf32>
    %214 = tpu.concatenate %210, %211, %212, %213 in 0 : vector<16x32xf32>, vector<16x32xf32>, vector<16x32xf32>, vector<1x32xf32> -> vector<49x32xf32>
    %215 = tpu.concatenate %202, %214 in 1 : vector<49x32xf32>, vector<49x32xf32> -> vector<49x64xf32>
    %216 = arith.truncf %215 : vector<49x64xf32> to vector<49x64xbf16>
    %cst_71 = arith.constant dense<0.000000e+00> : vector<16x64xf32>
    %217 = tpu.matmul %161, %216, %cst_71 {dimension_numbers = #tpu.dot_dimension_numbers<[1], [0], [0], [1], [0, 0, 1, 1], [], []>} : vector<16x49xbf16>, vector<49x64xbf16>, vector<16x64xf32> -> vector<16x64xf32>
    %218 = vector.extract_strided_slice %217 {offsets = [0, 0], sizes = [16, 32], strides = [1, 1]} : vector<16x64xf32> to vector<16x32xf32>
    %219 = vector.extract_strided_slice %217 {offsets = [0, 32], sizes = [16, 32], strides = [1, 1]} : vector<16x64xf32> to vector<16x32xf32>
    %220 = arith.addf %218, %158 : vector<16x32xf32>
    %221 = arith.addf %219, %159 : vector<16x32xf32>
    %c0_72 = arith.constant 0 : index
    %c0_73 = arith.constant 0 : index
    %222 = vector.load %arg9[%c0_72, %c0_73] : memref<16x49xbf16, #tpu.memory_space<vmem>>, vector<16x49xbf16>
    %c0_74 = arith.constant 0 : index
    %c0_75 = arith.constant 0 : index
    %223 = vector.load %arg10[%c0_74, %c0_75] : memref<16x49xbf16, #tpu.memory_space<vmem>>, vector<16x49xbf16>
    %cst_76 = arith.constant 0.000000e+00 : f32
    %224 = vector.broadcast %cst_76 : f32 to vector<16x32xf32>
    %225 = arith.cmpf oge, %220, %224 : vector<16x32xf32>
    %cst_77 = arith.constant 1.000000e-01 : f32
    %226 = vector.broadcast %cst_77 : f32 to vector<16x32xf32>
    %227 = arith.mulf %226, %220 : vector<16x32xf32>
    %228 = arith.select %225, %220, %227 : vector<16x32xi1>, vector<16x32xf32>
    %cst_78 = arith.constant 0.000000e+00 : f32
    %229 = vector.broadcast %cst_78 : f32 to vector<16x5xf32>
    %230 = tpu.concatenate %229, %228, %229 in 1 : vector<16x5xf32>, vector<16x32xf32>, vector<16x5xf32> -> vector<16x42xf32>
    %231 = vector.extract_strided_slice %230 {offsets = [0, 0], sizes = [16, 32], strides = [1, 1]} : vector<16x42xf32> to vector<16x32xf32>
    %232 = vector.extract_strided_slice %230 {offsets = [0, 5], sizes = [16, 32], strides = [1, 1]} : vector<16x42xf32> to vector<16x32xf32>
    %233 = vector.extract_strided_slice %230 {offsets = [0, 10], sizes = [16, 32], strides = [1, 1]} : vector<16x42xf32> to vector<16x32xf32>
    %cst_79 = arith.constant 1.000000e+00 : f32
    %234 = vector.broadcast %cst_79 : f32 to vector<1x32xf32>
    %235 = tpu.concatenate %231, %232, %233, %234 in 0 : vector<16x32xf32>, vector<16x32xf32>, vector<16x32xf32>, vector<1x32xf32> -> vector<49x32xf32>
    %cst_80 = arith.constant 0.000000e+00 : f32
    %236 = vector.broadcast %cst_80 : f32 to vector<16x32xf32>
    %237 = arith.cmpf oge, %221, %236 : vector<16x32xf32>
    %cst_81 = arith.constant 1.000000e-01 : f32
    %238 = vector.broadcast %cst_81 : f32 to vector<16x32xf32>
    %239 = arith.mulf %238, %221 : vector<16x32xf32>
    %240 = arith.select %237, %221, %239 : vector<16x32xi1>, vector<16x32xf32>
    %cst_82 = arith.constant 0.000000e+00 : f32
    %241 = vector.broadcast %cst_82 : f32 to vector<16x5xf32>
    %242 = tpu.concatenate %241, %240, %241 in 1 : vector<16x5xf32>, vector<16x32xf32>, vector<16x5xf32> -> vector<16x42xf32>
    %243 = vector.extract_strided_slice %242 {offsets = [0, 0], sizes = [16, 32], strides = [1, 1]} : vector<16x42xf32> to vector<16x32xf32>
    %244 = vector.extract_strided_slice %242 {offsets = [0, 5], sizes = [16, 32], strides = [1, 1]} : vector<16x42xf32> to vector<16x32xf32>
    %245 = vector.extract_strided_slice %242 {offsets = [0, 10], sizes = [16, 32], strides = [1, 1]} : vector<16x42xf32> to vector<16x32xf32>
    %cst_83 = arith.constant 1.000000e+00 : f32
    %246 = vector.broadcast %cst_83 : f32 to vector<1x32xf32>
    %247 = tpu.concatenate %243, %244, %245, %246 in 0 : vector<16x32xf32>, vector<16x32xf32>, vector<16x32xf32>, vector<1x32xf32> -> vector<49x32xf32>
    %248 = tpu.concatenate %235, %247 in 1 : vector<49x32xf32>, vector<49x32xf32> -> vector<49x64xf32>
    %249 = arith.truncf %248 : vector<49x64xf32> to vector<49x64xbf16>
    %cst_84 = arith.constant dense<0.000000e+00> : vector<16x64xf32>
    %250 = tpu.matmul %222, %249, %cst_84 {dimension_numbers = #tpu.dot_dimension_numbers<[1], [0], [0], [1], [0, 0, 1, 1], [], []>} : vector<16x49xbf16>, vector<49x64xbf16>, vector<16x64xf32> -> vector<16x64xf32>
    %251 = vector.extract_strided_slice %250 {offsets = [0, 0], sizes = [16, 32], strides = [1, 1]} : vector<16x64xf32> to vector<16x32xf32>
    %252 = vector.extract_strided_slice %250 {offsets = [0, 32], sizes = [16, 32], strides = [1, 1]} : vector<16x64xf32> to vector<16x32xf32>
    %cst_85 = arith.constant 0.000000e+00 : f32
    %253 = vector.broadcast %cst_85 : f32 to vector<16x32xf32>
    %254 = arith.cmpf oge, %251, %253 : vector<16x32xf32>
    %cst_86 = arith.constant 1.000000e-01 : f32
    %255 = vector.broadcast %cst_86 : f32 to vector<16x32xf32>
    %256 = arith.mulf %255, %251 : vector<16x32xf32>
    %257 = arith.select %254, %251, %256 : vector<16x32xi1>, vector<16x32xf32>
    %cst_87 = arith.constant 0.000000e+00 : f32
    %258 = vector.broadcast %cst_87 : f32 to vector<16x1xf32>
    %259 = tpu.concatenate %258, %257, %258 in 1 : vector<16x1xf32>, vector<16x32xf32>, vector<16x1xf32> -> vector<16x34xf32>
    %260 = vector.extract_strided_slice %259 {offsets = [0, 0], sizes = [16, 32], strides = [1, 1]} : vector<16x34xf32> to vector<16x32xf32>
    %261 = vector.extract_strided_slice %259 {offsets = [0, 1], sizes = [16, 32], strides = [1, 1]} : vector<16x34xf32> to vector<16x32xf32>
    %262 = vector.extract_strided_slice %259 {offsets = [0, 2], sizes = [16, 32], strides = [1, 1]} : vector<16x34xf32> to vector<16x32xf32>
    %cst_88 = arith.constant 1.000000e+00 : f32
    %263 = vector.broadcast %cst_88 : f32 to vector<1x32xf32>
    %264 = tpu.concatenate %260, %261, %262, %263 in 0 : vector<16x32xf32>, vector<16x32xf32>, vector<16x32xf32>, vector<1x32xf32> -> vector<49x32xf32>
    %cst_89 = arith.constant 0.000000e+00 : f32
    %265 = vector.broadcast %cst_89 : f32 to vector<16x32xf32>
    %266 = arith.cmpf oge, %252, %265 : vector<16x32xf32>
    %cst_90 = arith.constant 1.000000e-01 : f32
    %267 = vector.broadcast %cst_90 : f32 to vector<16x32xf32>
    %268 = arith.mulf %267, %252 : vector<16x32xf32>
    %269 = arith.select %266, %252, %268 : vector<16x32xi1>, vector<16x32xf32>
    %cst_91 = arith.constant 0.000000e+00 : f32
    %270 = vector.broadcast %cst_91 : f32 to vector<16x1xf32>
    %271 = tpu.concatenate %270, %269, %270 in 1 : vector<16x1xf32>, vector<16x32xf32>, vector<16x1xf32> -> vector<16x34xf32>
    %272 = vector.extract_strided_slice %271 {offsets = [0, 0], sizes = [16, 32], strides = [1, 1]} : vector<16x34xf32> to vector<16x32xf32>
    %273 = vector.extract_strided_slice %271 {offsets = [0, 1], sizes = [16, 32], strides = [1, 1]} : vector<16x34xf32> to vector<16x32xf32>
    %274 = vector.extract_strided_slice %271 {offsets = [0, 2], sizes = [16, 32], strides = [1, 1]} : vector<16x34xf32> to vector<16x32xf32>
    %cst_92 = arith.constant 1.000000e+00 : f32
    %275 = vector.broadcast %cst_92 : f32 to vector<1x32xf32>
    %276 = tpu.concatenate %272, %273, %274, %275 in 0 : vector<16x32xf32>, vector<16x32xf32>, vector<16x32xf32>, vector<1x32xf32> -> vector<49x32xf32>
    %277 = tpu.concatenate %264, %276 in 1 : vector<49x32xf32>, vector<49x32xf32> -> vector<49x64xf32>
    %278 = arith.truncf %277 : vector<49x64xf32> to vector<49x64xbf16>
    %cst_93 = arith.constant dense<0.000000e+00> : vector<16x64xf32>
    %279 = tpu.matmul %223, %278, %cst_93 {dimension_numbers = #tpu.dot_dimension_numbers<[1], [0], [0], [1], [0, 0, 1, 1], [], []>} : vector<16x49xbf16>, vector<49x64xbf16>, vector<16x64xf32> -> vector<16x64xf32>
    %280 = vector.extract_strided_slice %279 {offsets = [0, 0], sizes = [16, 32], strides = [1, 1]} : vector<16x64xf32> to vector<16x32xf32>
    %281 = vector.extract_strided_slice %279 {offsets = [0, 32], sizes = [16, 32], strides = [1, 1]} : vector<16x64xf32> to vector<16x32xf32>
    %282 = arith.addf %280, %220 : vector<16x32xf32>
    %283 = arith.addf %281, %221 : vector<16x32xf32>
    %c0_94 = arith.constant 0 : index
    %c0_95 = arith.constant 0 : index
    %284 = vector.load %arg11[%c0_94, %c0_95] : memref<16x81xbf16, #tpu.memory_space<vmem>>, vector<16x81xbf16>
    %c0_96 = arith.constant 0 : index
    %c0_97 = arith.constant 0 : index
    %285 = vector.load %arg12[%c0_96, %c0_97] : memref<16x81xbf16, #tpu.memory_space<vmem>>, vector<16x81xbf16>
    %cst_98 = arith.constant 0.000000e+00 : f32
    %286 = vector.broadcast %cst_98 : f32 to vector<16x32xf32>
    %287 = arith.cmpf oge, %93, %286 : vector<16x32xf32>
    %cst_99 = arith.constant 1.000000e-01 : f32
    %288 = vector.broadcast %cst_99 : f32 to vector<16x32xf32>
    %289 = arith.mulf %288, %93 : vector<16x32xf32>
    %290 = arith.select %287, %93, %289 : vector<16x32xi1>, vector<16x32xf32>
    %cst_100 = arith.constant 0.000000e+00 : f32
    %291 = vector.broadcast %cst_100 : f32 to vector<16x2xf32>
    %292 = tpu.concatenate %291, %290, %291 in 1 : vector<16x2xf32>, vector<16x32xf32>, vector<16x2xf32> -> vector<16x36xf32>
    %293 = vector.extract_strided_slice %292 {offsets = [0, 0], sizes = [16, 32], strides = [1, 1]} : vector<16x36xf32> to vector<16x32xf32>
    %294 = vector.extract_strided_slice %292 {offsets = [0, 1], sizes = [16, 32], strides = [1, 1]} : vector<16x36xf32> to vector<16x32xf32>
    %295 = vector.extract_strided_slice %292 {offsets = [0, 2], sizes = [16, 32], strides = [1, 1]} : vector<16x36xf32> to vector<16x32xf32>
    %296 = vector.extract_strided_slice %292 {offsets = [0, 3], sizes = [16, 32], strides = [1, 1]} : vector<16x36xf32> to vector<16x32xf32>
    %297 = vector.extract_strided_slice %292 {offsets = [0, 4], sizes = [16, 32], strides = [1, 1]} : vector<16x36xf32> to vector<16x32xf32>
    %cst_101 = arith.constant 1.000000e+00 : f32
    %298 = vector.broadcast %cst_101 : f32 to vector<1x32xf32>
    %299 = tpu.concatenate %293, %294, %295, %296, %297, %298 in 0 : vector<16x32xf32>, vector<16x32xf32>, vector<16x32xf32>, vector<16x32xf32>, vector<16x32xf32>, vector<1x32xf32> -> vector<81x32xf32>
    %cst_102 = arith.constant 0.000000e+00 : f32
    %300 = vector.broadcast %cst_102 : f32 to vector<16x32xf32>
    %301 = arith.cmpf oge, %97, %300 : vector<16x32xf32>
    %cst_103 = arith.constant 1.000000e-01 : f32
    %302 = vector.broadcast %cst_103 : f32 to vector<16x32xf32>
    %303 = arith.mulf %302, %97 : vector<16x32xf32>
    %304 = arith.select %301, %97, %303 : vector<16x32xi1>, vector<16x32xf32>
    %cst_104 = arith.constant 0.000000e+00 : f32
    %305 = vector.broadcast %cst_104 : f32 to vector<16x2xf32>
    %306 = tpu.concatenate %305, %304, %305 in 1 : vector<16x2xf32>, vector<16x32xf32>, vector<16x2xf32> -> vector<16x36xf32>
    %307 = vector.extract_strided_slice %306 {offsets = [0, 0], sizes = [16, 32], strides = [1, 1]} : vector<16x36xf32> to vector<16x32xf32>
    %308 = vector.extract_strided_slice %306 {offsets = [0, 1], sizes = [16, 32], strides = [1, 1]} : vector<16x36xf32> to vector<16x32xf32>
    %309 = vector.extract_strided_slice %306 {offsets = [0, 2], sizes = [16, 32], strides = [1, 1]} : vector<16x36xf32> to vector<16x32xf32>
    %310 = vector.extract_strided_slice %306 {offsets = [0, 3], sizes = [16, 32], strides = [1, 1]} : vector<16x36xf32> to vector<16x32xf32>
    %311 = vector.extract_strided_slice %306 {offsets = [0, 4], sizes = [16, 32], strides = [1, 1]} : vector<16x36xf32> to vector<16x32xf32>
    %cst_105 = arith.constant 1.000000e+00 : f32
    %312 = vector.broadcast %cst_105 : f32 to vector<1x32xf32>
    %313 = tpu.concatenate %307, %308, %309, %310, %311, %312 in 0 : vector<16x32xf32>, vector<16x32xf32>, vector<16x32xf32>, vector<16x32xf32>, vector<16x32xf32>, vector<1x32xf32> -> vector<81x32xf32>
    %314 = tpu.concatenate %299, %313 in 1 : vector<81x32xf32>, vector<81x32xf32> -> vector<81x64xf32>
    %315 = arith.truncf %314 : vector<81x64xf32> to vector<81x64xbf16>
    %cst_106 = arith.constant dense<0.000000e+00> : vector<16x64xf32>
    %316 = tpu.matmul %284, %315, %cst_106 {dimension_numbers = #tpu.dot_dimension_numbers<[1], [0], [0], [1], [0, 0, 1, 1], [], []>} : vector<16x81xbf16>, vector<81x64xbf16>, vector<16x64xf32> -> vector<16x64xf32>
    %317 = vector.extract_strided_slice %316 {offsets = [0, 0], sizes = [16, 32], strides = [1, 1]} : vector<16x64xf32> to vector<16x32xf32>
    %318 = vector.extract_strided_slice %316 {offsets = [0, 32], sizes = [16, 32], strides = [1, 1]} : vector<16x64xf32> to vector<16x32xf32>
    %cst_107 = arith.constant 0.000000e+00 : f32
    %319 = vector.broadcast %cst_107 : f32 to vector<16x32xf32>
    %320 = arith.cmpf oge, %317, %319 : vector<16x32xf32>
    %cst_108 = arith.constant 1.000000e-01 : f32
    %321 = vector.broadcast %cst_108 : f32 to vector<16x32xf32>
    %322 = arith.mulf %321, %317 : vector<16x32xf32>
    %323 = arith.select %320, %317, %322 : vector<16x32xi1>, vector<16x32xf32>
    %cst_109 = arith.constant 0.000000e+00 : f32
    %324 = vector.broadcast %cst_109 : f32 to vector<16x2xf32>
    %325 = tpu.concatenate %324, %323, %324 in 1 : vector<16x2xf32>, vector<16x32xf32>, vector<16x2xf32> -> vector<16x36xf32>
    %326 = vector.extract_strided_slice %325 {offsets = [0, 0], sizes = [16, 32], strides = [1, 1]} : vector<16x36xf32> to vector<16x32xf32>
    %327 = vector.extract_strided_slice %325 {offsets = [0, 1], sizes = [16, 32], strides = [1, 1]} : vector<16x36xf32> to vector<16x32xf32>
    %328 = vector.extract_strided_slice %325 {offsets = [0, 2], sizes = [16, 32], strides = [1, 1]} : vector<16x36xf32> to vector<16x32xf32>
    %329 = vector.extract_strided_slice %325 {offsets = [0, 3], sizes = [16, 32], strides = [1, 1]} : vector<16x36xf32> to vector<16x32xf32>
    %330 = vector.extract_strided_slice %325 {offsets = [0, 4], sizes = [16, 32], strides = [1, 1]} : vector<16x36xf32> to vector<16x32xf32>
    %cst_110 = arith.constant 1.000000e+00 : f32
    %331 = vector.broadcast %cst_110 : f32 to vector<1x32xf32>
    %332 = tpu.concatenate %326, %327, %328, %329, %330, %331 in 0 : vector<16x32xf32>, vector<16x32xf32>, vector<16x32xf32>, vector<16x32xf32>, vector<16x32xf32>, vector<1x32xf32> -> vector<81x32xf32>
    %cst_111 = arith.constant 0.000000e+00 : f32
    %333 = vector.broadcast %cst_111 : f32 to vector<16x32xf32>
    %334 = arith.cmpf oge, %318, %333 : vector<16x32xf32>
    %cst_112 = arith.constant 1.000000e-01 : f32
    %335 = vector.broadcast %cst_112 : f32 to vector<16x32xf32>
    %336 = arith.mulf %335, %318 : vector<16x32xf32>
    %337 = arith.select %334, %318, %336 : vector<16x32xi1>, vector<16x32xf32>
    %cst_113 = arith.constant 0.000000e+00 : f32
    %338 = vector.broadcast %cst_113 : f32 to vector<16x2xf32>
    %339 = tpu.concatenate %338, %337, %338 in 1 : vector<16x2xf32>, vector<16x32xf32>, vector<16x2xf32> -> vector<16x36xf32>
    %340 = vector.extract_strided_slice %339 {offsets = [0, 0], sizes = [16, 32], strides = [1, 1]} : vector<16x36xf32> to vector<16x32xf32>
    %341 = vector.extract_strided_slice %339 {offsets = [0, 1], sizes = [16, 32], strides = [1, 1]} : vector<16x36xf32> to vector<16x32xf32>
    %342 = vector.extract_strided_slice %339 {offsets = [0, 2], sizes = [16, 32], strides = [1, 1]} : vector<16x36xf32> to vector<16x32xf32>
    %343 = vector.extract_strided_slice %339 {offsets = [0, 3], sizes = [16, 32], strides = [1, 1]} : vector<16x36xf32> to vector<16x32xf32>
    %344 = vector.extract_strided_slice %339 {offsets = [0, 4], sizes = [16, 32], strides = [1, 1]} : vector<16x36xf32> to vector<16x32xf32>
    %cst_114 = arith.constant 1.000000e+00 : f32
    %345 = vector.broadcast %cst_114 : f32 to vector<1x32xf32>
    %346 = tpu.concatenate %340, %341, %342, %343, %344, %345 in 0 : vector<16x32xf32>, vector<16x32xf32>, vector<16x32xf32>, vector<16x32xf32>, vector<16x32xf32>, vector<1x32xf32> -> vector<81x32xf32>
    %347 = tpu.concatenate %332, %346 in 1 : vector<81x32xf32>, vector<81x32xf32> -> vector<81x64xf32>
    %348 = arith.truncf %347 : vector<81x64xf32> to vector<81x64xbf16>
    %cst_115 = arith.constant dense<0.000000e+00> : vector<16x64xf32>
    %349 = tpu.matmul %285, %348, %cst_115 {dimension_numbers = #tpu.dot_dimension_numbers<[1], [0], [0], [1], [0, 0, 1, 1], [], []>} : vector<16x81xbf16>, vector<81x64xbf16>, vector<16x64xf32> -> vector<16x64xf32>
    %350 = vector.extract_strided_slice %349 {offsets = [0, 0], sizes = [16, 32], strides = [1, 1]} : vector<16x64xf32> to vector<16x32xf32>
    %351 = vector.extract_strided_slice %349 {offsets = [0, 32], sizes = [16, 32], strides = [1, 1]} : vector<16x64xf32> to vector<16x32xf32>
    %352 = arith.addf %350, %93 : vector<16x32xf32>
    %353 = arith.addf %351, %97 : vector<16x32xf32>
    %c0_116 = arith.constant 0 : index
    %c0_117 = arith.constant 0 : index
    %354 = vector.load %arg13[%c0_116, %c0_117] : memref<16x81xbf16, #tpu.memory_space<vmem>>, vector<16x81xbf16>
    %c0_118 = arith.constant 0 : index
    %c0_119 = arith.constant 0 : index
    %355 = vector.load %arg14[%c0_118, %c0_119] : memref<16x81xbf16, #tpu.memory_space<vmem>>, vector<16x81xbf16>
    %cst_120 = arith.constant 0.000000e+00 : f32
    %356 = vector.broadcast %cst_120 : f32 to vector<16x32xf32>
    %357 = arith.cmpf oge, %352, %356 : vector<16x32xf32>
    %cst_121 = arith.constant 1.000000e-01 : f32
    %358 = vector.broadcast %cst_121 : f32 to vector<16x32xf32>
    %359 = arith.mulf %358, %352 : vector<16x32xf32>
    %360 = arith.select %357, %352, %359 : vector<16x32xi1>, vector<16x32xf32>
    %cst_122 = arith.constant 0.000000e+00 : f32
    %361 = vector.broadcast %cst_122 : f32 to vector<16x6xf32>
    %362 = tpu.concatenate %361, %360, %361 in 1 : vector<16x6xf32>, vector<16x32xf32>, vector<16x6xf32> -> vector<16x44xf32>
    %363 = vector.extract_strided_slice %362 {offsets = [0, 0], sizes = [16, 32], strides = [1, 1]} : vector<16x44xf32> to vector<16x32xf32>
    %364 = vector.extract_strided_slice %362 {offsets = [0, 3], sizes = [16, 32], strides = [1, 1]} : vector<16x44xf32> to vector<16x32xf32>
    %365 = vector.extract_strided_slice %362 {offsets = [0, 6], sizes = [16, 32], strides = [1, 1]} : vector<16x44xf32> to vector<16x32xf32>
    %366 = vector.extract_strided_slice %362 {offsets = [0, 9], sizes = [16, 32], strides = [1, 1]} : vector<16x44xf32> to vector<16x32xf32>
    %367 = vector.extract_strided_slice %362 {offsets = [0, 12], sizes = [16, 32], strides = [1, 1]} : vector<16x44xf32> to vector<16x32xf32>
    %cst_123 = arith.constant 1.000000e+00 : f32
    %368 = vector.broadcast %cst_123 : f32 to vector<1x32xf32>
    %369 = tpu.concatenate %363, %364, %365, %366, %367, %368 in 0 : vector<16x32xf32>, vector<16x32xf32>, vector<16x32xf32>, vector<16x32xf32>, vector<16x32xf32>, vector<1x32xf32> -> vector<81x32xf32>
    %cst_124 = arith.constant 0.000000e+00 : f32
    %370 = vector.broadcast %cst_124 : f32 to vector<16x32xf32>
    %371 = arith.cmpf oge, %353, %370 : vector<16x32xf32>
    %cst_125 = arith.constant 1.000000e-01 : f32
    %372 = vector.broadcast %cst_125 : f32 to vector<16x32xf32>
    %373 = arith.mulf %372, %353 : vector<16x32xf32>
    %374 = arith.select %371, %353, %373 : vector<16x32xi1>, vector<16x32xf32>
    %cst_126 = arith.constant 0.000000e+00 : f32
    %375 = vector.broadcast %cst_126 : f32 to vector<16x6xf32>
    %376 = tpu.concatenate %375, %374, %375 in 1 : vector<16x6xf32>, vector<16x32xf32>, vector<16x6xf32> -> vector<16x44xf32>
    %377 = vector.extract_strided_slice %376 {offsets = [0, 0], sizes = [16, 32], strides = [1, 1]} : vector<16x44xf32> to vector<16x32xf32>
    %378 = vector.extract_strided_slice %376 {offsets = [0, 3], sizes = [16, 32], strides = [1, 1]} : vector<16x44xf32> to vector<16x32xf32>
    %379 = vector.extract_strided_slice %376 {offsets = [0, 6], sizes = [16, 32], strides = [1, 1]} : vector<16x44xf32> to vector<16x32xf32>
    %380 = vector.extract_strided_slice %376 {offsets = [0, 9], sizes = [16, 32], strides = [1, 1]} : vector<16x44xf32> to vector<16x32xf32>
    %381 = vector.extract_strided_slice %376 {offsets = [0, 12], sizes = [16, 32], strides = [1, 1]} : vector<16x44xf32> to vector<16x32xf32>
    %cst_127 = arith.constant 1.000000e+00 : f32
    %382 = vector.broadcast %cst_127 : f32 to vector<1x32xf32>
    %383 = tpu.concatenate %377, %378, %379, %380, %381, %382 in 0 : vector<16x32xf32>, vector<16x32xf32>, vector<16x32xf32>, vector<16x32xf32>, vector<16x32xf32>, vector<1x32xf32> -> vector<81x32xf32>
    %384 = tpu.concatenate %369, %383 in 1 : vector<81x32xf32>, vector<81x32xf32> -> vector<81x64xf32>
    %385 = arith.truncf %384 : vector<81x64xf32> to vector<81x64xbf16>
    %cst_128 = arith.constant dense<0.000000e+00> : vector<16x64xf32>
    %386 = tpu.matmul %354, %385, %cst_128 {dimension_numbers = #tpu.dot_dimension_numbers<[1], [0], [0], [1], [0, 0, 1, 1], [], []>} : vector<16x81xbf16>, vector<81x64xbf16>, vector<16x64xf32> -> vector<16x64xf32>
    %387 = vector.extract_strided_slice %386 {offsets = [0, 0], sizes = [16, 32], strides = [1, 1]} : vector<16x64xf32> to vector<16x32xf32>
    %388 = vector.extract_strided_slice %386 {offsets = [0, 32], sizes = [16, 32], strides = [1, 1]} : vector<16x64xf32> to vector<16x32xf32>
    %cst_129 = arith.constant 0.000000e+00 : f32
    %389 = vector.broadcast %cst_129 : f32 to vector<16x32xf32>
    %390 = arith.cmpf oge, %387, %389 : vector<16x32xf32>
    %cst_130 = arith.constant 1.000000e-01 : f32
    %391 = vector.broadcast %cst_130 : f32 to vector<16x32xf32>
    %392 = arith.mulf %391, %387 : vector<16x32xf32>
    %393 = arith.select %390, %387, %392 : vector<16x32xi1>, vector<16x32xf32>
    %cst_131 = arith.constant 0.000000e+00 : f32
    %394 = vector.broadcast %cst_131 : f32 to vector<16x2xf32>
    %395 = tpu.concatenate %394, %393, %394 in 1 : vector<16x2xf32>, vector<16x32xf32>, vector<16x2xf32> -> vector<16x36xf32>
    %396 = vector.extract_strided_slice %395 {offsets = [0, 0], sizes = [16, 32], strides = [1, 1]} : vector<16x36xf32> to vector<16x32xf32>
    %397 = vector.extract_strided_slice %395 {offsets = [0, 1], sizes = [16, 32], strides = [1, 1]} : vector<16x36xf32> to vector<16x32xf32>
    %398 = vector.extract_strided_slice %395 {offsets = [0, 2], sizes = [16, 32], strides = [1, 1]} : vector<16x36xf32> to vector<16x32xf32>
    %399 = vector.extract_strided_slice %395 {offsets = [0, 3], sizes = [16, 32], strides = [1, 1]} : vector<16x36xf32> to vector<16x32xf32>
    %400 = vector.extract_strided_slice %395 {offsets = [0, 4], sizes = [16, 32], strides = [1, 1]} : vector<16x36xf32> to vector<16x32xf32>
    %cst_132 = arith.constant 1.000000e+00 : f32
    %401 = vector.broadcast %cst_132 : f32 to vector<1x32xf32>
    %402 = tpu.concatenate %396, %397, %398, %399, %400, %401 in 0 : vector<16x32xf32>, vector<16x32xf32>, vector<16x32xf32>, vector<16x32xf32>, vector<16x32xf32>, vector<1x32xf32> -> vector<81x32xf32>
    %cst_133 = arith.constant 0.000000e+00 : f32
    %403 = vector.broadcast %cst_133 : f32 to vector<16x32xf32>
    %404 = arith.cmpf oge, %388, %403 : vector<16x32xf32>
    %cst_134 = arith.constant 1.000000e-01 : f32
    %405 = vector.broadcast %cst_134 : f32 to vector<16x32xf32>
    %406 = arith.mulf %405, %388 : vector<16x32xf32>
    %407 = arith.select %404, %388, %406 : vector<16x32xi1>, vector<16x32xf32>
    %cst_135 = arith.constant 0.000000e+00 : f32
    %408 = vector.broadcast %cst_135 : f32 to vector<16x2xf32>
    %409 = tpu.concatenate %408, %407, %408 in 1 : vector<16x2xf32>, vector<16x32xf32>, vector<16x2xf32> -> vector<16x36xf32>
    %410 = vector.extract_strided_slice %409 {offsets = [0, 0], sizes = [16, 32], strides = [1, 1]} : vector<16x36xf32> to vector<16x32xf32>
    %411 = vector.extract_strided_slice %409 {offsets = [0, 1], sizes = [16, 32], strides = [1, 1]} : vector<16x36xf32> to vector<16x32xf32>
    %412 = vector.extract_strided_slice %409 {offsets = [0, 2], sizes = [16, 32], strides = [1, 1]} : vector<16x36xf32> to vector<16x32xf32>
    %413 = vector.extract_strided_slice %409 {offsets = [0, 3], sizes = [16, 32], strides = [1, 1]} : vector<16x36xf32> to vector<16x32xf32>
    %414 = vector.extract_strided_slice %409 {offsets = [0, 4], sizes = [16, 32], strides = [1, 1]} : vector<16x36xf32> to vector<16x32xf32>
    %cst_136 = arith.constant 1.000000e+00 : f32
    %415 = vector.broadcast %cst_136 : f32 to vector<1x32xf32>
    %416 = tpu.concatenate %410, %411, %412, %413, %414, %415 in 0 : vector<16x32xf32>, vector<16x32xf32>, vector<16x32xf32>, vector<16x32xf32>, vector<16x32xf32>, vector<1x32xf32> -> vector<81x32xf32>
    %417 = tpu.concatenate %402, %416 in 1 : vector<81x32xf32>, vector<81x32xf32> -> vector<81x64xf32>
    %418 = arith.truncf %417 : vector<81x64xf32> to vector<81x64xbf16>
    %cst_137 = arith.constant dense<0.000000e+00> : vector<16x64xf32>
    %419 = tpu.matmul %355, %418, %cst_137 {dimension_numbers = #tpu.dot_dimension_numbers<[1], [0], [0], [1], [0, 0, 1, 1], [], []>} : vector<16x81xbf16>, vector<81x64xbf16>, vector<16x64xf32> -> vector<16x64xf32>
    %420 = vector.extract_strided_slice %419 {offsets = [0, 0], sizes = [16, 32], strides = [1, 1]} : vector<16x64xf32> to vector<16x32xf32>
    %421 = vector.extract_strided_slice %419 {offsets = [0, 32], sizes = [16, 32], strides = [1, 1]} : vector<16x64xf32> to vector<16x32xf32>
    %422 = arith.addf %420, %352 : vector<16x32xf32>
    %423 = arith.addf %421, %353 : vector<16x32xf32>
    %c0_138 = arith.constant 0 : index
    %c0_139 = arith.constant 0 : index
    %424 = vector.load %arg15[%c0_138, %c0_139] : memref<16x81xbf16, #tpu.memory_space<vmem>>, vector<16x81xbf16>
    %c0_140 = arith.constant 0 : index
    %c0_141 = arith.constant 0 : index
    %425 = vector.load %arg16[%c0_140, %c0_141] : memref<16x81xbf16, #tpu.memory_space<vmem>>, vector<16x81xbf16>
    %cst_142 = arith.constant 0.000000e+00 : f32
    %426 = vector.broadcast %cst_142 : f32 to vector<16x32xf32>
    %427 = arith.cmpf oge, %422, %426 : vector<16x32xf32>
    %cst_143 = arith.constant 1.000000e-01 : f32
    %428 = vector.broadcast %cst_143 : f32 to vector<16x32xf32>
    %429 = arith.mulf %428, %422 : vector<16x32xf32>
    %430 = arith.select %427, %422, %429 : vector<16x32xi1>, vector<16x32xf32>
    %cst_144 = arith.constant 0.000000e+00 : f32
    %431 = vector.broadcast %cst_144 : f32 to vector<16x10xf32>
    %432 = tpu.concatenate %431, %430, %431 in 1 : vector<16x10xf32>, vector<16x32xf32>, vector<16x10xf32> -> vector<16x52xf32>
    %433 = vector.extract_strided_slice %432 {offsets = [0, 0], sizes = [16, 32], strides = [1, 1]} : vector<16x52xf32> to vector<16x32xf32>
    %434 = vector.extract_strided_slice %432 {offsets = [0, 5], sizes = [16, 32], strides = [1, 1]} : vector<16x52xf32> to vector<16x32xf32>
    %435 = vector.extract_strided_slice %432 {offsets = [0, 10], sizes = [16, 32], strides = [1, 1]} : vector<16x52xf32> to vector<16x32xf32>
    %436 = vector.extract_strided_slice %432 {offsets = [0, 15], sizes = [16, 32], strides = [1, 1]} : vector<16x52xf32> to vector<16x32xf32>
    %437 = vector.extract_strided_slice %432 {offsets = [0, 20], sizes = [16, 32], strides = [1, 1]} : vector<16x52xf32> to vector<16x32xf32>
    %cst_145 = arith.constant 1.000000e+00 : f32
    %438 = vector.broadcast %cst_145 : f32 to vector<1x32xf32>
    %439 = tpu.concatenate %433, %434, %435, %436, %437, %438 in 0 : vector<16x32xf32>, vector<16x32xf32>, vector<16x32xf32>, vector<16x32xf32>, vector<16x32xf32>, vector<1x32xf32> -> vector<81x32xf32>
    %cst_146 = arith.constant 0.000000e+00 : f32
    %440 = vector.broadcast %cst_146 : f32 to vector<16x32xf32>
    %441 = arith.cmpf oge, %423, %440 : vector<16x32xf32>
    %cst_147 = arith.constant 1.000000e-01 : f32
    %442 = vector.broadcast %cst_147 : f32 to vector<16x32xf32>
    %443 = arith.mulf %442, %423 : vector<16x32xf32>
    %444 = arith.select %441, %423, %443 : vector<16x32xi1>, vector<16x32xf32>
    %cst_148 = arith.constant 0.000000e+00 : f32
    %445 = vector.broadcast %cst_148 : f32 to vector<16x10xf32>
    %446 = tpu.concatenate %445, %444, %445 in 1 : vector<16x10xf32>, vector<16x32xf32>, vector<16x10xf32> -> vector<16x52xf32>
    %447 = vector.extract_strided_slice %446 {offsets = [0, 0], sizes = [16, 32], strides = [1, 1]} : vector<16x52xf32> to vector<16x32xf32>
    %448 = vector.extract_strided_slice %446 {offsets = [0, 5], sizes = [16, 32], strides = [1, 1]} : vector<16x52xf32> to vector<16x32xf32>
    %449 = vector.extract_strided_slice %446 {offsets = [0, 10], sizes = [16, 32], strides = [1, 1]} : vector<16x52xf32> to vector<16x32xf32>
    %450 = vector.extract_strided_slice %446 {offsets = [0, 15], sizes = [16, 32], strides = [1, 1]} : vector<16x52xf32> to vector<16x32xf32>
    %451 = vector.extract_strided_slice %446 {offsets = [0, 20], sizes = [16, 32], strides = [1, 1]} : vector<16x52xf32> to vector<16x32xf32>
    %cst_149 = arith.constant 1.000000e+00 : f32
    %452 = vector.broadcast %cst_149 : f32 to vector<1x32xf32>
    %453 = tpu.concatenate %447, %448, %449, %450, %451, %452 in 0 : vector<16x32xf32>, vector<16x32xf32>, vector<16x32xf32>, vector<16x32xf32>, vector<16x32xf32>, vector<1x32xf32> -> vector<81x32xf32>
    %454 = tpu.concatenate %439, %453 in 1 : vector<81x32xf32>, vector<81x32xf32> -> vector<81x64xf32>
    %455 = arith.truncf %454 : vector<81x64xf32> to vector<81x64xbf16>
    %cst_150 = arith.constant dense<0.000000e+00> : vector<16x64xf32>
    %456 = tpu.matmul %424, %455, %cst_150 {dimension_numbers = #tpu.dot_dimension_numbers<[1], [0], [0], [1], [0, 0, 1, 1], [], []>} : vector<16x81xbf16>, vector<81x64xbf16>, vector<16x64xf32> -> vector<16x64xf32>
    %457 = vector.extract_strided_slice %456 {offsets = [0, 0], sizes = [16, 32], strides = [1, 1]} : vector<16x64xf32> to vector<16x32xf32>
    %458 = vector.extract_strided_slice %456 {offsets = [0, 32], sizes = [16, 32], strides = [1, 1]} : vector<16x64xf32> to vector<16x32xf32>
    %cst_151 = arith.constant 0.000000e+00 : f32
    %459 = vector.broadcast %cst_151 : f32 to vector<16x32xf32>
    %460 = arith.cmpf oge, %457, %459 : vector<16x32xf32>
    %cst_152 = arith.constant 1.000000e-01 : f32
    %461 = vector.broadcast %cst_152 : f32 to vector<16x32xf32>
    %462 = arith.mulf %461, %457 : vector<16x32xf32>
    %463 = arith.select %460, %457, %462 : vector<16x32xi1>, vector<16x32xf32>
    %cst_153 = arith.constant 0.000000e+00 : f32
    %464 = vector.broadcast %cst_153 : f32 to vector<16x2xf32>
    %465 = tpu.concatenate %464, %463, %464 in 1 : vector<16x2xf32>, vector<16x32xf32>, vector<16x2xf32> -> vector<16x36xf32>
    %466 = vector.extract_strided_slice %465 {offsets = [0, 0], sizes = [16, 32], strides = [1, 1]} : vector<16x36xf32> to vector<16x32xf32>
    %467 = vector.extract_strided_slice %465 {offsets = [0, 1], sizes = [16, 32], strides = [1, 1]} : vector<16x36xf32> to vector<16x32xf32>
    %468 = vector.extract_strided_slice %465 {offsets = [0, 2], sizes = [16, 32], strides = [1, 1]} : vector<16x36xf32> to vector<16x32xf32>
    %469 = vector.extract_strided_slice %465 {offsets = [0, 3], sizes = [16, 32], strides = [1, 1]} : vector<16x36xf32> to vector<16x32xf32>
    %470 = vector.extract_strided_slice %465 {offsets = [0, 4], sizes = [16, 32], strides = [1, 1]} : vector<16x36xf32> to vector<16x32xf32>
    %cst_154 = arith.constant 1.000000e+00 : f32
    %471 = vector.broadcast %cst_154 : f32 to vector<1x32xf32>
    %472 = tpu.concatenate %466, %467, %468, %469, %470, %471 in 0 : vector<16x32xf32>, vector<16x32xf32>, vector<16x32xf32>, vector<16x32xf32>, vector<16x32xf32>, vector<1x32xf32> -> vector<81x32xf32>
    %cst_155 = arith.constant 0.000000e+00 : f32
    %473 = vector.broadcast %cst_155 : f32 to vector<16x32xf32>
    %474 = arith.cmpf oge, %458, %473 : vector<16x32xf32>
    %cst_156 = arith.constant 1.000000e-01 : f32
    %475 = vector.broadcast %cst_156 : f32 to vector<16x32xf32>
    %476 = arith.mulf %475, %458 : vector<16x32xf32>
    %477 = arith.select %474, %458, %476 : vector<16x32xi1>, vector<16x32xf32>
    %cst_157 = arith.constant 0.000000e+00 : f32
    %478 = vector.broadcast %cst_157 : f32 to vector<16x2xf32>
    %479 = tpu.concatenate %478, %477, %478 in 1 : vector<16x2xf32>, vector<16x32xf32>, vector<16x2xf32> -> vector<16x36xf32>
    %480 = vector.extract_strided_slice %479 {offsets = [0, 0], sizes = [16, 32], strides = [1, 1]} : vector<16x36xf32> to vector<16x32xf32>
    %481 = vector.extract_strided_slice %479 {offsets = [0, 1], sizes = [16, 32], strides = [1, 1]} : vector<16x36xf32> to vector<16x32xf32>
    %482 = vector.extract_strided_slice %479 {offsets = [0, 2], sizes = [16, 32], strides = [1, 1]} : vector<16x36xf32> to vector<16x32xf32>
    %483 = vector.extract_strided_slice %479 {offsets = [0, 3], sizes = [16, 32], strides = [1, 1]} : vector<16x36xf32> to vector<16x32xf32>
    %484 = vector.extract_strided_slice %479 {offsets = [0, 4], sizes = [16, 32], strides = [1, 1]} : vector<16x36xf32> to vector<16x32xf32>
    %cst_158 = arith.constant 1.000000e+00 : f32
    %485 = vector.broadcast %cst_158 : f32 to vector<1x32xf32>
    %486 = tpu.concatenate %480, %481, %482, %483, %484, %485 in 0 : vector<16x32xf32>, vector<16x32xf32>, vector<16x32xf32>, vector<16x32xf32>, vector<16x32xf32>, vector<1x32xf32> -> vector<81x32xf32>
    %487 = tpu.concatenate %472, %486 in 1 : vector<81x32xf32>, vector<81x32xf32> -> vector<81x64xf32>
    %488 = arith.truncf %487 : vector<81x64xf32> to vector<81x64xbf16>
    %cst_159 = arith.constant dense<0.000000e+00> : vector<16x64xf32>
    %489 = tpu.matmul %425, %488, %cst_159 {dimension_numbers = #tpu.dot_dimension_numbers<[1], [0], [0], [1], [0, 0, 1, 1], [], []>} : vector<16x81xbf16>, vector<81x64xbf16>, vector<16x64xf32> -> vector<16x64xf32>
    %490 = vector.extract_strided_slice %489 {offsets = [0, 0], sizes = [16, 32], strides = [1, 1]} : vector<16x64xf32> to vector<16x32xf32>
    %491 = vector.extract_strided_slice %489 {offsets = [0, 32], sizes = [16, 32], strides = [1, 1]} : vector<16x64xf32> to vector<16x32xf32>
    %492 = arith.addf %490, %422 : vector<16x32xf32>
    %493 = arith.addf %491, %423 : vector<16x32xf32>
    %494 = arith.addf %282, %492 : vector<16x32xf32>
    %495 = arith.addf %283, %493 : vector<16x32xf32>
    %cst_160 = arith.constant 5.000000e-01 : f32
    %496 = vector.broadcast %cst_160 : f32 to vector<16x32xf32>
    %497 = arith.mulf %494, %496 : vector<16x32xf32>
    %cst_161 = arith.constant 5.000000e-01 : f32
    %498 = vector.broadcast %cst_161 : f32 to vector<16x32xf32>
    %499 = arith.mulf %495, %498 : vector<16x32xf32>
    %c0_162 = arith.constant 0 : index
    %c0_163 = arith.constant 0 : index
    %500 = vector.load %arg17[%c0_162, %c0_163] : memref<8x33xbf16, #tpu.memory_space<vmem>>, vector<8x33xbf16>
    %c0_164 = arith.constant 0 : index
    %c0_165 = arith.constant 0 : index
    %501 = vector.load %arg18[%c0_164, %c0_165] : memref<8x33xbf16, #tpu.memory_space<vmem>>, vector<8x33xbf16>
    %cst_166 = arith.constant 0.000000e+00 : f32
    %502 = vector.broadcast %cst_166 : f32 to vector<16x32xf32>
    %503 = arith.cmpf oge, %497, %502 : vector<16x32xf32>
    %cst_167 = arith.constant 1.000000e-01 : f32
    %504 = vector.broadcast %cst_167 : f32 to vector<16x32xf32>
    %505 = arith.mulf %504, %497 : vector<16x32xf32>
    %506 = arith.select %503, %497, %505 : vector<16x32xi1>, vector<16x32xf32>
    %cst_168 = arith.constant 0.000000e+00 : f32
    %507 = vector.broadcast %cst_168 : f32 to vector<16x1xf32>
    %cst_169 = arith.constant 0.000000e+00 : f32
    %508 = vector.broadcast %cst_169 : f32 to vector<16x1xf32>
    %509 = tpu.concatenate %507, %506, %508 in 1 : vector<16x1xf32>, vector<16x32xf32>, vector<16x1xf32> -> vector<16x34xf32>
    %cst_170 = arith.constant 0.000000e+00 : f32
    %510 = vector.broadcast %cst_170 : f32 to vector<16x32xf32>
    %511 = arith.cmpf oge, %499, %510 : vector<16x32xf32>
    %cst_171 = arith.constant 1.000000e-01 : f32
    %512 = vector.broadcast %cst_171 : f32 to vector<16x32xf32>
    %513 = arith.mulf %512, %499 : vector<16x32xf32>
    %514 = arith.select %511, %499, %513 : vector<16x32xi1>, vector<16x32xf32>
    %cst_172 = arith.constant 0.000000e+00 : f32
    %515 = vector.broadcast %cst_172 : f32 to vector<16x1xf32>
    %cst_173 = arith.constant 0.000000e+00 : f32
    %516 = vector.broadcast %cst_173 : f32 to vector<16x1xf32>
    %517 = tpu.concatenate %515, %514, %516 in 1 : vector<16x1xf32>, vector<16x32xf32>, vector<16x1xf32> -> vector<16x34xf32>
    %518 = vector.extract_strided_slice %509 {offsets = [0, 0], sizes = [16, 32], strides = [1, 1]} : vector<16x34xf32> to vector<16x32xf32>
    %519 = vector.extract_strided_slice %509 {offsets = [0, 1], sizes = [16, 32], strides = [1, 1]} : vector<16x34xf32> to vector<16x32xf32>
    %cst_174 = arith.constant 1.000000e+00 : f32
    %520 = vector.broadcast %cst_174 : f32 to vector<1x32xf32>
    %521 = tpu.concatenate %518, %519, %520 in 0 : vector<16x32xf32>, vector<16x32xf32>, vector<1x32xf32> -> vector<33x32xf32>
    %522 = vector.extract_strided_slice %517 {offsets = [0, 0], sizes = [16, 32], strides = [1, 1]} : vector<16x34xf32> to vector<16x32xf32>
    %523 = vector.extract_strided_slice %517 {offsets = [0, 1], sizes = [16, 32], strides = [1, 1]} : vector<16x34xf32> to vector<16x32xf32>
    %cst_175 = arith.constant 1.000000e+00 : f32
    %524 = vector.broadcast %cst_175 : f32 to vector<1x32xf32>
    %525 = tpu.concatenate %522, %523, %524 in 0 : vector<16x32xf32>, vector<16x32xf32>, vector<1x32xf32> -> vector<33x32xf32>
    %526 = tpu.concatenate %521, %525 in 1 : vector<33x32xf32>, vector<33x32xf32> -> vector<33x64xf32>
    %527 = arith.truncf %526 : vector<33x64xf32> to vector<33x64xbf16>
    %cst_176 = arith.constant dense<0.000000e+00> : vector<8x64xf32>
    %528 = tpu.matmul %500, %527, %cst_176 {dimension_numbers = #tpu.dot_dimension_numbers<[1], [0], [0], [1], [0, 0, 1, 1], [], []>} : vector<8x33xbf16>, vector<33x64xbf16>, vector<8x64xf32> -> vector<8x64xf32>
    %529 = vector.extract_strided_slice %509 {offsets = [0, 1], sizes = [16, 32], strides = [1, 1]} : vector<16x34xf32> to vector<16x32xf32>
    %530 = vector.extract_strided_slice %509 {offsets = [0, 2], sizes = [16, 32], strides = [1, 1]} : vector<16x34xf32> to vector<16x32xf32>
    %cst_177 = arith.constant 1.000000e+00 : f32
    %531 = vector.broadcast %cst_177 : f32 to vector<1x32xf32>
    %532 = tpu.concatenate %529, %530, %531 in 0 : vector<16x32xf32>, vector<16x32xf32>, vector<1x32xf32> -> vector<33x32xf32>
    %533 = vector.extract_strided_slice %517 {offsets = [0, 1], sizes = [16, 32], strides = [1, 1]} : vector<16x34xf32> to vector<16x32xf32>
    %534 = vector.extract_strided_slice %517 {offsets = [0, 2], sizes = [16, 32], strides = [1, 1]} : vector<16x34xf32> to vector<16x32xf32>
    %cst_178 = arith.constant 1.000000e+00 : f32
    %535 = vector.broadcast %cst_178 : f32 to vector<1x32xf32>
    %536 = tpu.concatenate %533, %534, %535 in 0 : vector<16x32xf32>, vector<16x32xf32>, vector<1x32xf32> -> vector<33x32xf32>
    %537 = tpu.concatenate %532, %536 in 1 : vector<33x32xf32>, vector<33x32xf32> -> vector<33x64xf32>
    %538 = arith.truncf %537 : vector<33x64xf32> to vector<33x64xbf16>
    %cst_179 = arith.constant dense<0.000000e+00> : vector<8x64xf32>
    %539 = tpu.matmul %501, %538, %cst_179 {dimension_numbers = #tpu.dot_dimension_numbers<[1], [0], [0], [1], [0, 0, 1, 1], [], []>} : vector<8x33xbf16>, vector<33x64xbf16>, vector<8x64xf32> -> vector<8x64xf32>
    %540 = tpu.iota {dimensions = array<i32: 0>} : vector<32x64xi32>
    %541 = tpu.iota {dimensions = array<i32: 1>} : vector<32x64xi32>
    %c2_i32_180 = arith.constant 2 : i32
    %542 = vector.broadcast %c2_i32_180 : i32 to vector<32x64xi32>
    %543 = arith.muli %540, %542 : vector<32x64xi32>
    %c0_i32_181 = arith.constant 0 : i32
    %544 = vector.broadcast %c0_i32_181 : i32 to vector<32x64xi32>
    %545 = arith.addi %543, %544 : vector<32x64xi32>
    %546 = arith.cmpi eq, %541, %545 : vector<32x64xi32>
    %547 = arith.extui %546 : vector<32x64xi1> to vector<32x64xi32>
    %548 = arith.sitofp %547 : vector<32x64xi32> to vector<32x64xf32>
    %549 = tpu.iota {dimensions = array<i32: 0>} : vector<32x64xi32>
    %550 = tpu.iota {dimensions = array<i32: 1>} : vector<32x64xi32>
    %c2_i32_182 = arith.constant 2 : i32
    %551 = vector.broadcast %c2_i32_182 : i32 to vector<32x64xi32>
    %552 = arith.muli %549, %551 : vector<32x64xi32>
    %c1_i32_183 = arith.constant 1 : i32
    %553 = vector.broadcast %c1_i32_183 : i32 to vector<32x64xi32>
    %554 = arith.addi %552, %553 : vector<32x64xi32>
    %555 = arith.cmpi eq, %550, %554 : vector<32x64xi32>
    %556 = arith.extui %555 : vector<32x64xi1> to vector<32x64xi32>
    %557 = arith.sitofp %556 : vector<32x64xi32> to vector<32x64xf32>
    %558 = tpu.concatenate %548, %557 in 0 : vector<32x64xf32>, vector<32x64xf32> -> vector<64x64xf32>
    %559 = vector.extract_strided_slice %528 {offsets = [0, 0], sizes = [8, 32], strides = [1, 1]} : vector<8x64xf32> to vector<8x32xf32>
    %560 = vector.extract_strided_slice %539 {offsets = [0, 0], sizes = [8, 32], strides = [1, 1]} : vector<8x64xf32> to vector<8x32xf32>
    %561 = tpu.concatenate %559, %560 in 1 : vector<8x32xf32>, vector<8x32xf32> -> vector<8x64xf32>
    %cst_184 = arith.constant dense<0.000000e+00> : vector<8x64xf32>
    %562 = tpu.matmul %561, %558, %cst_184 {dimension_numbers = #tpu.dot_dimension_numbers<[1], [0], [0], [1], [0, 0, 1, 1], [], []>} : vector<8x64xf32>, vector<64x64xf32>, vector<8x64xf32> -> vector<8x64xf32>
    %563 = vector.extract_strided_slice %528 {offsets = [0, 32], sizes = [8, 32], strides = [1, 1]} : vector<8x64xf32> to vector<8x32xf32>
    %564 = vector.extract_strided_slice %539 {offsets = [0, 32], sizes = [8, 32], strides = [1, 1]} : vector<8x64xf32> to vector<8x32xf32>
    %565 = tpu.concatenate %563, %564 in 1 : vector<8x32xf32>, vector<8x32xf32> -> vector<8x64xf32>
    %cst_185 = arith.constant dense<0.000000e+00> : vector<8x64xf32>
    %566 = tpu.matmul %565, %558, %cst_185 {dimension_numbers = #tpu.dot_dimension_numbers<[1], [0], [0], [1], [0, 0, 1, 1], [], []>} : vector<8x64xf32>, vector<64x64xf32>, vector<8x64xf32> -> vector<8x64xf32>
    %c0_186 = arith.constant 0 : index
    %c0_187 = arith.constant 0 : index
    %567 = vector.load %arg19[%c0_186, %c0_187] : memref<8x25xbf16, #tpu.memory_space<vmem>>, vector<8x25xbf16>
    %c0_188 = arith.constant 0 : index
    %c0_189 = arith.constant 0 : index
    %568 = vector.load %arg20[%c0_188, %c0_189] : memref<8x25xbf16, #tpu.memory_space<vmem>>, vector<8x25xbf16>
    %cst_190 = arith.constant 0.000000e+00 : f32
    %569 = vector.broadcast %cst_190 : f32 to vector<8x64xf32>
    %570 = arith.cmpf oge, %562, %569 : vector<8x64xf32>
    %cst_191 = arith.constant 1.000000e-01 : f32
    %571 = vector.broadcast %cst_191 : f32 to vector<8x64xf32>
    %572 = arith.mulf %571, %562 : vector<8x64xf32>
    %573 = arith.select %570, %562, %572 : vector<8x64xi1>, vector<8x64xf32>
    %cst_192 = arith.constant 0.000000e+00 : f32
    %574 = vector.broadcast %cst_192 : f32 to vector<8x1xf32>
    %575 = tpu.concatenate %574, %573, %574 in 1 : vector<8x1xf32>, vector<8x64xf32>, vector<8x1xf32> -> vector<8x66xf32>
    %576 = vector.extract_strided_slice %575 {offsets = [0, 0], sizes = [8, 64], strides = [1, 1]} : vector<8x66xf32> to vector<8x64xf32>
    %577 = vector.extract_strided_slice %575 {offsets = [0, 1], sizes = [8, 64], strides = [1, 1]} : vector<8x66xf32> to vector<8x64xf32>
    %578 = vector.extract_strided_slice %575 {offsets = [0, 2], sizes = [8, 64], strides = [1, 1]} : vector<8x66xf32> to vector<8x64xf32>
    %cst_193 = arith.constant 1.000000e+00 : f32
    %579 = vector.broadcast %cst_193 : f32 to vector<1x64xf32>
    %580 = tpu.concatenate %576, %577, %578, %579 in 0 : vector<8x64xf32>, vector<8x64xf32>, vector<8x64xf32>, vector<1x64xf32> -> vector<25x64xf32>
    %cst_194 = arith.constant 0.000000e+00 : f32
    %581 = vector.broadcast %cst_194 : f32 to vector<8x64xf32>
    %582 = arith.cmpf oge, %566, %581 : vector<8x64xf32>
    %cst_195 = arith.constant 1.000000e-01 : f32
    %583 = vector.broadcast %cst_195 : f32 to vector<8x64xf32>
    %584 = arith.mulf %583, %566 : vector<8x64xf32>
    %585 = arith.select %582, %566, %584 : vector<8x64xi1>, vector<8x64xf32>
    %cst_196 = arith.constant 0.000000e+00 : f32
    %586 = vector.broadcast %cst_196 : f32 to vector<8x1xf32>
    %587 = tpu.concatenate %586, %585, %586 in 1 : vector<8x1xf32>, vector<8x64xf32>, vector<8x1xf32> -> vector<8x66xf32>
    %588 = vector.extract_strided_slice %587 {offsets = [0, 0], sizes = [8, 64], strides = [1, 1]} : vector<8x66xf32> to vector<8x64xf32>
    %589 = vector.extract_strided_slice %587 {offsets = [0, 1], sizes = [8, 64], strides = [1, 1]} : vector<8x66xf32> to vector<8x64xf32>
    %590 = vector.extract_strided_slice %587 {offsets = [0, 2], sizes = [8, 64], strides = [1, 1]} : vector<8x66xf32> to vector<8x64xf32>
    %cst_197 = arith.constant 1.000000e+00 : f32
    %591 = vector.broadcast %cst_197 : f32 to vector<1x64xf32>
    %592 = tpu.concatenate %588, %589, %590, %591 in 0 : vector<8x64xf32>, vector<8x64xf32>, vector<8x64xf32>, vector<1x64xf32> -> vector<25x64xf32>
    %593 = tpu.concatenate %580, %592 in 1 : vector<25x64xf32>, vector<25x64xf32> -> vector<25x128xf32>
    %594 = arith.truncf %593 : vector<25x128xf32> to vector<25x128xbf16>
    %cst_198 = arith.constant dense<0.000000e+00> : vector<8x128xf32>
    %595 = tpu.matmul %567, %594, %cst_198 {dimension_numbers = #tpu.dot_dimension_numbers<[1], [0], [0], [1], [0, 0, 1, 1], [], []>} : vector<8x25xbf16>, vector<25x128xbf16>, vector<8x128xf32> -> vector<8x128xf32>
    %596 = vector.extract_strided_slice %595 {offsets = [0, 0], sizes = [8, 64], strides = [1, 1]} : vector<8x128xf32> to vector<8x64xf32>
    %597 = vector.extract_strided_slice %595 {offsets = [0, 64], sizes = [8, 64], strides = [1, 1]} : vector<8x128xf32> to vector<8x64xf32>
    %cst_199 = arith.constant 0.000000e+00 : f32
    %598 = vector.broadcast %cst_199 : f32 to vector<8x64xf32>
    %599 = arith.cmpf oge, %596, %598 : vector<8x64xf32>
    %cst_200 = arith.constant 1.000000e-01 : f32
    %600 = vector.broadcast %cst_200 : f32 to vector<8x64xf32>
    %601 = arith.mulf %600, %596 : vector<8x64xf32>
    %602 = arith.select %599, %596, %601 : vector<8x64xi1>, vector<8x64xf32>
    %cst_201 = arith.constant 0.000000e+00 : f32
    %603 = vector.broadcast %cst_201 : f32 to vector<8x1xf32>
    %604 = tpu.concatenate %603, %602, %603 in 1 : vector<8x1xf32>, vector<8x64xf32>, vector<8x1xf32> -> vector<8x66xf32>
    %605 = vector.extract_strided_slice %604 {offsets = [0, 0], sizes = [8, 64], strides = [1, 1]} : vector<8x66xf32> to vector<8x64xf32>
    %606 = vector.extract_strided_slice %604 {offsets = [0, 1], sizes = [8, 64], strides = [1, 1]} : vector<8x66xf32> to vector<8x64xf32>
    %607 = vector.extract_strided_slice %604 {offsets = [0, 2], sizes = [8, 64], strides = [1, 1]} : vector<8x66xf32> to vector<8x64xf32>
    %cst_202 = arith.constant 1.000000e+00 : f32
    %608 = vector.broadcast %cst_202 : f32 to vector<1x64xf32>
    %609 = tpu.concatenate %605, %606, %607, %608 in 0 : vector<8x64xf32>, vector<8x64xf32>, vector<8x64xf32>, vector<1x64xf32> -> vector<25x64xf32>
    %cst_203 = arith.constant 0.000000e+00 : f32
    %610 = vector.broadcast %cst_203 : f32 to vector<8x64xf32>
    %611 = arith.cmpf oge, %597, %610 : vector<8x64xf32>
    %cst_204 = arith.constant 1.000000e-01 : f32
    %612 = vector.broadcast %cst_204 : f32 to vector<8x64xf32>
    %613 = arith.mulf %612, %597 : vector<8x64xf32>
    %614 = arith.select %611, %597, %613 : vector<8x64xi1>, vector<8x64xf32>
    %cst_205 = arith.constant 0.000000e+00 : f32
    %615 = vector.broadcast %cst_205 : f32 to vector<8x1xf32>
    %616 = tpu.concatenate %615, %614, %615 in 1 : vector<8x1xf32>, vector<8x64xf32>, vector<8x1xf32> -> vector<8x66xf32>
    %617 = vector.extract_strided_slice %616 {offsets = [0, 0], sizes = [8, 64], strides = [1, 1]} : vector<8x66xf32> to vector<8x64xf32>
    %618 = vector.extract_strided_slice %616 {offsets = [0, 1], sizes = [8, 64], strides = [1, 1]} : vector<8x66xf32> to vector<8x64xf32>
    %619 = vector.extract_strided_slice %616 {offsets = [0, 2], sizes = [8, 64], strides = [1, 1]} : vector<8x66xf32> to vector<8x64xf32>
    %cst_206 = arith.constant 1.000000e+00 : f32
    %620 = vector.broadcast %cst_206 : f32 to vector<1x64xf32>
    %621 = tpu.concatenate %617, %618, %619, %620 in 0 : vector<8x64xf32>, vector<8x64xf32>, vector<8x64xf32>, vector<1x64xf32> -> vector<25x64xf32>
    %622 = tpu.concatenate %609, %621 in 1 : vector<25x64xf32>, vector<25x64xf32> -> vector<25x128xf32>
    %623 = arith.truncf %622 : vector<25x128xf32> to vector<25x128xbf16>
    %cst_207 = arith.constant dense<0.000000e+00> : vector<8x128xf32>
    %624 = tpu.matmul %568, %623, %cst_207 {dimension_numbers = #tpu.dot_dimension_numbers<[1], [0], [0], [1], [0, 0, 1, 1], [], []>} : vector<8x25xbf16>, vector<25x128xbf16>, vector<8x128xf32> -> vector<8x128xf32>
    %625 = vector.extract_strided_slice %624 {offsets = [0, 0], sizes = [8, 64], strides = [1, 1]} : vector<8x128xf32> to vector<8x64xf32>
    %626 = vector.extract_strided_slice %624 {offsets = [0, 64], sizes = [8, 64], strides = [1, 1]} : vector<8x128xf32> to vector<8x64xf32>
    %627 = arith.addf %625, %562 : vector<8x64xf32>
    %628 = arith.addf %626, %566 : vector<8x64xf32>
    %c0_208 = arith.constant 0 : index
    %c0_209 = arith.constant 0 : index
    %629 = vector.load %arg21[%c0_208, %c0_209] : memref<8x25xbf16, #tpu.memory_space<vmem>>, vector<8x25xbf16>
    %c0_210 = arith.constant 0 : index
    %c0_211 = arith.constant 0 : index
    %630 = vector.load %arg22[%c0_210, %c0_211] : memref<8x25xbf16, #tpu.memory_space<vmem>>, vector<8x25xbf16>
    %cst_212 = arith.constant 0.000000e+00 : f32
    %631 = vector.broadcast %cst_212 : f32 to vector<8x64xf32>
    %632 = arith.cmpf oge, %627, %631 : vector<8x64xf32>
    %cst_213 = arith.constant 1.000000e-01 : f32
    %633 = vector.broadcast %cst_213 : f32 to vector<8x64xf32>
    %634 = arith.mulf %633, %627 : vector<8x64xf32>
    %635 = arith.select %632, %627, %634 : vector<8x64xi1>, vector<8x64xf32>
    %cst_214 = arith.constant 0.000000e+00 : f32
    %636 = vector.broadcast %cst_214 : f32 to vector<8x3xf32>
    %637 = tpu.concatenate %636, %635, %636 in 1 : vector<8x3xf32>, vector<8x64xf32>, vector<8x3xf32> -> vector<8x70xf32>
    %638 = vector.extract_strided_slice %637 {offsets = [0, 0], sizes = [8, 64], strides = [1, 1]} : vector<8x70xf32> to vector<8x64xf32>
    %639 = vector.extract_strided_slice %637 {offsets = [0, 3], sizes = [8, 64], strides = [1, 1]} : vector<8x70xf32> to vector<8x64xf32>
    %640 = vector.extract_strided_slice %637 {offsets = [0, 6], sizes = [8, 64], strides = [1, 1]} : vector<8x70xf32> to vector<8x64xf32>
    %cst_215 = arith.constant 1.000000e+00 : f32
    %641 = vector.broadcast %cst_215 : f32 to vector<1x64xf32>
    %642 = tpu.concatenate %638, %639, %640, %641 in 0 : vector<8x64xf32>, vector<8x64xf32>, vector<8x64xf32>, vector<1x64xf32> -> vector<25x64xf32>
    %cst_216 = arith.constant 0.000000e+00 : f32
    %643 = vector.broadcast %cst_216 : f32 to vector<8x64xf32>
    %644 = arith.cmpf oge, %628, %643 : vector<8x64xf32>
    %cst_217 = arith.constant 1.000000e-01 : f32
    %645 = vector.broadcast %cst_217 : f32 to vector<8x64xf32>
    %646 = arith.mulf %645, %628 : vector<8x64xf32>
    %647 = arith.select %644, %628, %646 : vector<8x64xi1>, vector<8x64xf32>
    %cst_218 = arith.constant 0.000000e+00 : f32
    %648 = vector.broadcast %cst_218 : f32 to vector<8x3xf32>
    %649 = tpu.concatenate %648, %647, %648 in 1 : vector<8x3xf32>, vector<8x64xf32>, vector<8x3xf32> -> vector<8x70xf32>
    %650 = vector.extract_strided_slice %649 {offsets = [0, 0], sizes = [8, 64], strides = [1, 1]} : vector<8x70xf32> to vector<8x64xf32>
    %651 = vector.extract_strided_slice %649 {offsets = [0, 3], sizes = [8, 64], strides = [1, 1]} : vector<8x70xf32> to vector<8x64xf32>
    %652 = vector.extract_strided_slice %649 {offsets = [0, 6], sizes = [8, 64], strides = [1, 1]} : vector<8x70xf32> to vector<8x64xf32>
    %cst_219 = arith.constant 1.000000e+00 : f32
    %653 = vector.broadcast %cst_219 : f32 to vector<1x64xf32>
    %654 = tpu.concatenate %650, %651, %652, %653 in 0 : vector<8x64xf32>, vector<8x64xf32>, vector<8x64xf32>, vector<1x64xf32> -> vector<25x64xf32>
    %655 = tpu.concatenate %642, %654 in 1 : vector<25x64xf32>, vector<25x64xf32> -> vector<25x128xf32>
    %656 = arith.truncf %655 : vector<25x128xf32> to vector<25x128xbf16>
    %cst_220 = arith.constant dense<0.000000e+00> : vector<8x128xf32>
    %657 = tpu.matmul %629, %656, %cst_220 {dimension_numbers = #tpu.dot_dimension_numbers<[1], [0], [0], [1], [0, 0, 1, 1], [], []>} : vector<8x25xbf16>, vector<25x128xbf16>, vector<8x128xf32> -> vector<8x128xf32>
    %658 = vector.extract_strided_slice %657 {offsets = [0, 0], sizes = [8, 64], strides = [1, 1]} : vector<8x128xf32> to vector<8x64xf32>
    %659 = vector.extract_strided_slice %657 {offsets = [0, 64], sizes = [8, 64], strides = [1, 1]} : vector<8x128xf32> to vector<8x64xf32>
    %cst_221 = arith.constant 0.000000e+00 : f32
    %660 = vector.broadcast %cst_221 : f32 to vector<8x64xf32>
    %661 = arith.cmpf oge, %658, %660 : vector<8x64xf32>
    %cst_222 = arith.constant 1.000000e-01 : f32
    %662 = vector.broadcast %cst_222 : f32 to vector<8x64xf32>
    %663 = arith.mulf %662, %658 : vector<8x64xf32>
    %664 = arith.select %661, %658, %663 : vector<8x64xi1>, vector<8x64xf32>
    %cst_223 = arith.constant 0.000000e+00 : f32
    %665 = vector.broadcast %cst_223 : f32 to vector<8x1xf32>
    %666 = tpu.concatenate %665, %664, %665 in 1 : vector<8x1xf32>, vector<8x64xf32>, vector<8x1xf32> -> vector<8x66xf32>
    %667 = vector.extract_strided_slice %666 {offsets = [0, 0], sizes = [8, 64], strides = [1, 1]} : vector<8x66xf32> to vector<8x64xf32>
    %668 = vector.extract_strided_slice %666 {offsets = [0, 1], sizes = [8, 64], strides = [1, 1]} : vector<8x66xf32> to vector<8x64xf32>
    %669 = vector.extract_strided_slice %666 {offsets = [0, 2], sizes = [8, 64], strides = [1, 1]} : vector<8x66xf32> to vector<8x64xf32>
    %cst_224 = arith.constant 1.000000e+00 : f32
    %670 = vector.broadcast %cst_224 : f32 to vector<1x64xf32>
    %671 = tpu.concatenate %667, %668, %669, %670 in 0 : vector<8x64xf32>, vector<8x64xf32>, vector<8x64xf32>, vector<1x64xf32> -> vector<25x64xf32>
    %cst_225 = arith.constant 0.000000e+00 : f32
    %672 = vector.broadcast %cst_225 : f32 to vector<8x64xf32>
    %673 = arith.cmpf oge, %659, %672 : vector<8x64xf32>
    %cst_226 = arith.constant 1.000000e-01 : f32
    %674 = vector.broadcast %cst_226 : f32 to vector<8x64xf32>
    %675 = arith.mulf %674, %659 : vector<8x64xf32>
    %676 = arith.select %673, %659, %675 : vector<8x64xi1>, vector<8x64xf32>
    %cst_227 = arith.constant 0.000000e+00 : f32
    %677 = vector.broadcast %cst_227 : f32 to vector<8x1xf32>
    %678 = tpu.concatenate %677, %676, %677 in 1 : vector<8x1xf32>, vector<8x64xf32>, vector<8x1xf32> -> vector<8x66xf32>
    %679 = vector.extract_strided_slice %678 {offsets = [0, 0], sizes = [8, 64], strides = [1, 1]} : vector<8x66xf32> to vector<8x64xf32>
    %680 = vector.extract_strided_slice %678 {offsets = [0, 1], sizes = [8, 64], strides = [1, 1]} : vector<8x66xf32> to vector<8x64xf32>
    %681 = vector.extract_strided_slice %678 {offsets = [0, 2], sizes = [8, 64], strides = [1, 1]} : vector<8x66xf32> to vector<8x64xf32>
    %cst_228 = arith.constant 1.000000e+00 : f32
    %682 = vector.broadcast %cst_228 : f32 to vector<1x64xf32>
    %683 = tpu.concatenate %679, %680, %681, %682 in 0 : vector<8x64xf32>, vector<8x64xf32>, vector<8x64xf32>, vector<1x64xf32> -> vector<25x64xf32>
    %684 = tpu.concatenate %671, %683 in 1 : vector<25x64xf32>, vector<25x64xf32> -> vector<25x128xf32>
    %685 = arith.truncf %684 : vector<25x128xf32> to vector<25x128xbf16>
    %cst_229 = arith.constant dense<0.000000e+00> : vector<8x128xf32>
    %686 = tpu.matmul %630, %685, %cst_229 {dimension_numbers = #tpu.dot_dimension_numbers<[1], [0], [0], [1], [0, 0, 1, 1], [], []>} : vector<8x25xbf16>, vector<25x128xbf16>, vector<8x128xf32> -> vector<8x128xf32>
    %687 = vector.extract_strided_slice %686 {offsets = [0, 0], sizes = [8, 64], strides = [1, 1]} : vector<8x128xf32> to vector<8x64xf32>
    %688 = vector.extract_strided_slice %686 {offsets = [0, 64], sizes = [8, 64], strides = [1, 1]} : vector<8x128xf32> to vector<8x64xf32>
    %689 = arith.addf %687, %627 : vector<8x64xf32>
    %690 = arith.addf %688, %628 : vector<8x64xf32>
    %c0_230 = arith.constant 0 : index
    %c0_231 = arith.constant 0 : index
    %691 = vector.load %arg23[%c0_230, %c0_231] : memref<8x25xbf16, #tpu.memory_space<vmem>>, vector<8x25xbf16>
    %c0_232 = arith.constant 0 : index
    %c0_233 = arith.constant 0 : index
    %692 = vector.load %arg24[%c0_232, %c0_233] : memref<8x25xbf16, #tpu.memory_space<vmem>>, vector<8x25xbf16>
    %cst_234 = arith.constant 0.000000e+00 : f32
    %693 = vector.broadcast %cst_234 : f32 to vector<8x64xf32>
    %694 = arith.cmpf oge, %689, %693 : vector<8x64xf32>
    %cst_235 = arith.constant 1.000000e-01 : f32
    %695 = vector.broadcast %cst_235 : f32 to vector<8x64xf32>
    %696 = arith.mulf %695, %689 : vector<8x64xf32>
    %697 = arith.select %694, %689, %696 : vector<8x64xi1>, vector<8x64xf32>
    %cst_236 = arith.constant 0.000000e+00 : f32
    %698 = vector.broadcast %cst_236 : f32 to vector<8x5xf32>
    %699 = tpu.concatenate %698, %697, %698 in 1 : vector<8x5xf32>, vector<8x64xf32>, vector<8x5xf32> -> vector<8x74xf32>
    %700 = vector.extract_strided_slice %699 {offsets = [0, 0], sizes = [8, 64], strides = [1, 1]} : vector<8x74xf32> to vector<8x64xf32>
    %701 = vector.extract_strided_slice %699 {offsets = [0, 5], sizes = [8, 64], strides = [1, 1]} : vector<8x74xf32> to vector<8x64xf32>
    %702 = vector.extract_strided_slice %699 {offsets = [0, 10], sizes = [8, 64], strides = [1, 1]} : vector<8x74xf32> to vector<8x64xf32>
    %cst_237 = arith.constant 1.000000e+00 : f32
    %703 = vector.broadcast %cst_237 : f32 to vector<1x64xf32>
    %704 = tpu.concatenate %700, %701, %702, %703 in 0 : vector<8x64xf32>, vector<8x64xf32>, vector<8x64xf32>, vector<1x64xf32> -> vector<25x64xf32>
    %cst_238 = arith.constant 0.000000e+00 : f32
    %705 = vector.broadcast %cst_238 : f32 to vector<8x64xf32>
    %706 = arith.cmpf oge, %690, %705 : vector<8x64xf32>
    %cst_239 = arith.constant 1.000000e-01 : f32
    %707 = vector.broadcast %cst_239 : f32 to vector<8x64xf32>
    %708 = arith.mulf %707, %690 : vector<8x64xf32>
    %709 = arith.select %706, %690, %708 : vector<8x64xi1>, vector<8x64xf32>
    %cst_240 = arith.constant 0.000000e+00 : f32
    %710 = vector.broadcast %cst_240 : f32 to vector<8x5xf32>
    %711 = tpu.concatenate %710, %709, %710 in 1 : vector<8x5xf32>, vector<8x64xf32>, vector<8x5xf32> -> vector<8x74xf32>
    %712 = vector.extract_strided_slice %711 {offsets = [0, 0], sizes = [8, 64], strides = [1, 1]} : vector<8x74xf32> to vector<8x64xf32>
    %713 = vector.extract_strided_slice %711 {offsets = [0, 5], sizes = [8, 64], strides = [1, 1]} : vector<8x74xf32> to vector<8x64xf32>
    %714 = vector.extract_strided_slice %711 {offsets = [0, 10], sizes = [8, 64], strides = [1, 1]} : vector<8x74xf32> to vector<8x64xf32>
    %cst_241 = arith.constant 1.000000e+00 : f32
    %715 = vector.broadcast %cst_241 : f32 to vector<1x64xf32>
    %716 = tpu.concatenate %712, %713, %714, %715 in 0 : vector<8x64xf32>, vector<8x64xf32>, vector<8x64xf32>, vector<1x64xf32> -> vector<25x64xf32>
    %717 = tpu.concatenate %704, %716 in 1 : vector<25x64xf32>, vector<25x64xf32> -> vector<25x128xf32>
    %718 = arith.truncf %717 : vector<25x128xf32> to vector<25x128xbf16>
    %cst_242 = arith.constant dense<0.000000e+00> : vector<8x128xf32>
    %719 = tpu.matmul %691, %718, %cst_242 {dimension_numbers = #tpu.dot_dimension_numbers<[1], [0], [0], [1], [0, 0, 1, 1], [], []>} : vector<8x25xbf16>, vector<25x128xbf16>, vector<8x128xf32> -> vector<8x128xf32>
    %720 = vector.extract_strided_slice %719 {offsets = [0, 0], sizes = [8, 64], strides = [1, 1]} : vector<8x128xf32> to vector<8x64xf32>
    %721 = vector.extract_strided_slice %719 {offsets = [0, 64], sizes = [8, 64], strides = [1, 1]} : vector<8x128xf32> to vector<8x64xf32>
    %cst_243 = arith.constant 0.000000e+00 : f32
    %722 = vector.broadcast %cst_243 : f32 to vector<8x64xf32>
    %723 = arith.cmpf oge, %720, %722 : vector<8x64xf32>
    %cst_244 = arith.constant 1.000000e-01 : f32
    %724 = vector.broadcast %cst_244 : f32 to vector<8x64xf32>
    %725 = arith.mulf %724, %720 : vector<8x64xf32>
    %726 = arith.select %723, %720, %725 : vector<8x64xi1>, vector<8x64xf32>
    %cst_245 = arith.constant 0.000000e+00 : f32
    %727 = vector.broadcast %cst_245 : f32 to vector<8x1xf32>
    %728 = tpu.concatenate %727, %726, %727 in 1 : vector<8x1xf32>, vector<8x64xf32>, vector<8x1xf32> -> vector<8x66xf32>
    %729 = vector.extract_strided_slice %728 {offsets = [0, 0], sizes = [8, 64], strides = [1, 1]} : vector<8x66xf32> to vector<8x64xf32>
    %730 = vector.extract_strided_slice %728 {offsets = [0, 1], sizes = [8, 64], strides = [1, 1]} : vector<8x66xf32> to vector<8x64xf32>
    %731 = vector.extract_strided_slice %728 {offsets = [0, 2], sizes = [8, 64], strides = [1, 1]} : vector<8x66xf32> to vector<8x64xf32>
    %cst_246 = arith.constant 1.000000e+00 : f32
    %732 = vector.broadcast %cst_246 : f32 to vector<1x64xf32>
    %733 = tpu.concatenate %729, %730, %731, %732 in 0 : vector<8x64xf32>, vector<8x64xf32>, vector<8x64xf32>, vector<1x64xf32> -> vector<25x64xf32>
    %cst_247 = arith.constant 0.000000e+00 : f32
    %734 = vector.broadcast %cst_247 : f32 to vector<8x64xf32>
    %735 = arith.cmpf oge, %721, %734 : vector<8x64xf32>
    %cst_248 = arith.constant 1.000000e-01 : f32
    %736 = vector.broadcast %cst_248 : f32 to vector<8x64xf32>
    %737 = arith.mulf %736, %721 : vector<8x64xf32>
    %738 = arith.select %735, %721, %737 : vector<8x64xi1>, vector<8x64xf32>
    %cst_249 = arith.constant 0.000000e+00 : f32
    %739 = vector.broadcast %cst_249 : f32 to vector<8x1xf32>
    %740 = tpu.concatenate %739, %738, %739 in 1 : vector<8x1xf32>, vector<8x64xf32>, vector<8x1xf32> -> vector<8x66xf32>
    %741 = vector.extract_strided_slice %740 {offsets = [0, 0], sizes = [8, 64], strides = [1, 1]} : vector<8x66xf32> to vector<8x64xf32>
    %742 = vector.extract_strided_slice %740 {offsets = [0, 1], sizes = [8, 64], strides = [1, 1]} : vector<8x66xf32> to vector<8x64xf32>
    %743 = vector.extract_strided_slice %740 {offsets = [0, 2], sizes = [8, 64], strides = [1, 1]} : vector<8x66xf32> to vector<8x64xf32>
    %cst_250 = arith.constant 1.000000e+00 : f32
    %744 = vector.broadcast %cst_250 : f32 to vector<1x64xf32>
    %745 = tpu.concatenate %741, %742, %743, %744 in 0 : vector<8x64xf32>, vector<8x64xf32>, vector<8x64xf32>, vector<1x64xf32> -> vector<25x64xf32>
    %746 = tpu.concatenate %733, %745 in 1 : vector<25x64xf32>, vector<25x64xf32> -> vector<25x128xf32>
    %747 = arith.truncf %746 : vector<25x128xf32> to vector<25x128xbf16>
    %cst_251 = arith.constant dense<0.000000e+00> : vector<8x128xf32>
    %748 = tpu.matmul %692, %747, %cst_251 {dimension_numbers = #tpu.dot_dimension_numbers<[1], [0], [0], [1], [0, 0, 1, 1], [], []>} : vector<8x25xbf16>, vector<25x128xbf16>, vector<8x128xf32> -> vector<8x128xf32>
    %749 = vector.extract_strided_slice %748 {offsets = [0, 0], sizes = [8, 64], strides = [1, 1]} : vector<8x128xf32> to vector<8x64xf32>
    %750 = vector.extract_strided_slice %748 {offsets = [0, 64], sizes = [8, 64], strides = [1, 1]} : vector<8x128xf32> to vector<8x64xf32>
    %751 = arith.addf %749, %689 : vector<8x64xf32>
    %752 = arith.addf %750, %690 : vector<8x64xf32>
    %c0_252 = arith.constant 0 : index
    %c0_253 = arith.constant 0 : index
    %753 = vector.load %arg25[%c0_252, %c0_253] : memref<8x41xbf16, #tpu.memory_space<vmem>>, vector<8x41xbf16>
    %c0_254 = arith.constant 0 : index
    %c0_255 = arith.constant 0 : index
    %754 = vector.load %arg26[%c0_254, %c0_255] : memref<8x41xbf16, #tpu.memory_space<vmem>>, vector<8x41xbf16>
    %cst_256 = arith.constant 0.000000e+00 : f32
    %755 = vector.broadcast %cst_256 : f32 to vector<8x64xf32>
    %756 = arith.cmpf oge, %562, %755 : vector<8x64xf32>
    %cst_257 = arith.constant 1.000000e-01 : f32
    %757 = vector.broadcast %cst_257 : f32 to vector<8x64xf32>
    %758 = arith.mulf %757, %562 : vector<8x64xf32>
    %759 = arith.select %756, %562, %758 : vector<8x64xi1>, vector<8x64xf32>
    %cst_258 = arith.constant 0.000000e+00 : f32
    %760 = vector.broadcast %cst_258 : f32 to vector<8x2xf32>
    %761 = tpu.concatenate %760, %759, %760 in 1 : vector<8x2xf32>, vector<8x64xf32>, vector<8x2xf32> -> vector<8x68xf32>
    %762 = vector.extract_strided_slice %761 {offsets = [0, 0], sizes = [8, 64], strides = [1, 1]} : vector<8x68xf32> to vector<8x64xf32>
    %763 = vector.extract_strided_slice %761 {offsets = [0, 1], sizes = [8, 64], strides = [1, 1]} : vector<8x68xf32> to vector<8x64xf32>
    %764 = vector.extract_strided_slice %761 {offsets = [0, 2], sizes = [8, 64], strides = [1, 1]} : vector<8x68xf32> to vector<8x64xf32>
    %765 = vector.extract_strided_slice %761 {offsets = [0, 3], sizes = [8, 64], strides = [1, 1]} : vector<8x68xf32> to vector<8x64xf32>
    %766 = vector.extract_strided_slice %761 {offsets = [0, 4], sizes = [8, 64], strides = [1, 1]} : vector<8x68xf32> to vector<8x64xf32>
    %cst_259 = arith.constant 1.000000e+00 : f32
    %767 = vector.broadcast %cst_259 : f32 to vector<1x64xf32>
    %768 = tpu.concatenate %762, %763, %764, %765, %766, %767 in 0 : vector<8x64xf32>, vector<8x64xf32>, vector<8x64xf32>, vector<8x64xf32>, vector<8x64xf32>, vector<1x64xf32> -> vector<41x64xf32>
    %cst_260 = arith.constant 0.000000e+00 : f32
    %769 = vector.broadcast %cst_260 : f32 to vector<8x64xf32>
    %770 = arith.cmpf oge, %566, %769 : vector<8x64xf32>
    %cst_261 = arith.constant 1.000000e-01 : f32
    %771 = vector.broadcast %cst_261 : f32 to vector<8x64xf32>
    %772 = arith.mulf %771, %566 : vector<8x64xf32>
    %773 = arith.select %770, %566, %772 : vector<8x64xi1>, vector<8x64xf32>
    %cst_262 = arith.constant 0.000000e+00 : f32
    %774 = vector.broadcast %cst_262 : f32 to vector<8x2xf32>
    %775 = tpu.concatenate %774, %773, %774 in 1 : vector<8x2xf32>, vector<8x64xf32>, vector<8x2xf32> -> vector<8x68xf32>
    %776 = vector.extract_strided_slice %775 {offsets = [0, 0], sizes = [8, 64], strides = [1, 1]} : vector<8x68xf32> to vector<8x64xf32>
    %777 = vector.extract_strided_slice %775 {offsets = [0, 1], sizes = [8, 64], strides = [1, 1]} : vector<8x68xf32> to vector<8x64xf32>
    %778 = vector.extract_strided_slice %775 {offsets = [0, 2], sizes = [8, 64], strides = [1, 1]} : vector<8x68xf32> to vector<8x64xf32>
    %779 = vector.extract_strided_slice %775 {offsets = [0, 3], sizes = [8, 64], strides = [1, 1]} : vector<8x68xf32> to vector<8x64xf32>
    %780 = vector.extract_strided_slice %775 {offsets = [0, 4], sizes = [8, 64], strides = [1, 1]} : vector<8x68xf32> to vector<8x64xf32>
    %cst_263 = arith.constant 1.000000e+00 : f32
    %781 = vector.broadcast %cst_263 : f32 to vector<1x64xf32>
    %782 = tpu.concatenate %776, %777, %778, %779, %780, %781 in 0 : vector<8x64xf32>, vector<8x64xf32>, vector<8x64xf32>, vector<8x64xf32>, vector<8x64xf32>, vector<1x64xf32> -> vector<41x64xf32>
    %783 = tpu.concatenate %768, %782 in 1 : vector<41x64xf32>, vector<41x64xf32> -> vector<41x128xf32>
    %784 = arith.truncf %783 : vector<41x128xf32> to vector<41x128xbf16>
    %cst_264 = arith.constant dense<0.000000e+00> : vector<8x128xf32>
    %785 = tpu.matmul %753, %784, %cst_264 {dimension_numbers = #tpu.dot_dimension_numbers<[1], [0], [0], [1], [0, 0, 1, 1], [], []>} : vector<8x41xbf16>, vector<41x128xbf16>, vector<8x128xf32> -> vector<8x128xf32>
    %786 = vector.extract_strided_slice %785 {offsets = [0, 0], sizes = [8, 64], strides = [1, 1]} : vector<8x128xf32> to vector<8x64xf32>
    %787 = vector.extract_strided_slice %785 {offsets = [0, 64], sizes = [8, 64], strides = [1, 1]} : vector<8x128xf32> to vector<8x64xf32>
    %cst_265 = arith.constant 0.000000e+00 : f32
    %788 = vector.broadcast %cst_265 : f32 to vector<8x64xf32>
    %789 = arith.cmpf oge, %786, %788 : vector<8x64xf32>
    %cst_266 = arith.constant 1.000000e-01 : f32
    %790 = vector.broadcast %cst_266 : f32 to vector<8x64xf32>
    %791 = arith.mulf %790, %786 : vector<8x64xf32>
    %792 = arith.select %789, %786, %791 : vector<8x64xi1>, vector<8x64xf32>
    %cst_267 = arith.constant 0.000000e+00 : f32
    %793 = vector.broadcast %cst_267 : f32 to vector<8x2xf32>
    %794 = tpu.concatenate %793, %792, %793 in 1 : vector<8x2xf32>, vector<8x64xf32>, vector<8x2xf32> -> vector<8x68xf32>
    %795 = vector.extract_strided_slice %794 {offsets = [0, 0], sizes = [8, 64], strides = [1, 1]} : vector<8x68xf32> to vector<8x64xf32>
    %796 = vector.extract_strided_slice %794 {offsets = [0, 1], sizes = [8, 64], strides = [1, 1]} : vector<8x68xf32> to vector<8x64xf32>
    %797 = vector.extract_strided_slice %794 {offsets = [0, 2], sizes = [8, 64], strides = [1, 1]} : vector<8x68xf32> to vector<8x64xf32>
    %798 = vector.extract_strided_slice %794 {offsets = [0, 3], sizes = [8, 64], strides = [1, 1]} : vector<8x68xf32> to vector<8x64xf32>
    %799 = vector.extract_strided_slice %794 {offsets = [0, 4], sizes = [8, 64], strides = [1, 1]} : vector<8x68xf32> to vector<8x64xf32>
    %cst_268 = arith.constant 1.000000e+00 : f32
    %800 = vector.broadcast %cst_268 : f32 to vector<1x64xf32>
    %801 = tpu.concatenate %795, %796, %797, %798, %799, %800 in 0 : vector<8x64xf32>, vector<8x64xf32>, vector<8x64xf32>, vector<8x64xf32>, vector<8x64xf32>, vector<1x64xf32> -> vector<41x64xf32>
    %cst_269 = arith.constant 0.000000e+00 : f32
    %802 = vector.broadcast %cst_269 : f32 to vector<8x64xf32>
    %803 = arith.cmpf oge, %787, %802 : vector<8x64xf32>
    %cst_270 = arith.constant 1.000000e-01 : f32
    %804 = vector.broadcast %cst_270 : f32 to vector<8x64xf32>
    %805 = arith.mulf %804, %787 : vector<8x64xf32>
    %806 = arith.select %803, %787, %805 : vector<8x64xi1>, vector<8x64xf32>
    %cst_271 = arith.constant 0.000000e+00 : f32
    %807 = vector.broadcast %cst_271 : f32 to vector<8x2xf32>
    %808 = tpu.concatenate %807, %806, %807 in 1 : vector<8x2xf32>, vector<8x64xf32>, vector<8x2xf32> -> vector<8x68xf32>
    %809 = vector.extract_strided_slice %808 {offsets = [0, 0], sizes = [8, 64], strides = [1, 1]} : vector<8x68xf32> to vector<8x64xf32>
    %810 = vector.extract_strided_slice %808 {offsets = [0, 1], sizes = [8, 64], strides = [1, 1]} : vector<8x68xf32> to vector<8x64xf32>
    %811 = vector.extract_strided_slice %808 {offsets = [0, 2], sizes = [8, 64], strides = [1, 1]} : vector<8x68xf32> to vector<8x64xf32>
    %812 = vector.extract_strided_slice %808 {offsets = [0, 3], sizes = [8, 64], strides = [1, 1]} : vector<8x68xf32> to vector<8x64xf32>
    %813 = vector.extract_strided_slice %808 {offsets = [0, 4], sizes = [8, 64], strides = [1, 1]} : vector<8x68xf32> to vector<8x64xf32>
    %cst_272 = arith.constant 1.000000e+00 : f32
    %814 = vector.broadcast %cst_272 : f32 to vector<1x64xf32>
    %815 = tpu.concatenate %809, %810, %811, %812, %813, %814 in 0 : vector<8x64xf32>, vector<8x64xf32>, vector<8x64xf32>, vector<8x64xf32>, vector<8x64xf32>, vector<1x64xf32> -> vector<41x64xf32>
    %816 = tpu.concatenate %801, %815 in 1 : vector<41x64xf32>, vector<41x64xf32> -> vector<41x128xf32>
    %817 = arith.truncf %816 : vector<41x128xf32> to vector<41x128xbf16>
    %cst_273 = arith.constant dense<0.000000e+00> : vector<8x128xf32>
    %818 = tpu.matmul %754, %817, %cst_273 {dimension_numbers = #tpu.dot_dimension_numbers<[1], [0], [0], [1], [0, 0, 1, 1], [], []>} : vector<8x41xbf16>, vector<41x128xbf16>, vector<8x128xf32> -> vector<8x128xf32>
    %819 = vector.extract_strided_slice %818 {offsets = [0, 0], sizes = [8, 64], strides = [1, 1]} : vector<8x128xf32> to vector<8x64xf32>
    %820 = vector.extract_strided_slice %818 {offsets = [0, 64], sizes = [8, 64], strides = [1, 1]} : vector<8x128xf32> to vector<8x64xf32>
    %821 = arith.addf %819, %562 : vector<8x64xf32>
    %822 = arith.addf %820, %566 : vector<8x64xf32>
    %c0_274 = arith.constant 0 : index
    %c0_275 = arith.constant 0 : index
    %823 = vector.load %arg27[%c0_274, %c0_275] : memref<8x41xbf16, #tpu.memory_space<vmem>>, vector<8x41xbf16>
    %c0_276 = arith.constant 0 : index
    %c0_277 = arith.constant 0 : index
    %824 = vector.load %arg28[%c0_276, %c0_277] : memref<8x41xbf16, #tpu.memory_space<vmem>>, vector<8x41xbf16>
    %cst_278 = arith.constant 0.000000e+00 : f32
    %825 = vector.broadcast %cst_278 : f32 to vector<8x64xf32>
    %826 = arith.cmpf oge, %821, %825 : vector<8x64xf32>
    %cst_279 = arith.constant 1.000000e-01 : f32
    %827 = vector.broadcast %cst_279 : f32 to vector<8x64xf32>
    %828 = arith.mulf %827, %821 : vector<8x64xf32>
    %829 = arith.select %826, %821, %828 : vector<8x64xi1>, vector<8x64xf32>
    %cst_280 = arith.constant 0.000000e+00 : f32
    %830 = vector.broadcast %cst_280 : f32 to vector<8x6xf32>
    %831 = tpu.concatenate %830, %829, %830 in 1 : vector<8x6xf32>, vector<8x64xf32>, vector<8x6xf32> -> vector<8x76xf32>
    %832 = vector.extract_strided_slice %831 {offsets = [0, 0], sizes = [8, 64], strides = [1, 1]} : vector<8x76xf32> to vector<8x64xf32>
    %833 = vector.extract_strided_slice %831 {offsets = [0, 3], sizes = [8, 64], strides = [1, 1]} : vector<8x76xf32> to vector<8x64xf32>
    %834 = vector.extract_strided_slice %831 {offsets = [0, 6], sizes = [8, 64], strides = [1, 1]} : vector<8x76xf32> to vector<8x64xf32>
    %835 = vector.extract_strided_slice %831 {offsets = [0, 9], sizes = [8, 64], strides = [1, 1]} : vector<8x76xf32> to vector<8x64xf32>
    %836 = vector.extract_strided_slice %831 {offsets = [0, 12], sizes = [8, 64], strides = [1, 1]} : vector<8x76xf32> to vector<8x64xf32>
    %cst_281 = arith.constant 1.000000e+00 : f32
    %837 = vector.broadcast %cst_281 : f32 to vector<1x64xf32>
    %838 = tpu.concatenate %832, %833, %834, %835, %836, %837 in 0 : vector<8x64xf32>, vector<8x64xf32>, vector<8x64xf32>, vector<8x64xf32>, vector<8x64xf32>, vector<1x64xf32> -> vector<41x64xf32>
    %cst_282 = arith.constant 0.000000e+00 : f32
    %839 = vector.broadcast %cst_282 : f32 to vector<8x64xf32>
    %840 = arith.cmpf oge, %822, %839 : vector<8x64xf32>
    %cst_283 = arith.constant 1.000000e-01 : f32
    %841 = vector.broadcast %cst_283 : f32 to vector<8x64xf32>
    %842 = arith.mulf %841, %822 : vector<8x64xf32>
    %843 = arith.select %840, %822, %842 : vector<8x64xi1>, vector<8x64xf32>
    %cst_284 = arith.constant 0.000000e+00 : f32
    %844 = vector.broadcast %cst_284 : f32 to vector<8x6xf32>
    %845 = tpu.concatenate %844, %843, %844 in 1 : vector<8x6xf32>, vector<8x64xf32>, vector<8x6xf32> -> vector<8x76xf32>
    %846 = vector.extract_strided_slice %845 {offsets = [0, 0], sizes = [8, 64], strides = [1, 1]} : vector<8x76xf32> to vector<8x64xf32>
    %847 = vector.extract_strided_slice %845 {offsets = [0, 3], sizes = [8, 64], strides = [1, 1]} : vector<8x76xf32> to vector<8x64xf32>
    %848 = vector.extract_strided_slice %845 {offsets = [0, 6], sizes = [8, 64], strides = [1, 1]} : vector<8x76xf32> to vector<8x64xf32>
    %849 = vector.extract_strided_slice %845 {offsets = [0, 9], sizes = [8, 64], strides = [1, 1]} : vector<8x76xf32> to vector<8x64xf32>
    %850 = vector.extract_strided_slice %845 {offsets = [0, 12], sizes = [8, 64], strides = [1, 1]} : vector<8x76xf32> to vector<8x64xf32>
    %cst_285 = arith.constant 1.000000e+00 : f32
    %851 = vector.broadcast %cst_285 : f32 to vector<1x64xf32>
    %852 = tpu.concatenate %846, %847, %848, %849, %850, %851 in 0 : vector<8x64xf32>, vector<8x64xf32>, vector<8x64xf32>, vector<8x64xf32>, vector<8x64xf32>, vector<1x64xf32> -> vector<41x64xf32>
    %853 = tpu.concatenate %838, %852 in 1 : vector<41x64xf32>, vector<41x64xf32> -> vector<41x128xf32>
    %854 = arith.truncf %853 : vector<41x128xf32> to vector<41x128xbf16>
    %cst_286 = arith.constant dense<0.000000e+00> : vector<8x128xf32>
    %855 = tpu.matmul %823, %854, %cst_286 {dimension_numbers = #tpu.dot_dimension_numbers<[1], [0], [0], [1], [0, 0, 1, 1], [], []>} : vector<8x41xbf16>, vector<41x128xbf16>, vector<8x128xf32> -> vector<8x128xf32>
    %856 = vector.extract_strided_slice %855 {offsets = [0, 0], sizes = [8, 64], strides = [1, 1]} : vector<8x128xf32> to vector<8x64xf32>
    %857 = vector.extract_strided_slice %855 {offsets = [0, 64], sizes = [8, 64], strides = [1, 1]} : vector<8x128xf32> to vector<8x64xf32>
    %cst_287 = arith.constant 0.000000e+00 : f32
    %858 = vector.broadcast %cst_287 : f32 to vector<8x64xf32>
    %859 = arith.cmpf oge, %856, %858 : vector<8x64xf32>
    %cst_288 = arith.constant 1.000000e-01 : f32
    %860 = vector.broadcast %cst_288 : f32 to vector<8x64xf32>
    %861 = arith.mulf %860, %856 : vector<8x64xf32>
    %862 = arith.select %859, %856, %861 : vector<8x64xi1>, vector<8x64xf32>
    %cst_289 = arith.constant 0.000000e+00 : f32
    %863 = vector.broadcast %cst_289 : f32 to vector<8x2xf32>
    %864 = tpu.concatenate %863, %862, %863 in 1 : vector<8x2xf32>, vector<8x64xf32>, vector<8x2xf32> -> vector<8x68xf32>
    %865 = vector.extract_strided_slice %864 {offsets = [0, 0], sizes = [8, 64], strides = [1, 1]} : vector<8x68xf32> to vector<8x64xf32>
    %866 = vector.extract_strided_slice %864 {offsets = [0, 1], sizes = [8, 64], strides = [1, 1]} : vector<8x68xf32> to vector<8x64xf32>
    %867 = vector.extract_strided_slice %864 {offsets = [0, 2], sizes = [8, 64], strides = [1, 1]} : vector<8x68xf32> to vector<8x64xf32>
    %868 = vector.extract_strided_slice %864 {offsets = [0, 3], sizes = [8, 64], strides = [1, 1]} : vector<8x68xf32> to vector<8x64xf32>
    %869 = vector.extract_strided_slice %864 {offsets = [0, 4], sizes = [8, 64], strides = [1, 1]} : vector<8x68xf32> to vector<8x64xf32>
    %cst_290 = arith.constant 1.000000e+00 : f32
    %870 = vector.broadcast %cst_290 : f32 to vector<1x64xf32>
    %871 = tpu.concatenate %865, %866, %867, %868, %869, %870 in 0 : vector<8x64xf32>, vector<8x64xf32>, vector<8x64xf32>, vector<8x64xf32>, vector<8x64xf32>, vector<1x64xf32> -> vector<41x64xf32>
    %cst_291 = arith.constant 0.000000e+00 : f32
    %872 = vector.broadcast %cst_291 : f32 to vector<8x64xf32>
    %873 = arith.cmpf oge, %857, %872 : vector<8x64xf32>
    %cst_292 = arith.constant 1.000000e-01 : f32
    %874 = vector.broadcast %cst_292 : f32 to vector<8x64xf32>
    %875 = arith.mulf %874, %857 : vector<8x64xf32>
    %876 = arith.select %873, %857, %875 : vector<8x64xi1>, vector<8x64xf32>
    %cst_293 = arith.constant 0.000000e+00 : f32
    %877 = vector.broadcast %cst_293 : f32 to vector<8x2xf32>
    %878 = tpu.concatenate %877, %876, %877 in 1 : vector<8x2xf32>, vector<8x64xf32>, vector<8x2xf32> -> vector<8x68xf32>
    %879 = vector.extract_strided_slice %878 {offsets = [0, 0], sizes = [8, 64], strides = [1, 1]} : vector<8x68xf32> to vector<8x64xf32>
    %880 = vector.extract_strided_slice %878 {offsets = [0, 1], sizes = [8, 64], strides = [1, 1]} : vector<8x68xf32> to vector<8x64xf32>
    %881 = vector.extract_strided_slice %878 {offsets = [0, 2], sizes = [8, 64], strides = [1, 1]} : vector<8x68xf32> to vector<8x64xf32>
    %882 = vector.extract_strided_slice %878 {offsets = [0, 3], sizes = [8, 64], strides = [1, 1]} : vector<8x68xf32> to vector<8x64xf32>
    %883 = vector.extract_strided_slice %878 {offsets = [0, 4], sizes = [8, 64], strides = [1, 1]} : vector<8x68xf32> to vector<8x64xf32>
    %cst_294 = arith.constant 1.000000e+00 : f32
    %884 = vector.broadcast %cst_294 : f32 to vector<1x64xf32>
    %885 = tpu.concatenate %879, %880, %881, %882, %883, %884 in 0 : vector<8x64xf32>, vector<8x64xf32>, vector<8x64xf32>, vector<8x64xf32>, vector<8x64xf32>, vector<1x64xf32> -> vector<41x64xf32>
    %886 = tpu.concatenate %871, %885 in 1 : vector<41x64xf32>, vector<41x64xf32> -> vector<41x128xf32>
    %887 = arith.truncf %886 : vector<41x128xf32> to vector<41x128xbf16>
    %cst_295 = arith.constant dense<0.000000e+00> : vector<8x128xf32>
    %888 = tpu.matmul %824, %887, %cst_295 {dimension_numbers = #tpu.dot_dimension_numbers<[1], [0], [0], [1], [0, 0, 1, 1], [], []>} : vector<8x41xbf16>, vector<41x128xbf16>, vector<8x128xf32> -> vector<8x128xf32>
    %889 = vector.extract_strided_slice %888 {offsets = [0, 0], sizes = [8, 64], strides = [1, 1]} : vector<8x128xf32> to vector<8x64xf32>
    %890 = vector.extract_strided_slice %888 {offsets = [0, 64], sizes = [8, 64], strides = [1, 1]} : vector<8x128xf32> to vector<8x64xf32>
    %891 = arith.addf %889, %821 : vector<8x64xf32>
    %892 = arith.addf %890, %822 : vector<8x64xf32>
    %c0_296 = arith.constant 0 : index
    %c0_297 = arith.constant 0 : index
    %893 = vector.load %arg29[%c0_296, %c0_297] : memref<8x41xbf16, #tpu.memory_space<vmem>>, vector<8x41xbf16>
    %c0_298 = arith.constant 0 : index
    %c0_299 = arith.constant 0 : index
    %894 = vector.load %arg30[%c0_298, %c0_299] : memref<8x41xbf16, #tpu.memory_space<vmem>>, vector<8x41xbf16>
    %cst_300 = arith.constant 0.000000e+00 : f32
    %895 = vector.broadcast %cst_300 : f32 to vector<8x64xf32>
    %896 = arith.cmpf oge, %891, %895 : vector<8x64xf32>
    %cst_301 = arith.constant 1.000000e-01 : f32
    %897 = vector.broadcast %cst_301 : f32 to vector<8x64xf32>
    %898 = arith.mulf %897, %891 : vector<8x64xf32>
    %899 = arith.select %896, %891, %898 : vector<8x64xi1>, vector<8x64xf32>
    %cst_302 = arith.constant 0.000000e+00 : f32
    %900 = vector.broadcast %cst_302 : f32 to vector<8x10xf32>
    %901 = tpu.concatenate %900, %899, %900 in 1 : vector<8x10xf32>, vector<8x64xf32>, vector<8x10xf32> -> vector<8x84xf32>
    %902 = vector.extract_strided_slice %901 {offsets = [0, 0], sizes = [8, 64], strides = [1, 1]} : vector<8x84xf32> to vector<8x64xf32>
    %903 = vector.extract_strided_slice %901 {offsets = [0, 5], sizes = [8, 64], strides = [1, 1]} : vector<8x84xf32> to vector<8x64xf32>
    %904 = vector.extract_strided_slice %901 {offsets = [0, 10], sizes = [8, 64], strides = [1, 1]} : vector<8x84xf32> to vector<8x64xf32>
    %905 = vector.extract_strided_slice %901 {offsets = [0, 15], sizes = [8, 64], strides = [1, 1]} : vector<8x84xf32> to vector<8x64xf32>
    %906 = vector.extract_strided_slice %901 {offsets = [0, 20], sizes = [8, 64], strides = [1, 1]} : vector<8x84xf32> to vector<8x64xf32>
    %cst_303 = arith.constant 1.000000e+00 : f32
    %907 = vector.broadcast %cst_303 : f32 to vector<1x64xf32>
    %908 = tpu.concatenate %902, %903, %904, %905, %906, %907 in 0 : vector<8x64xf32>, vector<8x64xf32>, vector<8x64xf32>, vector<8x64xf32>, vector<8x64xf32>, vector<1x64xf32> -> vector<41x64xf32>
    %cst_304 = arith.constant 0.000000e+00 : f32
    %909 = vector.broadcast %cst_304 : f32 to vector<8x64xf32>
    %910 = arith.cmpf oge, %892, %909 : vector<8x64xf32>
    %cst_305 = arith.constant 1.000000e-01 : f32
    %911 = vector.broadcast %cst_305 : f32 to vector<8x64xf32>
    %912 = arith.mulf %911, %892 : vector<8x64xf32>
    %913 = arith.select %910, %892, %912 : vector<8x64xi1>, vector<8x64xf32>
    %cst_306 = arith.constant 0.000000e+00 : f32
    %914 = vector.broadcast %cst_306 : f32 to vector<8x10xf32>
    %915 = tpu.concatenate %914, %913, %914 in 1 : vector<8x10xf32>, vector<8x64xf32>, vector<8x10xf32> -> vector<8x84xf32>
    %916 = vector.extract_strided_slice %915 {offsets = [0, 0], sizes = [8, 64], strides = [1, 1]} : vector<8x84xf32> to vector<8x64xf32>
    %917 = vector.extract_strided_slice %915 {offsets = [0, 5], sizes = [8, 64], strides = [1, 1]} : vector<8x84xf32> to vector<8x64xf32>
    %918 = vector.extract_strided_slice %915 {offsets = [0, 10], sizes = [8, 64], strides = [1, 1]} : vector<8x84xf32> to vector<8x64xf32>
    %919 = vector.extract_strided_slice %915 {offsets = [0, 15], sizes = [8, 64], strides = [1, 1]} : vector<8x84xf32> to vector<8x64xf32>
    %920 = vector.extract_strided_slice %915 {offsets = [0, 20], sizes = [8, 64], strides = [1, 1]} : vector<8x84xf32> to vector<8x64xf32>
    %cst_307 = arith.constant 1.000000e+00 : f32
    %921 = vector.broadcast %cst_307 : f32 to vector<1x64xf32>
    %922 = tpu.concatenate %916, %917, %918, %919, %920, %921 in 0 : vector<8x64xf32>, vector<8x64xf32>, vector<8x64xf32>, vector<8x64xf32>, vector<8x64xf32>, vector<1x64xf32> -> vector<41x64xf32>
    %923 = tpu.concatenate %908, %922 in 1 : vector<41x64xf32>, vector<41x64xf32> -> vector<41x128xf32>
    %924 = arith.truncf %923 : vector<41x128xf32> to vector<41x128xbf16>
    %cst_308 = arith.constant dense<0.000000e+00> : vector<8x128xf32>
    %925 = tpu.matmul %893, %924, %cst_308 {dimension_numbers = #tpu.dot_dimension_numbers<[1], [0], [0], [1], [0, 0, 1, 1], [], []>} : vector<8x41xbf16>, vector<41x128xbf16>, vector<8x128xf32> -> vector<8x128xf32>
    %926 = vector.extract_strided_slice %925 {offsets = [0, 0], sizes = [8, 64], strides = [1, 1]} : vector<8x128xf32> to vector<8x64xf32>
    %927 = vector.extract_strided_slice %925 {offsets = [0, 64], sizes = [8, 64], strides = [1, 1]} : vector<8x128xf32> to vector<8x64xf32>
    %cst_309 = arith.constant 0.000000e+00 : f32
    %928 = vector.broadcast %cst_309 : f32 to vector<8x64xf32>
    %929 = arith.cmpf oge, %926, %928 : vector<8x64xf32>
    %cst_310 = arith.constant 1.000000e-01 : f32
    %930 = vector.broadcast %cst_310 : f32 to vector<8x64xf32>
    %931 = arith.mulf %930, %926 : vector<8x64xf32>
    %932 = arith.select %929, %926, %931 : vector<8x64xi1>, vector<8x64xf32>
    %cst_311 = arith.constant 0.000000e+00 : f32
    %933 = vector.broadcast %cst_311 : f32 to vector<8x2xf32>
    %934 = tpu.concatenate %933, %932, %933 in 1 : vector<8x2xf32>, vector<8x64xf32>, vector<8x2xf32> -> vector<8x68xf32>
    %935 = vector.extract_strided_slice %934 {offsets = [0, 0], sizes = [8, 64], strides = [1, 1]} : vector<8x68xf32> to vector<8x64xf32>
    %936 = vector.extract_strided_slice %934 {offsets = [0, 1], sizes = [8, 64], strides = [1, 1]} : vector<8x68xf32> to vector<8x64xf32>
    %937 = vector.extract_strided_slice %934 {offsets = [0, 2], sizes = [8, 64], strides = [1, 1]} : vector<8x68xf32> to vector<8x64xf32>
    %938 = vector.extract_strided_slice %934 {offsets = [0, 3], sizes = [8, 64], strides = [1, 1]} : vector<8x68xf32> to vector<8x64xf32>
    %939 = vector.extract_strided_slice %934 {offsets = [0, 4], sizes = [8, 64], strides = [1, 1]} : vector<8x68xf32> to vector<8x64xf32>
    %cst_312 = arith.constant 1.000000e+00 : f32
    %940 = vector.broadcast %cst_312 : f32 to vector<1x64xf32>
    %941 = tpu.concatenate %935, %936, %937, %938, %939, %940 in 0 : vector<8x64xf32>, vector<8x64xf32>, vector<8x64xf32>, vector<8x64xf32>, vector<8x64xf32>, vector<1x64xf32> -> vector<41x64xf32>
    %cst_313 = arith.constant 0.000000e+00 : f32
    %942 = vector.broadcast %cst_313 : f32 to vector<8x64xf32>
    %943 = arith.cmpf oge, %927, %942 : vector<8x64xf32>
    %cst_314 = arith.constant 1.000000e-01 : f32
    %944 = vector.broadcast %cst_314 : f32 to vector<8x64xf32>
    %945 = arith.mulf %944, %927 : vector<8x64xf32>
    %946 = arith.select %943, %927, %945 : vector<8x64xi1>, vector<8x64xf32>
    %cst_315 = arith.constant 0.000000e+00 : f32
    %947 = vector.broadcast %cst_315 : f32 to vector<8x2xf32>
    %948 = tpu.concatenate %947, %946, %947 in 1 : vector<8x2xf32>, vector<8x64xf32>, vector<8x2xf32> -> vector<8x68xf32>
    %949 = vector.extract_strided_slice %948 {offsets = [0, 0], sizes = [8, 64], strides = [1, 1]} : vector<8x68xf32> to vector<8x64xf32>
    %950 = vector.extract_strided_slice %948 {offsets = [0, 1], sizes = [8, 64], strides = [1, 1]} : vector<8x68xf32> to vector<8x64xf32>
    %951 = vector.extract_strided_slice %948 {offsets = [0, 2], sizes = [8, 64], strides = [1, 1]} : vector<8x68xf32> to vector<8x64xf32>
    %952 = vector.extract_strided_slice %948 {offsets = [0, 3], sizes = [8, 64], strides = [1, 1]} : vector<8x68xf32> to vector<8x64xf32>
    %953 = vector.extract_strided_slice %948 {offsets = [0, 4], sizes = [8, 64], strides = [1, 1]} : vector<8x68xf32> to vector<8x64xf32>
    %cst_316 = arith.constant 1.000000e+00 : f32
    %954 = vector.broadcast %cst_316 : f32 to vector<1x64xf32>
    %955 = tpu.concatenate %949, %950, %951, %952, %953, %954 in 0 : vector<8x64xf32>, vector<8x64xf32>, vector<8x64xf32>, vector<8x64xf32>, vector<8x64xf32>, vector<1x64xf32> -> vector<41x64xf32>
    %956 = tpu.concatenate %941, %955 in 1 : vector<41x64xf32>, vector<41x64xf32> -> vector<41x128xf32>
    %957 = arith.truncf %956 : vector<41x128xf32> to vector<41x128xbf16>
    %cst_317 = arith.constant dense<0.000000e+00> : vector<8x128xf32>
    %958 = tpu.matmul %894, %957, %cst_317 {dimension_numbers = #tpu.dot_dimension_numbers<[1], [0], [0], [1], [0, 0, 1, 1], [], []>} : vector<8x41xbf16>, vector<41x128xbf16>, vector<8x128xf32> -> vector<8x128xf32>
    %959 = vector.extract_strided_slice %958 {offsets = [0, 0], sizes = [8, 64], strides = [1, 1]} : vector<8x128xf32> to vector<8x64xf32>
    %960 = vector.extract_strided_slice %958 {offsets = [0, 64], sizes = [8, 64], strides = [1, 1]} : vector<8x128xf32> to vector<8x64xf32>
    %961 = arith.addf %959, %891 : vector<8x64xf32>
    %962 = arith.addf %960, %892 : vector<8x64xf32>
    %963 = arith.addf %751, %961 : vector<8x64xf32>
    %964 = arith.addf %752, %962 : vector<8x64xf32>
    %cst_318 = arith.constant 5.000000e-01 : f32
    %965 = vector.broadcast %cst_318 : f32 to vector<8x64xf32>
    %966 = arith.mulf %963, %965 : vector<8x64xf32>
    %cst_319 = arith.constant 5.000000e-01 : f32
    %967 = vector.broadcast %cst_319 : f32 to vector<8x64xf32>
    %968 = arith.mulf %964, %967 : vector<8x64xf32>
    %c0_320 = arith.constant 0 : index
    %c0_321 = arith.constant 0 : index
    %969 = vector.load %arg31[%c0_320, %c0_321] : memref<1x57xbf16, #tpu.memory_space<vmem>>, vector<1x57xbf16>
    %cst_322 = arith.constant 0.000000e+00 : f32
    %970 = vector.broadcast %cst_322 : f32 to vector<8x64xf32>
    %971 = arith.cmpf oge, %966, %970 : vector<8x64xf32>
    %cst_323 = arith.constant 1.000000e-01 : f32
    %972 = vector.broadcast %cst_323 : f32 to vector<8x64xf32>
    %973 = arith.mulf %972, %966 : vector<8x64xf32>
    %974 = arith.select %971, %966, %973 : vector<8x64xi1>, vector<8x64xf32>
    %cst_324 = arith.constant 0.000000e+00 : f32
    %975 = vector.broadcast %cst_324 : f32 to vector<8x3xf32>
    %976 = tpu.concatenate %975, %974, %975 in 1 : vector<8x3xf32>, vector<8x64xf32>, vector<8x3xf32> -> vector<8x70xf32>
    %977 = vector.extract_strided_slice %976 {offsets = [0, 0], sizes = [8, 64], strides = [1, 1]} : vector<8x70xf32> to vector<8x64xf32>
    %978 = vector.extract_strided_slice %976 {offsets = [0, 1], sizes = [8, 64], strides = [1, 1]} : vector<8x70xf32> to vector<8x64xf32>
    %979 = vector.extract_strided_slice %976 {offsets = [0, 2], sizes = [8, 64], strides = [1, 1]} : vector<8x70xf32> to vector<8x64xf32>
    %980 = vector.extract_strided_slice %976 {offsets = [0, 3], sizes = [8, 64], strides = [1, 1]} : vector<8x70xf32> to vector<8x64xf32>
    %981 = vector.extract_strided_slice %976 {offsets = [0, 4], sizes = [8, 64], strides = [1, 1]} : vector<8x70xf32> to vector<8x64xf32>
    %982 = vector.extract_strided_slice %976 {offsets = [0, 5], sizes = [8, 64], strides = [1, 1]} : vector<8x70xf32> to vector<8x64xf32>
    %983 = vector.extract_strided_slice %976 {offsets = [0, 6], sizes = [8, 64], strides = [1, 1]} : vector<8x70xf32> to vector<8x64xf32>
    %cst_325 = arith.constant 1.000000e+00 : f32
    %984 = vector.broadcast %cst_325 : f32 to vector<1x64xf32>
    %985 = tpu.concatenate %977, %978, %979, %980, %981, %982, %983, %984 in 0 : vector<8x64xf32>, vector<8x64xf32>, vector<8x64xf32>, vector<8x64xf32>, vector<8x64xf32>, vector<8x64xf32>, vector<8x64xf32>, vector<1x64xf32> -> vector<57x64xf32>
    %cst_326 = arith.constant 0.000000e+00 : f32
    %986 = vector.broadcast %cst_326 : f32 to vector<8x64xf32>
    %987 = arith.cmpf oge, %968, %986 : vector<8x64xf32>
    %cst_327 = arith.constant 1.000000e-01 : f32
    %988 = vector.broadcast %cst_327 : f32 to vector<8x64xf32>
    %989 = arith.mulf %988, %968 : vector<8x64xf32>
    %990 = arith.select %987, %968, %989 : vector<8x64xi1>, vector<8x64xf32>
    %cst_328 = arith.constant 0.000000e+00 : f32
    %991 = vector.broadcast %cst_328 : f32 to vector<8x3xf32>
    %992 = tpu.concatenate %991, %990, %991 in 1 : vector<8x3xf32>, vector<8x64xf32>, vector<8x3xf32> -> vector<8x70xf32>
    %993 = vector.extract_strided_slice %992 {offsets = [0, 0], sizes = [8, 64], strides = [1, 1]} : vector<8x70xf32> to vector<8x64xf32>
    %994 = vector.extract_strided_slice %992 {offsets = [0, 1], sizes = [8, 64], strides = [1, 1]} : vector<8x70xf32> to vector<8x64xf32>
    %995 = vector.extract_strided_slice %992 {offsets = [0, 2], sizes = [8, 64], strides = [1, 1]} : vector<8x70xf32> to vector<8x64xf32>
    %996 = vector.extract_strided_slice %992 {offsets = [0, 3], sizes = [8, 64], strides = [1, 1]} : vector<8x70xf32> to vector<8x64xf32>
    %997 = vector.extract_strided_slice %992 {offsets = [0, 4], sizes = [8, 64], strides = [1, 1]} : vector<8x70xf32> to vector<8x64xf32>
    %998 = vector.extract_strided_slice %992 {offsets = [0, 5], sizes = [8, 64], strides = [1, 1]} : vector<8x70xf32> to vector<8x64xf32>
    %999 = vector.extract_strided_slice %992 {offsets = [0, 6], sizes = [8, 64], strides = [1, 1]} : vector<8x70xf32> to vector<8x64xf32>
    %cst_329 = arith.constant 1.000000e+00 : f32
    %1000 = vector.broadcast %cst_329 : f32 to vector<1x64xf32>
    %1001 = tpu.concatenate %993, %994, %995, %996, %997, %998, %999, %1000 in 0 : vector<8x64xf32>, vector<8x64xf32>, vector<8x64xf32>, vector<8x64xf32>, vector<8x64xf32>, vector<8x64xf32>, vector<8x64xf32>, vector<1x64xf32> -> vector<57x64xf32>
    %1002 = tpu.concatenate %985, %1001 in 1 : vector<57x64xf32>, vector<57x64xf32> -> vector<57x128xf32>
    %1003 = arith.truncf %1002 : vector<57x128xf32> to vector<57x128xbf16>
    %cst_330 = arith.constant dense<0.000000e+00> : vector<1x128xf32>
    %1004 = tpu.matmul %969, %1003, %cst_330 {dimension_numbers = #tpu.dot_dimension_numbers<[1], [0], [0], [1], [0, 0, 1, 1], [], []>} : vector<1x57xbf16>, vector<57x128xbf16>, vector<1x128xf32> -> vector<1x128xf32>
    %1005 = math.tanh %1004 : vector<1x128xf32>
    %1006 = vector.extract_strided_slice %1005 {offsets = [0, 0], sizes = [1, 64], strides = [1, 1]} : vector<1x128xf32> to vector<1x64xf32>
    %1007 = vector.extract_strided_slice %1005 {offsets = [0, 64], sizes = [1, 64], strides = [1, 1]} : vector<1x128xf32> to vector<1x64xf32>
    %1008 = tpu.concatenate %1006, %1007 in 1 : vector<1x64xf32>, vector<1x64xf32> -> vector<1x128xf32>
    %c0_331 = arith.constant 0 : index
    %c0_332 = arith.constant 0 : index
    %1009 = vector.load %arg32[%c0_331, %c0_332] : memref<1x128xf32, #tpu.memory_space<vmem>>, vector<1x128xf32>
    tpu.vector_store %arg32[%c0_331, %c0_332], %1008 {strides = array<i32>} : memref<1x128xf32, #tpu.memory_space<vmem>>, vector<1x128xf32>,
    return
  }
  func.func @transform_0(%arg0: i32) -> (i32, i32) {
    %c0_i32 = arith.constant 0 : i32
    %c0_i32_0 = arith.constant 0 : i32
    %c0_i32_1 = arith.constant 0 : i32
    return %c0_i32, %c0_i32_0 : i32, i32
  }
  func.func @transform_1(%arg0: i32) -> (i32, i32) {
    %c0_i32 = arith.constant 0 : i32
    %c0_i32_0 = arith.constant 0 : i32
    %c0_i32_1 = arith.constant 0 : i32
    return %c0_i32, %c0_i32_0 : i32, i32
  }
  func.func @transform_2(%arg0: i32) -> (i32, i32) {
    %c0_i32 = arith.constant 0 : i32
    %c0_i32_0 = arith.constant 0 : i32
    %c0_i32_1 = arith.constant 0 : i32
    return %c0_i32, %c0_i32_0 : i32, i32
  }
  func.func @transform_3(%arg0: i32) -> (i32, i32) {
    %c0_i32 = arith.constant 0 : i32
    %c0_i32_0 = arith.constant 0 : i32
    %c0_i32_1 = arith.constant 0 : i32
    return %c0_i32, %c0_i32_0 : i32, i32
  }
  func.func @transform_4(%arg0: i32) -> (i32, i32) {
    %c0_i32 = arith.constant 0 : i32
    %c0_i32_0 = arith.constant 0 : i32
    %c0_i32_1 = arith.constant 0 : i32
    return %c0_i32, %c0_i32_0 : i32, i32
  }
  func.func @transform_5(%arg0: i32) -> (i32, i32) {
    %c0_i32 = arith.constant 0 : i32
    %c0_i32_0 = arith.constant 0 : i32
    %c0_i32_1 = arith.constant 0 : i32
    return %c0_i32, %c0_i32_0 : i32, i32
  }
  func.func @transform_6(%arg0: i32) -> (i32, i32) {
    %c0_i32 = arith.constant 0 : i32
    %c0_i32_0 = arith.constant 0 : i32
    %c0_i32_1 = arith.constant 0 : i32
    return %c0_i32, %c0_i32_0 : i32, i32
  }
  func.func @transform_7(%arg0: i32) -> (i32, i32) {
    %c0_i32 = arith.constant 0 : i32
    %c0_i32_0 = arith.constant 0 : i32
    %c0_i32_1 = arith.constant 0 : i32
    return %c0_i32, %c0_i32_0 : i32, i32
  }
  func.func @transform_8(%arg0: i32) -> (i32, i32) {
    %c0_i32 = arith.constant 0 : i32
    %c0_i32_0 = arith.constant 0 : i32
    %c0_i32_1 = arith.constant 0 : i32
    return %c0_i32, %c0_i32_0 : i32, i32
  }
  func.func @transform_9(%arg0: i32) -> (i32, i32) {
    %c0_i32 = arith.constant 0 : i32
    %c0_i32_0 = arith.constant 0 : i32
    %c0_i32_1 = arith.constant 0 : i32
    return %c0_i32, %c0_i32_0 : i32, i32
  }
  func.func @transform_10(%arg0: i32) -> (i32, i32) {
    %c0_i32 = arith.constant 0 : i32
    %c0_i32_0 = arith.constant 0 : i32
    %c0_i32_1 = arith.constant 0 : i32
    return %c0_i32, %c0_i32_0 : i32, i32
  }
  func.func @transform_11(%arg0: i32) -> (i32, i32) {
    %c0_i32 = arith.constant 0 : i32
    %c0_i32_0 = arith.constant 0 : i32
    %c0_i32_1 = arith.constant 0 : i32
    return %c0_i32, %c0_i32_0 : i32, i32
  }
  func.func @transform_12(%arg0: i32) -> (i32, i32) {
    %c0_i32 = arith.constant 0 : i32
    %c0_i32_0 = arith.constant 0 : i32
    %c0_i32_1 = arith.constant 0 : i32
    return %c0_i32, %c0_i32_0 : i32, i32
  }
  func.func @transform_13(%arg0: i32) -> (i32, i32) {
    %c0_i32 = arith.constant 0 : i32
    %c0_i32_0 = arith.constant 0 : i32
    %c0_i32_1 = arith.constant 0 : i32
    return %c0_i32, %c0_i32_0 : i32, i32
  }
  func.func @transform_14(%arg0: i32) -> (i32, i32) {
    %c0_i32 = arith.constant 0 : i32
    %c0_i32_0 = arith.constant 0 : i32
    %c0_i32_1 = arith.constant 0 : i32
    return %c0_i32, %c0_i32_0 : i32, i32
  }
  func.func @transform_15(%arg0: i32) -> (i32, i32) {
    %c0_i32 = arith.constant 0 : i32
    %c0_i32_0 = arith.constant 0 : i32
    %c0_i32_1 = arith.constant 0 : i32
    return %c0_i32, %c0_i32_0 : i32, i32
  }
  func.func @transform_16(%arg0: i32) -> (i32, i32) {
    %c0_i32 = arith.constant 0 : i32
    %c0_i32_0 = arith.constant 0 : i32
    %c0_i32_1 = arith.constant 0 : i32
    return %c0_i32, %c0_i32_0 : i32, i32
  }
  func.func @transform_17(%arg0: i32) -> (i32, i32) {
    %c0_i32 = arith.constant 0 : i32
    %c0_i32_0 = arith.constant 0 : i32
    %c0_i32_1 = arith.constant 0 : i32
    return %c0_i32, %c0_i32_0 : i32, i32
  }
  func.func @transform_18(%arg0: i32) -> (i32, i32) {
    %c0_i32 = arith.constant 0 : i32
    %c0_i32_0 = arith.constant 0 : i32
    %c0_i32_1 = arith.constant 0 : i32
    return %c0_i32, %c0_i32_0 : i32, i32
  }
  func.func @transform_19(%arg0: i32) -> (i32, i32) {
    %c0_i32 = arith.constant 0 : i32
    %c0_i32_0 = arith.constant 0 : i32
    %c0_i32_1 = arith.constant 0 : i32
    return %c0_i32, %c0_i32_0 : i32, i32
  }
  func.func @transform_20(%arg0: i32) -> (i32, i32) {
    %c0_i32 = arith.constant 0 : i32
    %c0_i32_0 = arith.constant 0 : i32
    %c0_i32_1 = arith.constant 0 : i32
    return %c0_i32, %c0_i32_0 : i32, i32
  }
  func.func @transform_21(%arg0: i32) -> (i32, i32) {
    %c0_i32 = arith.constant 0 : i32
    %c0_i32_0 = arith.constant 0 : i32
    %c0_i32_1 = arith.constant 0 : i32
    return %c0_i32, %c0_i32_0 : i32, i32
  }
  func.func @transform_22(%arg0: i32) -> (i32, i32) {
    %c0_i32 = arith.constant 0 : i32
    %c0_i32_0 = arith.constant 0 : i32
    %c0_i32_1 = arith.constant 0 : i32
    return %c0_i32, %c0_i32_0 : i32, i32
  }
  func.func @transform_23(%arg0: i32) -> (i32, i32) {
    %c0_i32 = arith.constant 0 : i32
    %c0_i32_0 = arith.constant 0 : i32
    %c0_i32_1 = arith.constant 0 : i32
    return %c0_i32, %c0_i32_0 : i32, i32
  }
  func.func @transform_24(%arg0: i32) -> (i32, i32) {
    %c0_i32 = arith.constant 0 : i32
    %c0_i32_0 = arith.constant 0 : i32
    %c0_i32_1 = arith.constant 0 : i32
    return %c0_i32, %c0_i32_0 : i32, i32
  }
  func.func @transform_25(%arg0: i32) -> (i32, i32) {
    %c0_i32 = arith.constant 0 : i32
    %c0_i32_0 = arith.constant 0 : i32
    %c0_i32_1 = arith.constant 0 : i32
    return %c0_i32, %c0_i32_0 : i32, i32
  }
  func.func @transform_26(%arg0: i32) -> (i32, i32) {
    %c0_i32 = arith.constant 0 : i32
    %c0_i32_0 = arith.constant 0 : i32
    %c0_i32_1 = arith.constant 0 : i32
    return %c0_i32, %c0_i32_0 : i32, i32
  }
  func.func @transform_27(%arg0: i32) -> (i32, i32) {
    %c0_i32 = arith.constant 0 : i32
    %c0_i32_0 = arith.constant 0 : i32
    %c0_i32_1 = arith.constant 0 : i32
    return %c0_i32, %c0_i32_0 : i32, i32
  }
  func.func @transform_28(%arg0: i32) -> (i32, i32) {
    %c0_i32 = arith.constant 0 : i32
    %c0_i32_0 = arith.constant 0 : i32
    %c0_i32_1 = arith.constant 0 : i32
    return %c0_i32, %c0_i32_0 : i32, i32
  }
  func.func @transform_29(%arg0: i32) -> (i32, i32) {
    %c0_i32 = arith.constant 0 : i32
    %c0_i32_0 = arith.constant 0 : i32
    %c0_i32_1 = arith.constant 0 : i32
    return %c0_i32, %c0_i32_0 : i32, i32
  }
  func.func @transform_30(%arg0: i32) -> (i32, i32) {
    %c0_i32 = arith.constant 0 : i32
    %c0_i32_0 = arith.constant 0 : i32
    %c0_i32_1 = arith.constant 0 : i32
    return %c0_i32, %c0_i32_0 : i32, i32
  }
  func.func @transform_31(%arg0: i32) -> (i32, i32) {
    %c0_i32 = arith.constant 0 : i32
    %c0_i32_0 = arith.constant 0 : i32
    %c0_i32_1 = arith.constant 0 : i32
    return %c0_i32, %c0_i32_0 : i32, i32
  }
}

</mosaic_0001>

<bundles_post_ra>
// kernel: generator_forward.1
= control target key start
LH: loop header
LB: loop body
LE: loop exit
PB: predicated region body
PF: predicated region fallthrough
CT: control target
= control target key end

     0   :  { %s7586_s6 = smov 115   ;;  %s7587_s7 = smov 3   ;;  %vm9532_vm0 = vcmask 23552   ;;  %vm204_vm1 = vcmask 154624   ;;  %vm799_vm2 = vcmask 130048   ;;  %vm964_vm3 = vcmask 1040384   ;;  %s9524_s0 = inlined_call_operand.smem [shape: u32[32], index: -1, kind: input, shape index: {}] }
   0x1   :  { %s1_s5 = sld [smem:[%s9524_s0]]   ;;  %s7588_s8 = smov 127   ;;  %vm957_vm4 = vcmask 400384   ;;  %vm1149_vm9 = vcmask 7168   ;;  %vm1154_vm10 = vcmask 138240   ;;  %vm7601_vm11 = vmmov 0  }
   0x2   :  { %s7589_s9 = smov 126   ;;  %s7590_s10 = smov 125   ;;  %vm1248_vm12 = vcmask 531456  }
   0x3   :  { %s7591_s11 = smov 124   ;;  %s7592_s12 = smov 123  }
   0x4   :  { %s7593_s13 = smov 122   ;;  %s7594_s14 = smov 16  }
   0x5   :  { %s7595_s15 = smov 1   ;;  %s7598_s19 = smov 15  }
   0x6   :  { %s7885_s18 = sld [smem:[%s9524_s0 + %s7595_s15]]   ;;  %s7599_s23 = smov 113  }
   0x7   :  { %v137_v0 = vld [vmem:[%s1_s5 + $0x30] sm:$0xff]  ;;  %v138_v1 = vld [vmem:[%s1_s5 + $0x38] sm:$0xff]  ;;  %v131_v2 = vld [vmem:[%s1_s5] sm:$0xff]  ;;  %s8154_s22 = sld [smem:[%s9524_s0 + %s7598_s19]]   ;;  %s7602_s27 = smov 2  }
   0x8   :  { %v6061_v3 = vpack.i.bf16 %v138_v1, %v137_v0  ;;  %v132_v4 = vld [vmem:[%s1_s5 + $0x8] sm:$0xff]  ;;  %v139_v5 = vld [vmem:[%s1_s5 + $0x40] sm:$0xff]  ;;  %v133_v8 = vld [vmem:[%s1_s5 + $0x10] sm:$0xff]  ;;  %s8224_s26 = sld [smem:[%s9524_s0 + %s7587_s7]]   ;;  %s7604_s1 = smov 112  }
   0x9   :  { %v140_v6 = vld [vmem:[%s1_s5 + $0x48] sm:$0xff]  ;;  %v6071_v7 = vpack.i.bf16 %v132_v4, %v131_v2  ;;  %v134_v9 = vld [vmem:[%s1_s5 + $0x18] sm:$0xff]  ;;  %v135_v12 = vld [vmem:[%s1_s5 + $0x20] sm:$0xff]  ;;  %s8247_s30 = sld [smem:[%s9524_s0 + %s7602_s27]]   ;;  %s7605_s2 = smov 32  }
   0xa   :  { %6062 = vrot.lane.b32.xlu0 %v6061_v3, %s7586_s6  ;;  %v6066_v10 = vpack.i.bf16 %v140_v6, %v139_v5  ;;  %v6076_v11 = vpack.i.bf16 %v134_v9, %v133_v8  ;;  %v136_v13 = vld [vmem:[%s1_s5 + $0x28] sm:$0xff]  ;;  %s7606_s3 = smov 4   ;;  %s7607_s16 = smov 97  }
   0xb   :  { %6072 = vrot.lane.b32.xlu1 %v6071_v7, %s7586_s6  ;;  %v6081_v14 = vpack.i.bf16 %v136_v13, %v135_v12  ;;  %s7608_s17 = smov 5   ;;  %s7609_s21 = smov 99  }
   0xc   :  { %s5196_s20 = sld [smem:[%s9524_s0 + %s7608_s17]]   ;;  %s7610_s24 = smov 6  }
   0xd   :  { %s5197_s28 = sld [smem:[%s9524_s0 + %s7610_s24]]   ;;  %s7611_s29 = smov 7  }
   0xe   :  { %6067 = vrot.lane.b32.xlu0 %v6066_v10, %s7586_s6  ;;  %s7612_s4 = smov 101   ;;  %s7613_s5 = smov 118  }
   0xf   :  { %6077 = vrot.lane.b32.xlu1 %v6076_v11, %s7586_s6  ;;  %s7619_s25 = smov 102  }
  0x12   :  { %6082 = vrot.lane.b32.xlu0 %v6081_v14, %s7586_s6  ;;  %s8385_s6 = sld [smem:[%s9524_s0 + %s7606_s3]]  }
  0x13   :  { %6087 = vrot.lane.b32.xlu1 %v6061_v3, %s7587_s7  ;;  %s5198_s3 = sld [smem:[%s9524_s0 + %s7611_s29]]   ;;  %s7616_s29 = smov 98  }
  0x16   :  { %6102 = vrot.lane.b32.xlu0 %v6076_v11, %s7587_s7 }
  0x17   :  { %6092 = vrot.lane.b32.xlu1 %v6066_v10, %s7587_s7 }
  0x1a   :  { %6107 = vrot.lane.b32.xlu0 %v6081_v14, %s7587_s7 }
  0x1b   :  { %6097 = vrot.lane.b32.xlu1 %v6071_v7, %s7587_s7 }
  0x7c   :  { %v6063_v15 = vpop.permute.xlu0 %6062 }
  0x7d   :  { %v6065_v16 = vunpack.i.h.bf16 %v6063_v15  ;;  %v6064_v17 = vunpack.i.l.bf16 %v6063_v15  ;;  %v6073_v18 = vpop.permute.xlu1 %6072 }
  0x7e   :  { %v6075_v19 = vunpack.i.h.bf16 %v6073_v18  ;;  %v6074_v20 = vunpack.i.l.bf16 %v6073_v18 }
  0x7f   :  { %v442_v21 = vsel %vm9532_vm0, 0.0, %v6065_v16  ;;  %v441_v22 = vsel %vm9532_vm0, 0.0, %v6064_v17 }
  0x80   :  { %v452_v23 = vsel %vm204_vm1, %v442_v21, 0.0  ;;  %v451_v24 = vsel %vm204_vm1, %v441_v22, 0.0  ;;  %v436_v25 = vsel %vm9532_vm0, 0.0, %v6075_v19  ;;  %v435_v26 = vsel %vm9532_vm0, 0.0, %v6074_v20  ;;  %v6068_v27 = vpop.permute.xlu0 %6067 }
  0x81   :  { %v446_v28 = vsel %vm204_vm1, %v436_v25, 0.0  ;;  %v445_v29 = vsel %vm204_vm1, %v435_v26, 0.0  ;;  %v6070_v30 = vunpack.i.h.bf16 %v6068_v27  ;;  %v6069_v31 = vunpack.i.l.bf16 %v6068_v27  ;;  %v6078_v32 = vpop.permute.xlu1 %6077 }
  0x82   :  { %v6080_v33 = vunpack.i.h.bf16 %v6078_v32  ;;  %v6079_v34 = vunpack.i.l.bf16 %v6078_v32  ;;  %v7673_v35 = vpack.i.bf16 %v452_v23, %v451_v24  ;;  %v7675_v36 = vpack.i.bf16 %v446_v28, %v445_v29 }
  0x83   :  { %v444_v37 = vsel %vm9532_vm0, 0.0, %v6070_v30  ;;  %v443_v38 = vsel %vm9532_vm0, 0.0, %v6069_v31 }
  0x84   :  { %v454_v39 = vsel %vm204_vm1, %v444_v37, 0.0  ;;  %v453_v40 = vsel %vm204_vm1, %v443_v38, 0.0  ;;  %v438_v41 = vsel %vm9532_vm0, 0.0, %v6080_v33  ;;  %v437_v42 = vsel %vm9532_vm0, 0.0, %v6079_v34  ;;  %6112 = vrot.lane.b32.xlu0 %v7673_v35, %s7588_s8  ;;  %6122 = vrot.lane.b32.xlu1 %v7675_v36, %s7589_s9  ;;  %v6083_v43 = vpop.permute.xlu0 %6082 }
  0x85   :  { %v448_v44 = vsel %vm204_vm1, %v438_v41, 0.0  ;;  %v447_v45 = vsel %vm204_vm1, %v437_v42, 0.0  ;;  %v7689_v46 = vpack.i.bf16 %v454_v39, %v453_v40  ;;  %v6085_v47 = vunpack.i.h.bf16 %v6083_v43  ;;  %v6088_v55 = vpop.permute.xlu1 %6087 }
  0x86   :  { %v7691_v48 = vpack.i.bf16 %v448_v44, %v447_v45  ;;  %v6084_v49 = vunpack.i.l.bf16 %v6083_v43  ;;  %v6090_v57 = vunpack.i.h.bf16 %v6088_v55  ;;  %v6089_v58 = vunpack.i.l.bf16 %v6088_v55 }
  0x87   :  { %v440_v50 = vsel %vm9532_vm0, 0.0, %v6085_v47 }
  0x88   :  { %6117 = vrot.lane.b32.xlu0 %v7689_v46, %s7588_s8  ;;  %6132 = vrot.lane.b32.xlu1 %v7691_v48, %s7590_s10  ;;  %v439_v51 = vsel %vm9532_vm0, 0.0, %v6084_v49  ;;  %v450_v52 = vsel %vm204_vm1, %v440_v50, 0.0  ;;  %v201_v61 = vsel %vm9532_vm0, 0.0, %v6090_v57  ;;  %v200_v62 = vsel %vm9532_vm0, 0.0, %v6089_v58  ;;  %v6103_v8 = vpop.permute.xlu0 %6102 }
  0x89   :  { %v449_v53 = vsel %vm204_vm1, %v439_v51, 0.0  ;;  %v6093_v56 = vpop.permute.xlu1 %6092  ;;  %v7756_v2 = vsel %vm204_vm1, %v201_v61, 0.0  ;;  %v7759_v3 = vsel %vm204_vm1, %v200_v62, 0.0  ;;  %v6105_v13 = vunpack.i.h.bf16 %v6103_v8 }
  0x8a   :  { %v7705_v54 = vpack.i.bf16 %v450_v52, %v449_v53  ;;  %v6095_v59 = vunpack.i.h.bf16 %v6093_v56  ;;  %v6094_v60 = vunpack.i.l.bf16 %v6093_v56  ;;  %v7773_v9 = vpack.i.bf16 %v7756_v2, %v7759_v3 }
  0x8b   :  { %v6104_v14 = vunpack.i.l.bf16 %v6103_v8  ;;  %v197_v17 = vsel %vm9532_vm0, 0.0, %v6105_v13 }
  0x8c   :  { %6127 = vrot.lane.b32.xlu0 %v7689_v46, %s7591_s11  ;;  %6137 = vrot.lane.b32.xlu1 %v7691_v48, %s7589_s9  ;;  %v203_v63 = vsel %vm9532_vm0, 0.0, %v6095_v59  ;;  %v202_v0 = vsel %vm9532_vm0, 0.0, %v6094_v60  ;;  %v6108_v19 = vpop.permute.xlu0 %6107  ;;  %v7800_v21 = vsel %vm204_vm1, %v197_v17, 0.0 }
  0x8d   :  { %v6098_v1 = vpop.permute.xlu1 %6097  ;;  %v7762_v4 = vsel %vm204_vm1, %v203_v63, 0.0  ;;  %v7765_v5 = vsel %vm204_vm1, %v202_v0, 0.0  ;;  %v196_v18 = vsel %vm9532_vm0, 0.0, %v6104_v14  ;;  %v6110_v23 = vunpack.i.h.bf16 %v6108_v19  ;;  %v7558_v63 = vld [vmem:[%s7885_s18 + $0x4] ss:$20 sps:$4 sm:$0xff]  }
  0x8e   :  { %v6100_v6 = vunpack.i.h.bf16 %v6098_v1  ;;  %v6099_v7 = vunpack.i.l.bf16 %v6098_v1  ;;  %v7777_v10 = vpack.i.bf16 %v7762_v4, %v7765_v5  ;;  %v7803_v22 = vsel %vm204_vm1, %v196_v18, 0.0  ;;  %1002 = vmatprep.mubr.bf16.mxu0 %v7558_v63 }
  0x8f   :  { %v6109_v24 = vunpack.i.l.bf16 %v6108_v19  ;;  %v6291_v25 = vpack.i.bf16 %v7800_v21, %v7803_v22  ;;  %v199_v26 = vsel %vm9532_vm0, 0.0, %v6110_v23 }
  0x90   :  { %6142 = vrot.lane.b32.xlu0 %v7675_v36, %s7592_s12  ;;  %6147 = vrot.lane.b32.xlu1 %v7705_v54, %s7590_s10  ;;  %v195_v11 = vsel %vm9532_vm0, 0.0, %v6100_v6  ;;  %v194_v12 = vsel %vm9532_vm0, 0.0, %v6099_v7  ;;  %v7816_v28 = vsel %vm204_vm1, %v199_v26, 0.0  ;;  %v7564_v6 = vld [vmem:[%s7885_s18 + $0xc] ss:$20 sps:$4 sm:$0xff]  }
  0x91   :  { %v7786_v15 = vsel %vm204_vm1, %v195_v11, 0.0  ;;  %v7789_v16 = vsel %vm204_vm1, %v194_v12, 0.0  ;;  %v198_v27 = vsel %vm9532_vm0, 0.0, %v6109_v24  ;;  %1051 = vmatprep.mubr.bf16.mxu1 %v7564_v6  ;;  %v9525_v12 = vmov 1.0  }
  0x92   :  { %v6281_v20 = vpack.i.bf16 %v7786_v15, %v7789_v16  ;;  %v7819_v29 = vsel %vm204_vm1, %v198_v27, 0.0 }
  0x93   :  { %v6311_v30 = vpack.i.bf16 %v7816_v28, %v7819_v29 }
  0x94   :  { %6152 = vrot.lane.b32.xlu0 %v7705_v54, %s7589_s9  ;;  %6157 = vrot.lane.b32.xlu1 %v7691_v48, %s7592_s12 }
  0x98   :  { %6162 = vrot.lane.b32.xlu0 %v7673_v35, %s7590_s10  ;;  %6167 = vrot.lane.b32.xlu1 %v7673_v35, %s7589_s9 }
  0x9c   :  { %6172 = vrot.lane.b32.xlu0 %v7705_v54, %s7592_s12  ;;  %6177 = vrot.lane.b32.xlu1 %v7675_v36, %s7588_s8 }
  0xa0   :  { %6182 = vrot.lane.b32.xlu0 %v7689_v46, %s7590_s10  ;;  %6187 = vrot.lane.b32.xlu1 %v7689_v46, %s7589_s9 }
  0xa4   :  { %6192 = vrot.lane.b32.xlu0 %v7673_v35, %s7592_s12  ;;  %6197 = vrot.lane.b32.xlu1 %v7691_v48, %s7588_s8 }
  0xa8   :  { %6202 = vrot.lane.b32.xlu0 %v7675_v36, %s7591_s11  ;;  %6207 = vrot.lane.b32.xlu1 %v7675_v36, %s7590_s10 }
  0xac   :  { %6212 = vrot.lane.b32.xlu0 %v7689_v46, %s7592_s12  ;;  %6217 = vrot.lane.b32.xlu1 %v7705_v54, %s7588_s8 }
  0xb0   :  { %6222 = vrot.lane.b32.xlu0 %v7691_v48, %s7591_s11  ;;  %6227 = vrot.lane.b32.xlu1 %v7675_v36, %s7593_s13 }
  0xb4   :  { %6232 = vrot.lane.b32.xlu0 %v7705_v54, %s7593_s13  ;;  %6237 = vrot.lane.b32.xlu1 %v7705_v54, %s7591_s11 }
  0xb8   :  { %6242 = vrot.lane.b32.xlu0 %v7691_v48, %s7593_s13  ;;  %6247 = vrot.lane.b32.xlu1 %v7673_v35, %s7593_s13 }
  0xbc   :  { %6252 = vrot.lane.b32.xlu0 %v7673_v35, %s7591_s11  ;;  %6257 = vrot.lane.b32.xlu1 %v7689_v46, %s7593_s13 }
  0xc0   :  { %6262 = vrot.lane.b32.xlu0 %v7773_v9, %s7588_s8  ;;  %6272 = vrot.lane.b32.xlu1 %v7777_v10, %s7588_s8 }
  0xc4   :  { %6267 = vrot.lane.b32.xlu0 %v7675_v36, %s7594_s14  ;;  %6277 = vrot.lane.b32.xlu1 %v7691_v48, %s7594_s14 }
  0xc8   :  { %6282 = vrot.lane.b32.xlu0 %v6281_v20, %s7589_s9  ;;  %6287 = vrot.lane.b32.xlu1 %v7777_v10, %s7591_s11 }
  0xcc   :  { %6292 = vrot.lane.b32.xlu0 %v6291_v25, %s7590_s10  ;;  %6297 = vrot.lane.b32.xlu1 %v7705_v54, %s7594_s14 }
  0xd0   :  { %6307 = vrot.lane.b32.xlu0 %v6281_v20, %s7592_s12  ;;  %6302 = vrot.lane.b32.xlu1 %v6291_v25, %s7589_s9 }
  0xd4   :  { %6317 = vrot.lane.b32.xlu0 %v7673_v35, %s7594_s14  ;;  %6312 = vrot.lane.b32.xlu1 %v6311_v30, %s7590_s10 }
  0xd8   :  { %6322 = vrot.lane.b32.xlu0 %v6311_v30, %s7589_s9  ;;  %6327 = vrot.lane.b32.xlu1 %v6291_v25, %s7592_s12 }
  0xdc   :  { %6332 = vrot.lane.b32.xlu0 %v7773_v9, %s7590_s10  ;;  %6337 = vrot.lane.b32.xlu1 %v7689_v46, %s7594_s14 }
  0xe0   :  { %6347 = vrot.lane.b32.xlu0 %v6311_v30, %s7592_s12  ;;  %6342 = vrot.lane.b32.xlu1 %v7773_v9, %s7589_s9 }
  0xe4   :  { %6357 = vrot.lane.b32.xlu0 %v7777_v10, %s7590_s10  ;;  %6352 = vrot.lane.b32.xlu1 %v6281_v20, %s7588_s8 }
  0xe8   :  { %6367 = vrot.lane.b32.xlu0 %v7773_v9, %s7592_s12  ;;  %6362 = vrot.lane.b32.xlu1 %v7777_v10, %s7589_s9 }
  0xec   :  { %6377 = vrot.lane.b32.xlu0 %v6281_v20, %s7591_s11  ;;  %6372 = vrot.lane.b32.xlu1 %v6291_v25, %s7588_s8 }
  0xf0   :  { %6387 = vrot.lane.b32.xlu0 %v7777_v10, %s7592_s12  ;;  %6382 = vrot.lane.b32.xlu1 %v6281_v20, %s7590_s10 }
  0xf4   :  { %6397 = vrot.lane.b32.xlu0 %v6291_v25, %s7591_s11  ;;  %6392 = vrot.lane.b32.xlu1 %v6311_v30, %s7588_s8 }
  0xf6   :  { %v6113_v31 = vpop.permute.xlu0 %6112  ;;  %v6123_v32 = vpop.permute.xlu1 %6122 }
  0xf8   :  { %6407 = vrot.lane.b32.xlu0 %v6311_v30, %s7593_s13  ;;  %6402 = vrot.lane.b32.xlu1 %v6281_v20, %s7593_s13 }
  0xfa   :  { %v6118_v33 = vpop.permute.xlu0 %6117  ;;  %v6133_v34 = vpop.permute.xlu1 %6132 }
  0xfc   :  { %6422 = vrot.lane.b32.xlu0 %v7773_v9, %s7593_s13  ;;  %6412 = vrot.lane.b32.xlu1 %v6311_v30, %s7591_s11 }
  0xfe   :  { %v6128_v35 = vpop.permute.xlu0 %6127  ;;  %v6138_v36 = vpop.permute.xlu1 %6137 }
 0x100   :  { %6437 = vrot.lane.b32.xlu0 %v6118_v33, %s7594_s14  ;;  %6417 = vrot.lane.b32.xlu1 %v6291_v25, %s7593_s13 }
 0x102   :  { %v6143_v37 = vpop.permute.xlu0 %6142  ;;  %v6148_v38 = vpop.permute.xlu1 %6147 }
 0x104   :  { %6427 = vrot.lane.b32.xlu1 %v7773_v9, %s7591_s11  ;;  %6442 = vrot.lane.b32.xlu0 %v6123_v32, %s7594_s14 }
 0x106   :  { %v6153_v39 = vpop.permute.xlu0 %6152  ;;  %v6158_v40 = vpop.permute.xlu1 %6157 }
 0x108   :  { %6432 = vrot.lane.b32.xlu1 %v6113_v31, %s7594_s14  ;;  %6452 = vrot.lane.b32.xlu0 %v6133_v34, %s7594_s14 }
 0x10a   :  { %v6163_v41 = vpop.permute.xlu0 %6162  ;;  %v6168_v42 = vpop.permute.xlu1 %6167 }
 0x10c   :  { %6447 = vrot.lane.b32.xlu1 %v6128_v35, %s7594_s14  ;;  %6462 = vrot.lane.b32.xlu0 %v6143_v37, %s7594_s14 }
 0x10e   :  { %v6173_v43 = vpop.permute.xlu0 %6172  ;;  %v6178_v44 = vpop.permute.xlu1 %6177 }
 0x110   :  { %6457 = vrot.lane.b32.xlu1 %v6138_v36, %s7594_s14  ;;  %6472 = vrot.lane.b32.xlu0 %v6153_v39, %s7594_s14 }
 0x112   :  { %v6183_v45 = vpop.permute.xlu0 %6182  ;;  %v6188_v46 = vpop.permute.xlu1 %6187 }
 0x114   :  { %6467 = vrot.lane.b32.xlu1 %v6148_v38, %s7594_s14  ;;  %6482 = vrot.lane.b32.xlu0 %v6163_v41, %s7594_s14 }
 0x116   :  { %v6193_v47 = vpop.permute.xlu0 %6192  ;;  %v6198_v48 = vpop.permute.xlu1 %6197 }
 0x118   :  { %6477 = vrot.lane.b32.xlu1 %v6158_v40, %s7594_s14  ;;  %6492 = vrot.lane.b32.xlu0 %v6173_v43, %s7594_s14 }
 0x11a   :  { %v6203_v49 = vpop.permute.xlu0 %6202  ;;  %v6208_v50 = vpop.permute.xlu1 %6207 }
 0x11c   :  { %6487 = vrot.lane.b32.xlu1 %v6168_v42, %s7594_s14  ;;  %6502 = vrot.lane.b32.xlu0 %v6183_v45, %s7594_s14 }
 0x11e   :  { %v6213_v51 = vpop.permute.xlu0 %6212  ;;  %v6218_v52 = vpop.permute.xlu1 %6217 }
 0x120   :  { %6497 = vrot.lane.b32.xlu1 %v6178_v44, %s7594_s14  ;;  %6512 = vrot.lane.b32.xlu0 %v6193_v47, %s7594_s14 }
 0x122   :  { %v6223_v53 = vpop.permute.xlu0 %6222  ;;  %v6228_v54 = vpop.permute.xlu1 %6227 }
 0x124   :  { %6507 = vrot.lane.b32.xlu1 %v6188_v46, %s7594_s14  ;;  %6522 = vrot.lane.b32.xlu0 %v6203_v49, %s7594_s14 }
 0x126   :  { %v6233_v55 = vpop.permute.xlu0 %6232  ;;  %v6238_v56 = vpop.permute.xlu1 %6237 }
 0x128   :  { %6517 = vrot.lane.b32.xlu1 %v6198_v48, %s7594_s14  ;;  %6532 = vrot.lane.b32.xlu0 %v6213_v51, %s7594_s14 }
 0x12a   :  { %v6243_v57 = vpop.permute.xlu0 %6242  ;;  %v6248_v58 = vpop.permute.xlu1 %6247 }
 0x12c   :  { %6527 = vrot.lane.b32.xlu1 %v6208_v50, %s7594_s14  ;;  %6542 = vrot.lane.b32.xlu0 %v6223_v53, %s7594_s14 }
 0x12e   :  { %v6253_v59 = vpop.permute.xlu0 %6252  ;;  %v6258_v60 = vpop.permute.xlu1 %6257 }
 0x130   :  { %6537 = vrot.lane.b32.xlu1 %v6218_v52, %s7594_s14  ;;  %6552 = vrot.lane.b32.xlu0 %v6233_v55, %s7594_s14 }
 0x132   :  { %v7889_v61 = vpop.permute.xlu0 %6262  ;;  %v7891_v62 = vpop.permute.xlu1 %6272 }
 0x133   :  { %v6264_v55 = vunpack.i.l.bf16 %v7889_v61 }
 0x134   :  { %6547 = vrot.lane.b32.xlu1 %v6228_v54, %s7594_s14  ;;  %6557 = vrot.lane.b32.xlu0 %v6238_v56, %s7594_s14  ;;  %v6265_v54 = vunpack.i.h.bf16 %v7889_v61  ;;  %v6275_v56 = vunpack.i.h.bf16 %v7891_v62 }
 0x136   :  { %v6268_v0 = vpop.permute.xlu0 %6267  ;;  %v6278_v1 = vpop.permute.xlu1 %6277 }
 0x137   :  { %v6270_v42 = vunpack.i.h.bf16 %v6268_v0  ;;  %v6269_v43 = vunpack.i.l.bf16 %v6268_v0  ;;  %v6280_v44 = vunpack.i.h.bf16 %v6278_v1  ;;  %v6279_v45 = vunpack.i.l.bf16 %v6278_v1 }
 0x138   :  { %6562 = vrot.lane.b32.xlu1 %v6243_v57, %s7594_s14  ;;  %6572 = vrot.lane.b32.xlu0 %v6248_v58, %s7594_s14  ;;  %v6274_v57 = vunpack.i.l.bf16 %v7891_v62 }
 0x139   :  { %v800_v50 = vsel %vm799_vm2, %v7789_v16, %v6269_v43  ;;  %v801_v51 = vsel %vm799_vm2, %v7786_v15, %v6270_v42  ;;  %v7967_v52 = vsel %vm799_vm2, %v7803_v22, %v6279_v45  ;;  %v7971_v53 = vsel %vm799_vm2, %v7800_v21, %v6280_v44 }
 0x13a   :  { %v7899_v7 = vpop.permute.xlu0 %6282  ;;  %v7901_v8 = vpop.permute.xlu1 %6287 }
 0x13b   :  { %v6285_v63 = vunpack.i.h.bf16 %v7899_v7  ;;  %v6284_v62 = vunpack.i.l.bf16 %v7899_v7  ;;  %v6290_v0 = vunpack.i.h.bf16 %v7901_v8  ;;  %v6289_v1 = vunpack.i.l.bf16 %v7901_v8 }
 0x13c   :  { %6567 = vrot.lane.b32.xlu1 %v7777_v10, %s7593_s13  ;;  %6577 = vrot.lane.b32.xlu0 %v6253_v59, %s7594_s14 }
 0x13e   :  { %v7906_v9 = vpop.permute.xlu0 %6292  ;;  %v6298_v11 = vpop.permute.xlu1 %6297 }
 0x13f   :  { %v6300_v46 = vunpack.i.h.bf16 %v6298_v11  ;;  %v6299_v47 = vunpack.i.l.bf16 %v6298_v11  ;;  %v6294_v6 = vunpack.i.l.bf16 %v7906_v9 }
 0x140   :  { %6582 = vrot.lane.b32.xlu0 %v6258_v60, %s7594_s14  ;;  %726 = vrot.lane.b32.xlu1 %v9525_v12, %s7594_s14  ;;  %v871_v60 = vpack.c.bf16 %v801_v51, %v800_v50 }
 0x141   :  { %v7981_v15 = vsel %vm799_vm2, %v7819_v29, %v6299_v47  ;;  %v7985_v22 = vsel %vm799_vm2, %v7816_v28, %v6300_v46  ;;  %v6295_v29 = vunpack.i.h.bf16 %v7906_v9 }
 0x142   :  { %v7911_v13 = vpop.permute.xlu0 %6307  ;;  %v7913_v14 = vpop.permute.xlu1 %6302 }
 0x143   :  { %v6310_v28 = vunpack.i.h.bf16 %v7911_v13  ;;  %v6309_v42 = vunpack.i.l.bf16 %v7911_v13  ;;  %v6305_v43 = vunpack.i.h.bf16 %v7913_v14  ;;  %v6304_v13 = vunpack.i.l.bf16 %v7913_v14 }
 0x146   :  { %v7915_v17 = vpop.permute.xlu0 %6317  ;;  %v7917_v18 = vpop.permute.xlu1 %6312 }
 0x147   :  { %v6320_v44 = vunpack.i.h.bf16 %v7915_v17  ;;  %v6319_v7 = vunpack.i.l.bf16 %v7915_v17  ;;  %v6315_v61 = vunpack.i.h.bf16 %v7917_v18 }
 0x14a   :  { %v7919_v10 = vpop.permute.xlu0 %6322  ;;  %v7921_v19 = vpop.permute.xlu1 %6327 }
 0x14e   :  { %v7923_v20 = vpop.permute.xlu0 %6332  ;;  %v7925_v23 = vpop.permute.xlu1 %6337 }
 0x152   :  { %v7927_v24 = vpop.permute.xlu0 %6347  ;;  %v7929_v25 = vpop.permute.xlu1 %6342 }
 0x156   :  { %v7931_v26 = vpop.permute.xlu0 %6357  ;;  %v7933_v27 = vpop.permute.xlu1 %6352 }
 0x15a   :  { %v7935_v30 = vpop.permute.xlu0 %6367  ;;  %v7937_v31 = vpop.permute.xlu1 %6362 }
 0x15e   :  { %v7939_v32 = vpop.permute.xlu0 %6377  ;;  %v7941_v33 = vpop.permute.xlu1 %6372 }
 0x162   :  { %v7943_v34 = vpop.permute.xlu0 %6387  ;;  %v7945_v35 = vpop.permute.xlu1 %6382 }
 0x166   :  { %v7947_v36 = vpop.permute.xlu0 %6397  ;;  %v7949_v37 = vpop.permute.xlu1 %6392 }
 0x16a   :  { %v7951_v38 = vpop.permute.xlu0 %6407  ;;  %v7953_v39 = vpop.permute.xlu1 %6402 }
 0x16e   :  { %v7955_v40 = vpop.permute.xlu0 %6422  ;;  %v7957_v41 = vpop.permute.xlu1 %6412 }
 0x16f   :  { %9534 = vst [vmem:[#allocation2_spill] sm:$0xff] %v7955_v40  ;;  %9535 = vst [vmem:[#allocation3_spill] sm:$0xff] %v7957_v41 }
 0x172   :  { %v6438_v48 = vpop.permute.xlu0 %6437  ;;  %v7959_v49 = vpop.permute.xlu1 %6417 }
 0x173   :  { %9536 = vst [vmem:[#allocation4_spill] sm:$0xff] %v7959_v49  ;;  %v6440_v21 = vunpack.i.h.bf16 %v6438_v48  ;;  %v6439_v59 = vunpack.i.l.bf16 %v6438_v48 }
 0x175   :  { %v818_v48 = vsel %vm799_vm2, %v6274_v57, %v6439_v59  ;;  %v819_v9 = vsel %vm799_vm2, %v6275_v56, %v6440_v21  ;;  %v8010_v57 = vsel %vm799_vm2, %v7759_v3, %v6319_v7  ;;  %v8014_v56 = vsel %vm799_vm2, %v7756_v2, %v6320_v44 }
 0x176   :  { %v7977_v16 = vpop.permute.xlu1 %6427  ;;  %v6443_v58 = vpop.permute.xlu0 %6442 }
 0x177   :  { %9537 = vst [vmem:[#allocation5_spill] sm:$0xff] %v7977_v16  ;;  %v6445_v50 = vunpack.i.h.bf16 %v6443_v58  ;;  %v6444_v51 = vunpack.i.l.bf16 %v6443_v58 }
 0x17a   :  { %v6433_v45 = vpop.permute.xlu1 %6432  ;;  %v6453_v46 = vpop.permute.xlu0 %6452 }
 0x17b   :  { %v6435_v8 = vunpack.i.h.bf16 %v6433_v45  ;;  %v6434_v47 = vunpack.i.l.bf16 %v6433_v45  ;;  %v6455_v12 = vunpack.i.h.bf16 %v6453_v46  ;;  %v6454_v11 = vunpack.i.l.bf16 %v6453_v46 }
 0x17c   :  { %v880_v45 = vpack.c.bf16 %v819_v9, %v818_v48  ;;  %v821_v46 = vsel %vm799_vm2, %v6285_v63, %v6445_v50  ;;  %v874_v63 = vpack.c.bf16 %v8014_v56, %v8010_v57  ;;  %v9538_v48 = vpack.c.bf16 %v7971_v53, %v7967_v52 }
 0x17d   :  { %v816_v16 = vsel %vm799_vm2, %v6264_v55, %v6434_v47  ;;  %v817_v17 = vsel %vm799_vm2, %v6265_v54, %v6435_v8  ;;  %v832_v55 = vsel %vm799_vm2, %v6294_v6, %v6454_v11  ;;  %v833_v54 = vsel %vm799_vm2, %v6295_v29, %v6455_v12 }
 0x17e   :  { %v6448_v49 = vpop.permute.xlu1 %6447  ;;  %v6463_v40 = vpop.permute.xlu0 %6462  ;;  %v879_v41 = vpack.c.bf16 %v817_v17, %v816_v16  ;;  %v820_v16 = vsel %vm799_vm2, %v6284_v62, %v6444_v51  ;;  %v6340_v11 = vunpack.i.h.bf16 %v7925_v23  ;;  %v6330_v50 = vunpack.i.h.bf16 %v7921_v19 }
 0x17f   :  { %v6450_v58 = vunpack.i.h.bf16 %v6448_v49  ;;  %v6449_v14 = vunpack.i.l.bf16 %v6448_v49  ;;  %v6465_v21 = vunpack.i.h.bf16 %v6463_v40  ;;  %v6464_v59 = vunpack.i.l.bf16 %v6463_v40 }
 0x180   :  { %5316 = vmatprep.subr.bf16.mxu0 %v879_v41  ;;  %v6314_v40 = vunpack.i.l.bf16 %v7917_v18  ;;  %v6325_v41 = vunpack.i.h.bf16 %v7919_v10  ;;  %v6329_v51 = vunpack.i.l.bf16 %v7921_v19  ;;  %v6334_v17 = vunpack.i.l.bf16 %v7923_v20 }
 0x181   :  { %5317 = vmatpush3.bf16.msra.mxu0 %v871_v60  ;;  %v848_v3 = vsel %vm799_vm2, %v6289_v1, %v6449_v14  ;;  %v849_v7 = vsel %vm799_vm2, %v6290_v0, %v6450_v58  ;;  %v850_v2 = vsel %vm799_vm2, %v6309_v42, %v6464_v59  ;;  %v851_v49 = vsel %vm799_vm2, %v6310_v28, %v6465_v21 }
 0x182   :  { %5318 = vmatprep.subr.bf16.mxu0 %v880_v45  ;;  %v6458_v6 = vpop.permute.xlu1 %6457  ;;  %v6473_v12 = vpop.permute.xlu0 %6472  ;;  %v895_v29 = vpack.c.bf16 %v849_v7, %v848_v3  ;;  %v6324_v60 = vunpack.i.l.bf16 %v7919_v10  ;;  %v887_v0 = vpack.c.bf16 %v833_v54, %v832_v55  ;;  %v6339_v28 = vunpack.i.l.bf16 %v7925_v23 }
 0x183   :  { %v6460_v62 = vunpack.i.h.bf16 %v6458_v6  ;;  %v6459_v1 = vunpack.i.l.bf16 %v6458_v6  ;;  %v881_v42 = vpack.c.bf16 %v821_v46, %v820_v16  ;;  %v896_v44 = vpack.c.bf16 %v851_v49, %v850_v2 }
 0x184   :  { %5344 = vmatprep.subr.bf16.mxu1 %v895_v29  ;;  %v6475_v8 = vunpack.i.h.bf16 %v6473_v12  ;;  %v6474_v47 = vunpack.i.l.bf16 %v6473_v12  ;;  %v6335_v23 = vunpack.i.h.bf16 %v7923_v20  ;;  %v809_v19 = vsel %vm799_vm2, %v7762_v4, %v6340_v11 }
 0x185   :  { %5319 = vmatpush3.bf16.msra.mxu0 %v9538_v48  ;;  %5345 = vmatpush3.bf16.msra.mxu1 %v887_v0  ;;  %v822_v9 = vsel %vm799_vm2, %v6304_v13, %v6459_v1  ;;  %v823_v10 = vsel %vm799_vm2, %v6305_v43, %v6460_v62  ;;  %v6350_v13 = vunpack.i.h.bf16 %v7927_v24  ;;  %v808_v43 = vsel %vm799_vm2, %v7765_v5, %v6339_v28 }
 0x186   :  { %v6468_v45 = vpop.permute.xlu1 %6467  ;;  %v6483_v57 = vpop.permute.xlu0 %6482  ;;  %5320 = vmatprep.subr.bf16.mxu0 %v881_v42  ;;  %5346 = vmatprep.subr.bf16.mxu1 %v896_v44  ;;  %v882_v14 = vpack.c.bf16 %v823_v10, %v822_v9  ;;  %v9539_v20 = vpack.c.bf16 %v7985_v22, %v7981_v15  ;;  %v824_v55 = vsel %vm799_vm2, %v6324_v60, %v6474_v47  ;;  %v6349_v16 = vunpack.i.l.bf16 %v7927_v24 }
 0x187   :  { %v6470_v56 = vunpack.i.h.bf16 %v6468_v45  ;;  %v6469_v52 = vunpack.i.l.bf16 %v6468_v45  ;;  %v6485_v53 = vunpack.i.h.bf16 %v6483_v57  ;;  %v6484_v58 = vunpack.i.l.bf16 %v6483_v57 }
 0x188   :  { %v825_v54 = vsel %vm799_vm2, %v6325_v41, %v6475_v8  ;;  %v6344_v29 = vunpack.i.l.bf16 %v7929_v25  ;;  %v6359_v60 = vunpack.i.l.bf16 %v7931_v26  ;;  %v6360_v8 = vunpack.i.h.bf16 %v7931_v26 }
 0x189   :  { %5321 = vmatpush3.bf16.msra.mxu0 %v9539_v20  ;;  %v834_v21 = vsel %vm799_vm2, %v6314_v40, %v6469_v52  ;;  %v835_v59 = vsel %vm799_vm2, %v6315_v61, %v6470_v56  ;;  %v836_v3 = vsel %vm799_vm2, %v6334_v17, %v6484_v58  ;;  %v837_v15 = vsel %vm799_vm2, %v6335_v23, %v6485_v53 }
 0x18a   :  { %v6478_v5 = vpop.permute.xlu1 %6477  ;;  %v6493_v46 = vpop.permute.xlu0 %6492  ;;  %5322 = vmatprep.subr.bf16.mxu0 %v882_v14  ;;  %v888_v4 = vpack.c.bf16 %v835_v59, %v834_v21  ;;  %v6345_v61 = vunpack.i.h.bf16 %v7929_v25  ;;  %v883_v49 = vpack.c.bf16 %v825_v54, %v824_v55  ;;  %v875_v40 = vpack.c.bf16 %v809_v19, %v808_v43 }
 0x18b   :  { %v6480_v22 = vunpack.i.h.bf16 %v6478_v5  ;;  %v6479_v7 = vunpack.i.l.bf16 %v6478_v5  ;;  %v6495_v2 = vunpack.i.h.bf16 %v6493_v46  ;;  %v6494_v18 = vunpack.i.l.bf16 %v6493_v46 }
 0x18c   :  { %5347 = vmatpush3.bf16.msra.mxu1 %v888_v4  ;;  %v889_v11 = vpack.c.bf16 %v837_v15, %v836_v3  ;;  %v6355_v47 = vunpack.i.h.bf16 %v7933_v27  ;;  %v6354_v9 = vunpack.i.l.bf16 %v7933_v27  ;;  %v6369_v23 = vunpack.i.l.bf16 %v7935_v30 }
 0x18d   :  { %5323 = vmatpush3.bf16.msra.mxu0 %v874_v63  ;;  %v852_v24 = vsel %vm799_vm2, %v6329_v51, %v6479_v7  ;;  %v853_v41 = vsel %vm799_vm2, %v6330_v50, %v6480_v22  ;;  %v854_v6 = vsel %vm799_vm2, %v6349_v16, %v6494_v18  ;;  %v855_v12 = vsel %vm799_vm2, %v6350_v13, %v6495_v2 }
 0x18e   :  { %v6488_v62 = vpop.permute.xlu1 %6487  ;;  %v6503_v1 = vpop.permute.xlu0 %6502  ;;  %5324 = vmatprep.subr.bf16.mxu0 %v883_v49  ;;  %v897_v0 = vpack.c.bf16 %v853_v41, %v852_v24  ;;  %v898_v48 = vpack.c.bf16 %v855_v12, %v854_v6  ;;  %v6370_v51 = vunpack.i.h.bf16 %v7935_v30  ;;  %v6365_v58 = vunpack.i.h.bf16 %v7937_v31 }
 0x18f   :  { %v6490_v28 = vunpack.i.h.bf16 %v6488_v62  ;;  %v6489_v42 = vunpack.i.l.bf16 %v6488_v62  ;;  %v6505_v63 = vunpack.i.h.bf16 %v6503_v1  ;;  %v6504_v44 = vunpack.i.l.bf16 %v6503_v1 }
 0x190   :  { %5348 = vmatprep.subr.bf16.mxu1 %v897_v0  ;;  %v6364_v13 = vunpack.i.l.bf16 %v7937_v31  ;;  %v6380_v21 = vunpack.i.h.bf16 %v7939_v32  ;;  %v6379_v59 = vunpack.i.l.bf16 %v7939_v32  ;;  %v6375_v15 = vunpack.i.h.bf16 %v7941_v33 }
 0x191   :  { %5325 = vmatpush3.bf16.msra.mxu0 %v875_v40  ;;  %5349 = vmatpush3.bf16.msra.mxu1 %v889_v11  ;;  %v826_v25 = vsel %vm799_vm2, %v6344_v29, %v6489_v42  ;;  %v827_v10 = vsel %vm799_vm2, %v6345_v61, %v6490_v28  ;;  %v838_v50 = vsel %vm799_vm2, %v6359_v60, %v6504_v44  ;;  %v6374_v22 = vunpack.i.l.bf16 %v7941_v33 }
 0x192   :  { %v6498_v17 = vpop.permute.xlu1 %6497  ;;  %v6513_v26 = vpop.permute.xlu0 %6512  ;;  %5350 = vmatprep.subr.bf16.mxu1 %v898_v48  ;;  %v884_v45 = vpack.c.bf16 %v827_v10, %v826_v25  ;;  %v839_v57 = vsel %vm799_vm2, %v6360_v8, %v6505_v63  ;;  %v6390_v61 = vunpack.i.h.bf16 %v7943_v34  ;;  %v6389_v49 = vunpack.i.l.bf16 %v7943_v34 }
 0x193   :  { %v6500_v56 = vunpack.i.h.bf16 %v6498_v17  ;;  %v6499_v27 = vunpack.i.l.bf16 %v6498_v17  ;;  %v6515_v52 = vunpack.i.h.bf16 %v6513_v26  ;;  %v6514_v53 = vunpack.i.l.bf16 %v6513_v26 }
 0x194   :  { %5326 = vmatprep.subr.bf16.mxu0 %v884_v45  ;;  %v890_v14 = vpack.c.bf16 %v839_v57, %v838_v50  ;;  %v6385_v62 = vunpack.i.h.bf16 %v7945_v35  ;;  %v6384_v1 = vunpack.i.l.bf16 %v7945_v35  ;;  %v6400_v42 = vunpack.i.h.bf16 %v7947_v36 }
 0x195   :  { %v810_v43 = vsel %vm799_vm2, %v6354_v9, %v6499_v27  ;;  %v811_v30 = vsel %vm799_vm2, %v6355_v47, %v6500_v56  ;;  %v856_v19 = vsel %vm799_vm2, %v6369_v23, %v6514_v53  ;;  %v857_v20 = vsel %vm799_vm2, %v6370_v51, %v6515_v52 }
 0x196   :  { %5351 = vmatpush3.bf16.msra.mxu1 %v890_v14  ;;  %v6508_v55 = vpop.permute.xlu1 %6507  ;;  %v6523_v54 = vpop.permute.xlu0 %6522  ;;  %v876_v16 = vpack.c.bf16 %v811_v30, %v810_v43  ;;  %v899_v5 = vpack.c.bf16 %v857_v20, %v856_v19  ;;  %v6399_v63 = vunpack.i.l.bf16 %v7947_v36  ;;  %v6395_v50 = vunpack.i.h.bf16 %v7949_v37 }
 0x197   :  { %v6510_v31 = vunpack.i.h.bf16 %v6508_v55  ;;  %v6509_v46 = vunpack.i.l.bf16 %v6508_v55  ;;  %v6525_v4 = vunpack.i.h.bf16 %v6523_v54  ;;  %v6524_v3 = vunpack.i.l.bf16 %v6523_v54 }
 0x198   :  { %5327 = vmatpush3.bf16.msra.mxu0 %v876_v16  ;;  %5352 = vmatprep.subr.bf16.mxu1 %v899_v5  ;;  %v6394_v51 = vunpack.i.l.bf16 %v7949_v37  ;;  %v6410_v45 = vunpack.i.h.bf16 %v7951_v38  ;;  %v6409_v57 = vunpack.i.l.bf16 %v7951_v38  ;;  %v6405_v43 = vunpack.i.h.bf16 %v7953_v39 }
 0x199   :  { %v828_v7 = vsel %vm799_vm2, %v6364_v13, %v6509_v46  ;;  %v829_v2 = vsel %vm799_vm2, %v6365_v58, %v6510_v31  ;;  %v840_v32 = vsel %vm799_vm2, %v6379_v59, %v6524_v3  ;;  %v841_v18 = vsel %vm799_vm2, %v6380_v21, %v6525_v4  ;;  %v9540_v59 = vld [vmem:[#allocation3_spill] sm:$0xff] }
 0x19a   :  { %v6518_v40 = vpop.permute.xlu1 %6517  ;;  %v6533_v24 = vpop.permute.xlu0 %6532  ;;  %v885_v41 = vpack.c.bf16 %v829_v2, %v828_v7  ;;  %v891_v6 = vpack.c.bf16 %v841_v18, %v840_v32  ;;  %v6404_v30 = vunpack.i.l.bf16 %v7953_v39  ;;  %v6415_v55 = vunpack.i.h.bf16 %v9540_v59  ;;  %v9541_v7 = vld [vmem:[#allocation2_spill] sm:$0xff] }
 0x19b   :  { %v6520_v12 = vunpack.i.h.bf16 %v6518_v40  ;;  %v6519_v33 = vunpack.i.l.bf16 %v6518_v40  ;;  %v6535_v29 = vunpack.i.h.bf16 %v6533_v24  ;;  %v6534_v60 = vunpack.i.l.bf16 %v6533_v24  ;;  %v9542_v24 = vld [vmem:[#allocation4_spill] sm:$0xff] }
 0x19c   :  { %5328 = vmatprep.subr.bf16.mxu0 %v885_v41  ;;  %5353 = vmatpush3.bf16.msra.mxu1 %v891_v6  ;;  %v6414_v54 = vunpack.i.l.bf16 %v9540_v59  ;;  %v6425_v2 = vunpack.i.h.bf16 %v9541_v7  ;;  %v6424_v32 = vunpack.i.l.bf16 %v9541_v7  ;;  %v6420_v41 = vunpack.i.h.bf16 %v9542_v24 }
 0x19d   :  { %v812_v0 = vsel %vm799_vm2, %v6374_v22, %v6519_v33  ;;  %v813_v11 = vsel %vm799_vm2, %v6375_v15, %v6520_v12  ;;  %v858_v34 = vsel %vm799_vm2, %v6389_v49, %v6534_v60  ;;  %v859_v28 = vsel %vm799_vm2, %v6390_v61, %v6535_v29  ;;  %v7556_v22 = vld [vmem:[%s7885_s18] ss:$20 sps:$4 sm:$0xff]  }
 0x19e   :  { %v6528_v44 = vpop.permute.xlu1 %6527  ;;  %v6543_v8 = vpop.permute.xlu0 %6542  ;;  %v877_v47 = vpack.c.bf16 %v813_v11, %v812_v0  ;;  %v900_v48 = vpack.c.bf16 %v859_v28, %v858_v34  ;;  %v6419_v6 = vunpack.i.l.bf16 %v9542_v24 }
 0x19f   :  { %v6530_v9 = vunpack.i.h.bf16 %v6528_v44  ;;  %v6529_v35 = vunpack.i.l.bf16 %v6528_v44  ;;  %v6545_v25 = vunpack.i.h.bf16 %v6543_v8  ;;  %v6544_v10 = vunpack.i.l.bf16 %v6543_v8 }
 0x1a0   :  { %5329 = vmatpush3.bf16.msra.mxu0 %v877_v47  ;;  %5354 = vmatprep.subr.bf16.mxu1 %v900_v48 }
 0x1a1   :  { %v830_v23 = vsel %vm799_vm2, %v6384_v1, %v6529_v35  ;;  %v831_v17 = vsel %vm799_vm2, %v6385_v62, %v6530_v9  ;;  %v842_v36 = vsel %vm799_vm2, %v6399_v63, %v6544_v10  ;;  %v843_v26 = vsel %vm799_vm2, %v6400_v42, %v6545_v25  ;;  %v7559_v62 = vld [vmem:[%s7885_s18 + $0x2c] ss:$20 sps:$4 sm:$0xff]   ;;  %v9543_v35 = vld [vmem:[#allocation5_spill] sm:$0xff] }
 0x1a2   :  { %v6538_v56 = vpop.permute.xlu1 %6537  ;;  %v6553_v27 = vpop.permute.xlu0 %6552  ;;  %v886_v52 = vpack.c.bf16 %v831_v17, %v830_v23  ;;  %v892_v53 = vpack.c.bf16 %v843_v26, %v842_v36  ;;  %v6430_v25 = vunpack.i.h.bf16 %v9543_v35  ;;  %v6429_v10 = vunpack.i.l.bf16 %v9543_v35  ;;  %v7561_v23 = vld [vmem:[%s7885_s18 + $0x28] ss:$20 sps:$4 sm:$0xff]   ;;  %v7568_v17 = vld [vmem:[%s7885_s18 + $0x10] ss:$20 sps:$4 sm:$0xff]  }
 0x1a3   :  { %v6540_v58 = vunpack.i.h.bf16 %v6538_v56  ;;  %v6539_v37 = vunpack.i.l.bf16 %v6538_v56  ;;  %v6555_v13 = vunpack.i.h.bf16 %v6553_v27  ;;  %v6554_v14 = vunpack.i.l.bf16 %v6553_v27 }
 0x1a4   :  { %5330 = vmatprep.subr.bf16.mxu0 %v886_v52  ;;  %5355 = vmatpush3.bf16.msra.mxu1 %v892_v53  ;;  %v7597_v52 = vmov 0  }
 0x1a5   :  { %v814_v19 = vsel %vm799_vm2, %v6394_v51, %v6539_v37  ;;  %v815_v20 = vsel %vm799_vm2, %v6395_v50, %v6540_v58  ;;  %v864_v38 = vsel %vm799_vm2, %v6409_v57, %v6554_v14  ;;  %v865_v21 = vsel %vm799_vm2, %v6410_v45, %v6555_v13  ;;  %v7562_v14 = vld [vmem:[%s7885_s18 + $0x8] ss:$20 sps:$4 sm:$0xff]  }
 0x1a6   :  { %v6548_v16 = vpop.permute.xlu1 %6547  ;;  %v6558_v5 = vpop.permute.xlu0 %6557  ;;  %v878_v31 = vpack.c.bf16 %v815_v20, %v814_v19  ;;  %v903_v46 = vpack.c.bf16 %v865_v21, %v864_v38  ;;  %v8134_v53 = vsel %vm964_vm3, 65535, %v7597_v52  ;;  %v7565_v19 = vld [vmem:[%s7885_s18 + $0x34] ss:$20 sps:$4 sm:$0xff]  }
 0x1a7   :  { %v6550_v39 = vunpack.i.h.bf16 %v6548_v16  ;;  %v6549_v4 = vunpack.i.l.bf16 %v6548_v16  ;;  %v6560_v3 = vunpack.i.h.bf16 %v6558_v5  ;;  %v6559_v15 = vunpack.i.l.bf16 %v6558_v5 }
 0x1a8   :  { %5331 = vmatpush3.bf16.msra.mxu0 %v878_v31 }
 0x1a9   :  { %5547 = vmatprep.subr.bf16.mxu0 %v903_v46  ;;  %v860_v18 = vsel %vm799_vm2, %v6404_v30, %v6549_v4  ;;  %v861_v61 = vsel %vm799_vm2, %v6405_v43, %v6550_v39  ;;  %v844_v49 = vsel %vm799_vm2, %v6414_v54, %v6559_v15  ;;  %v845_v40 = vsel %vm799_vm2, %v6415_v55, %v6560_v3  ;;  %v7567_v55 = vld [vmem:[%s7885_s18 + $0x30] ss:$20 sps:$4 sm:$0xff]   ;;  %v7569_v54 = vld [vmem:[%s7885_s18 + $0x38] ss:$20 sps:$4 sm:$0xff]   ;;  %s5207_s18 = sld [smem:[%s9524_s0 + %s7594_s14]]  }
 0x1aa   :  { %v6563_v12 = vpop.permute.xlu1 %6562  ;;  %v6573_v33 = vpop.permute.xlu0 %6572  ;;  %v901_v29 = vpack.c.bf16 %v861_v61, %v860_v18  ;;  %v893_v60 = vpack.c.bf16 %v845_v40, %v844_v49 }
 0x1ab   :  { %v6565_v1 = vunpack.i.h.bf16 %v6563_v12  ;;  %v6564_v0 = vunpack.i.l.bf16 %v6563_v12  ;;  %v6575_v11 = vunpack.i.h.bf16 %v6573_v33  ;;  %v6574_v34 = vunpack.i.l.bf16 %v6573_v33  ;;  %1003 = vmatmul.mubr.bf16.vlgmr.msra.gmra.mrb[0].mxu0 %v7556_v22 }
 0x1ac   :  { %5356 = vmatprep.subr.bf16.mxu1 %v901_v29  ;;  %5548 = vmatpush3.bf16.msra.mxu0 %v903_v46 }
 0x1ad   :  { %5357 = vmatpush3.bf16.msra.mxu1 %v893_v60  ;;  %v862_v28 = vsel %vm799_vm2, %v6419_v6, %v6564_v0  ;;  %v863_v42 = vsel %vm799_vm2, %v6420_v41, %v6565_v1  ;;  %v866_v63 = vsel %vm799_vm2, %v6424_v32, %v6574_v34  ;;  %v867_v44 = vsel %vm799_vm2, %v6425_v2, %v6575_v11 }
 0x1ae   :  { %v6568_v8 = vpop.permute.xlu1 %6567  ;;  %v6578_v47 = vpop.permute.xlu0 %6577  ;;  %v902_v48 = vpack.c.bf16 %v863_v42, %v862_v28  ;;  %v904_v9 = vpack.c.bf16 %v867_v44, %v866_v63  ;;  %1010 = vmatprep.mubr.bf16.mxu0 %v7559_v62 }
 0x1af   :  { %v6580_v50 = vunpack.i.h.bf16 %v6578_v47  ;;  %v6579_v51 = vunpack.i.l.bf16 %v6578_v47  ;;  %v6570_v45 = vunpack.i.h.bf16 %v6568_v8  ;;  %v6569_v58 = vunpack.i.l.bf16 %v6568_v8 }
 0x1b0   :  { %5358 = vmatprep.subr.bf16.mxu1 %v902_v48  ;;  %5549 = vmatprep.subr.bf16.mxu0 %v904_v9 }
 0x1b1   :  { %5550 = vmatpush3.bf16.msra.mxu0 %v904_v9  ;;  %v846_v36 = vsel %vm799_vm2, %v6429_v10, %v6579_v51  ;;  %v847_v26 = vsel %vm799_vm2, %v6430_v25, %v6580_v50 }
 0x1b2   :  { %v6583_v57 = vpop.permute.xlu0 %6582  ;;  %v894_v56 = vpack.c.bf16 %v847_v26, %v846_v36  ;;  %v727_v27 = vpop.permute.xlu1 %726 }
 0x1b3   :  { %v6585_v37 = vunpack.i.h.bf16 %v6583_v57  ;;  %v6584_v13 = vunpack.i.l.bf16 %v6583_v57  ;;  %1011 = vmatmul.mubr.bf16.gmra.mrb[4].mxu0 %v7561_v23  ;;  %v870_v43 = vsel %vm799_vm2, 1.0, %v727_v27 }
 0x1b4   :  { %5359 = vmatpush3.bf16.msra.mxu1 %v894_v56  ;;  %v906_v30 = vpack.c.bf16 %v870_v43, %v870_v43  ;;  %5555 = vmatprep.mubr.msk.bf16.mxu0 %vm957_vm4, %v7568_v17 }
 0x1b5   :  { %v868_v20 = vsel %vm799_vm2, %v6569_v58, %v6584_v13  ;;  %v869_v38 = vsel %vm799_vm2, %v6570_v45, %v6585_v37 }
 0x1b6   :  { %v905_v21 = vpack.c.bf16 %v869_v38, %v868_v20  ;;  %v8143_v59 = vand.u32 %v8134_v53, %v906_v30 }
 0x1b7   :  { %1052 = vmatmul.mubr.bf16.vlgmr.msra.gmra.mrb[0].mxu1 %v7562_v14 }
 0x1b8   :  { %5551 = vmatprep.subr.bf16.mxu0 %v905_v21  ;;  %1059 = vmatprep.mubr.bf16.mxu1 %v7565_v19 }
 0x1b9   :  { %5552 = vmatpush3.bf16.msra.mxu0 %v905_v21 }
 0x1ba   :  { %5553 = vmatprep.subr.bf16.mxu0 %v8143_v59 }
 0x1bd   :  { %5554 = vmatpush3.bf16.msra.mxu0 %v8143_v59 }
 0x1bf   :  { %1060 = vmatmul.mubr.bf16.gmra.mrb[4].mxu1 %v7567_v55 }
 0x1c0   :  { %5556 = vmatmul.mubr.msk.bf16.vlgmr.msra.gmra.mrb[8].mxu0 %vm957_vm4, %v7569_v54 }
 0x27e   :  { %v5332_v16 = vpop.f32.mrb[0].mxu0 }
 0x27f   :  { %v5333_v5 = vpop.f32.mrb[1].mxu0 }
 0x280   :  { %v5334_v31 = vadd.f32 %v5333_v5, %v5332_v16  ;;  %v5335_v46 = vpop.f32.mrb[2].mxu0 }
 0x281   :  { %v5336_v39 = vpop.f32.mrb[3].mxu0 }
 0x282   :  { %v5337_v4 = vadd.f32 %v5336_v39, %v5335_v46 }
 0x286   :  { %v5338_v3 = vpop.f32.mrb[4].mxu0 }
 0x287   :  { %v5339_v15 = vpop.f32.mrb[5].mxu0 }
 0x288   :  { %v5340_v22 = vadd.f32 %v5339_v15, %v5338_v3  ;;  %v5341_v7 = vpop.f32.mrb[6].mxu0 }
 0x289   :  { %v5342_v2 = vpop.f32.mrb[7].mxu0 }
 0x28a   :  { %v5360_v32 = vpop.f32.mrb[0].mxu1  ;;  %v5343_v18 = vadd.f32 %v5342_v2, %v5341_v7 }
 0x28b   :  { %v5361_v61 = vpop.f32.mrb[1].mxu1 }
 0x28c   :  { %v5362_v49 = vadd.f32 %v5361_v61, %v5360_v32  ;;  %v5363_v40 = vpop.f32.mrb[2].mxu1 }
 0x28d   :  { %v5364_v24 = vpop.f32.mrb[3].mxu1 }
 0x28e   :  { %v5365_v41 = vadd.f32 %v5364_v24, %v5363_v40  ;;  %v1054_v6 = vadd.f32 %v5362_v49, %v5334_v31  ;;  %v7600_v24 = vmov 0.0  }
 0x28f   :  { %5573 = vmatprep.subr.bf16.mxu0 %v7600_v24  ;;  %5559 = vmatprep.subr.bf16.mxu1 %v7600_v24 }
 0x290   :  { %v1057_v12 = vadd.f32 %v5365_v41, %v5337_v4  ;;  %5583 = vmatprep.mubr.msk.bf16.mxu0 %vm7601_vm11, %v7600_v24  ;;  %5569 = vmatprep.mubr.msk.bf16.mxu1 %vm7601_vm11, %v7600_v24 }
 0x292   :  { %v5366_v33 = vpop.f32.mrb[4].mxu1 }
 0x293   :  { %v5367_v29 = vpop.f32.mrb[5].mxu1  ;;  %v5557_v60 = vpop.f32.mrb[8].mxu0 }
 0x294   :  { %v5368_v62 = vadd.f32 %v5367_v29, %v5366_v33  ;;  %v5369_v1 = vpop.f32.mrb[6].mxu1  ;;  %v1102_v0 = vpop.f32.mrb[9].mxu0 }
 0x295   :  { %v1103_v11 = vadd.f32 %v1102_v0, %v1054_v6  ;;  %v5370_v34 = vpop.f32.mrb[7].mxu1  ;;  %v5558_v28 = vpop.f32.mrb[10].mxu0 }
 0x296   :  { %v1062_v42 = vadd.f32 %v5368_v62, %v5340_v22  ;;  %v5371_v63 = vadd.f32 %v5370_v34, %v5369_v1  ;;  %v1105_v44 = vpop.f32.mrb[11].mxu0 }
 0x297   :  { %v1125_v8 = vmul.f32 0.1, %v1103_v11  ;;  %v1106_v47 = vadd.f32 %v1105_v44, %v1057_v12  ;;  %vm1121_vm5 = vcmp.ge.f32.partialorder %v1103_v11, 0.0 }
 0x298   :  { %v1111_v48 = vadd.f32 %v5557_v60, %v1062_v42  ;;  %v1065_v9 = vadd.f32 %v5371_v63, %v5343_v18 }
 0x299   :  { %vm1122_vm6 = vcmp.ge.f32.partialorder %v1106_v47, 0.0  ;;  %v1126_v35 = vmul.f32 0.1, %v1106_v47  ;;  %v1129_v50 = vsel %vm1121_vm5, %v1103_v11, %v1125_v8 }
 0x29a   :  { %v1127_v25 = vmul.f32 0.1, %v1111_v48  ;;  %v1114_v10 = vadd.f32 %v5558_v28, %v1065_v9  ;;  %vm1123_vm7 = vcmp.ge.f32.partialorder %v1111_v48, 0.0 }
 0x29b   :  { %v1130_v51 = vsel %vm1122_vm6, %v1106_v47, %v1126_v35  ;;  %vm1432_vm6 = vcmask 261120  }
 0x29c   :  { %vm1124_vm8 = vcmp.ge.f32.partialorder %v1114_v10, 0.0  ;;  %v1128_v23 = vmul.f32 0.1, %v1114_v10  ;;  %v6596_v17 = vpack.i.bf16 %v1130_v51, %v1129_v50  ;;  %v1131_v36 = vsel %vm1123_vm7, %v1111_v48, %v1127_v25 }
 0x29e   :  { %v1132_v26 = vsel %vm1124_vm8, %v1114_v10, %v1128_v23  ;;  %6597 = vrot.lane.b32.xlu1 %v6596_v17, %s7599_s23  ;;  %6587 = vrot.lane.b32.xlu0 %v6596_v17, %s7595_s15  ;;  %v9544_v17 = vmov 1.0  }
 0x29f   :  { %v6601_v45 = vpack.i.bf16 %v1132_v26, %v1131_v36 }
 0x2a2   :  { %6602 = vrot.lane.b32.xlu1 %v6601_v45, %s7599_s23  ;;  %6592 = vrot.lane.b32.xlu0 %v6601_v45, %s7595_s15 }
 0x310   :  { %v6598_v57 = vpop.permute.xlu1 %6597  ;;  %v6588_v52 = vpop.permute.xlu0 %6587 }
 0x311   :  { %v6600_v56 = vunpack.i.h.bf16 %v6598_v57  ;;  %v6599_v27 = vunpack.i.l.bf16 %v6598_v57  ;;  %v6590_v58 = vunpack.i.h.bf16 %v6588_v52  ;;  %v6589_v37 = vunpack.i.l.bf16 %v6588_v52 }
 0x313   :  { %v1172_v13 = vsel %vm1149_vm9, 0.0, %v6600_v56  ;;  %v1171_v14 = vsel %vm1149_vm9, 0.0, %v6599_v27  ;;  %v1151_v19 = vsel %vm1149_vm9, 0.0, %v6590_v58  ;;  %v1150_v20 = vsel %vm1149_vm9, 0.0, %v6589_v37 }
 0x314   :  { %v1176_v43 = vsel %vm1154_vm10, %v1172_v13, 0.0  ;;  %v1175_v30 = vsel %vm1154_vm10, %v1171_v14, 0.0  ;;  %v6603_v38 = vpop.permute.xlu1 %6602  ;;  %v8167_v21 = vsel %vm1154_vm10, %v1151_v19, 0.0  ;;  %v8170_v55 = vsel %vm1154_vm10, %v1150_v20, 0.0  ;;  %v6593_v5 = vpop.permute.xlu0 %6592 }
 0x315   :  { %v6605_v54 = vunpack.i.h.bf16 %v6603_v38  ;;  %v6604_v16 = vunpack.i.l.bf16 %v6603_v38  ;;  %v6595_v31 = vunpack.i.h.bf16 %v6593_v5  ;;  %v6594_v46 = vunpack.i.l.bf16 %v6593_v5 }
 0x316   :  { %v6616_v39 = vpack.i.bf16 %v1176_v43, %v1175_v30  ;;  %v6606_v4 = vpack.i.bf16 %v8167_v21, %v8170_v55 }
 0x317   :  { %v1174_v3 = vsel %vm1149_vm9, 0.0, %v6605_v54  ;;  %v1173_v15 = vsel %vm1149_vm9, 0.0, %v6604_v16  ;;  %v1153_v2 = vsel %vm1149_vm9, 0.0, %v6595_v31  ;;  %v1152_v32 = vsel %vm1149_vm9, 0.0, %v6594_v46 }
 0x318   :  { %v1178_v22 = vsel %vm1154_vm10, %v1174_v3, 0.0  ;;  %v1177_v7 = vsel %vm1154_vm10, %v1173_v15, 0.0  ;;  %6617 = vrot.lane.b32.xlu1 %v6616_v39, %s7588_s8  ;;  %6607 = vrot.lane.b32.xlu0 %v6606_v4, %s7588_s8  ;;  %v1158_v18 = vsel %vm1154_vm10, %v1153_v2, 0.0  ;;  %v1157_v61 = vsel %vm1154_vm10, %v1152_v32, 0.0 }
 0x319   :  { %v6621_v49 = vpack.i.bf16 %v1178_v22, %v1177_v7  ;;  %v6611_v40 = vpack.i.bf16 %v1158_v18, %v1157_v61 }
 0x31c   :  { %6622 = vrot.lane.b32.xlu1 %v6621_v49, %s7588_s8  ;;  %6612 = vrot.lane.b32.xlu0 %v6611_v40, %s7588_s8 }
 0x320   :  { %6627 = vrot.lane.b32.xlu1 %v6621_v49, %s7598_s19  ;;  %6637 = vrot.lane.b32.xlu0 %v6616_v39, %s7598_s19 }
 0x324   :  { %6632 = vrot.lane.b32.xlu1 %v6621_v49, %s7594_s14  ;;  %6642 = vrot.lane.b32.xlu0 %v6616_v39, %s7594_s14 }
 0x38a   :  { %v6618_v41 = vpop.permute.xlu1 %6617  ;;  %v8192_v6 = vpop.permute.xlu0 %6607 }
 0x38b   :  { %v6610_v12 = vunpack.i.h.bf16 %v8192_v6  ;;  %v6609_v33 = vunpack.i.l.bf16 %v8192_v6  ;;  %6652 = vrot.lane.b32.xlu1 %v8192_v6, %s7588_s8 }
 0x38e   :  { %v6623_v29 = vpop.permute.xlu1 %6622  ;;  %v8196_v60 = vpop.permute.xlu0 %6612 }
 0x38f   :  { %v6615_v62 = vunpack.i.h.bf16 %v8196_v60  ;;  %v6614_v1 = vunpack.i.l.bf16 %v8196_v60  ;;  %6647 = vrot.lane.b32.xlu0 %v8196_v60, %s7588_s8  ;;  %6657 = vrot.lane.b32.xlu1 %v6623_v29, %s7598_s19 }
 0x392   :  { %v6628_v0 = vpop.permute.xlu1 %6627  ;;  %v6638_v11 = vpop.permute.xlu0 %6637 }
 0x393   :  { %v6630_v34 = vunpack.i.h.bf16 %v6628_v0  ;;  %v6629_v28 = vunpack.i.l.bf16 %v6628_v0  ;;  %v6640_v42 = vunpack.i.h.bf16 %v6638_v11  ;;  %v6639_v63 = vunpack.i.l.bf16 %v6638_v11  ;;  %6662 = vrot.lane.b32.xlu0 %v6618_v41, %s7598_s19  ;;  %1324 = vrot.lane.b32.xlu1 %v9544_v17, %s7598_s19  ;;  %s7628_s19 = smov 17  }
 0x395   :  { %v1335_v44 = vsel %vm799_vm2, %v6609_v33, %v6639_v63  ;;  %v1336_v8 = vsel %vm799_vm2, %v6610_v12, %v6640_v42  ;;  %v1337_v47 = vsel %vm799_vm2, %v6614_v1, %v6629_v28  ;;  %v1338_v48 = vsel %vm799_vm2, %v6615_v62, %v6630_v34  ;;  %v7570_v42 = vld [vmem:[%s8224_s26] sm:$0xff]   ;;  %s7620_s26 = smov 119  }
 0x396   :  { %v6633_v9 = vpop.permute.xlu1 %6632  ;;  %v6643_v35 = vpop.permute.xlu0 %6642  ;;  %v1344_v25 = vpack.c.bf16 %v1336_v8, %v1335_v44  ;;  %v1345_v57 = vpack.c.bf16 %v1338_v48, %v1337_v47  ;;  %v7603_v48 = vmov 1.0|1.0  }
 0x397   :  { %v6635_v10 = vunpack.i.h.bf16 %v6633_v9  ;;  %v6634_v50 = vunpack.i.l.bf16 %v6633_v9  ;;  %v6645_v51 = vunpack.i.h.bf16 %v6643_v35  ;;  %v6644_v23 = vunpack.i.l.bf16 %v6643_v35  ;;  %1301 = vrot.lane.b32.xlu0 %v9544_v17, %s7588_s8  ;;  %6672 = vrot.lane.b32.xlu1 %v6623_v29, %s7594_s14 }
 0x398   :  { %5574 = vmatpush3.bf16.msra.mxu0 %v1344_v25 }
 0x399   :  { %v1232_v36 = vsel %vm799_vm2, %v8167_v21, %v6645_v51  ;;  %v1231_v26 = vsel %vm799_vm2, %v8170_v55, %v6644_v23  ;;  %5575 = vmatprep.subr.bf16.mxu0 %v7600_v24  ;;  %v1233_v56 = vsel %vm799_vm2, %v1157_v61, %v6634_v50  ;;  %v1234_v27 = vsel %vm799_vm2, %v1158_v18, %v6635_v10 }
 0x39a   :  { %v1239_v45 = vpack.c.bf16 %v1232_v36, %v1231_v26  ;;  %v1240_v52 = vpack.c.bf16 %v1234_v27, %v1233_v56 }
 0x39b   :  { %6667 = vrot.lane.b32.xlu0 %v6618_v41, %s7594_s14 }
 0x39c   :  { %5560 = vmatpush3.bf16.msra.mxu1 %v1239_v45  ;;  %5576 = vmatpush3.bf16.msra.mxu0 %v1345_v57 }
 0x39d   :  { %5561 = vmatprep.subr.bf16.mxu1 %v7600_v24  ;;  %5577 = vmatprep.subr.bf16.mxu0 %v7600_v24 }
 0x3a0   :  { %5562 = vmatpush3.bf16.msra.mxu1 %v1240_v52 }
 0x3a1   :  { %5563 = vmatprep.subr.bf16.mxu1 %v7600_v24 }
 0x3fd   :  { %v6653_v58 = vpop.permute.xlu1 %6652 }
 0x3fe   :  { %v6655_v14 = vunpack.i.h.bf16 %v6653_v58  ;;  %v6654_v43 = vunpack.i.l.bf16 %v6653_v58 }
 0x401   :  { %v6648_v37 = vpop.permute.xlu0 %6647  ;;  %v6658_v13 = vpop.permute.xlu1 %6657 }
 0x402   :  { %v6650_v30 = vunpack.i.h.bf16 %v6648_v37  ;;  %v6649_v19 = vunpack.i.l.bf16 %v6648_v37  ;;  %v6660_v21 = vunpack.i.h.bf16 %v6658_v13  ;;  %v6659_v55 = vunpack.i.l.bf16 %v6658_v13 }
 0x404   :  { %v1342_v4 = vsel %vm799_vm2, %v6650_v30, %v6660_v21  ;;  %v1341_v3 = vsel %vm799_vm2, %v6649_v19, %v6659_v55 }
 0x405   :  { %v6663_v20 = vpop.permute.xlu0 %6662  ;;  %v1325_v38 = vpop.permute.xlu1 %1324  ;;  %v1347_v32 = vpack.c.bf16 %v1342_v4, %v1341_v3 }
 0x406   :  { %v6665_v54 = vunpack.i.h.bf16 %v6663_v20  ;;  %v6664_v16 = vunpack.i.l.bf16 %v6663_v20 }
 0x408   :  { %v1339_v5 = vsel %vm799_vm2, %v6654_v43, %v6664_v16  ;;  %v1340_v31 = vsel %vm799_vm2, %v6655_v14, %v6665_v54 }
 0x409   :  { %v8252_v46 = vpop.permute.xlu0 %1301  ;;  %v1346_v39 = vpack.c.bf16 %v1340_v31, %v1339_v5  ;;  %v6673_v22 = vpop.permute.xlu1 %6672 }
 0x40a   :  { %v1343_v15 = vsel %vm799_vm2, %v8252_v46, %v1325_v38  ;;  %v6675_v18 = vunpack.i.h.bf16 %v6673_v22  ;;  %v6674_v61 = vunpack.i.l.bf16 %v6673_v22 }
 0x40b   :  { %5578 = vmatpush3.bf16.msra.mxu0 %v1346_v39  ;;  %v1348_v7 = vpack.c.bf16 %v1343_v15, %v1343_v15 }
 0x40c   :  { %5579 = vmatprep.subr.bf16.mxu0 %v7600_v24  ;;  %v1238_v34 = vsel %vm799_vm2, %v6615_v62, %v6675_v18  ;;  %v1237_v28 = vsel %vm799_vm2, %v6614_v1, %v6674_v61 }
 0x40d   :  { %v6668_v2 = vpop.permute.xlu0 %6667  ;;  %v1358_v0 = vand.u32 %v1348_v7, %v8134_v53  ;;  %v1242_v6 = vpack.c.bf16 %v1238_v34, %v1237_v28 }
 0x40e   :  { %v6670_v49 = vunpack.i.h.bf16 %v6668_v2  ;;  %v6669_v40 = vunpack.i.l.bf16 %v6668_v2 }
 0x40f   :  { %5580 = vmatpush3.bf16.msra.mxu0 %v1347_v32 }
 0x410   :  { %v1235_v41 = vsel %vm799_vm2, %v6609_v33, %v6669_v40  ;;  %v1236_v29 = vsel %vm799_vm2, %v6610_v12, %v6670_v49  ;;  %5581 = vmatprep.subr.bf16.mxu0 %v7600_v24  ;;  %v7571_v12 = vld [vmem:[%s8247_s30] sm:$0xff]   ;;  %v1401_v33 = vlaneseq  ;;  %s7617_s30 = smov 9  }
 0x411   :  { %v1241_v11 = vpack.c.bf16 %v1236_v29, %v1235_v41 }
 0x412   :  { %v8283_v60 = vshrl.u32 %v1401_v33, 7  ;;  %v8285_v62 = vand.u32 127, %v1401_v33 }
 0x413   :  { %5564 = vmatpush3.bf16.msra.mxu1 %v1241_v11  ;;  %5582 = vmatpush3.bf16.msra.mxu0 %v1358_v0 }
 0x414   :  { %5565 = vmatprep.subr.bf16.mxu1 %v7600_v24  ;;  %5609 = vmatprep.subr.bf16.mxu0 %v7600_v24  ;;  %v1403_v1 = vadd.s32 8, %v8283_v60  ;;  %v1406_v63 = vmul.u32 2, %v8283_v60 }
 0x416   :  { %5584 = vmatmul.mubr.msk.bf16.vlgmr.msra.gmra.mrb[12].mxu0 %vm1248_vm12, %v7570_v42  ;;  %v1407_v44 = vmul.u32 2, %v1403_v1  ;;  %vm1408_vm13 = vcmp.eq.s32.totalorder %v8285_v62, %v1406_v63  ;;  %v1414_v8 = vadd.s32 1, %v1406_v63 }
 0x417   :  { %5566 = vmatpush3.bf16.msra.mxu1 %v1242_v6  ;;  %5617 = vmatprep.mubr.msk.bf16.mxu0 %vm7601_vm11, %v7600_v24 }
 0x418   :  { %5567 = vmatprep.subr.bf16.mxu1 %v7600_v24  ;;  %vm1409_vm14 = vcmp.eq.s32.totalorder %v8285_v62, %v1407_v44  ;;  %v1415_v47 = vadd.s32 1, %v1407_v44  ;;  %vm1416_vm15 = vcmp.eq.s32.totalorder %v8285_v62, %v1414_v8 }
 0x419   :  { %vm8292_vm1 = vmpackc.low %vm1409_vm14, %vm1408_vm13  ;;  %vm1625_vm13 = vcmask 269312  }
 0x41a   :  { %vm1417_vm3 = vcmp.eq.s32.totalorder %v8285_v62, %v1415_v47 }
 0x41b   :  { %5568 = vmatpush3.bf16.msra.mxu1 %v8143_v59  ;;  %vm8303_vm5 = vmpackc.low %vm1417_vm3, %vm1416_vm15 }
 0x41c   :  { %5956 = vmatprep.subr.msk.bf16.mxu1 %vm8292_vm1, %v7603_v48 }
 0x41e   :  { %5570 = vmatmul.mubr.msk.bf16.vlgmr.msra.gmra.mrb[8].mxu1 %vm1248_vm12, %v7571_v12 }
 0x41f   :  { %5958 = vmatpush3.bf16.msk.msra.mxu1 %vm8292_vm1, %v7603_v48 }
 0x420   :  { %5960 = vmatprep.subr.msk.bf16.mxu1 %vm8303_vm5, %v7603_v48 }
 0x423   :  { %5962 = vmatpush3.bf16.msk.msra.mxu1 %vm8303_vm5, %v7603_v48 }
 0x424   :  { %5964 = vmatprep.subr.msk.bf16.mxu1 %vm8292_vm1, %v7603_v48 }
 0x4e9   :  { %v1394_v35 = vpop.f32.mrb[12].mxu0 }
 0x4ea   :  { %1424 = vrot.lane.b32.xlu0 %v1394_v35, %s7594_s14  ;;  %v5585_v25 = vpop.f32.mrb[13].mxu0 }
 0x4eb   :  { %v1397_v10 = vpop.f32.mrb[14].mxu0 }
 0x4ec   :  { %1426 = vrot.lane.b32.xlu1 %v1397_v10, %s7594_s14  ;;  %v5586_v50 = vpop.f32.mrb[15].mxu0  ;;  %s7630_s14 = smov 96  }
 0x4f1   :  { %v1286_v51 = vpop.f32.mrb[8].mxu1 }
 0x4f2   :  { %v5571_v23 = vpop.f32.mrb[9].mxu1  ;;  %1516 = vrot.lane.b32.xlu0 %v1286_v51, %s7604_s1 }
 0x4f3   :  { %v1289_v36 = vpop.f32.mrb[10].mxu1 }
 0x4f4   :  { %v5572_v26 = vpop.f32.mrb[11].mxu1  ;;  %1518 = vrot.lane.b32.xlu1 %v1289_v36, %s7604_s1  ;;  %s7626_s1 = smov 14  }
 0x55c   :  { %v1425_v45 = vpop.permute.xlu0 %1424 }
 0x55d   :  { %v1430_v57 = vsel %vm799_vm2, %v1286_v51, %v1425_v45 }
 0x55e   :  { %5595 = vmatprep.mubr.msk.f32.mxu1 %vm1432_vm6, %v1430_v57  ;;  %v1427_v56 = vpop.permute.xlu1 %1426 }
 0x55f   :  { %v1431_v27 = vsel %vm799_vm2, %v1289_v36, %v1427_v56 }
 0x560   :  { %5596 = vmatmul.mubr.msk.f32.vlgmr.msra.gmra.mrb[12].mxu1 %vm1432_vm6, %v1431_v27 }
 0x561   :  { %5966 = vmatpush3.bf16.msk.msra.mxu1 %vm8292_vm1, %v7603_v48 }
 0x562   :  { %5968 = vmatprep.subr.msk.bf16.mxu1 %vm8303_vm5, %v7603_v48 }
 0x564   :  { %v1517_v52 = vpop.permute.xlu0 %1516 }
 0x565   :  { %v1522_v58 = vsel %vm799_vm2, %v1517_v52, %v1394_v35  ;;  %5970 = vmatpush3.bf16.msk.msra.mxu1 %vm8303_vm5, %v7603_v48 }
 0x566   :  { %5606 = vmatprep.mubr.msk.f32.mxu1 %vm1432_vm6, %v1522_v58  ;;  %v1519_v37 = vpop.permute.xlu1 %1518  ;;  %5621 = vmatprep.subr.bf16.mxu1 %v7600_v24 }
 0x567   :  { %v1523_v13 = vsel %vm799_vm2, %v1519_v37, %v1397_v10 }
 0x568   :  { %5607 = vmatmul.mubr.msk.f32.vlgmr.msra.gmra.mrb[14].mxu1 %vm1432_vm6, %v1523_v13 }
 0x569   :  { %5629 = vmatprep.mubr.msk.bf16.mxu1 %vm7601_vm11, %v7600_v24 }
 0x633   :  { %v8338_v14 = vpop.f32.mrb[12].mxu1 }
 0x634   :  { %vm1610_vm7 = vcmp.ge.f32.partialorder %v8338_v14, 0.0  ;;  %v1612_v43 = vmul.f32 0.1, %v8338_v14  ;;  %v8342_v30 = vpop.f32.mrb[13].mxu1 }
 0x635   :  { %vm1609_vm8 = vcmp.ge.f32.partialorder %v8342_v30, 0.0  ;;  %v1611_v19 = vmul.f32 0.1, %v8342_v30 }
 0x636   :  { %v1614_v20 = vsel %vm1610_vm7, %v8338_v14, %v1612_v43 }
 0x637   :  { %v1613_v38 = vsel %vm1609_vm8, %v8342_v30, %v1611_v19 }
 0x638   :  { %v8348_v21 = vpack.i.bf16 %v1614_v20, %v1613_v38 }
 0x63a   :  { %6682 = vrot.lane.b32.xlu1 %v8348_v21, %s7595_s15 }
 0x63b   :  { %v8352_v55 = vpop.f32.mrb[14].mxu1 }
 0x63c   :  { %vm1643_vm2 = vcmp.ge.f32.partialorder %v8352_v55, 0.0  ;;  %v1645_v54 = vmul.f32 0.1, %v8352_v55  ;;  %v8356_v16 = vpop.f32.mrb[15].mxu1 }
 0x63d   :  { %vm1642_vm10 = vcmp.ge.f32.partialorder %v8356_v16, 0.0  ;;  %v1644_v5 = vmul.f32 0.1, %v8356_v16 }
 0x63e   :  { %v1647_v31 = vsel %vm1643_vm2, %v8352_v55, %v1645_v54 }
 0x63f   :  { %v1646_v39 = vsel %vm1642_vm10, %v8356_v16, %v1644_v5  ;;  %v7572_v5 = vld [vmem:[%s8385_s6] sm:$0xff]   ;;  %vm1914_vm10 = vcmask 285696   ;;  %s7614_s6 = smov 8  }
 0x640   :  { %v8362_v4 = vpack.i.bf16 %v1647_v31, %v1646_v39 }
 0x642   :  { %6677 = vrot.lane.b32.xlu0 %v8362_v4, %s7595_s15 }
 0x6ac   :  { %v6683_v3 = vpop.permute.xlu1 %6682 }
 0x6ad   :  { %v6685_v15 = vunpack.i.h.bf16 %v6683_v3  ;;  %v6684_v22 = vunpack.i.l.bf16 %v6683_v3 }
 0x6af   :  { %v1624_v18 = vsel %vm1149_vm9, 0.0, %v6685_v15  ;;  %v1623_v61 = vsel %vm1149_vm9, 0.0, %v6684_v22 }
 0x6b0   :  { %v1627_v11 = vsel %vm1625_vm13, %v1624_v18, 0.0  ;;  %v1626_v34 = vsel %vm1625_vm13, %v1623_v61, 0.0 }
 0x6b1   :  { %v6696_v28 = vpack.i.bf16 %v1627_v11, %v1626_v34 }
 0x6b4   :  { %v6678_v7 = vpop.permute.xlu0 %6677 }
 0x6b5   :  { %v6680_v2 = vunpack.i.h.bf16 %v6678_v7  ;;  %v6679_v32 = vunpack.i.l.bf16 %v6678_v7 }
 0x6b7   :  { %v1657_v49 = vsel %vm1149_vm9, 0.0, %v6680_v2  ;;  %v1656_v40 = vsel %vm1149_vm9, 0.0, %v6679_v32 }
 0x6b8   :  { %v1659_v41 = vsel %vm1625_vm13, %v1657_v49, 0.0  ;;  %v1658_v29 = vsel %vm1625_vm13, %v1656_v40, 0.0 }
 0x6b9   :  { %v6691_v0 = vpack.i.bf16 %v1659_v41, %v1658_v29 }
 0x6bb   :  { %6692 = vrot.lane.b32.xlu1 %v6691_v0, %s7589_s9  ;;  %6687 = vrot.lane.b32.xlu0 %v6691_v0, %s7588_s8 }
 0x6bf   :  { %6707 = vrot.lane.b32.xlu0 %v6691_v0, %s7605_s2  ;;  %6697 = vrot.lane.b32.xlu1 %v6696_v28, %s7588_s8 }
 0x6c3   :  { %6702 = vrot.lane.b32.xlu1 %v6696_v28, %s7589_s9 }
 0x6c7   :  { %1682 = vrot.lane.b32.xlu1 %v9544_v17, %s7605_s2 }
 0x72d   :  { %v6688_v42 = vpop.permute.xlu0 %6687  ;;  %v6693_v6 = vpop.permute.xlu1 %6692 }
 0x72e   :  { %6712 = vrot.lane.b32.xlu0 %v6688_v42, %s7605_s2 }
 0x731   :  { %v6708_v12 = vpop.permute.xlu0 %6707  ;;  %v6698_v47 = vpop.permute.xlu1 %6697 }
 0x732   :  { %v6710_v33 = vunpack.i.h.bf16 %v6708_v12  ;;  %v6709_v1 = vunpack.i.l.bf16 %v6708_v12  ;;  %6717 = vrot.lane.b32.xlu0 %v6693_v6, %s7605_s2  ;;  %v6700_v50 = vunpack.i.h.bf16 %v6698_v47  ;;  %v6699_v51 = vunpack.i.l.bf16 %v6698_v47 }
 0x734   :  { %v1691_v63 = vsel %vm1432_vm6, %v1626_v34, %v6709_v1  ;;  %v1692_v44 = vsel %vm1432_vm6, %v1627_v11, %v6710_v33 }
 0x735   :  { %v1698_v8 = vpack.c.bf16 %v1692_v44, %v1691_v63  ;;  %v6703_v35 = vpop.permute.xlu1 %6702 }
 0x736   :  { %v6705_v52 = vunpack.i.h.bf16 %v6703_v35  ;;  %v6704_v58 = vunpack.i.l.bf16 %v6703_v35 }
 0x737   :  { %5610 = vmatpush3.bf16.msra.mxu0 %v1698_v8 }
 0x738   :  { %5611 = vmatprep.subr.bf16.mxu0 %v7600_v24 }
 0x739   :  { %v1683_v10 = vpop.permute.xlu1 %1682 }
 0x73a   :  { %v1697_v57 = vsel %vm1432_vm6, 1.0, %v1683_v10 }
 0x73b   :  { %v1701_v43 = vpack.c.bf16 %v1697_v57, %v1697_v57 }
 0x73d   :  { %v8398_v54 = vand.u32 %v1701_v43, %v8134_v53 }
 0x7a0   :  { %v6713_v25 = vpop.permute.xlu0 %6712 }
 0x7a1   :  { %v6715_v23 = vunpack.i.h.bf16 %v6713_v25  ;;  %v6714_v36 = vunpack.i.l.bf16 %v6713_v25 }
 0x7a3   :  { %v1693_v26 = vsel %vm1432_vm6, %v6699_v51, %v6714_v36  ;;  %v1694_v45 = vsel %vm1432_vm6, %v6700_v50, %v6715_v23 }
 0x7a4   :  { %v6718_v56 = vpop.permute.xlu0 %6717  ;;  %v1699_v27 = vpack.c.bf16 %v1694_v45, %v1693_v26 }
 0x7a5   :  { %v6720_v37 = vunpack.i.h.bf16 %v6718_v56  ;;  %v6719_v13 = vunpack.i.l.bf16 %v6718_v56 }
 0x7a6   :  { %5612 = vmatpush3.bf16.msra.mxu0 %v1699_v27 }
 0x7a7   :  { %v1695_v19 = vsel %vm1432_vm6, %v6704_v58, %v6719_v13  ;;  %v1696_v20 = vsel %vm1432_vm6, %v6705_v52, %v6720_v37  ;;  %5613 = vmatprep.subr.bf16.mxu0 %v7600_v24 }
 0x7a8   :  { %v1700_v38 = vpack.c.bf16 %v1696_v20, %v1695_v19 }
 0x7aa   :  { %5614 = vmatpush3.bf16.msra.mxu0 %v1700_v38 }
 0x7ab   :  { %5615 = vmatprep.subr.bf16.mxu0 %v7600_v24 }
 0x7ae   :  { %5616 = vmatpush3.bf16.msra.mxu0 %v8398_v54 }
 0x7af   :  { %5633 = vmatprep.subr.bf16.mxu0 %v7600_v24 }
 0x7b1   :  { %5618 = vmatmul.mubr.msk.bf16.vlgmr.msra.gmra.mrb[16].mxu0 %vm957_vm4, %v7572_v5 }
 0x7b2   :  { %5641 = vmatprep.mubr.msk.bf16.mxu0 %vm7601_vm11, %v7600_v24 }
 0x884   :  { %v1747_v31 = vpop.f32.mrb[16].mxu0 }
 0x885   :  { %v1756_v39 = vmul.f32 0.1, %v1747_v31  ;;  %v5619_v3 = vpop.f32.mrb[17].mxu0  ;;  %vm1754_vm14 = vcmp.ge.f32.partialorder %v1747_v31, 0.0 }
 0x886   :  { %v1750_v15 = vpop.f32.mrb[18].mxu0 }
 0x887   :  { %vm1755_vm15 = vcmp.ge.f32.partialorder %v1750_v15, 0.0  ;;  %v1757_v22 = vmul.f32 0.1, %v1750_v15  ;;  %v5620_v7 = vpop.f32.mrb[19].mxu0  ;;  %v1758_v2 = vsel %vm1754_vm14, %v1747_v31, %v1756_v39  ;;  %v7573_v39 = vld [vmem:[%s5196_s20] sm:$0xff]   ;;  %s8599_s20 = sld [smem:[%s9524_s0 + %s7614_s6]]   ;;  %s7618_s6 = smov 11  }
 0x889   :  { %v1759_v32 = vsel %vm1755_vm15, %v1750_v15, %v1757_v22 }
 0x88a   :  { %v6726_v18 = vpack.i.bf16 %v1759_v32, %v1758_v2 }
 0x88c   :  { %6727 = vrot.lane.b32.xlu1 %v6726_v18, %s7595_s15  ;;  %6722 = vrot.lane.b32.xlu0 %v6726_v18, %s7607_s16 }
 0x8fe   :  { %v6728_v61 = vpop.permute.xlu1 %6727  ;;  %v6723_v49 = vpop.permute.xlu0 %6722 }
 0x8ff   :  { %v6730_v40 = vunpack.i.h.bf16 %v6728_v61  ;;  %v6729_v41 = vunpack.i.l.bf16 %v6728_v61  ;;  %v6725_v29 = vunpack.i.h.bf16 %v6723_v49  ;;  %v6724_v0 = vunpack.i.l.bf16 %v6723_v49 }
 0x901   :  { %v1769_v11 = vsel %vm1149_vm9, 0.0, %v6730_v40  ;;  %v1768_v34 = vsel %vm1149_vm9, 0.0, %v6729_v41  ;;  %v1793_v28 = vsel %vm1149_vm9, 0.0, %v6725_v29  ;;  %v1792_v42 = vsel %vm1149_vm9, 0.0, %v6724_v0 }
 0x902   :  { %v1795_v6 = vsel %vm1625_vm13, %v1793_v28, 0.0  ;;  %v1794_v12 = vsel %vm1625_vm13, %v1792_v42, 0.0  ;;  %v1771_v1 = vsel %vm1625_vm13, %v1769_v11, 0.0  ;;  %v1770_v63 = vsel %vm1625_vm13, %v1768_v34, 0.0 }
 0x903   :  { %v6736_v33 = vpack.i.bf16 %v1795_v6, %v1794_v12  ;;  %v6746_v44 = vpack.i.bf16 %v1771_v1, %v1770_v63 }
 0x905   :  { %6737 = vrot.lane.b32.xlu1 %v6736_v33, %s7589_s9  ;;  %6732 = vrot.lane.b32.xlu0 %v6736_v33, %s7588_s8 }
 0x909   :  { %6747 = vrot.lane.b32.xlu1 %v6746_v44, %s7588_s8  ;;  %6742 = vrot.lane.b32.xlu0 %v6736_v33, %s7605_s2 }
 0x90d   :  { %6752 = vrot.lane.b32.xlu1 %v6746_v44, %s7589_s9 }
 0x911   :  { %1886 = vrot.lane.b32.xlu1 %v8356_v16, %s7605_s2 }
 0x977   :  { %v6738_v8 = vpop.permute.xlu1 %6737  ;;  %v6733_v47 = vpop.permute.xlu0 %6732 }
 0x978   :  { %6757 = vrot.lane.b32.xlu0 %v6733_v47, %s7605_s2 }
 0x97b   :  { %v6743_v35 = vpop.permute.xlu0 %6742  ;;  %v6748_v16 = vpop.permute.xlu1 %6747 }
 0x97c   :  { %v6745_v25 = vunpack.i.h.bf16 %v6743_v35  ;;  %v6744_v10 = vunpack.i.l.bf16 %v6743_v35  ;;  %6762 = vrot.lane.b32.xlu0 %v6738_v8, %s7605_s2  ;;  %v6750_v26 = vunpack.i.h.bf16 %v6748_v16  ;;  %v6749_v45 = vunpack.i.l.bf16 %v6748_v16 }
 0x97e   :  { %v1825_v50 = vsel %vm1432_vm6, %v1771_v1, %v6745_v25  ;;  %v1824_v51 = vsel %vm1432_vm6, %v1770_v63, %v6744_v10 }
 0x97f   :  { %v1830_v23 = vpack.c.bf16 %v1825_v50, %v1824_v51  ;;  %v6753_v27 = vpop.permute.xlu1 %6752 }
 0x980   :  { %1888 = vrot.lane.b32.xlu0 %v8352_v55, %s7605_s2  ;;  %v6755_v43 = vunpack.i.h.bf16 %v6753_v27  ;;  %v6754_v19 = vunpack.i.l.bf16 %v6753_v27 }
 0x981   :  { %5622 = vmatpush3.bf16.msra.mxu1 %v1830_v23 }
 0x982   :  { %5623 = vmatprep.subr.bf16.mxu1 %v7600_v24 }
 0x983   :  { %v8446_v3 = vpop.permute.xlu1 %1886 }
 0x9ea   :  { %v6758_v36 = vpop.permute.xlu0 %6757 }
 0x9eb   :  { %v6760_v57 = vunpack.i.h.bf16 %v6758_v36  ;;  %v6759_v56 = vunpack.i.l.bf16 %v6758_v36 }
 0x9ed   :  { %v1827_v52 = vsel %vm1432_vm6, %v6750_v26, %v6760_v57  ;;  %v1826_v58 = vsel %vm1432_vm6, %v6749_v45, %v6759_v56 }
 0x9ee   :  { %v6763_v37 = vpop.permute.xlu0 %6762  ;;  %v1831_v13 = vpack.c.bf16 %v1827_v52, %v1826_v58 }
 0x9ef   :  { %v6765_v20 = vunpack.i.h.bf16 %v6763_v37  ;;  %v6764_v38 = vunpack.i.l.bf16 %v6763_v37 }
 0x9f0   :  { %5624 = vmatpush3.bf16.msra.mxu1 %v1831_v13 }
 0x9f1   :  { %v1829_v55 = vsel %vm1432_vm6, %v6755_v43, %v6765_v20  ;;  %v1828_v5 = vsel %vm1432_vm6, %v6754_v19, %v6764_v38  ;;  %5625 = vmatprep.subr.bf16.mxu1 %v7600_v24 }
 0x9f2   :  { %v1832_v31 = vpack.c.bf16 %v1829_v55, %v1828_v5  ;;  %v8454_v18 = vpop.permute.xlu0 %1888 }
 0x9f4   :  { %5626 = vmatpush3.bf16.msra.mxu1 %v1832_v31 }
 0x9f5   :  { %5627 = vmatprep.subr.bf16.mxu1 %v7600_v24 }
 0x9f8   :  { %5628 = vmatpush3.bf16.msra.mxu1 %v8398_v54 }
 0x9f9   :  { %5645 = vmatprep.subr.bf16.mxu1 %v7600_v24 }
 0x9fb   :  { %5630 = vmatmul.mubr.msk.bf16.vlgmr.msra.gmra.mrb[16].mxu1 %vm957_vm4, %v7573_v39 }
 0x9fc   :  { %5653 = vmatprep.mubr.msk.bf16.mxu1 %vm7601_vm11, %v7600_v24 }
 0xace   :  { %v1875_v15 = vpop.f32.mrb[16].mxu1 }
 0xacf   :  { %v8449_v22 = vadd.f32 %v1875_v15, %v8342_v30  ;;  %v8452_v7 = vadd.f32 %v8446_v3, %v1875_v15  ;;  %v5631_v2 = vpop.f32.mrb[17].mxu1 }
 0xad0   :  { %v1878_v32 = vpop.f32.mrb[18].mxu1 }
 0xad1   :  { %v1900_v61 = vmul.f32 0.1, %v8449_v22  ;;  %v1933_v49 = vmul.f32 0.1, %v8452_v7  ;;  %v8459_v40 = vadd.f32 %v8338_v14, %v1878_v32  ;;  %v8462_v41 = vadd.f32 %v8454_v18, %v1878_v32  ;;  %v5632_v29 = vpop.f32.mrb[19].mxu1 }
 0xad2   :  { %vm1898_vm3 = vcmp.ge.f32.partialorder %v8449_v22, 0.0  ;;  %vm1931_vm7 = vcmp.ge.f32.partialorder %v8452_v7, 0.0 }
 0xad3   :  { %vm1899_vm8 = vcmp.ge.f32.partialorder %v8459_v40, 0.0  ;;  %v1901_v0 = vmul.f32 0.1, %v8459_v40  ;;  %vm1932_vm2 = vcmp.ge.f32.partialorder %v8462_v41, 0.0  ;;  %v1934_v11 = vmul.f32 0.1, %v8462_v41 }
 0xad4   :  { %v1935_v34 = vsel %vm1931_vm7, %v8452_v7, %v1933_v49  ;;  %v1902_v42 = vsel %vm1898_vm3, %v8449_v22, %v1900_v61 }
 0xad5   :  { %v1936_v28 = vsel %vm1932_vm2, %v8462_v41, %v1934_v11  ;;  %v1903_v6 = vsel %vm1899_vm8, %v8459_v40, %v1901_v0 }
 0xad6   :  { %v6766_v12 = vpack.i.bf16 %v1936_v28, %v1935_v34  ;;  %v6771_v33 = vpack.i.bf16 %v1903_v6, %v1902_v42 }
 0xad8   :  { %6767 = vrot.lane.b32.xlu1 %v6766_v12, %s7609_s21  ;;  %6772 = vrot.lane.b32.xlu0 %v6771_v33, %s7587_s7  ;;  %v7574_v12 = vld [vmem:[%s5197_s28] sm:$0xff]   ;;  %s7615_s21 = smov 10  }
 0xad9   :  { %s8617_s28 = sld [smem:[%s9524_s0 + %s7615_s21]]  }
 0xb4a   :  { %v6768_v1 = vpop.permute.xlu1 %6767  ;;  %v6773_v63 = vpop.permute.xlu0 %6772 }
 0xb4b   :  { %v6770_v44 = vunpack.i.h.bf16 %v6768_v1  ;;  %v6769_v8 = vunpack.i.l.bf16 %v6768_v1  ;;  %v6775_v47 = vunpack.i.h.bf16 %v6773_v63  ;;  %v6774_v35 = vunpack.i.l.bf16 %v6773_v63 }
 0xb4d   :  { %v1946_v25 = vsel %vm9532_vm0, 0.0, %v6770_v44  ;;  %v1945_v10 = vsel %vm9532_vm0, 0.0, %v6769_v8  ;;  %v1913_v50 = vsel %vm9532_vm0, 0.0, %v6775_v47  ;;  %v1912_v51 = vsel %vm9532_vm0, 0.0, %v6774_v35 }
 0xb4e   :  { %v1948_v23 = vsel %vm1914_vm10, %v1946_v25, 0.0  ;;  %v1947_v16 = vsel %vm1914_vm10, %v1945_v10, 0.0  ;;  %v1916_v26 = vsel %vm1914_vm10, %v1913_v50, 0.0  ;;  %v1915_v45 = vsel %vm1914_vm10, %v1912_v51, 0.0 }
 0xb4f   :  { %v6776_v36 = vpack.i.bf16 %v1948_v23, %v1947_v16  ;;  %v6791_v57 = vpack.i.bf16 %v1916_v26, %v1915_v45  ;;  %vm2451_vm10 = vcmask 15360   ;;  %vm2797_vm0 = vcmask 310272  }
 0xb51   :  { %6777 = vrot.lane.b32.xlu1 %v6776_v36, %s7590_s10  ;;  %6782 = vrot.lane.b32.xlu0 %v6776_v36, %s7593_s13 }
 0xb55   :  { %6787 = vrot.lane.b32.xlu1 %v6776_v36, %s7605_s2  ;;  %6792 = vrot.lane.b32.xlu0 %v6791_v57, %s7590_s10 }
 0xb59   :  { %6797 = vrot.lane.b32.xlu0 %v6791_v57, %s7593_s13 }
 0xbc3   :  { %v6778_v56 = vpop.permute.xlu1 %6777  ;;  %v6783_v27 = vpop.permute.xlu0 %6782 }
 0xbc4   :  { %6802 = vrot.lane.b32.xlu1 %v6778_v56, %s7605_s2 }
 0xbc7   :  { %v6788_v52 = vpop.permute.xlu1 %6787  ;;  %v6793_v20 = vpop.permute.xlu0 %6792 }
 0xbc8   :  { %v6790_v58 = vunpack.i.h.bf16 %v6788_v52  ;;  %v6789_v37 = vunpack.i.l.bf16 %v6788_v52  ;;  %6807 = vrot.lane.b32.xlu1 %v6783_v27, %s7605_s2  ;;  %v6795_v55 = vunpack.i.h.bf16 %v6793_v20  ;;  %v6794_v5 = vunpack.i.l.bf16 %v6793_v20 }
 0xbca   :  { %v1977_v13 = vsel %vm1432_vm6, %v1915_v45, %v6789_v37  ;;  %v1978_v43 = vsel %vm1432_vm6, %v1916_v26, %v6790_v58 }
 0xbcb   :  { %v1983_v19 = vpack.c.bf16 %v1978_v43, %v1977_v13  ;;  %v6798_v15 = vpop.permute.xlu0 %6797 }
 0xbcc   :  { %v6800_v29 = vunpack.i.h.bf16 %v6798_v15  ;;  %v6799_v0 = vunpack.i.l.bf16 %v6798_v15 }
 0xbcd   :  { %5634 = vmatpush3.bf16.msra.mxu0 %v1983_v19 }
 0xbce   :  { %5635 = vmatprep.subr.bf16.mxu0 %v7600_v24 }
 0xc36   :  { %v6803_v38 = vpop.permute.xlu1 %6802 }
 0xc37   :  { %v6805_v31 = vunpack.i.h.bf16 %v6803_v38  ;;  %v6804_v39 = vunpack.i.l.bf16 %v6803_v38 }
 0xc39   :  { %v1979_v2 = vsel %vm1432_vm6, %v6794_v5, %v6804_v39  ;;  %v1980_v32 = vsel %vm1432_vm6, %v6795_v55, %v6805_v31 }
 0xc3a   :  { %v6808_v61 = vpop.permute.xlu1 %6807  ;;  %v1984_v49 = vpack.c.bf16 %v1980_v32, %v1979_v2 }
 0xc3b   :  { %v6810_v11 = vunpack.i.h.bf16 %v6808_v61  ;;  %v6809_v34 = vunpack.i.l.bf16 %v6808_v61 }
 0xc3c   :  { %5636 = vmatpush3.bf16.msra.mxu0 %v1984_v49 }
 0xc3d   :  { %v1981_v28 = vsel %vm1432_vm6, %v6799_v0, %v6809_v34  ;;  %v1982_v42 = vsel %vm1432_vm6, %v6800_v29, %v6810_v11  ;;  %5637 = vmatprep.subr.bf16.mxu0 %v7600_v24 }
 0xc3e   :  { %v1985_v6 = vpack.c.bf16 %v1982_v42, %v1981_v28 }
 0xc40   :  { %5638 = vmatpush3.bf16.msra.mxu0 %v1985_v6 }
 0xc41   :  { %5639 = vmatprep.subr.bf16.mxu0 %v7600_v24 }
 0xc44   :  { %5640 = vmatpush3.bf16.msra.mxu0 %v8398_v54 }
 0xc45   :  { %5657 = vmatprep.subr.bf16.mxu0 %v7600_v24 }
 0xc47   :  { %5642 = vmatmul.mubr.msk.bf16.vlgmr.msra.gmra.mrb[20].mxu0 %vm957_vm4, %v7574_v12 }
 0xc48   :  { %5665 = vmatprep.mubr.msk.bf16.mxu0 %vm7601_vm11, %v7600_v24 }
 0xd1a   :  { %v2028_v33 = vpop.f32.mrb[20].mxu0 }
 0xd1b   :  { %v2037_v1 = vmul.f32 0.1, %v2028_v33  ;;  %v5643_v63 = vpop.f32.mrb[21].mxu0  ;;  %vm2035_vm14 = vcmp.ge.f32.partialorder %v2028_v33, 0.0 }
 0xd1c   :  { %v2031_v44 = vpop.f32.mrb[22].mxu0 }
 0xd1d   :  { %vm2036_vm15 = vcmp.ge.f32.partialorder %v2031_v44, 0.0  ;;  %v2038_v8 = vmul.f32 0.1, %v2031_v44  ;;  %v5644_v47 = vpop.f32.mrb[23].mxu0  ;;  %v2039_v35 = vsel %vm2035_vm14, %v2028_v33, %v2037_v1  ;;  %vm9531_vm14 = vcmask 39936  }
 0xd1f   :  { %v2040_v25 = vsel %vm2036_vm15, %v2031_v44, %v2038_v8  ;;  %vm2188_vm15 = vcmask 302080  }
 0xd20   :  { %v6816_v10 = vpack.i.bf16 %v2040_v25, %v2039_v35  ;;  %v7575_v35 = vld [vmem:[%s5198_s3] sm:$0xff]   ;;  %s7633_s3 = smov 18  }
 0xd22   :  { %6817 = vrot.lane.b32.xlu1 %v6816_v10, %s7595_s15  ;;  %6812 = vrot.lane.b32.xlu0 %v6816_v10, %s7607_s16 }
 0xd94   :  { %v6818_v50 = vpop.permute.xlu1 %6817  ;;  %v6813_v51 = vpop.permute.xlu0 %6812 }
 0xd95   :  { %v6820_v23 = vunpack.i.h.bf16 %v6818_v50  ;;  %v6819_v16 = vunpack.i.l.bf16 %v6818_v50  ;;  %v6815_v36 = vunpack.i.h.bf16 %v6813_v51  ;;  %v6814_v26 = vunpack.i.l.bf16 %v6813_v51 }
 0xd97   :  { %v2050_v45 = vsel %vm1149_vm9, 0.0, %v6820_v23  ;;  %v2049_v57 = vsel %vm1149_vm9, 0.0, %v6819_v16  ;;  %v2074_v56 = vsel %vm1149_vm9, 0.0, %v6815_v36  ;;  %v2073_v27 = vsel %vm1149_vm9, 0.0, %v6814_v26 }
 0xd98   :  { %v2076_v52 = vsel %vm1625_vm13, %v2074_v56, 0.0  ;;  %v2075_v58 = vsel %vm1625_vm13, %v2073_v27, 0.0  ;;  %v2052_v13 = vsel %vm1625_vm13, %v2050_v45, 0.0  ;;  %v2051_v43 = vsel %vm1625_vm13, %v2049_v57, 0.0 }
 0xd99   :  { %v6826_v37 = vpack.i.bf16 %v2076_v52, %v2075_v58  ;;  %v6836_v19 = vpack.i.bf16 %v2052_v13, %v2051_v43 }
 0xd9b   :  { %6827 = vrot.lane.b32.xlu1 %v6826_v37, %s7589_s9  ;;  %6822 = vrot.lane.b32.xlu0 %v6826_v37, %s7588_s8 }
 0xd9f   :  { %6837 = vrot.lane.b32.xlu1 %v6836_v19, %s7588_s8  ;;  %6832 = vrot.lane.b32.xlu0 %v6826_v37, %s7605_s2 }
 0xda3   :  { %6842 = vrot.lane.b32.xlu1 %v6836_v19, %s7589_s9 }
 0xe0d   :  { %v6828_v20 = vpop.permute.xlu1 %6827  ;;  %v6823_v38 = vpop.permute.xlu0 %6822 }
 0xe0e   :  { %6847 = vrot.lane.b32.xlu0 %v6823_v38, %s7605_s2 }
 0xe11   :  { %v6833_v55 = vpop.permute.xlu0 %6832  ;;  %v6838_v32 = vpop.permute.xlu1 %6837 }
 0xe12   :  { %v6835_v5 = vunpack.i.h.bf16 %v6833_v55  ;;  %v6834_v31 = vunpack.i.l.bf16 %v6833_v55  ;;  %6852 = vrot.lane.b32.xlu0 %v6828_v20, %s7605_s2  ;;  %v6840_v49 = vunpack.i.h.bf16 %v6838_v32  ;;  %v6839_v29 = vunpack.i.l.bf16 %v6838_v32 }
 0xe14   :  { %v2106_v39 = vsel %vm1432_vm6, %v2052_v13, %v6835_v5  ;;  %v2105_v15 = vsel %vm1432_vm6, %v2051_v43, %v6834_v31 }
 0xe15   :  { %v2111_v2 = vpack.c.bf16 %v2106_v39, %v2105_v15  ;;  %v6843_v34 = vpop.permute.xlu1 %6842 }
 0xe16   :  { %6862 = vrot.lane.b32.xlu0 %v8362_v4, %s7602_s27  ;;  %v6845_v33 = vunpack.i.h.bf16 %v6843_v34  ;;  %v6844_v1 = vunpack.i.l.bf16 %v6843_v34 }
 0xe17   :  { %5646 = vmatpush3.bf16.msra.mxu1 %v2111_v2 }
 0xe18   :  { %5647 = vmatprep.subr.bf16.mxu1 %v7600_v24 }
 0xe80   :  { %v6848_v61 = vpop.permute.xlu0 %6847 }
 0xe81   :  { %v6850_v0 = vunpack.i.h.bf16 %v6848_v61  ;;  %v6849_v11 = vunpack.i.l.bf16 %v6848_v61 }
 0xe83   :  { %v2108_v28 = vsel %vm1432_vm6, %v6840_v49, %v6850_v0  ;;  %v2107_v42 = vsel %vm1432_vm6, %v6839_v29, %v6849_v11 }
 0xe84   :  { %v6853_v6 = vpop.permute.xlu0 %6852  ;;  %v2112_v12 = vpack.c.bf16 %v2108_v28, %v2107_v42 }
 0xe85   :  { %v6855_v63 = vunpack.i.h.bf16 %v6853_v6  ;;  %v6854_v44 = vunpack.i.l.bf16 %v6853_v6 }
 0xe86   :  { %5648 = vmatpush3.bf16.msra.mxu1 %v2112_v12 }
 0xe87   :  { %v2110_v4 = vsel %vm1432_vm6, %v6845_v33, %v6855_v63  ;;  %v2109_v8 = vsel %vm1432_vm6, %v6844_v1, %v6854_v44  ;;  %5649 = vmatprep.subr.bf16.mxu1 %v7600_v24 }
 0xe88   :  { %v2113_v47 = vpack.c.bf16 %v2110_v4, %v2109_v8  ;;  %v6863_v37 = vpop.permute.xlu0 %6862 }
 0xe89   :  { %v6865_v13 = vunpack.i.h.bf16 %v6863_v37  ;;  %v6864_v43 = vunpack.i.l.bf16 %v6863_v37 }
 0xe8a   :  { %5650 = vmatpush3.bf16.msra.mxu1 %v2113_v47 }
 0xe8b   :  { %5651 = vmatprep.subr.bf16.mxu1 %v7600_v24  ;;  %v2490_v55 = vsel %vm2451_vm10, 0.0, %v6865_v13  ;;  %v2489_v5 = vsel %vm2451_vm10, 0.0, %v6864_v43 }
 0xe8e   :  { %5652 = vmatpush3.bf16.msra.mxu1 %v8398_v54 }
 0xe8f   :  { %5669 = vmatprep.subr.bf16.mxu1 %v7600_v24 }
 0xe91   :  { %5654 = vmatmul.mubr.msk.bf16.vlgmr.msra.gmra.mrb[20].mxu1 %vm957_vm4, %v7575_v35 }
 0xe92   :  { %5677 = vmatprep.mubr.msk.bf16.mxu1 %vm7601_vm11, %v7600_v24 }
 0xf64   :  { %v2156_v25 = vpop.f32.mrb[20].mxu1 }
 0xf65   :  { %v8541_v10 = vadd.f32 %v2156_v25, %v8452_v7  ;;  %v5655_v50 = vpop.f32.mrb[21].mxu1  ;;  %v8544_v23 = vadd.f32 %v2156_v25, %v8449_v22 }
 0xf66   :  { %v2159_v51 = vpop.f32.mrb[22].mxu1 }
 0xf67   :  { %v2207_v16 = vmul.f32 0.1, %v8541_v10  ;;  %v8548_v36 = vadd.f32 %v2159_v51, %v8459_v40  ;;  %v8551_v26 = vadd.f32 %v2159_v51, %v8462_v41  ;;  %v5656_v45 = vpop.f32.mrb[23].mxu1  ;;  %vm2205_vm3 = vcmp.ge.f32.partialorder %v8541_v10, 0.0 }
 0xf68   :  { %v2173_v22 = vmul.f32 0.1, %v8544_v23  ;;  %vm2171_vm2 = vcmp.ge.f32.partialorder %v8544_v23, 0.0 }
 0xf69   :  { %v2174_v57 = vmul.f32 0.1, %v8548_v36  ;;  %vm2206_vm7 = vcmp.ge.f32.partialorder %v8551_v26, 0.0  ;;  %v2208_v7 = vmul.f32 0.1, %v8551_v26  ;;  %vm2172_vm8 = vcmp.ge.f32.partialorder %v8548_v36, 0.0 }
 0xf6a   :  { %v2209_v56 = vsel %vm2205_vm3, %v8541_v10, %v2207_v16  ;;  %v2175_v52 = vsel %vm2171_vm2, %v8544_v23, %v2173_v22  ;;  %vm2454_vm3 = vcmask 277504  }
 0xf6b   :  { %v2210_v40 = vsel %vm2206_vm7, %v8551_v26, %v2208_v7  ;;  %v2176_v27 = vsel %vm2172_vm8, %v8548_v36, %v2174_v57  ;;  %v2492_v61 = vsel %vm2454_vm3, %v2490_v55, 0.0  ;;  %v2491_v49 = vsel %vm2454_vm3, %v2489_v5, 0.0 }
 0xf6c   :  { %v6856_v41 = vpack.i.bf16 %v2210_v40, %v2209_v56  ;;  %v6866_v58 = vpack.i.bf16 %v2176_v27, %v2175_v52  ;;  %v6886_v0 = vpack.i.bf16 %v2492_v61, %v2491_v49  ;;  %vm2561_vm7 = vcmask 662528  }
 0xf6e   :  { %6857 = vrot.lane.b32.xlu1 %v6856_v41, %s7612_s4  ;;  %s8685_s4 = sld [smem:[%s9524_s0 + %s7617_s30]]   ;;  %s7622_s30 = smov 12  }
 0xf72   :  { %6867 = vrot.lane.b32.xlu1 %v6866_v58, %s7608_s17 }
 0xfe0   :  { %v6858_v19 = vpop.permute.xlu1 %6857 }
 0xfe1   :  { %v6860_v20 = vunpack.i.h.bf16 %v6858_v19  ;;  %v6859_v38 = vunpack.i.l.bf16 %v6858_v19 }
 0xfe3   :  { %v2220_v31 = vsel %vm9531_vm14, 0.0, %v6860_v20  ;;  %v2219_v39 = vsel %vm9531_vm14, 0.0, %v6859_v38 }
 0xfe4   :  { %v2222_v15 = vsel %vm2188_vm15, %v2220_v31, 0.0  ;;  %v2221_v2 = vsel %vm2188_vm15, %v2219_v39, 0.0  ;;  %v6868_v29 = vpop.permute.xlu1 %6867 }
 0xfe5   :  { %v6871_v32 = vpack.i.bf16 %v2222_v15, %v2221_v2  ;;  %v6870_v11 = vunpack.i.h.bf16 %v6868_v29  ;;  %v6869_v34 = vunpack.i.l.bf16 %v6868_v29 }
 0xfe7   :  { %6872 = vrot.lane.b32.xlu0 %v6871_v32, %s7592_s12  ;;  %6877 = vrot.lane.b32.xlu1 %v6871_v32, %s7613_s5  ;;  %v2187_v28 = vsel %vm9531_vm14, 0.0, %v6870_v11  ;;  %v2186_v42 = vsel %vm9531_vm14, 0.0, %v6869_v34 }
 0xfe8   :  { %v2190_v6 = vsel %vm2188_vm15, %v2187_v28, 0.0  ;;  %v2189_v12 = vsel %vm2188_vm15, %v2186_v42, 0.0 }
 0xfe9   :  { %v6911_v33 = vpack.i.bf16 %v2190_v6, %v2189_v12 }
 0xfeb   :  { %6882 = vrot.lane.b32.xlu0 %v8348_v21, %s7602_s27  ;;  %6887 = vrot.lane.b32.xlu1 %v6886_v0, %s7588_s8 }
 0xfef   :  { %6892 = vrot.lane.b32.xlu0 %v6886_v0, %s7589_s9  ;;  %6897 = vrot.lane.b32.xlu1 %v6886_v0, %s7590_s10 }
 0xff3   :  { %6902 = vrot.lane.b32.xlu0 %v6886_v0, %s7591_s11  ;;  %6907 = vrot.lane.b32.xlu1 %v6871_v32, %s7605_s2 }
 0xff7   :  { %6912 = vrot.lane.b32.xlu0 %v6911_v33, %s7592_s12 }
 0xffb   :  { %6917 = vrot.lane.b32.xlu0 %v6911_v33, %s7613_s5 }
 0xfff   :  { %6932 = vrot.lane.b32.xlu0 %v6886_v0, %s7605_s2 }
0x1059   :  { %v6873_v21 = vpop.permute.xlu0 %6872  ;;  %v6878_v1 = vpop.permute.xlu1 %6877 }
0x105a   :  { %6922 = vrot.lane.b32.xlu1 %v6873_v21, %s7605_s2 }
0x105d   :  { %v6883_v63 = vpop.permute.xlu0 %6882  ;;  %v6888_v44 = vpop.permute.xlu1 %6887 }
0x105e   :  { %v6885_v4 = vunpack.i.h.bf16 %v6883_v63  ;;  %v6884_v8 = vunpack.i.l.bf16 %v6883_v63  ;;  %6927 = vrot.lane.b32.xlu1 %v6878_v1, %s7605_s2  ;;  %6942 = vrot.lane.b32.xlu0 %v6888_v44, %s7605_s2 }
0x1060   :  { %v2453_v47 = vsel %vm2451_vm10, 0.0, %v6885_v4  ;;  %v2452_v35 = vsel %vm2451_vm10, 0.0, %v6884_v8  ;;  %v7576_v4 = vld [vmem:[%s8599_s20] sm:$0xff]   ;;  %s8699_s20 = sld [smem:[%s9524_s0 + %s7618_s6]]   ;;  %s7623_s6 = smov 13  }
0x1061   :  { %v2456_v25 = vsel %vm2454_vm3, %v2453_v47, 0.0  ;;  %v2455_v50 = vsel %vm2454_vm3, %v2452_v35, 0.0  ;;  %v6893_v51 = vpop.permute.xlu0 %6892  ;;  %v6898_v16 = vpop.permute.xlu1 %6897 }
0x1062   :  { %v6936_v45 = vpack.i.bf16 %v2456_v25, %v2455_v50  ;;  %6952 = vrot.lane.b32.xlu0 %v6893_v51, %s7605_s2 }
0x1064   :  { %6937 = vrot.lane.b32.xlu1 %v6936_v45, %s7588_s8 }
0x1065   :  { %v6903_v57 = vpop.permute.xlu0 %6902  ;;  %v6908_v7 = vpop.permute.xlu1 %6907 }
0x1066   :  { %v6910_v22 = vunpack.i.h.bf16 %v6908_v7  ;;  %v6909_v56 = vunpack.i.l.bf16 %v6908_v7  ;;  %6962 = vrot.lane.b32.xlu0 %v6898_v16, %s7605_s2 }
0x1068   :  { %v2251_v40 = vsel %vm1432_vm6, %v2189_v12, %v6909_v56  ;;  %v2252_v41 = vsel %vm1432_vm6, %v2190_v6, %v6910_v22  ;;  %6947 = vrot.lane.b32.xlu1 %v6936_v45, %s7589_s9 }
0x1069   :  { %v6913_v27 = vpop.permute.xlu0 %6912  ;;  %v2257_v52 = vpack.c.bf16 %v2252_v41, %v2251_v40 }
0x106a   :  { %6972 = vrot.lane.b32.xlu0 %v6903_v57, %s7605_s2  ;;  %v6915_v5 = vunpack.i.h.bf16 %v6913_v27  ;;  %v6914_v31 = vunpack.i.l.bf16 %v6913_v27 }
0x106b   :  { %5658 = vmatpush3.bf16.msra.mxu0 %v2257_v52 }
0x106c   :  { %5659 = vmatprep.subr.bf16.mxu0 %v7600_v24  ;;  %6957 = vrot.lane.b32.xlu1 %v6936_v45, %s7590_s10 }
0x106d   :  { %v6918_v58 = vpop.permute.xlu0 %6917 }
0x106e   :  { %v6920_v29 = vunpack.i.h.bf16 %v6918_v58  ;;  %v6919_v0 = vunpack.i.l.bf16 %v6918_v58 }
0x1070   :  { %6967 = vrot.lane.b32.xlu1 %v6936_v45, %s7591_s11 }
0x1071   :  { %v6933_v37 = vpop.permute.xlu0 %6932 }
0x1072   :  { %v6935_v13 = vunpack.i.h.bf16 %v6933_v37  ;;  %v6934_v43 = vunpack.i.l.bf16 %v6933_v37 }
0x1074   :  { %v2542_v19 = vsel %vm1432_vm6, %v2456_v25, %v6935_v13  ;;  %v2541_v20 = vsel %vm1432_vm6, %v2455_v50, %v6934_v43 }
0x1075   :  { %v2551_v38 = vpack.c.bf16 %v2542_v19, %v2541_v20 }
0x10cc   :  { %v6923_v55 = vpop.permute.xlu1 %6922 }
0x10cd   :  { %v6925_v39 = vunpack.i.h.bf16 %v6923_v55  ;;  %v6924_v15 = vunpack.i.l.bf16 %v6923_v55 }
0x10cf   :  { %v2253_v2 = vsel %vm1432_vm6, %v6914_v31, %v6924_v15  ;;  %v2254_v32 = vsel %vm1432_vm6, %v6915_v5, %v6925_v39 }
0x10d0   :  { %v6928_v61 = vpop.permute.xlu1 %6927  ;;  %v2258_v49 = vpack.c.bf16 %v2254_v32, %v2253_v2  ;;  %v6943_v28 = vpop.permute.xlu0 %6942 }
0x10d1   :  { %v6930_v11 = vunpack.i.h.bf16 %v6928_v61  ;;  %v6929_v34 = vunpack.i.l.bf16 %v6928_v61  ;;  %v6945_v8 = vunpack.i.h.bf16 %v6943_v28  ;;  %v6944_v47 = vunpack.i.l.bf16 %v6943_v28  ;;  %v7577_v61 = vld [vmem:[%s8617_s28] sm:$0xff]   ;;  %s7621_s28 = smov 116  }
0x10d2   :  { %5660 = vmatpush3.bf16.msra.mxu0 %v2258_v49 }
0x10d3   :  { %v2255_v42 = vsel %vm1432_vm6, %v6919_v0, %v6929_v34  ;;  %v2256_v6 = vsel %vm1432_vm6, %v6920_v29, %v6930_v11  ;;  %5661 = vmatprep.subr.bf16.mxu0 %v7600_v24 }
0x10d4   :  { %v2259_v33 = vpack.c.bf16 %v2256_v6, %v2255_v42  ;;  %v6953_v21 = vpop.permute.xlu0 %6952 }
0x10d5   :  { %v6955_v57 = vunpack.i.h.bf16 %v6953_v21  ;;  %v6954_v7 = vunpack.i.l.bf16 %v6953_v21 }
0x10d6   :  { %v6938_v12 = vpop.permute.xlu1 %6937  ;;  %5662 = vmatpush3.bf16.msra.mxu0 %v2259_v33 }
0x10d7   :  { %5663 = vmatprep.subr.bf16.mxu0 %v7600_v24  ;;  %v6940_v63 = vunpack.i.h.bf16 %v6938_v12  ;;  %v6939_v44 = vunpack.i.l.bf16 %v6938_v12 }
0x10d8   :  { %v6963_v45 = vpop.permute.xlu0 %6962 }
0x10d9   :  { %v2543_v25 = vsel %vm1432_vm6, %v6939_v44, %v6944_v47  ;;  %v2544_v50 = vsel %vm1432_vm6, %v6940_v63, %v6945_v8  ;;  %v6965_v58 = vunpack.i.h.bf16 %v6963_v45  ;;  %v6964_v37 = vunpack.i.l.bf16 %v6963_v45 }
0x10da   :  { %v6948_v1 = vpop.permute.xlu1 %6947  ;;  %5664 = vmatpush3.bf16.msra.mxu0 %v8398_v54  ;;  %v2552_v22 = vpack.c.bf16 %v2544_v50, %v2543_v25 }
0x10db   :  { %5681 = vmatprep.subr.bf16.mxu0 %v7600_v24  ;;  %v6950_v51 = vunpack.i.h.bf16 %v6948_v1  ;;  %v6949_v16 = vunpack.i.l.bf16 %v6948_v1 }
0x10dc   :  { %v6973_v13 = vpop.permute.xlu0 %6972 }
0x10dd   :  { %5666 = vmatmul.mubr.msk.bf16.vlgmr.msra.gmra.mrb[24].mxu0 %vm957_vm4, %v7576_v4  ;;  %v2545_v56 = vsel %vm1432_vm6, %v6949_v16, %v6954_v7  ;;  %v2546_v40 = vsel %vm1432_vm6, %v6950_v51, %v6955_v57  ;;  %v6975_v5 = vunpack.i.h.bf16 %v6973_v13  ;;  %v6974_v31 = vunpack.i.l.bf16 %v6973_v13 }
0x10de   :  { %v6958_v35 = vpop.permute.xlu1 %6957  ;;  %5682 = vmatpush3.bf16.msra.mxu0 %v2551_v38  ;;  %5693 = vmatprep.mubr.msk.bf16.mxu0 %vm7601_vm11, %v7600_v24  ;;  %v2553_v43 = vpack.c.bf16 %v2546_v40, %v2545_v56 }
0x10df   :  { %5683 = vmatprep.subr.bf16.mxu0 %v7600_v24  ;;  %v6960_v41 = vunpack.i.h.bf16 %v6958_v35  ;;  %v6959_v27 = vunpack.i.l.bf16 %v6958_v35 }
0x10e1   :  { %v2547_v19 = vsel %vm1432_vm6, %v6959_v27, %v6964_v37  ;;  %v2548_v20 = vsel %vm1432_vm6, %v6960_v41, %v6965_v58 }
0x10e2   :  { %v6968_v52 = vpop.permute.xlu1 %6967  ;;  %5684 = vmatpush3.bf16.msra.mxu0 %v2552_v22  ;;  %v2554_v39 = vpack.c.bf16 %v2548_v20, %v2547_v19 }
0x10e3   :  { %5685 = vmatprep.subr.bf16.mxu0 %v7600_v24  ;;  %v6970_v38 = vunpack.i.h.bf16 %v6968_v52  ;;  %v6969_v55 = vunpack.i.l.bf16 %v6968_v52 }
0x10e5   :  { %v2549_v15 = vsel %vm1432_vm6, %v6969_v55, %v6974_v31  ;;  %v2550_v2 = vsel %vm1432_vm6, %v6970_v38, %v6975_v5 }
0x10e6   :  { %5686 = vmatpush3.bf16.msra.mxu0 %v2553_v43  ;;  %v2555_v32 = vpack.c.bf16 %v2550_v2, %v2549_v15 }
0x10e7   :  { %5687 = vmatprep.subr.bf16.mxu0 %v7600_v24 }
0x10ea   :  { %5688 = vmatpush3.bf16.msra.mxu0 %v2554_v39 }
0x10eb   :  { %5689 = vmatprep.subr.bf16.mxu0 %v7600_v24 }
0x10ee   :  { %5690 = vmatpush3.bf16.msra.mxu0 %v2555_v32 }
0x10ef   :  { %5691 = vmatprep.subr.bf16.mxu0 %v7600_v24 }
0x10f2   :  { %5692 = vmatpush3.bf16.msra.mxu0 %v8398_v54 }
0x10f3   :  { %5713 = vmatprep.subr.bf16.mxu0 %v7600_v24 }
0x10f5   :  { %5694 = vmatmul.mubr.msk.bf16.vlgmr.msra.gmra.mrb[28].mxu0 %vm2561_vm7, %v7577_v61 }
0x10f6   :  { %5725 = vmatprep.mubr.msk.bf16.mxu0 %vm7601_vm11, %v7600_v24 }
0x11b0   :  { %v2302_v49 = vpop.f32.mrb[24].mxu0 }
0x11b1   :  { %v2311_v29 = vmul.f32 0.1, %v2302_v49  ;;  %v5667_v0 = vpop.f32.mrb[25].mxu0  ;;  %vm2309_vm8 = vcmp.ge.f32.partialorder %v2302_v49, 0.0 }
0x11b2   :  { %v2305_v11 = vpop.f32.mrb[26].mxu0 }
0x11b3   :  { %vm2310_vm2 = vcmp.ge.f32.partialorder %v2305_v11, 0.0  ;;  %v2312_v34 = vmul.f32 0.1, %v2305_v11  ;;  %v5668_v28 = vpop.f32.mrb[27].mxu0  ;;  %v2313_v42 = vsel %vm2309_vm8, %v2302_v49, %v2311_v29 }
0x11b5   :  { %v2314_v6 = vsel %vm2310_vm2, %v2305_v11, %v2312_v34 }
0x11b6   :  { %v6986_v12 = vpack.i.bf16 %v2314_v6, %v2313_v42 }
0x11b8   :  { %6977 = vrot.lane.b32.xlu1 %v6986_v12, %s7607_s16 }
0x11bc   :  { %6987 = vrot.lane.b32.xlu1 %v6986_v12, %s7595_s15 }
0x11c8   :  { %v2599_v33 = vpop.f32.mrb[28].mxu0 }
0x11c9   :  { %v2608_v21 = vmul.f32 0.1, %v2599_v33  ;;  %v5695_v1 = vpop.f32.mrb[29].mxu0  ;;  %vm2606_vm15 = vcmp.ge.f32.partialorder %v2599_v33, 0.0 }
0x11ca   :  { %v2602_v63 = vpop.f32.mrb[30].mxu0 }
0x11cb   :  { %vm2607_vm14 = vcmp.ge.f32.partialorder %v2602_v63, 0.0  ;;  %v2609_v44 = vmul.f32 0.1, %v2602_v63  ;;  %v5696_v4 = vpop.f32.mrb[31].mxu0  ;;  %v2610_v8 = vsel %vm2606_vm15, %v2599_v33, %v2608_v21  ;;  %vm9533_vm15 = vcmask 48128  }
0x11cd   :  { %v2611_v47 = vsel %vm2607_vm14, %v2602_v63, %v2609_v44 }
0x11ce   :  { %v7001_v35 = vpack.i.bf16 %v2611_v47, %v2610_v8 }
0x11d0   :  { %6982 = vrot.lane.b32.xlu0 %v7001_v35, %s7616_s29 }
0x122a   :  { %v6978_v25 = vpop.permute.xlu1 %6977 }
0x122b   :  { %v6980_v50 = vunpack.i.h.bf16 %v6978_v25  ;;  %v6979_v51 = vunpack.i.l.bf16 %v6978_v25 }
0x122d   :  { %v2348_v16 = vsel %vm1149_vm9, 0.0, %v6980_v50  ;;  %v2347_v45 = vsel %vm1149_vm9, 0.0, %v6979_v51 }
0x122e   :  { %v2350_v57 = vsel %vm1625_vm13, %v2348_v16, 0.0  ;;  %v2349_v7 = vsel %vm1625_vm13, %v2347_v45, 0.0  ;;  %v6988_v56 = vpop.permute.xlu1 %6987 }
0x122f   :  { %v6996_v22 = vpack.i.bf16 %v2350_v57, %v2349_v7  ;;  %v6990_v52 = vunpack.i.h.bf16 %v6988_v56  ;;  %v6989_v58 = vunpack.i.l.bf16 %v6988_v56 }
0x1231   :  { %6997 = vrot.lane.b32.xlu1 %v6996_v22, %s7589_s9  ;;  %6992 = vrot.lane.b32.xlu0 %v6996_v22, %s7588_s8  ;;  %v2324_v38 = vsel %vm1149_vm9, 0.0, %v6990_v52  ;;  %v2323_v55 = vsel %vm1149_vm9, 0.0, %v6989_v58 }
0x1232   :  { %v2326_v5 = vsel %vm1625_vm13, %v2324_v38, 0.0  ;;  %v2325_v31 = vsel %vm1625_vm13, %v2323_v55, 0.0 }
0x1233   :  { %v7031_v39 = vpack.i.bf16 %v2326_v5, %v2325_v31 }
0x1235   :  { %7002 = vrot.lane.b32.xlu0 %v7001_v35, %s7602_s27 }
0x1242   :  { %v6983_v40 = vpop.permute.xlu0 %6982 }
0x1243   :  { %v6985_v41 = vunpack.i.h.bf16 %v6983_v40  ;;  %v6984_v27 = vunpack.i.l.bf16 %v6983_v40 }
0x1245   :  { %v2657_v37 = vsel %vm2451_vm10, 0.0, %v6985_v41  ;;  %v2656_v13 = vsel %vm2451_vm10, 0.0, %v6984_v27 }
0x1246   :  { %v2659_v43 = vsel %vm2454_vm3, %v2657_v37, 0.0  ;;  %v2658_v19 = vsel %vm2454_vm3, %v2656_v13, 0.0 }
0x1247   :  { %v7011_v20 = vpack.i.bf16 %v2659_v43, %v2658_v19 }
0x1249   :  { %7012 = vrot.lane.b32.xlu0 %v7011_v20, %s7589_s9  ;;  %7007 = vrot.lane.b32.xlu1 %v7011_v20, %s7588_s8 }
0x124d   :  { %7022 = vrot.lane.b32.xlu0 %v7011_v20, %s7591_s11  ;;  %7017 = vrot.lane.b32.xlu1 %v7011_v20, %s7590_s10 }
0x1251   :  { %7032 = vrot.lane.b32.xlu0 %v7031_v39, %s7588_s8  ;;  %7027 = vrot.lane.b32.xlu1 %v6996_v22, %s7605_s2 }
0x1255   :  { %7037 = vrot.lane.b32.xlu0 %v7031_v39, %s7589_s9 }
0x1259   :  { %7052 = vrot.lane.b32.xlu0 %v7011_v20, %s7605_s2 }
0x12a3   :  { %v6998_v15 = vpop.permute.xlu1 %6997  ;;  %v6993_v2 = vpop.permute.xlu0 %6992 }
0x12a4   :  { %7042 = vrot.lane.b32.xlu1 %v6993_v2, %s7605_s2 }
0x12a7   :  { %v7003_v32 = vpop.permute.xlu0 %7002 }
0x12a8   :  { %v7005_v61 = vunpack.i.h.bf16 %v7003_v32  ;;  %v7004_v49 = vunpack.i.l.bf16 %v7003_v32  ;;  %7047 = vrot.lane.b32.xlu1 %v6998_v15, %s7605_s2 }
0x12aa   :  { %v2621_v29 = vsel %vm2451_vm10, 0.0, %v7005_v61  ;;  %v2620_v0 = vsel %vm2451_vm10, 0.0, %v7004_v49 }
0x12ab   :  { %v2623_v11 = vsel %vm2454_vm3, %v2621_v29, 0.0  ;;  %v2622_v34 = vsel %vm2454_vm3, %v2620_v0, 0.0 }
0x12ac   :  { %v7056_v28 = vpack.i.bf16 %v2623_v11, %v2622_v34 }
0x12ae   :  { %7057 = vrot.lane.b32.xlu1 %v7056_v28, %s7588_s8 }
0x12b2   :  { %7062 = vrot.lane.b32.xlu1 %v7056_v28, %s7589_s9 }
0x12b6   :  { %7067 = vrot.lane.b32.xlu1 %v7056_v28, %s7590_s10 }
0x12ba   :  { %7072 = vrot.lane.b32.xlu1 %v7056_v28, %s7591_s11 }
0x12bb   :  { %v7013_v42 = vpop.permute.xlu0 %7012  ;;  %v7008_v6 = vpop.permute.xlu1 %7007 }
0x12bc   :  { %7077 = vrot.lane.b32.xlu0 %v7008_v6, %s7605_s2 }
0x12bf   :  { %v7023_v12 = vpop.permute.xlu0 %7022  ;;  %v7018_v33 = vpop.permute.xlu1 %7017 }
0x12c0   :  { %7082 = vrot.lane.b32.xlu0 %v7013_v42, %s7605_s2 }
0x12c3   :  { %v7033_v21 = vpop.permute.xlu0 %7032  ;;  %v7028_v1 = vpop.permute.xlu1 %7027 }
0x12c4   :  { %v7030_v63 = vunpack.i.h.bf16 %v7028_v1  ;;  %v7029_v44 = vunpack.i.l.bf16 %v7028_v1  ;;  %7087 = vrot.lane.b32.xlu0 %v7018_v33, %s7605_s2  ;;  %v7035_v22 = vunpack.i.h.bf16 %v7033_v21  ;;  %v7034_v56 = vunpack.i.l.bf16 %v7033_v21 }
0x12c6   :  { %v2380_v4 = vsel %vm1432_vm6, %v2326_v5, %v7030_v63  ;;  %v2379_v8 = vsel %vm1432_vm6, %v2325_v31, %v7029_v44  ;;  %v7578_v31 = vld [vmem:[%s8685_s4] sm:$0xff]   ;;  %s8786_s4 = sld [smem:[%s9524_s0 + %s7622_s30]]   ;;  %s7625_s30 = smov 108  }
0x12c7   :  { %v7038_v47 = vpop.permute.xlu0 %7037  ;;  %v2385_v35 = vpack.c.bf16 %v2380_v4, %v2379_v8 }
0x12c8   :  { %7092 = vrot.lane.b32.xlu0 %v7023_v12, %s7605_s2  ;;  %v7040_v13 = vunpack.i.h.bf16 %v7038_v47  ;;  %v7039_v43 = vunpack.i.l.bf16 %v7038_v47 }
0x12c9   :  { %5670 = vmatpush3.bf16.msra.mxu1 %v2385_v35 }
0x12ca   :  { %5671 = vmatprep.subr.bf16.mxu1 %v7600_v24 }
0x12cb   :  { %v7053_v25 = vpop.permute.xlu0 %7052 }
0x12cc   :  { %v7055_v50 = vunpack.i.h.bf16 %v7053_v25  ;;  %v7054_v51 = vunpack.i.l.bf16 %v7053_v25 }
0x12ce   :  { %v2709_v16 = vsel %vm1432_vm6, %v2623_v11, %v7055_v50  ;;  %v2708_v45 = vsel %vm1432_vm6, %v2622_v34, %v7054_v51 }
0x12cf   :  { %v2718_v57 = vpack.c.bf16 %v2709_v16, %v2708_v45 }
0x1316   :  { %v7043_v7 = vpop.permute.xlu1 %7042 }
0x1317   :  { %v7045_v40 = vunpack.i.h.bf16 %v7043_v7  ;;  %v7044_v41 = vunpack.i.l.bf16 %v7043_v7 }
0x1319   :  { %v2382_v27 = vsel %vm1432_vm6, %v7035_v22, %v7045_v40  ;;  %v2381_v52 = vsel %vm1432_vm6, %v7034_v56, %v7044_v41 }
0x131a   :  { %v7048_v58 = vpop.permute.xlu1 %7047  ;;  %v2386_v37 = vpack.c.bf16 %v2382_v27, %v2381_v52 }
0x131b   :  { %v7050_v19 = vunpack.i.h.bf16 %v7048_v58  ;;  %v7049_v20 = vunpack.i.l.bf16 %v7048_v58  ;;  %v7579_v58 = vld [vmem:[%s8699_s20] sm:$0xff]   ;;  %s8835_s20 = sld [smem:[%s9524_s0 + %s7623_s6]]  }
0x131c   :  { %5672 = vmatpush3.bf16.msra.mxu1 %v2386_v37  ;;  %s8903_s6 = sld [smem:[%s9524_s0 + %s7626_s1]]  }
0x131d   :  { %v2384_v38 = vsel %vm1432_vm6, %v7040_v13, %v7050_v19  ;;  %v2383_v55 = vsel %vm1432_vm6, %v7039_v43, %v7049_v20  ;;  %5673 = vmatprep.subr.bf16.mxu1 %v7600_v24  ;;  %s5208_s1 = sld [smem:[%s9524_s0 + %s7628_s19]]  }
0x131e   :  { %v2387_v5 = vpack.c.bf16 %v2384_v38, %v2383_v55 }
0x1320   :  { %5674 = vmatpush3.bf16.msra.mxu1 %v2387_v5  ;;  %v7058_v39 = vpop.permute.xlu1 %7057 }
0x1321   :  { %5675 = vmatprep.subr.bf16.mxu1 %v7600_v24  ;;  %v7060_v32 = vunpack.i.h.bf16 %v7058_v39  ;;  %v7059_v61 = vunpack.i.l.bf16 %v7058_v39 }
0x1324   :  { %5676 = vmatpush3.bf16.msra.mxu1 %v8398_v54  ;;  %v7063_v15 = vpop.permute.xlu1 %7062 }
0x1325   :  { %5697 = vmatprep.subr.bf16.mxu1 %v7600_v24  ;;  %v7065_v6 = vunpack.i.h.bf16 %v7063_v15  ;;  %v7064_v12 = vunpack.i.l.bf16 %v7063_v15 }
0x1327   :  { %5678 = vmatmul.mubr.msk.bf16.vlgmr.msra.gmra.mrb[24].mxu1 %vm957_vm4, %v7578_v31 }
0x1328   :  { %5698 = vmatpush3.bf16.msra.mxu1 %v2718_v57  ;;  %5709 = vmatprep.mubr.msk.bf16.mxu1 %vm7601_vm11, %v7600_v24  ;;  %v7068_v34 = vpop.permute.xlu1 %7067 }
0x1329   :  { %5699 = vmatprep.subr.bf16.mxu1 %v7600_v24  ;;  %v7070_v8 = vunpack.i.h.bf16 %v7068_v34  ;;  %v7069_v47 = vunpack.i.l.bf16 %v7068_v34 }
0x132c   :  { %v7073_v50 = vpop.permute.xlu1 %7072 }
0x132d   :  { %v7075_v7 = vunpack.i.h.bf16 %v7073_v50  ;;  %v7074_v22 = vunpack.i.l.bf16 %v7073_v50 }
0x132e   :  { %v7078_v2 = vpop.permute.xlu0 %7077 }
0x132f   :  { %v7080_v49 = vunpack.i.h.bf16 %v7078_v2  ;;  %v7079_v29 = vunpack.i.l.bf16 %v7078_v2 }
0x1331   :  { %v2711_v0 = vsel %vm1432_vm6, %v7060_v32, %v7080_v49  ;;  %v2710_v11 = vsel %vm1432_vm6, %v7059_v61, %v7079_v29 }
0x1332   :  { %v7083_v28 = vpop.permute.xlu0 %7082  ;;  %v2719_v42 = vpack.c.bf16 %v2711_v0, %v2710_v11 }
0x1333   :  { %v7085_v33 = vunpack.i.h.bf16 %v7083_v28  ;;  %v7084_v21 = vunpack.i.l.bf16 %v7083_v28 }
0x1334   :  { %5700 = vmatpush3.bf16.msra.mxu1 %v2719_v42 }
0x1335   :  { %v2713_v1 = vsel %vm1432_vm6, %v7065_v6, %v7085_v33  ;;  %v2712_v63 = vsel %vm1432_vm6, %v7064_v12, %v7084_v21  ;;  %5701 = vmatprep.subr.bf16.mxu1 %v7600_v24 }
0x1336   :  { %v7088_v44 = vpop.permute.xlu0 %7087  ;;  %v2720_v4 = vpack.c.bf16 %v2713_v1, %v2712_v63 }
0x1337   :  { %v7090_v35 = vunpack.i.h.bf16 %v7088_v44  ;;  %v7089_v25 = vunpack.i.l.bf16 %v7088_v44 }
0x1338   :  { %5702 = vmatpush3.bf16.msra.mxu1 %v2720_v4 }
0x1339   :  { %v2715_v51 = vsel %vm1432_vm6, %v7070_v8, %v7090_v35  ;;  %v2714_v16 = vsel %vm1432_vm6, %v7069_v47, %v7089_v25  ;;  %5703 = vmatprep.subr.bf16.mxu1 %v7600_v24 }
0x133a   :  { %v7093_v45 = vpop.permute.xlu0 %7092  ;;  %v2721_v57 = vpack.c.bf16 %v2715_v51, %v2714_v16 }
0x133b   :  { %v7095_v56 = vunpack.i.h.bf16 %v7093_v45  ;;  %v7094_v40 = vunpack.i.l.bf16 %v7093_v45 }
0x133c   :  { %5704 = vmatpush3.bf16.msra.mxu1 %v2721_v57 }
0x133d   :  { %v2717_v41 = vsel %vm1432_vm6, %v7075_v7, %v7095_v56  ;;  %v2716_v27 = vsel %vm1432_vm6, %v7074_v22, %v7094_v40  ;;  %5705 = vmatprep.subr.bf16.mxu1 %v7600_v24 }
0x133e   :  { %v2722_v52 = vpack.c.bf16 %v2717_v41, %v2716_v27 }
0x1340   :  { %5706 = vmatpush3.bf16.msra.mxu1 %v2722_v52 }
0x1341   :  { %5707 = vmatprep.subr.bf16.mxu1 %v7600_v24 }
0x1344   :  { %5708 = vmatpush3.bf16.msra.mxu1 %v8398_v54 }
0x1345   :  { %5729 = vmatprep.subr.bf16.mxu1 %v7600_v24 }
0x1347   :  { %5710 = vmatmul.mubr.msk.bf16.vlgmr.msra.gmra.mrb[28].mxu1 %vm2561_vm7, %v7579_v58 }
0x1348   :  { %5741 = vmatprep.mubr.msk.bf16.mxu1 %vm7601_vm11, %v7600_v24 }
0x13fa   :  { %v8736_v37 = vpop.f32.mrb[24].mxu1 }
0x13fb   :  { %v5679_v13 = vpop.f32.mrb[25].mxu1 }
0x13fc   :  { %v8738_v43 = vpop.f32.mrb[26].mxu1 }
0x13fd   :  { %v5680_v19 = vpop.f32.mrb[27].mxu1 }
0x141a   :  { %v2765_v20 = vpop.f32.mrb[28].mxu1 }
0x141b   :  { %v8741_v38 = vadd.f32 %v2765_v20, %v8342_v30  ;;  %v8744_v55 = vadd.f32 %v2765_v20, %v8446_v3  ;;  %v5711_v5 = vpop.f32.mrb[29].mxu1 }
0x141c   :  { %v2768_v31 = vpop.f32.mrb[30].mxu1 }
0x141d   :  { %v2782_v39 = vmul.f32 0.1, %v8741_v38  ;;  %v2828_v15 = vmul.f32 0.1, %v8744_v55  ;;  %v8749_v2 = vadd.f32 %v8338_v14, %v2768_v31  ;;  %v8752_v32 = vadd.f32 %v2768_v31, %v8454_v18  ;;  %v5712_v61 = vpop.f32.mrb[31].mxu1 }
0x141e   :  { %vm2780_vm4 = vcmp.ge.f32.partialorder %v8741_v38, 0.0  ;;  %vm2826_vm14 = vcmp.ge.f32.partialorder %v8744_v55, 0.0 }
0x141f   :  { %vm2781_vm8 = vcmp.ge.f32.partialorder %v8749_v2, 0.0  ;;  %v2783_v30 = vmul.f32 0.1, %v8749_v2  ;;  %vm2827_vm2 = vcmp.ge.f32.partialorder %v8752_v32, 0.0  ;;  %v2829_v3 = vmul.f32 0.1, %v8752_v32 }
0x1420   :  { %v2830_v49 = vsel %vm2826_vm14, %v8744_v55, %v2828_v15  ;;  %v2784_v18 = vsel %vm2780_vm4, %v8741_v38, %v2782_v39 }
0x1421   :  { %v2831_v14 = vsel %vm2827_vm2, %v8752_v32, %v2829_v3  ;;  %v2785_v29 = vsel %vm2781_vm8, %v8749_v2, %v2783_v30 }
0x1422   :  { %v7096_v0 = vpack.i.bf16 %v2831_v14, %v2830_v49  ;;  %v7101_v11 = vpack.i.bf16 %v2785_v29, %v2784_v18 }
0x1424   :  { %7097 = vrot.lane.b32.xlu1 %v7096_v0, %s7619_s25  ;;  %7102 = vrot.lane.b32.xlu0 %v7101_v11, %s7610_s24  ;;  %s7624_s25 = smov 106  }
0x1496   :  { %v7098_v34 = vpop.permute.xlu1 %7097  ;;  %v7103_v28 = vpop.permute.xlu0 %7102 }
0x1497   :  { %v7100_v42 = vunpack.i.h.bf16 %v7098_v34  ;;  %v7099_v6 = vunpack.i.l.bf16 %v7098_v34  ;;  %v7105_v21 = vunpack.i.h.bf16 %v7103_v28  ;;  %v7104_v1 = vunpack.i.l.bf16 %v7103_v28 }
0x1499   :  { %v2841_v12 = vsel %vm9533_vm15, 0.0, %v7100_v42  ;;  %v2840_v33 = vsel %vm9533_vm15, 0.0, %v7099_v6  ;;  %v2796_v8 = vsel %vm9533_vm15, 0.0, %v7105_v21  ;;  %v2795_v47 = vsel %vm9533_vm15, 0.0, %v7104_v1 }
0x149a   :  { %v2843_v63 = vsel %vm2797_vm0, %v2841_v12, 0.0  ;;  %v2842_v44 = vsel %vm2797_vm0, %v2840_v33, 0.0  ;;  %v2799_v35 = vsel %vm2797_vm0, %v2796_v8, 0.0  ;;  %v2798_v25 = vsel %vm2797_vm0, %v2795_v47, 0.0 }
0x149b   :  { %v7106_v4 = vpack.i.bf16 %v2843_v63, %v2842_v44  ;;  %v7131_v50 = vpack.i.bf16 %v2799_v35, %v2798_v25  ;;  %vm3147_vm15 = vcmask 343040  }
0x149d   :  { %7107 = vrot.lane.b32.xlu1 %v7106_v4, %s7590_s10  ;;  %7112 = vrot.lane.b32.xlu0 %v7106_v4, %s7593_s13 }
0x14a1   :  { %7117 = vrot.lane.b32.xlu1 %v7106_v4, %s7620_s26  ;;  %7122 = vrot.lane.b32.xlu0 %v7106_v4, %s7621_s28 }
0x14a5   :  { %7127 = vrot.lane.b32.xlu1 %v7106_v4, %s7605_s2  ;;  %7132 = vrot.lane.b32.xlu0 %v7131_v50, %s7590_s10 }
0x14a9   :  { %7137 = vrot.lane.b32.xlu0 %v7131_v50, %s7593_s13 }
0x14ad   :  { %7142 = vrot.lane.b32.xlu0 %v7131_v50, %s7620_s26 }
0x14b1   :  { %7147 = vrot.lane.b32.xlu0 %v7131_v50, %s7621_s28 }
0x150f   :  { %v7108_v51 = vpop.permute.xlu1 %7107  ;;  %v7113_v16 = vpop.permute.xlu0 %7112 }
0x1510   :  { %7152 = vrot.lane.b32.xlu1 %v7108_v51, %s7605_s2 }
0x1513   :  { %v7118_v45 = vpop.permute.xlu1 %7117  ;;  %v7123_v57 = vpop.permute.xlu0 %7122 }
0x1514   :  { %7157 = vrot.lane.b32.xlu1 %v7113_v16, %s7605_s2 }
0x1517   :  { %v7128_v7 = vpop.permute.xlu1 %7127  ;;  %v7133_v52 = vpop.permute.xlu0 %7132 }
0x1518   :  { %v7130_v22 = vunpack.i.h.bf16 %v7128_v7  ;;  %v7129_v56 = vunpack.i.l.bf16 %v7128_v7  ;;  %7162 = vrot.lane.b32.xlu1 %v7118_v45, %s7605_s2  ;;  %v7135_v19 = vunpack.i.h.bf16 %v7133_v52  ;;  %v7134_v20 = vunpack.i.l.bf16 %v7133_v52  ;;  %v7580_v45 = vld [vmem:[%s8786_s4] sm:$0xff]  }
0x151a   :  { %v2892_v40 = vsel %vm1432_vm6, %v2798_v25, %v7129_v56  ;;  %v2893_v41 = vsel %vm1432_vm6, %v2799_v35, %v7130_v22 }
0x151b   :  { %v2902_v27 = vpack.c.bf16 %v2893_v41, %v2892_v40  ;;  %v7138_v58 = vpop.permute.xlu0 %7137 }
0x151c   :  { %7167 = vrot.lane.b32.xlu1 %v7123_v57, %s7605_s2  ;;  %v7140_v49 = vunpack.i.h.bf16 %v7138_v58  ;;  %v7139_v14 = vunpack.i.l.bf16 %v7138_v58 }
0x151d   :  { %5714 = vmatpush3.bf16.msra.mxu0 %v2902_v27 }
0x151e   :  { %5715 = vmatprep.subr.bf16.mxu0 %v7600_v24 }
0x151f   :  { %v7143_v61 = vpop.permute.xlu0 %7142 }
0x1520   :  { %v7145_v42 = vunpack.i.h.bf16 %v7143_v61  ;;  %v7144_v6 = vunpack.i.l.bf16 %v7143_v61 }
0x1523   :  { %v7148_v21 = vpop.permute.xlu0 %7147 }
0x1524   :  { %v7150_v8 = vunpack.i.h.bf16 %v7148_v21  ;;  %v7149_v47 = vunpack.i.l.bf16 %v7148_v21 }
0x1582   :  { %v7153_v13 = vpop.permute.xlu1 %7152 }
0x1583   :  { %v7155_v5 = vunpack.i.h.bf16 %v7153_v13  ;;  %v7154_v31 = vunpack.i.l.bf16 %v7153_v13 }
0x1585   :  { %v2894_v39 = vsel %vm1432_vm6, %v7134_v20, %v7154_v31  ;;  %v2895_v15 = vsel %vm1432_vm6, %v7135_v19, %v7155_v5 }
0x1586   :  { %v7158_v30 = vpop.permute.xlu1 %7157  ;;  %v2903_v3 = vpack.c.bf16 %v2895_v15, %v2894_v39 }
0x1587   :  { %v7160_v18 = vunpack.i.h.bf16 %v7158_v30  ;;  %v7159_v29 = vunpack.i.l.bf16 %v7158_v30 }
0x1588   :  { %5716 = vmatpush3.bf16.msra.mxu0 %v2903_v3 }
0x1589   :  { %v2896_v0 = vsel %vm1432_vm6, %v7139_v14, %v7159_v29  ;;  %v2897_v11 = vsel %vm1432_vm6, %v7140_v49, %v7160_v18  ;;  %5717 = vmatprep.subr.bf16.mxu0 %v7600_v24 }
0x158a   :  { %v7163_v34 = vpop.permute.xlu1 %7162  ;;  %v2904_v28 = vpack.c.bf16 %v2897_v11, %v2896_v0 }
0x158b   :  { %v7165_v12 = vunpack.i.h.bf16 %v7163_v34  ;;  %v7164_v33 = vunpack.i.l.bf16 %v7163_v34 }
0x158c   :  { %5718 = vmatpush3.bf16.msra.mxu0 %v2904_v28 }
0x158d   :  { %v2898_v1 = vsel %vm1432_vm6, %v7144_v6, %v7164_v33  ;;  %v2899_v63 = vsel %vm1432_vm6, %v7145_v42, %v7165_v12  ;;  %5719 = vmatprep.subr.bf16.mxu0 %v7600_v24 }
0x158e   :  { %v7168_v44 = vpop.permute.xlu1 %7167  ;;  %v2905_v4 = vpack.c.bf16 %v2899_v63, %v2898_v1 }
0x158f   :  { %v7170_v35 = vunpack.i.h.bf16 %v7168_v44  ;;  %v7169_v25 = vunpack.i.l.bf16 %v7168_v44 }
0x1590   :  { %5720 = vmatpush3.bf16.msra.mxu0 %v2905_v4 }
0x1591   :  { %v2900_v50 = vsel %vm1432_vm6, %v7149_v47, %v7169_v25  ;;  %v2901_v51 = vsel %vm1432_vm6, %v7150_v8, %v7170_v35  ;;  %5721 = vmatprep.subr.bf16.mxu0 %v7600_v24 }
0x1592   :  { %v2906_v16 = vpack.c.bf16 %v2901_v51, %v2900_v50 }
0x1594   :  { %5722 = vmatpush3.bf16.msra.mxu0 %v2906_v16 }
0x1595   :  { %5723 = vmatprep.subr.bf16.mxu0 %v7600_v24 }
0x1598   :  { %5724 = vmatpush3.bf16.msra.mxu0 %v8398_v54 }
0x1599   :  { %5745 = vmatprep.subr.bf16.mxu0 %v7600_v24 }
0x159b   :  { %5726 = vmatmul.mubr.msk.bf16.vlgmr.msra.gmra.mrb[32].mxu0 %vm2561_vm7, %v7580_v45 }
0x159c   :  { %5757 = vmatprep.mubr.msk.bf16.mxu0 %vm7601_vm11, %v7600_v24 }
0x166e   :  { %v2949_v57 = vpop.f32.mrb[32].mxu0 }
0x166f   :  { %v2958_v7 = vmul.f32 0.1, %v2949_v57  ;;  %v5727_v22 = vpop.f32.mrb[33].mxu0  ;;  %vm2956_vm0 = vcmp.ge.f32.partialorder %v2949_v57, 0.0 }
0x1670   :  { %v2952_v56 = vpop.f32.mrb[34].mxu0 }
0x1671   :  { %vm2957_vm4 = vcmp.ge.f32.partialorder %v2952_v56, 0.0  ;;  %v2959_v40 = vmul.f32 0.1, %v2952_v56  ;;  %v5728_v41 = vpop.f32.mrb[35].mxu0  ;;  %v2960_v27 = vsel %vm2956_vm0, %v2949_v57, %v2958_v7 }
0x1673   :  { %v2961_v52 = vsel %vm2957_vm4, %v2952_v56, %v2959_v40  ;;  %vm3144_vm4 = vcmask 80896  }
0x1674   :  { %v7176_v58 = vpack.i.bf16 %v2961_v52, %v2960_v27 }
0x1676   :  { %7177 = vrot.lane.b32.xlu1 %v7176_v58, %s7602_s27  ;;  %7172 = vrot.lane.b32.xlu0 %v7176_v58, %s7616_s29 }
0x16e8   :  { %v7178_v13 = vpop.permute.xlu1 %7177  ;;  %v7173_v19 = vpop.permute.xlu0 %7172 }
0x16e9   :  { %v7175_v20 = vunpack.i.h.bf16 %v7173_v19  ;;  %v7174_v5 = vunpack.i.l.bf16 %v7173_v19  ;;  %v7180_v31 = vunpack.i.h.bf16 %v7178_v13  ;;  %v7179_v39 = vunpack.i.l.bf16 %v7178_v13 }
0x16eb   :  { %v3007_v15 = vsel %vm2451_vm10, 0.0, %v7175_v20  ;;  %v3006_v61 = vsel %vm2451_vm10, 0.0, %v7174_v5  ;;  %v2971_v14 = vsel %vm2451_vm10, 0.0, %v7180_v31  ;;  %v2970_v18 = vsel %vm2451_vm10, 0.0, %v7179_v39 }
0x16ec   :  { %v3009_v30 = vsel %vm2454_vm3, %v3007_v15, 0.0  ;;  %v3008_v3 = vsel %vm2454_vm3, %v3006_v61, 0.0  ;;  %v2973_v29 = vsel %vm2454_vm3, %v2971_v14, 0.0  ;;  %v2972_v0 = vsel %vm2454_vm3, %v2970_v18, 0.0 }
0x16ed   :  { %v7186_v49 = vpack.i.bf16 %v3009_v30, %v3008_v3  ;;  %v7206_v11 = vpack.i.bf16 %v2973_v29, %v2972_v0 }
0x16ef   :  { %7187 = vrot.lane.b32.xlu1 %v7186_v49, %s7589_s9  ;;  %7182 = vrot.lane.b32.xlu0 %v7186_v49, %s7588_s8 }
0x16f3   :  { %7197 = vrot.lane.b32.xlu1 %v7186_v49, %s7591_s11  ;;  %7192 = vrot.lane.b32.xlu0 %v7186_v49, %s7590_s10 }
0x16f7   :  { %7207 = vrot.lane.b32.xlu1 %v7206_v11, %s7588_s8  ;;  %7202 = vrot.lane.b32.xlu0 %v7186_v49, %s7605_s2 }
0x16fb   :  { %7212 = vrot.lane.b32.xlu1 %v7206_v11, %s7589_s9 }
0x16ff   :  { %7217 = vrot.lane.b32.xlu1 %v7206_v11, %s7590_s10 }
0x1703   :  { %7222 = vrot.lane.b32.xlu1 %v7206_v11, %s7591_s11 }
0x1761   :  { %v7188_v34 = vpop.permute.xlu1 %7187  ;;  %v7183_v28 = vpop.permute.xlu0 %7182 }
0x1762   :  { %7227 = vrot.lane.b32.xlu0 %v7183_v28, %s7605_s2 }
0x1765   :  { %v7193_v42 = vpop.permute.xlu0 %7192  ;;  %v7198_v6 = vpop.permute.xlu1 %7197 }
0x1766   :  { %7232 = vrot.lane.b32.xlu0 %v7188_v34, %s7605_s2 }
0x1769   :  { %v7203_v12 = vpop.permute.xlu0 %7202  ;;  %v7208_v4 = vpop.permute.xlu1 %7207 }
0x176a   :  { %v7205_v33 = vunpack.i.h.bf16 %v7203_v12  ;;  %v7204_v21 = vunpack.i.l.bf16 %v7203_v12  ;;  %7237 = vrot.lane.b32.xlu0 %v7193_v42, %s7605_s2  ;;  %v7210_v35 = vunpack.i.h.bf16 %v7208_v4  ;;  %v7209_v25 = vunpack.i.l.bf16 %v7208_v4  ;;  %v7581_v42 = vld [vmem:[%s8835_s20] sm:$0xff]  }
0x176c   :  { %v3059_v1 = vsel %vm1432_vm6, %v2973_v29, %v7205_v33  ;;  %v3058_v63 = vsel %vm1432_vm6, %v2972_v0, %v7204_v21 }
0x176d   :  { %v3068_v44 = vpack.c.bf16 %v3059_v1, %v3058_v63  ;;  %v7213_v8 = vpop.permute.xlu1 %7212 }
0x176e   :  { %7242 = vrot.lane.b32.xlu0 %v7198_v6, %s7605_s2  ;;  %v7215_v56 = vunpack.i.h.bf16 %v7213_v8  ;;  %v7214_v40 = vunpack.i.l.bf16 %v7213_v8 }
0x176f   :  { %5730 = vmatpush3.bf16.msra.mxu1 %v3068_v44 }
0x1770   :  { %5731 = vmatprep.subr.bf16.mxu1 %v7600_v24 }
0x1771   :  { %v7218_v57 = vpop.permute.xlu1 %7217 }
0x1772   :  { %v7220_v20 = vunpack.i.h.bf16 %v7218_v57  ;;  %v7219_v5 = vunpack.i.l.bf16 %v7218_v57 }
0x1775   :  { %v7223_v15 = vpop.permute.xlu1 %7222 }
0x1776   :  { %v7225_v14 = vunpack.i.h.bf16 %v7223_v15  ;;  %v7224_v18 = vunpack.i.l.bf16 %v7223_v15 }
0x17d4   :  { %v7228_v47 = vpop.permute.xlu0 %7227 }
0x17d5   :  { %v7230_v50 = vunpack.i.h.bf16 %v7228_v47  ;;  %v7229_v51 = vunpack.i.l.bf16 %v7228_v47 }
0x17d7   :  { %v3061_v16 = vsel %vm1432_vm6, %v7210_v35, %v7230_v50  ;;  %v3060_v45 = vsel %vm1432_vm6, %v7209_v25, %v7229_v51 }
0x17d8   :  { %v7233_v7 = vpop.permute.xlu0 %7232  ;;  %v3069_v22 = vpack.c.bf16 %v3061_v16, %v3060_v45 }
0x17d9   :  { %v7235_v41 = vunpack.i.h.bf16 %v7233_v7  ;;  %v7234_v27 = vunpack.i.l.bf16 %v7233_v7 }
0x17da   :  { %5732 = vmatpush3.bf16.msra.mxu1 %v3069_v22 }
0x17db   :  { %v3063_v52 = vsel %vm1432_vm6, %v7215_v56, %v7235_v41  ;;  %v3062_v58 = vsel %vm1432_vm6, %v7214_v40, %v7234_v27  ;;  %5733 = vmatprep.subr.bf16.mxu1 %v7600_v24 }
0x17dc   :  { %v7238_v13 = vpop.permute.xlu0 %7237  ;;  %v3070_v19 = vpack.c.bf16 %v3063_v52, %v3062_v58 }
0x17dd   :  { %v7240_v31 = vunpack.i.h.bf16 %v7238_v13  ;;  %v7239_v39 = vunpack.i.l.bf16 %v7238_v13 }
0x17de   :  { %5734 = vmatpush3.bf16.msra.mxu1 %v3070_v19 }
0x17df   :  { %v3065_v61 = vsel %vm1432_vm6, %v7220_v20, %v7240_v31  ;;  %v3064_v30 = vsel %vm1432_vm6, %v7219_v5, %v7239_v39  ;;  %5735 = vmatprep.subr.bf16.mxu1 %v7600_v24 }
0x17e0   :  { %v7243_v3 = vpop.permute.xlu0 %7242  ;;  %v3071_v49 = vpack.c.bf16 %v3065_v61, %v3064_v30 }
0x17e1   :  { %v7245_v29 = vunpack.i.h.bf16 %v7243_v3  ;;  %v7244_v0 = vunpack.i.l.bf16 %v7243_v3 }
0x17e2   :  { %5736 = vmatpush3.bf16.msra.mxu1 %v3071_v49 }
0x17e3   :  { %v3067_v11 = vsel %vm1432_vm6, %v7225_v14, %v7245_v29  ;;  %v3066_v34 = vsel %vm1432_vm6, %v7224_v18, %v7244_v0  ;;  %5737 = vmatprep.subr.bf16.mxu1 %v7600_v24 }
0x17e4   :  { %v3072_v28 = vpack.c.bf16 %v3067_v11, %v3066_v34 }
0x17e6   :  { %5738 = vmatpush3.bf16.msra.mxu1 %v3072_v28 }
0x17e7   :  { %5739 = vmatprep.subr.bf16.mxu1 %v7600_v24 }
0x17ea   :  { %5740 = vmatpush3.bf16.msra.mxu1 %v8398_v54 }
0x17eb   :  { %5761 = vmatprep.subr.bf16.mxu1 %v7600_v24 }
0x17ed   :  { %5742 = vmatmul.mubr.msk.bf16.vlgmr.msra.gmra.mrb[32].mxu1 %vm2561_vm7, %v7581_v42 }
0x17ee   :  { %5773 = vmatprep.mubr.msk.bf16.mxu1 %vm7601_vm11, %v7600_v24 }
0x18c0   :  { %v3115_v6 = vpop.f32.mrb[32].mxu1 }
0x18c1   :  { %v8858_v12 = vadd.f32 %v3115_v6, %v8741_v38  ;;  %v8861_v33 = vadd.f32 %v3115_v6, %v8744_v55  ;;  %v5743_v21 = vpop.f32.mrb[33].mxu1 }
0x18c2   :  { %v3118_v1 = vpop.f32.mrb[34].mxu1 }
0x18c3   :  { %v3132_v63 = vmul.f32 0.1, %v8858_v12  ;;  %v3178_v44 = vmul.f32 0.1, %v8861_v33  ;;  %v8866_v4 = vadd.f32 %v3118_v1, %v8749_v2  ;;  %v8869_v8 = vadd.f32 %v3118_v1, %v8752_v32  ;;  %v5744_v47 = vpop.f32.mrb[35].mxu1 }
0x18c4   :  { %vm3130_vm14 = vcmp.ge.f32.partialorder %v8858_v12, 0.0  ;;  %vm3176_vm8 = vcmp.ge.f32.partialorder %v8861_v33, 0.0 }
0x18c5   :  { %vm3131_vm2 = vcmp.ge.f32.partialorder %v8866_v4, 0.0  ;;  %v3133_v38 = vmul.f32 0.1, %v8866_v4  ;;  %vm3177_vm0 = vcmp.ge.f32.partialorder %v8869_v8, 0.0  ;;  %v3179_v55 = vmul.f32 0.1, %v8869_v8 }
0x18c6   :  { %v3180_v35 = vsel %vm3176_vm8, %v8861_v33, %v3178_v44  ;;  %v3134_v32 = vsel %vm3130_vm14, %v8858_v12, %v3132_v63 }
0x18c7   :  { %v3181_v2 = vsel %vm3177_vm0, %v8869_v8, %v3179_v55  ;;  %v3135_v25 = vsel %vm3131_vm2, %v8866_v4, %v3133_v38 }
0x18c8   :  { %v7246_v50 = vpack.i.bf16 %v3181_v2, %v3180_v35  ;;  %v7251_v51 = vpack.i.bf16 %v3135_v25, %v3134_v32 }
0x18ca   :  { %7247 = vrot.lane.b32.xlu1 %v7246_v50, %s7624_s25  ;;  %7252 = vrot.lane.b32.xlu0 %v7251_v51, %s7615_s21 }
0x193c   :  { %v7248_v16 = vpop.permute.xlu1 %7247  ;;  %v7253_v45 = vpop.permute.xlu0 %7252 }
0x193d   :  { %v7250_v57 = vunpack.i.h.bf16 %v7248_v16  ;;  %v7249_v7 = vunpack.i.l.bf16 %v7248_v16  ;;  %v7255_v40 = vunpack.i.h.bf16 %v7253_v45  ;;  %v7254_v41 = vunpack.i.l.bf16 %v7253_v45 }
0x193f   :  { %v3191_v22 = vsel %vm3144_vm4, 0.0, %v7250_v57  ;;  %v3190_v56 = vsel %vm3144_vm4, 0.0, %v7249_v7  ;;  %v3146_v13 = vsel %vm3144_vm4, 0.0, %v7255_v40  ;;  %v3145_v19 = vsel %vm3144_vm4, 0.0, %v7254_v41 }
0x1940   :  { %v3193_v27 = vsel %vm3147_vm15, %v3191_v22, 0.0  ;;  %v3192_v52 = vsel %vm3147_vm15, %v3190_v56, 0.0  ;;  %v3149_v20 = vsel %vm3147_vm15, %v3146_v13, 0.0  ;;  %v3148_v5 = vsel %vm3147_vm15, %v3145_v19, 0.0 }
0x1941   :  { %v7256_v58 = vpack.i.bf16 %v3193_v27, %v3192_v52  ;;  %v7281_v31 = vpack.i.bf16 %v3149_v20, %v3148_v5 }
0x1943   :  { %7257 = vrot.lane.b32.xlu1 %v7256_v58, %s7592_s12  ;;  %7262 = vrot.lane.b32.xlu0 %v7256_v58, %s7613_s5 }
0x1947   :  { %7267 = vrot.lane.b32.xlu1 %v7256_v58, %s7599_s23  ;;  %7272 = vrot.lane.b32.xlu0 %v7256_v58, %s7625_s30 }
0x194b   :  { %7277 = vrot.lane.b32.xlu1 %v7256_v58, %s7605_s2  ;;  %7282 = vrot.lane.b32.xlu0 %v7281_v31, %s7592_s12 }
0x194f   :  { %7287 = vrot.lane.b32.xlu0 %v7281_v31, %s7613_s5 }
0x1953   :  { %7292 = vrot.lane.b32.xlu0 %v7281_v31, %s7599_s23 }
0x1957   :  { %7297 = vrot.lane.b32.xlu0 %v7281_v31, %s7625_s30 }
0x19b5   :  { %v7258_v39 = vpop.permute.xlu1 %7257  ;;  %v7263_v15 = vpop.permute.xlu0 %7262 }
0x19b6   :  { %7302 = vrot.lane.b32.xlu1 %v7258_v39, %s7605_s2 }
0x19b9   :  { %v7268_v61 = vpop.permute.xlu1 %7267  ;;  %v7273_v30 = vpop.permute.xlu0 %7272 }
0x19ba   :  { %7307 = vrot.lane.b32.xlu1 %v7263_v15, %s7605_s2 }
0x19bd   :  { %v7278_v3 = vpop.permute.xlu1 %7277  ;;  %v7283_v11 = vpop.permute.xlu0 %7282 }
0x19be   :  { %v7280_v49 = vunpack.i.h.bf16 %v7278_v3  ;;  %v7279_v14 = vunpack.i.l.bf16 %v7278_v3  ;;  %7312 = vrot.lane.b32.xlu1 %v7268_v61, %s7605_s2  ;;  %v7285_v42 = vunpack.i.h.bf16 %v7283_v11  ;;  %v7284_v6 = vunpack.i.l.bf16 %v7283_v11  ;;  %v7582_v61 = vld [vmem:[%s8903_s6] sm:$0xff]  }
0x19c0   :  { %v3242_v18 = vsel %vm1432_vm6, %v3148_v5, %v7279_v14  ;;  %v3243_v29 = vsel %vm1432_vm6, %v3149_v20, %v7280_v49 }
0x19c1   :  { %v3252_v0 = vpack.c.bf16 %v3243_v29, %v3242_v18  ;;  %v7288_v34 = vpop.permute.xlu0 %7287 }
0x19c2   :  { %7317 = vrot.lane.b32.xlu1 %v7273_v30, %s7605_s2  ;;  %v7290_v35 = vunpack.i.h.bf16 %v7288_v34  ;;  %v7289_v2 = vunpack.i.l.bf16 %v7288_v34 }
0x19c3   :  { %5746 = vmatpush3.bf16.msra.mxu0 %v3252_v0 }
0x19c4   :  { %5747 = vmatprep.subr.bf16.mxu0 %v7600_v24 }
0x19c5   :  { %v7293_v47 = vpop.permute.xlu0 %7292 }
0x19c6   :  { %v7295_v57 = vunpack.i.h.bf16 %v7293_v47  ;;  %v7294_v7 = vunpack.i.l.bf16 %v7293_v47 }
0x19c9   :  { %v7298_v40 = vpop.permute.xlu0 %7297 }
0x19ca   :  { %v7300_v13 = vunpack.i.h.bf16 %v7298_v40  ;;  %v7299_v19 = vunpack.i.l.bf16 %v7298_v40 }
0x1a28   :  { %v7303_v28 = vpop.permute.xlu1 %7302 }
0x1a29   :  { %v7305_v21 = vunpack.i.h.bf16 %v7303_v28  ;;  %v7304_v1 = vunpack.i.l.bf16 %v7303_v28 }
0x1a2b   :  { %v3244_v63 = vsel %vm1432_vm6, %v7284_v6, %v7304_v1  ;;  %v3245_v44 = vsel %vm1432_vm6, %v7285_v42, %v7305_v21 }
0x1a2c   :  { %v7308_v38 = vpop.permute.xlu1 %7307  ;;  %v3253_v55 = vpack.c.bf16 %v3245_v44, %v3244_v63 }
0x1a2d   :  { %v7310_v32 = vunpack.i.h.bf16 %v7308_v38  ;;  %v7309_v25 = vunpack.i.l.bf16 %v7308_v38 }
0x1a2e   :  { %5748 = vmatpush3.bf16.msra.mxu0 %v3253_v55 }
0x1a2f   :  { %v3246_v50 = vsel %vm1432_vm6, %v7289_v2, %v7309_v25  ;;  %v3247_v51 = vsel %vm1432_vm6, %v7290_v35, %v7310_v32  ;;  %5749 = vmatprep.subr.bf16.mxu0 %v7600_v24 }
0x1a30   :  { %v7313_v16 = vpop.permute.xlu1 %7312  ;;  %v3254_v45 = vpack.c.bf16 %v3247_v51, %v3246_v50 }
0x1a31   :  { %v7315_v22 = vunpack.i.h.bf16 %v7313_v16  ;;  %v7314_v56 = vunpack.i.l.bf16 %v7313_v16 }
0x1a32   :  { %5750 = vmatpush3.bf16.msra.mxu0 %v3254_v45 }
0x1a33   :  { %v3248_v41 = vsel %vm1432_vm6, %v7294_v7, %v7314_v56  ;;  %v3249_v27 = vsel %vm1432_vm6, %v7295_v57, %v7315_v22  ;;  %5751 = vmatprep.subr.bf16.mxu0 %v7600_v24 }
0x1a34   :  { %v7318_v52 = vpop.permute.xlu1 %7317  ;;  %v3255_v58 = vpack.c.bf16 %v3249_v27, %v3248_v41 }
0x1a35   :  { %v7320_v20 = vunpack.i.h.bf16 %v7318_v52  ;;  %v7319_v5 = vunpack.i.l.bf16 %v7318_v52 }
0x1a36   :  { %5752 = vmatpush3.bf16.msra.mxu0 %v3255_v58 }
0x1a37   :  { %v3250_v31 = vsel %vm1432_vm6, %v7299_v19, %v7319_v5  ;;  %v3251_v39 = vsel %vm1432_vm6, %v7300_v13, %v7320_v20  ;;  %5753 = vmatprep.subr.bf16.mxu0 %v7600_v24 }
0x1a38   :  { %v3256_v15 = vpack.c.bf16 %v3251_v39, %v3250_v31 }
0x1a3a   :  { %5754 = vmatpush3.bf16.msra.mxu0 %v3256_v15 }
0x1a3b   :  { %5755 = vmatprep.subr.bf16.mxu0 %v7600_v24 }
0x1a3e   :  { %5756 = vmatpush3.bf16.msra.mxu0 %v8398_v54 }
0x1a3f   :  { %5777 = vmatprep.subr.bf16.mxu0 %v7600_v24 }
0x1a41   :  { %5758 = vmatmul.mubr.msk.bf16.vlgmr.msra.gmra.mrb[36].mxu0 %vm2561_vm7, %v7582_v61 }
0x1a42   :  { %5783 = vmatprep.mubr.msk.bf16.mxu0 %vm7601_vm11, %v7600_v24 }
0x1b14   :  { %v3299_v30 = vpop.f32.mrb[36].mxu0 }
0x1b15   :  { %v3308_v3 = vmul.f32 0.1, %v3299_v30  ;;  %v5759_v49 = vpop.f32.mrb[37].mxu0  ;;  %vm3306_vm15 = vcmp.ge.f32.partialorder %v3299_v30, 0.0 }
0x1b16   :  { %v3302_v14 = vpop.f32.mrb[38].mxu0 }
0x1b17   :  { %vm3307_vm14 = vcmp.ge.f32.partialorder %v3302_v14, 0.0  ;;  %v3309_v18 = vmul.f32 0.1, %v3302_v14  ;;  %v5760_v29 = vpop.f32.mrb[39].mxu0  ;;  %v3310_v0 = vsel %vm3306_vm15, %v3299_v30, %v3308_v3 }
0x1b19   :  { %v3311_v11 = vsel %vm3307_vm14, %v3302_v14, %v3309_v18 }
0x1b1a   :  { %v7326_v34 = vpack.i.bf16 %v3311_v11, %v3310_v0 }
0x1b1c   :  { %7327 = vrot.lane.b32.xlu1 %v7326_v34, %s7602_s27  ;;  %7322 = vrot.lane.b32.xlu0 %v7326_v34, %s7616_s29  ;;  %s7634_s29 = smov 65  }
0x1b8e   :  { %v7328_v28 = vpop.permute.xlu1 %7327  ;;  %v7323_v42 = vpop.permute.xlu0 %7322 }
0x1b8f   :  { %v7325_v6 = vunpack.i.h.bf16 %v7323_v42  ;;  %v7324_v21 = vunpack.i.l.bf16 %v7323_v42  ;;  %v7330_v1 = vunpack.i.h.bf16 %v7328_v28  ;;  %v7329_v63 = vunpack.i.l.bf16 %v7328_v28 }
0x1b91   :  { %v3357_v44 = vsel %vm2451_vm10, 0.0, %v7325_v6  ;;  %v3356_v47 = vsel %vm2451_vm10, 0.0, %v7324_v21  ;;  %v3321_v2 = vsel %vm2451_vm10, 0.0, %v7330_v1  ;;  %v3320_v32 = vsel %vm2451_vm10, 0.0, %v7329_v63 }
0x1b92   :  { %v3359_v38 = vsel %vm2454_vm3, %v3357_v44, 0.0  ;;  %v3358_v55 = vsel %vm2454_vm3, %v3356_v47, 0.0  ;;  %v3323_v25 = vsel %vm2454_vm3, %v3321_v2, 0.0  ;;  %v3322_v50 = vsel %vm2454_vm3, %v3320_v32, 0.0 }
0x1b93   :  { %v7336_v35 = vpack.i.bf16 %v3359_v38, %v3358_v55  ;;  %v7356_v51 = vpack.i.bf16 %v3323_v25, %v3322_v50 }
0x1b95   :  { %7337 = vrot.lane.b32.xlu1 %v7336_v35, %s7589_s9  ;;  %7332 = vrot.lane.b32.xlu0 %v7336_v35, %s7588_s8 }
0x1b99   :  { %7347 = vrot.lane.b32.xlu1 %v7336_v35, %s7591_s11  ;;  %7342 = vrot.lane.b32.xlu0 %v7336_v35, %s7590_s10 }
0x1b9d   :  { %7357 = vrot.lane.b32.xlu1 %v7356_v51, %s7588_s8  ;;  %7352 = vrot.lane.b32.xlu0 %v7336_v35, %s7605_s2 }
0x1ba1   :  { %7362 = vrot.lane.b32.xlu1 %v7356_v51, %s7589_s9 }
0x1ba5   :  { %7367 = vrot.lane.b32.xlu1 %v7356_v51, %s7590_s10 }
0x1ba9   :  { %7372 = vrot.lane.b32.xlu1 %v7356_v51, %s7591_s11 }
0x1c07   :  { %v7338_v16 = vpop.permute.xlu1 %7337  ;;  %v7333_v45 = vpop.permute.xlu0 %7332 }
0x1c08   :  { %7377 = vrot.lane.b32.xlu0 %v7333_v45, %s7605_s2 }
0x1c0b   :  { %v7343_v57 = vpop.permute.xlu0 %7342  ;;  %v7348_v7 = vpop.permute.xlu1 %7347 }
0x1c0c   :  { %7382 = vrot.lane.b32.xlu0 %v7338_v16, %s7605_s2 }
0x1c0f   :  { %v7353_v22 = vpop.permute.xlu0 %7352  ;;  %v7358_v58 = vpop.permute.xlu1 %7357 }
0x1c10   :  { %v7355_v56 = vunpack.i.h.bf16 %v7353_v22  ;;  %v7354_v40 = vunpack.i.l.bf16 %v7353_v22  ;;  %7387 = vrot.lane.b32.xlu0 %v7343_v57, %s7605_s2  ;;  %v7360_v20 = vunpack.i.h.bf16 %v7358_v58  ;;  %v7359_v5 = vunpack.i.l.bf16 %v7358_v58  ;;  %v7583_v57 = vld [vmem:[%s8154_s22] sm:$0xff]   ;;  %s7627_s22 = smov 31  }
0x1c11   :  { %v2437_v22 = vadd.f32 %v8736_v37, %v8544_v23  ;;  %v2440_v58 = vadd.f32 %v8738_v43, %v8551_v26 }
0x1c12   :  { %v3409_v41 = vsel %vm1432_vm6, %v3323_v25, %v7355_v56  ;;  %v3408_v27 = vsel %vm1432_vm6, %v3322_v50, %v7354_v40  ;;  %v2439_v56 = vadd.f32 %v8736_v37, %v8541_v10 }
0x1c13   :  { %v3418_v52 = vpack.c.bf16 %v3409_v41, %v3408_v27  ;;  %v7363_v13 = vpop.permute.xlu1 %7362 }
0x1c14   :  { %7392 = vrot.lane.b32.xlu0 %v7348_v7, %s7605_s2  ;;  %v7365_v14 = vunpack.i.h.bf16 %v7363_v13  ;;  %v7364_v18 = vunpack.i.l.bf16 %v7363_v13 }
0x1c15   :  { %5762 = vmatpush3.bf16.msra.mxu1 %v3418_v52  ;;  %v2438_v52 = vadd.f32 %v8738_v43, %v8548_v36 }
0x1c16   :  { %5763 = vmatprep.subr.bf16.mxu1 %v7600_v24 }
0x1c17   :  { %v7368_v30 = vpop.permute.xlu1 %7367 }
0x1c18   :  { %v7370_v6 = vunpack.i.h.bf16 %v7368_v30  ;;  %v7369_v21 = vunpack.i.l.bf16 %v7368_v30 }
0x1c1b   :  { %v7373_v44 = vpop.permute.xlu1 %7372 }
0x1c1c   :  { %v7375_v2 = vunpack.i.h.bf16 %v7373_v44  ;;  %v7374_v32 = vunpack.i.l.bf16 %v7373_v44 }
0x1c7a   :  { %v7378_v19 = vpop.permute.xlu0 %7377 }
0x1c7b   :  { %v7380_v31 = vunpack.i.h.bf16 %v7378_v19  ;;  %v7379_v39 = vunpack.i.l.bf16 %v7378_v19 }
0x1c7d   :  { %v3411_v15 = vsel %vm1432_vm6, %v7360_v20, %v7380_v31  ;;  %v3410_v61 = vsel %vm1432_vm6, %v7359_v5, %v7379_v39 }
0x1c7e   :  { %v7383_v3 = vpop.permute.xlu0 %7382  ;;  %v3419_v49 = vpack.c.bf16 %v3411_v15, %v3410_v61 }
0x1c7f   :  { %v7385_v29 = vunpack.i.h.bf16 %v7383_v3  ;;  %v7384_v0 = vunpack.i.l.bf16 %v7383_v3 }
0x1c80   :  { %5764 = vmatpush3.bf16.msra.mxu1 %v3419_v49 }
0x1c81   :  { %v3413_v11 = vsel %vm1432_vm6, %v7365_v14, %v7385_v29  ;;  %v3412_v34 = vsel %vm1432_vm6, %v7364_v18, %v7384_v0  ;;  %5765 = vmatprep.subr.bf16.mxu1 %v7600_v24 }
0x1c82   :  { %v7388_v28 = vpop.permute.xlu0 %7387  ;;  %v3420_v42 = vpack.c.bf16 %v3413_v11, %v3412_v34 }
0x1c83   :  { %v7390_v1 = vunpack.i.h.bf16 %v7388_v28  ;;  %v7389_v63 = vunpack.i.l.bf16 %v7388_v28 }
0x1c84   :  { %5766 = vmatpush3.bf16.msra.mxu1 %v3420_v42 }
0x1c85   :  { %v3415_v47 = vsel %vm1432_vm6, %v7370_v6, %v7390_v1  ;;  %v3414_v38 = vsel %vm1432_vm6, %v7369_v21, %v7389_v63  ;;  %5767 = vmatprep.subr.bf16.mxu1 %v7600_v24 }
0x1c86   :  { %v7393_v55 = vpop.permute.xlu0 %7392  ;;  %v3421_v35 = vpack.c.bf16 %v3415_v47, %v3414_v38 }
0x1c87   :  { %v7395_v25 = vunpack.i.h.bf16 %v7393_v55  ;;  %v7394_v50 = vunpack.i.l.bf16 %v7393_v55 }
0x1c88   :  { %5768 = vmatpush3.bf16.msra.mxu1 %v3421_v35 }
0x1c89   :  { %v3417_v51 = vsel %vm1432_vm6, %v7375_v2, %v7395_v25  ;;  %v3416_v16 = vsel %vm1432_vm6, %v7374_v32, %v7394_v50  ;;  %5769 = vmatprep.subr.bf16.mxu1 %v7600_v24 }
0x1c8a   :  { %v3422_v45 = vpack.c.bf16 %v3417_v51, %v3416_v16 }
0x1c8c   :  { %5770 = vmatpush3.bf16.msra.mxu1 %v3422_v45 }
0x1c8d   :  { %5771 = vmatprep.subr.bf16.mxu1 %v7600_v24 }
0x1c90   :  { %5772 = vmatpush3.bf16.msra.mxu1 %v8398_v54 }
0x1c91   :  { %5787 = vmatprep.subr.bf16.mxu1 %v7600_v24 }
0x1c93   :  { %5774 = vmatmul.mubr.msk.bf16.vlgmr.msra.gmra.mrb[36].mxu1 %vm2561_vm7, %v7583_v57 }
0x1c94   :  { %5793 = vmatprep.mubr.msk.bf16.mxu1 %vm7601_vm11, %v7600_v24 }
0x1d66   :  { %v3465_v7 = vpop.f32.mrb[36].mxu1 }
0x1d67   :  { %v3472_v40 = vadd.f32 %v3465_v7, %v8858_v12  ;;  %v3474_v41 = vadd.f32 %v3465_v7, %v8861_v33  ;;  %v5775_v27 = vpop.f32.mrb[37].mxu1 }
0x1d68   :  { %v3468_v13 = vpop.f32.mrb[38].mxu1 }
0x1d69   :  { %v3476_v19 = vadd.f32 %v3472_v40, %v2437_v22  ;;  %v3478_v20 = vadd.f32 %v3474_v41, %v2439_v56  ;;  %v3473_v5 = vadd.f32 %v3468_v13, %v8866_v4  ;;  %v3475_v23 = vadd.f32 %v3468_v13, %v8869_v8  ;;  %v5776_v31 = vpop.f32.mrb[39].mxu1 }
0x1d6b   :  { %v3480_v10 = vmul.f32 0.5, %v3476_v19  ;;  %v3482_v37 = vmul.f32 0.5, %v3478_v20  ;;  %v3477_v12 = vadd.f32 %v3473_v5, %v2438_v52  ;;  %v3479_v39 = vadd.f32 %v3475_v23, %v2440_v58 }
0x1d6d   :  { %v3488_v33 = vmul.f32 0.1, %v3480_v10  ;;  %v3506_v15 = vmul.f32 0.1, %v3482_v37  ;;  %v3481_v61 = vmul.f32 0.5, %v3477_v12  ;;  %v3483_v30 = vmul.f32 0.5, %v3479_v39 }
0x1d6e   :  { %vm3486_vm3 = vcmp.ge.f32.partialorder %v3480_v10, 0.0  ;;  %vm3504_vm7 = vcmp.ge.f32.partialorder %v3482_v37, 0.0 }
0x1d6f   :  { %vm3487_vm8 = vcmp.ge.f32.partialorder %v3481_v61, 0.0  ;;  %v3489_v36 = vmul.f32 0.1, %v3481_v61  ;;  %vm3505_vm2 = vcmp.ge.f32.partialorder %v3483_v30, 0.0  ;;  %v3507_v26 = vmul.f32 0.1, %v3483_v30 }
0x1d70   :  { %v3508_v43 = vsel %vm3504_vm7, %v3482_v37, %v3506_v15  ;;  %v3490_v4 = vsel %vm3486_vm3, %v3480_v10, %v3488_v33 }
0x1d71   :  { %v3509_v3 = vsel %vm3505_vm2, %v3483_v30, %v3507_v26  ;;  %v3491_v49 = vsel %vm3487_vm8, %v3481_v61, %v3489_v36  ;;  %vm3901_vm8 = vcmask 1043456   ;;  %vm3902_vm2 = vcmask 1044480  }
0x1d72   :  { %v7396_v8 = vpack.i.bf16 %v3509_v3, %v3508_v43  ;;  %v7401_v14 = vpack.i.bf16 %v3491_v49, %v3490_v4  ;;  %v3484_v4 = vld [vmem:[%s5207_s18] sm:$0xf]  ;;  %s7635_s18 = smov 19  }
0x1d73   :  { %s5210_s25 = sld [smem:[%s9524_s0 + %s7635_s18]]  }
0x1d74   :  { %7397 = vrot.lane.b32.xlu1 %v7396_v8, %s7607_s16  ;;  %7402 = vrot.lane.b32.xlu0 %v7401_v14, %s7595_s15  ;;  %v3485_v8 = vld [vmem:[%s5208_s1] sm:$0xf]  ;;  %v7629_v14 = vmov 0.0|0.0   ;;  %s5209_s16 = sld [smem:[%s9524_s0 + %s7633_s3]]   ;;  %s7636_s1 = smov 67  }
0x1de6   :  { %v7398_v18 = vpop.permute.xlu1 %7397  ;;  %v7403_v29 = vpop.permute.xlu0 %7402 }
0x1de7   :  { %v7400_v0 = vunpack.i.h.bf16 %v7398_v18  ;;  %v7399_v11 = vunpack.i.l.bf16 %v7398_v18  ;;  %v7405_v34 = vunpack.i.h.bf16 %v7403_v29  ;;  %v7404_v28 = vunpack.i.l.bf16 %v7403_v29 }
0x1de9   :  { %v3519_v42 = vsel %vm1149_vm9, 0.0, %v7400_v0  ;;  %v3518_v6 = vsel %vm1149_vm9, 0.0, %v7399_v11  ;;  %v3501_v21 = vsel %vm1149_vm9, 0.0, %v7405_v34  ;;  %v3500_v1 = vsel %vm1149_vm9, 0.0, %v7404_v28 }
0x1dea   :  { %v3521_v63 = vsel %vm1625_vm13, %v3519_v42, 0.0  ;;  %v3520_v44 = vsel %vm1625_vm13, %v3518_v6, 0.0  ;;  %v3503_v38 = vsel %vm1625_vm13, %v3501_v21, 0.0  ;;  %v3502_v55 = vsel %vm1625_vm13, %v3500_v1, 0.0 }
0x1deb   :  { %v7406_v47 = vpack.i.bf16 %v3521_v63, %v3520_v44  ;;  %v7416_v35 = vpack.i.bf16 %v3503_v38, %v3502_v55 }
0x1ded   :  { %7407 = vrot.lane.b32.xlu1 %v7406_v47, %s7588_s8  ;;  %7412 = vrot.lane.b32.xlu0 %v7406_v47, %s7605_s2 }
0x1df1   :  { %7417 = vrot.lane.b32.xlu1 %v7416_v35, %s7588_s8 }
0x1df5   :  { %7427 = vrot.lane.b32.xlu1 %v7406_v47, %s7627_s22 }
0x1e5f   :  { %v7408_v2 = vpop.permute.xlu1 %7407  ;;  %v7413_v32 = vpop.permute.xlu0 %7412 }
0x1e60   :  { %v7415_v25 = vunpack.i.h.bf16 %v7413_v32  ;;  %v7414_v50 = vunpack.i.l.bf16 %v7413_v32  ;;  %7422 = vrot.lane.b32.xlu0 %v7408_v2, %s7605_s2  ;;  %7437 = vrot.lane.b32.xlu1 %v7408_v2, %s7627_s22 }
0x1e62   :  { %v3548_v51 = vsel %vm1432_vm6, %v3502_v55, %v7414_v50  ;;  %v3549_v16 = vsel %vm1432_vm6, %v3503_v38, %v7415_v25 }
0x1e63   :  { %v7418_v45 = vpop.permute.xlu1 %7417  ;;  %v3552_v57 = vpack.c.bf16 %v3549_v16, %v3548_v51 }
0x1e64   :  { %v7420_v7 = vunpack.i.h.bf16 %v7418_v45  ;;  %v7419_v22 = vunpack.i.l.bf16 %v7418_v45  ;;  %7432 = vrot.lane.b32.xlu0 %v7418_v45, %s7588_s8 }
0x1e65   :  { %5778 = vmatpush3.bf16.msra.mxu0 %v3552_v57 }
0x1e66   :  { %5779 = vmatprep.subr.bf16.mxu0 %v7600_v24 }
0x1e67   :  { %v7428_v56 = vpop.permute.xlu1 %7427 }
0x1e68   :  { %v7430_v40 = vunpack.i.h.bf16 %v7428_v56  ;;  %v7429_v41 = vunpack.i.l.bf16 %v7428_v56  ;;  %3611 = vrot.lane.b32.xlu0 %v9544_v17, %s7627_s22 }
0x1e6a   :  { %v3618_v27 = vsel %vm1432_vm6, %v7419_v22, %v7429_v41  ;;  %v3619_v52 = vsel %vm1432_vm6, %v7420_v7, %v7430_v40 }
0x1e6b   :  { %v3623_v58 = vpack.c.bf16 %v3619_v52, %v3618_v27 }
0x1e6d   :  { %5788 = vmatpush3.bf16.msra.mxu1 %v3623_v58 }
0x1e6e   :  { %5789 = vmatprep.subr.bf16.mxu1 %v7600_v24 }
0x1ed2   :  { %v7423_v13 = vpop.permute.xlu0 %7422  ;;  %v7438_v5 = vpop.permute.xlu1 %7437 }
0x1ed3   :  { %v7425_v19 = vunpack.i.h.bf16 %v7423_v13  ;;  %v7424_v20 = vunpack.i.l.bf16 %v7423_v13  ;;  %v7440_v12 = vunpack.i.h.bf16 %v7438_v5  ;;  %v7439_v39 = vunpack.i.l.bf16 %v7438_v5 }
0x1ed5   :  { %v3550_v23 = vsel %vm1432_vm6, %v7419_v22, %v7424_v20  ;;  %v3551_v31 = vsel %vm1432_vm6, %v7420_v7, %v7425_v19 }
0x1ed6   :  { %v7433_v10 = vpop.permute.xlu0 %7432  ;;  %v3553_v37 = vpack.c.bf16 %v3551_v31, %v3550_v23  ;;  %v7632_v23 = vmov 65535  }
0x1ed7   :  { %v7435_v33 = vunpack.i.h.bf16 %v7433_v10  ;;  %v7434_v15 = vunpack.i.l.bf16 %v7433_v10  ;;  %v3903_v31 = vsel %vm3901_vm8, 4294967295, %v7632_v23 }
0x1ed8   :  { %5780 = vmatpush3.bf16.msra.mxu0 %v3553_v37 }
0x1ed9   :  { %v3621_v61 = vsel %vm1432_vm6, %v7435_v33, %v7440_v12  ;;  %v3620_v30 = vsel %vm1432_vm6, %v7434_v15, %v7439_v39  ;;  %5781 = vmatprep.subr.bf16.mxu0 %v7600_v24  ;;  %v9101_v33 = vsel %vm3902_vm2, %v3903_v31, 0 }
0x1eda   :  { %v3612_v36 = vpop.permute.xlu0 %3611  ;;  %v3624_v26 = vpack.c.bf16 %v3621_v61, %v3620_v30  ;;  %v3847_v30 = vld [vmem:[%s5209_s16] sm:$0xf]  ;;  %s7638_s16 = smov 21  }
0x1edb   :  { %v3622_v43 = vsel %vm1432_vm6, %v8252_v46, %v3612_v36  ;;  %v3672_v46 = vadd.s32 16, %v8283_v60  ;;  %s5212_s20 = sld [smem:[%s9524_s0 + %s7638_s16]]   ;;  %s7645_s16 = smov 70  }
0x1edc   :  { %v3625_v3 = vpack.c.bf16 %v3622_v43, %v3622_v43  ;;  %5782 = vmatpush3.bf16.msra.mxu0 %v8398_v54  ;;  %5790 = vmatpush3.bf16.msra.mxu1 %v3624_v26  ;;  %v3673_v54 = vadd.s32 24, %v8283_v60 }
0x1edd   :  { %5791 = vmatprep.subr.bf16.mxu1 %v7600_v24  ;;  %5971 = vmatprep.subr.bf16.mxu0 %v7629_v14 }
0x1ede   :  { %v3630_v49 = vand.u32 %v3625_v3, %v8134_v53  ;;  %v3674_v53 = vmul.u32 2, %v3672_v46  ;;  %v3675_v18 = vmul.u32 2, %v3673_v54 }
0x1edf   :  { %5784 = vmatmul.mubr.msk.bf16.vlgmr.msra.gmra.mrb[40].mxu0 %vm1625_vm13, %v3484_v4 }
0x1ee0   :  { %5792 = vmatpush3.bf16.msra.mxu1 %v3630_v49  ;;  %5813 = vmatprep.mubr.msk.f32.mxu0 %vm7601_vm11, %v7600_v24  ;;  %vm3677_vm0 = vcmp.eq.s32.totalorder %v8285_v62, %v3675_v18  ;;  %v3682_v60 = vadd.s32 1, %v3674_v53  ;;  %v3683_v29 = vadd.s32 1, %v3675_v18 }
0x1ee1   :  { %5983 = vmatprep.subr.bf16.mxu1 %v7629_v14  ;;  %5973 = vmatpush3.bf16.msk.msra.mxu0 %vm8292_vm1, %v7603_v48 }
0x1ee2   :  { %5974 = vmatprep.subr.bf16.mxu0 %v7629_v14  ;;  %vm3684_vm14 = vcmp.eq.s32.totalorder %v8285_v62, %v3682_v60 }
0x1ee3   :  { %5794 = vmatmul.mubr.msk.bf16.vlgmr.msra.gmra.mrb[40].mxu1 %vm1625_vm13, %v3485_v8  ;;  %vm3676_vm13 = vcmp.eq.s32.totalorder %v8285_v62, %v3674_v53 }
0x1ee4   :  { %5832 = vmatprep.mubr.msk.f32.mxu1 %vm7601_vm11, %v7600_v24  ;;  %5985 = vmatpush3.bf16.msk.msra.mxu1 %vm8292_vm1, %v7603_v48  ;;  %vm5975_vm15 = vmpackc.low %vm3677_vm0, %vm3676_vm13  ;;  %vm3685_vm1 = vcmp.eq.s32.totalorder %v8285_v62, %v3683_v29  ;;  %vm3897_vm13 = vcmask 203776  }
0x1ee5   :  { %5986 = vmatprep.subr.bf16.mxu1 %v7629_v14  ;;  %5976 = vmatpush3.bf16.msk.msra.mxu0 %vm5975_vm15, %v7603_v48  ;;  %vm5981_vm3 = vmpackc.low %vm3685_vm1, %vm3684_vm14  ;;  %vm4050_vm1 = vcmask 547840  }
0x1ee6   :  { %5977 = vmatprep.subr.bf16.mxu0 %v7629_v14 }
0x1ee8   :  { %5988 = vmatpush3.bf16.msk.msra.mxu1 %vm5975_vm15, %v7603_v48 }
0x1ee9   :  { %5989 = vmatprep.subr.bf16.mxu1 %v7629_v14  ;;  %5979 = vmatpush3.bf16.msk.msra.mxu0 %vm8303_vm5, %v7603_v48 }
0x1eea   :  { %5980 = vmatprep.subr.bf16.mxu0 %v7629_v14 }
0x1eec   :  { %5991 = vmatpush3.bf16.msk.msra.mxu1 %vm8303_vm5, %v7603_v48  ;;  %vm3695_vm5 = vcmask 523264  }
0x1eed   :  { %5992 = vmatprep.subr.bf16.mxu1 %v7629_v14  ;;  %5982 = vmatpush3.bf16.msk.msra.mxu0 %vm5981_vm3, %v7603_v48 }
0x1eee   :  { %5851 = vmatprep.subr.bf16.mxu0 %v7600_v24 }
0x1ef0   :  { %5994 = vmatpush3.bf16.msk.msra.mxu1 %vm5981_vm3, %v7603_v48  ;;  %vm9549_vm3 = vcmask 23552  }
0x1ef1   :  { %5835 = vmatprep.subr.bf16.mxu1 %v7600_v24 }
0x1fb2   :  { %v3591_v62 = vpop.f32.mrb[40].mxu0 }
0x1fb3   :  { %3770 = vrot.lane.b32.xlu1 %v3591_v62, %s7630_s14  ;;  %v5785_v59 = vpop.f32.mrb[41].mxu0  ;;  %s7637_s14 = smov 20  }
0x1fb4   :  { %v3594_v0 = vpop.f32.mrb[42].mxu0  ;;  %s5211_s6 = sld [smem:[%s9524_s0 + %s7637_s14]]   ;;  %s7644_s14 = smov 25  }
0x1fb5   :  { %v5786_v11 = vpop.f32.mrb[43].mxu0 }
0x1fb6   :  { %v3666_v34 = vpop.f32.mrb[40].mxu1 }
0x1fb7   :  { %3691 = vrot.lane.b32.xlu0 %v3666_v34, %s7605_s2  ;;  %v5795_v9 = vpop.f32.mrb[41].mxu1  ;;  %s7631_s2 = smov 64  }
0x1fb8   :  { %v3669_v28 = vpop.f32.mrb[42].mxu1 }
0x1fb9   :  { %v5796_v42 = vpop.f32.mrb[43].mxu1 }
0x2025   :  { %v3771_v6 = vpop.permute.xlu1 %3770 }
0x2026   :  { %v3773_v48 = vsel %vm1432_vm6, %v3771_v6, %v3666_v34 }
0x2027   :  { %5833 = vmatmul.mubr.msk.f32.vlgmr.msra.gmra.mrb[44].mxu1 %vm3695_vm5, %v3773_v48 }
0x2028   :  { %5839 = vmatprep.mubr.msk.bf16.mxu1 %vm7601_vm11, %v7600_v24 }
0x2029   :  { %v3692_v21 = vpop.permute.xlu0 %3691 }
0x202a   :  { %v3694_v1 = vsel %vm1432_vm6, %v3591_v62, %v3692_v21 }
0x202b   :  { %5814 = vmatmul.mubr.msk.f32.vlgmr.msra.gmra.mrb[44].mxu0 %vm3695_vm5, %v3694_v1 }
0x202c   :  { %5855 = vmatprep.mubr.msk.bf16.mxu0 %vm7601_vm11, %v7600_v24 }
0x20fa   :  { %v9062_v63 = vpop.f32.mrb[44].mxu1 }
0x20fb   :  { %v3866_v44 = vmul.f32 0.1, %v9062_v63  ;;  %v5834_v47 = vpop.f32.mrb[45].mxu1  ;;  %vm3865_vm7 = vcmp.ge.f32.partialorder %v9062_v63, 0.0 }
0x20fd   :  { %v9067_v38 = vsel %vm3865_vm7, %v9062_v63, %v3866_v44  ;;  %v3848_v44 = vld [vmem:[%s5210_s25] sm:$0xf]  ;;  %vm9550_vm7 = vmmov %vm9549_vm3  ;;  %s7639_s25 = smov 69  }
0x20fe   :  { %3869 = vrot.lane.b32.xlu1 %v9067_v38, %s7595_s15  ;;  %v9071_v55 = vpop.f32.mrb[44].mxu0 }
0x20ff   :  { %v5815_v35 = vpop.f32.mrb[45].mxu0  ;;  %vm3849_vm6 = vcmp.ge.f32.partialorder %v9071_v55, 0.0  ;;  %v3850_v2 = vmul.f32 0.1, %v9071_v55 }
0x2101   :  { %v9076_v32 = vsel %vm3849_vm6, %v9071_v55, %v3850_v2 }
0x2102   :  { %3853 = vrot.lane.b32.xlu0 %v9076_v32, %s7595_s15 }
0x2170   :  { %v3870_v25 = vpop.permute.xlu1 %3869 }
0x2171   :  { %v3872_v50 = vsel %vm1149_vm9, 0.0, %v3870_v25 }
0x2172   :  { %v3873_v51 = vsel %vm1248_vm12, %v3872_v50, 0.0 }
0x2173   :  { %3875 = vrot.lane.b32.xlu1 %v3873_v51, %s7588_s8  ;;  %3877 = vrot.lane.b32.xlu0 %v3873_v51, %s7589_s9 }
0x2174   :  { %v3854_v16 = vpop.permute.xlu0 %3853 }
0x2175   :  { %v3856_v45 = vsel %vm1149_vm9, 0.0, %v3854_v16 }
0x2176   :  { %v3857_v57 = vsel %vm1248_vm12, %v3856_v45, 0.0 }
0x2177   :  { %3859 = vrot.lane.b32.xlu1 %v3857_v57, %s7588_s8 }
0x217b   :  { %3862 = vrot.lane.b32.xlu1 %v3857_v57, %s7589_s9 }
0x21e5   :  { %v3876_v7 = vpop.permute.xlu1 %3875  ;;  %v3878_v56 = vpop.permute.xlu0 %3877 }
0x21e6   :  { %v7441_v22 = vpack.i.bf16 %v3876_v7, %v3873_v51  ;;  %v7446_v40 = vpack.i.bf16 %v9544_v17, %v3878_v56 }
0x21e8   :  { %7442 = vrot.lane.b32.xlu0 %v7441_v22, %s7631_s2 }
0x21e9   :  { %v3860_v41 = vpop.permute.xlu1 %3859 }
0x21ec   :  { %7447 = vrot.lane.b32.xlu0 %v7446_v40, %s7631_s2 }
0x21ed   :  { %v3863_v37 = vpop.permute.xlu1 %3862 }
0x225a   :  { %v7443_v27 = vpop.permute.xlu0 %7442 }
0x225b   :  { %v7445_v52 = vunpack.i.h.bf16 %v7443_v27  ;;  %v7444_v58 = vunpack.i.l.bf16 %v7443_v27 }
0x225d   :  { %v3892_v13 = vsel %vm3695_vm5, %v3860_v41, %v7445_v52  ;;  %v3891_v19 = vsel %vm3695_vm5, %v3857_v57, %v7444_v58 }
0x225e   :  { %v7448_v20 = vpop.permute.xlu0 %7447  ;;  %v3895_v5 = vpack.c.bf16 %v3892_v13, %v3891_v19 }
0x225f   :  { %v7450_v17 = vunpack.i.h.bf16 %v7448_v20  ;;  %v7449_v10 = vunpack.i.l.bf16 %v7448_v20 }
0x2260   :  { %5836 = vmatpush3.bf16.msra.mxu1 %v3895_v5 }
0x2261   :  { %v9097_v12 = vsel %vm3695_vm5, 1.0, %v7450_v17  ;;  %v3893_v39 = vsel %vm3695_vm5, %v3863_v37, %v7449_v10  ;;  %5837 = vmatprep.subr.bf16.mxu1 %v7600_v24 }
0x2262   :  { %v3896_v15 = vpack.c.bf16 %v9097_v12, %v3893_v39 }
0x2264   :  { %v3906_v61 = vand.u32 %v9101_v33, %v3896_v15 }
0x2266   :  { %5838 = vmatpush3.bf16.msra.mxu1 %v3906_v61 }
0x2267   :  { %5843 = vmatprep.subr.bf16.mxu1 %v7600_v24 }
0x2269   :  { %5840 = vmatmul.mubr.msk.bf16.vlgmr.msra.gmra.mrb[48].mxu1 %vm3897_vm13, %v3847_v30 }
0x226a   :  { %5847 = vmatprep.mubr.msk.bf16.mxu1 %vm7601_vm11, %v7600_v24 }
0x233c   :  { %v3942_v36 = vpop.f32.mrb[48].mxu1 }
0x233d   :  { %vm3948_vm0 = vcmp.ge.f32.partialorder %v3942_v36, 0.0  ;;  %v3949_v26 = vmul.f32 0.1, %v3942_v36  ;;  %v5841_v43 = vpop.f32.mrb[49].mxu1 }
0x233e   :  { %v3945_v3 = vpop.f32.mrb[50].mxu1  ;;  %v4040_v43 = vld [vmem:[%s5211_s6] sm:$0xf]  ;;  %s7641_s6 = smov 24  }
0x233f   :  { %v5842_v4 = vpop.f32.mrb[51].mxu1  ;;  %v3950_v49 = vsel %vm3948_vm0, %v3942_v36, %v3949_v26  ;;  %vm4231_vm0 = vcmask 564224   ;;  %s5215_s19 = sld [smem:[%s9524_s0 + %s7641_s6]]  }
0x2340   :  { %3952 = vrot.lane.b32.xlu0 %v3950_v49, %s7595_s15  ;;  %3964 = vrot.lane.b32.xlu1 %v3950_v49, %s7634_s29  ;;  %s5216_s6 = sld [smem:[%s9524_s0 + %s7644_s14]]  }
0x23b2   :  { %v3953_v8 = vpop.permute.xlu0 %3952  ;;  %v3965_v46 = vpop.permute.xlu1 %3964 }
0x23b3   :  { %v3967_v54 = vsel %vm1149_vm9, 0.0, %v3965_v46  ;;  %v3955_v53 = vsel %vm1149_vm9, 0.0, %v3953_v8 }
0x23b4   :  { %v3968_v14 = vsel %vm1248_vm12, %v3967_v54, 0.0  ;;  %v3956_v18 = vsel %vm1248_vm12, %v3955_v53, 0.0 }
0x23b5   :  { %3972 = vrot.lane.b32.xlu0 %v3968_v14, %s7589_s9  ;;  %3970 = vrot.lane.b32.xlu1 %v3968_v14, %s7588_s8 }
0x23b9   :  { %3958 = vrot.lane.b32.xlu1 %v3956_v18, %s7588_s8 }
0x23bd   :  { %3961 = vrot.lane.b32.xlu1 %v3956_v18, %s7589_s9 }
0x23c1   :  { %4036 = vrot.lane.b32.xlu1 %v9062_v63, %s7631_s2 }
0x2427   :  { %v3971_v60 = vpop.permute.xlu1 %3970  ;;  %v3973_v62 = vpop.permute.xlu0 %3972 }
0x2428   :  { %v7451_v29 = vpack.i.bf16 %v3971_v60, %v3968_v14 }
0x242a   :  { %7452 = vrot.lane.b32.xlu0 %v7451_v29, %s7631_s2 }
0x242b   :  { %v3959_v59 = vpop.permute.xlu1 %3958 }
0x242e   :  { %3978 = vrot.lane.b32.xlu0 %v3973_v62, %s7631_s2 }
0x242f   :  { %v3962_v42 = vpop.permute.xlu1 %3961 }
0x2433   :  { %v9136_v47 = vpop.permute.xlu1 %4036 }
0x249c   :  { %v7453_v0 = vpop.permute.xlu0 %7452 }
0x249d   :  { %v7455_v11 = vunpack.i.h.bf16 %v7453_v0  ;;  %v7454_v34 = vunpack.i.l.bf16 %v7453_v0 }
0x249f   :  { %v3983_v9 = vsel %vm3695_vm5, %v3956_v18, %v7454_v34  ;;  %v3984_v28 = vsel %vm3695_vm5, %v3959_v59, %v7455_v11 }
0x24a0   :  { %v3979_v6 = vpop.permute.xlu0 %3978  ;;  %v3986_v48 = vpack.c.bf16 %v3984_v28, %v3983_v9 }
0x24a1   :  { %v3985_v21 = vsel %vm3695_vm5, %v3962_v42, %v3979_v6 }
0x24a2   :  { %v3987_v1 = vpack.c.bf16 %v9097_v12, %v3985_v21  ;;  %5844 = vmatpush3.bf16.msra.mxu1 %v3986_v48 }
0x24a3   :  { %5845 = vmatprep.subr.bf16.mxu1 %v7600_v24 }
0x24a4   :  { %v3992_v63 = vand.u32 %v3987_v1, %v9101_v33 }
0x24a6   :  { %5846 = vmatpush3.bf16.msra.mxu1 %v3992_v63 }
0x24a7   :  { %5859 = vmatprep.subr.bf16.mxu1 %v7600_v24 }
0x24a9   :  { %5848 = vmatmul.mubr.msk.bf16.vlgmr.msra.gmra.mrb[52].mxu1 %vm3897_vm13, %v3848_v44 }
0x24aa   :  { %5863 = vmatprep.mubr.msk.bf16.mxu1 %vm7601_vm11, %v7600_v24 }
0x257c   :  { %v4028_v35 = vpop.f32.mrb[52].mxu1 }
0x257d   :  { %v9139_v2 = vadd.f32 %v4028_v35, %v9071_v55  ;;  %v9142_v25 = vadd.f32 %v9136_v47, %v4028_v35  ;;  %v5849_v50 = vpop.f32.mrb[53].mxu1 }
0x257e   :  { %v4031_v51 = vpop.f32.mrb[54].mxu1  ;;  %v4041_v50 = vld [vmem:[%s5212_s20] sm:$0xf]  ;;  %s7642_s20 = smov 66  }
0x257f   :  { %v5850_v16 = vpop.f32.mrb[55].mxu1  ;;  %vm4059_vm15 = vcmp.ge.f32.partialorder %v9142_v25, 0.0  ;;  %v4060_v45 = vmul.f32 0.1, %v9142_v25  ;;  %vm4042_vm14 = vcmp.ge.f32.partialorder %v9139_v2, 0.0 }
0x2580   :  { %v4043_v57 = vmul.f32 0.1, %v9139_v2 }
0x2581   :  { %v4061_v7 = vsel %vm4059_vm15, %v9142_v25, %v4060_v45  ;;  %vm9551_vm15 = vcmask 39936  }
0x2582   :  { %4063 = vrot.lane.b32.xlu0 %v4061_v7, %s7636_s1  ;;  %v4044_v22 = vsel %vm4042_vm14, %v9139_v2, %v4043_v57  ;;  %vm4408_vm14 = vcmask 539648  }
0x2583   :  { %4046 = vrot.lane.b32.xlu1 %v4044_v22, %s7587_s7 }
0x25f4   :  { %v4064_v56 = vpop.permute.xlu0 %4063 }
0x25f5   :  { %v4066_v40 = vsel %vm9549_vm3, 0.0, %v4064_v56  ;;  %v4047_v41 = vpop.permute.xlu1 %4046  ;;  %vm9552_vm3 = vmmov %vm9551_vm15 }
0x25f6   :  { %v4067_v27 = vsel %vm4050_vm1, %v4066_v40, 0.0  ;;  %v4049_v52 = vsel %vm9550_vm7, 0.0, %v4047_v41  ;;  %vm4460_vm7 = vcmask 334848  }
0x25f7   :  { %4069 = vrot.lane.b32.xlu0 %v4067_v27, %s7590_s10  ;;  %4071 = vrot.lane.b32.xlu1 %v4067_v27, %s7593_s13  ;;  %v4051_v58 = vsel %vm4050_vm1, %v4049_v52, 0.0 }
0x25fb   :  { %4053 = vrot.lane.b32.xlu0 %v4051_v58, %s7590_s10 }
0x25ff   :  { %4056 = vrot.lane.b32.xlu0 %v4051_v58, %s7593_s13 }
0x2669   :  { %v4070_v13 = vpop.permute.xlu0 %4069  ;;  %v4072_v20 = vpop.permute.xlu1 %4071 }
0x266a   :  { %v7456_v19 = vpack.i.bf16 %v4070_v13, %v4067_v27 }
0x266c   :  { %7457 = vrot.lane.b32.xlu1 %v7456_v19, %s7631_s2 }
0x266d   :  { %v4054_v5 = vpop.permute.xlu0 %4053 }
0x2670   :  { %4077 = vrot.lane.b32.xlu1 %v4072_v20, %s7631_s2 }
0x2671   :  { %v4057_v39 = vpop.permute.xlu0 %4056 }
0x26de   :  { %v7458_v23 = vpop.permute.xlu1 %7457 }
0x26df   :  { %v7460_v31 = vunpack.i.h.bf16 %v7458_v23  ;;  %v7459_v17 = vunpack.i.l.bf16 %v7458_v23 }
0x26e1   :  { %v4083_v10 = vsel %vm3695_vm5, %v4054_v5, %v7460_v31  ;;  %v4082_v37 = vsel %vm3695_vm5, %v4051_v58, %v7459_v17 }
0x26e2   :  { %v4078_v15 = vpop.permute.xlu1 %4077  ;;  %v4085_v61 = vpack.c.bf16 %v4083_v10, %v4082_v37 }
0x26e3   :  { %v4084_v30 = vsel %vm3695_vm5, %v4057_v39, %v4078_v15 }
0x26e4   :  { %v4086_v36 = vpack.c.bf16 %v9097_v12, %v4084_v30  ;;  %5852 = vmatpush3.bf16.msra.mxu0 %v4085_v61 }
0x26e5   :  { %5853 = vmatprep.subr.bf16.mxu0 %v7600_v24 }
0x26e6   :  { %v4091_v26 = vand.u32 %v4086_v36, %v9101_v33 }
0x26e8   :  { %5854 = vmatpush3.bf16.msra.mxu0 %v4091_v26 }
0x26e9   :  { %5867 = vmatprep.subr.bf16.mxu0 %v7600_v24 }
0x26eb   :  { %5856 = vmatmul.mubr.msk.bf16.vlgmr.msra.gmra.mrb[48].mxu0 %vm3897_vm13, %v4040_v43 }
0x26ec   :  { %5871 = vmatprep.mubr.msk.bf16.mxu0 %vm7601_vm11, %v7600_v24 }
0x27be   :  { %v4127_v3 = vpop.f32.mrb[48].mxu0 }
0x27bf   :  { %vm4133_vm6 = vcmp.ge.f32.partialorder %v4127_v3, 0.0  ;;  %v4134_v4 = vmul.f32 0.1, %v4127_v3  ;;  %v5857_v49 = vpop.f32.mrb[49].mxu0 }
0x27c0   :  { %v4130_v8 = vpop.f32.mrb[50].mxu0 }
0x27c1   :  { %v5858_v46 = vpop.f32.mrb[51].mxu0  ;;  %v4135_v54 = vsel %vm4133_vm6, %v4127_v3, %v4134_v4 }
0x27c2   :  { %4137 = vrot.lane.b32.xlu1 %v4135_v54, %s7595_s15  ;;  %4149 = vrot.lane.b32.xlu0 %v4135_v54, %s7634_s29 }
0x2834   :  { %v4138_v14 = vpop.permute.xlu1 %4137  ;;  %v4150_v53 = vpop.permute.xlu0 %4149 }
0x2835   :  { %v4152_v18 = vsel %vm1149_vm9, 0.0, %v4150_v53  ;;  %v4140_v29 = vsel %vm1149_vm9, 0.0, %v4138_v14 }
0x2836   :  { %v4153_v60 = vsel %vm1248_vm12, %v4152_v18, 0.0  ;;  %v4141_v62 = vsel %vm1248_vm12, %v4140_v29, 0.0 }
0x2837   :  { %4157 = vrot.lane.b32.xlu1 %v4153_v60, %s7589_s9  ;;  %4155 = vrot.lane.b32.xlu0 %v4153_v60, %s7588_s8 }
0x283b   :  { %4143 = vrot.lane.b32.xlu0 %v4141_v62, %s7588_s8 }
0x283f   :  { %4146 = vrot.lane.b32.xlu0 %v4141_v62, %s7589_s9 }
0x28a9   :  { %v4156_v59 = vpop.permute.xlu0 %4155  ;;  %v4158_v11 = vpop.permute.xlu1 %4157 }
0x28aa   :  { %v7461_v0 = vpack.i.bf16 %v4156_v59, %v4153_v60 }
0x28ac   :  { %7462 = vrot.lane.b32.xlu1 %v7461_v0, %s7631_s2 }
0x28ad   :  { %v4144_v34 = vpop.permute.xlu0 %4143 }
0x28b0   :  { %4163 = vrot.lane.b32.xlu1 %v4158_v11, %s7631_s2 }
0x28b1   :  { %v4147_v21 = vpop.permute.xlu0 %4146 }
0x28b4   :  { %4423 = vrot.lane.b32.xlu1 %v9067_v38, %s7602_s27 }
0x291e   :  { %v7463_v9 = vpop.permute.xlu1 %7462 }
0x291f   :  { %v7465_v28 = vunpack.i.h.bf16 %v7463_v9  ;;  %v7464_v42 = vunpack.i.l.bf16 %v7463_v9 }
0x2921   :  { %v4168_v6 = vsel %vm3695_vm5, %v4141_v62, %v7464_v42  ;;  %v4169_v48 = vsel %vm3695_vm5, %v4144_v34, %v7465_v28 }
0x2922   :  { %v4164_v1 = vpop.permute.xlu1 %4163  ;;  %v4171_v63 = vpack.c.bf16 %v4169_v48, %v4168_v6 }
0x2923   :  { %v4170_v44 = vsel %vm3695_vm5, %v4147_v21, %v4164_v1 }
0x2924   :  { %v4172_v38 = vpack.c.bf16 %v9097_v12, %v4170_v44  ;;  %5860 = vmatpush3.bf16.msra.mxu1 %v4171_v63 }
0x2925   :  { %5861 = vmatprep.subr.bf16.mxu1 %v7600_v24 }
0x2926   :  { %v4177_v35 = vand.u32 %v4172_v38, %v9101_v33 }
0x2928   :  { %5862 = vmatpush3.bf16.msra.mxu1 %v4177_v35 }
0x2929   :  { %5875 = vmatprep.subr.bf16.mxu1 %v7600_v24 }
0x292b   :  { %5864 = vmatmul.mubr.msk.bf16.vlgmr.msra.gmra.mrb[56].mxu1 %vm3897_vm13, %v4041_v50 }
0x292c   :  { %5879 = vmatprep.mubr.msk.bf16.mxu1 %vm7601_vm11, %v7600_v24 }
0x29fe   :  { %v4213_v51 = vpop.f32.mrb[56].mxu1 }
0x29ff   :  { %v9203_v16 = vadd.f32 %v4213_v51, %v9139_v2  ;;  %v9206_v45 = vadd.f32 %v4213_v51, %v9142_v25  ;;  %v5865_v57 = vpop.f32.mrb[57].mxu1  ;;  %v4424_v25 = vpop.permute.xlu1 %4423 }
0x2a00   :  { %v4216_v7 = vpop.f32.mrb[58].mxu1  ;;  %v4426_v13 = vsel %vm2451_vm10, 0.0, %v4424_v25 }
0x2a01   :  { %v5866_v22 = vpop.f32.mrb[59].mxu1  ;;  %vm4240_vm8 = vcmp.ge.f32.partialorder %v9206_v45, 0.0  ;;  %v4241_v56 = vmul.f32 0.1, %v9206_v45  ;;  %v4224_v41 = vmul.f32 0.1, %v9203_v16 }
0x2a02   :  { %vm4223_vm2 = vcmp.ge.f32.partialorder %v9203_v16, 0.0  ;;  %v4427_v19 = vsel %vm4408_vm14, %v4426_v13, 0.0 }
0x2a03   :  { %v4242_v40 = vsel %vm4240_vm8, %v9206_v45, %v4241_v56  ;;  %v4225_v2 = vsel %vm4223_vm2, %v9203_v16, %v4224_v41  ;;  %vm9553_vm2 = vcmask 48128  }
0x2a04   :  { %4244 = vrot.lane.b32.xlu0 %v4242_v40, %s7639_s25  ;;  %v4402_v40 = vld [vmem:[%s5215_s19] sm:$0xf]  ;;  %s7647_s19 = smov 27  }
0x2a05   :  { %s5218_s25 = sld [smem:[%s9524_s0 + %s7647_s19]]  }
0x2a08   :  { %4227 = vrot.lane.b32.xlu0 %v4225_v2, %s7608_s17  ;;  %s7640_s17 = smov 22  }
0x2a09   :  { %s5213_s4 = sld [smem:[%s9524_s0 + %s7640_s17]]  }
0x2a0f   :  { %v4221_v48 = vld [vmem:[%s5213_s4] sm:$0xf] }
0x2a76   :  { %v4245_v27 = vpop.permute.xlu0 %4244 }
0x2a77   :  { %v4247_v52 = vsel %vm9551_vm15, 0.0, %v4245_v27 }
0x2a78   :  { %v4248_v58 = vsel %vm4231_vm0, %v4247_v52, 0.0 }
0x2a79   :  { %4250 = vrot.lane.b32.xlu1 %v4248_v58, %s7592_s12  ;;  %4252 = vrot.lane.b32.xlu0 %v4248_v58, %s7613_s5 }
0x2a7a   :  { %v4228_v20 = vpop.permute.xlu0 %4227 }
0x2a7b   :  { %v4230_v39 = vsel %vm9552_vm3, 0.0, %v4228_v20 }
0x2a7c   :  { %v4232_v36 = vsel %vm4231_vm0, %v4230_v39, 0.0  ;;  %vm9554_vm0 = vmmov %vm9553_vm2 }
0x2a7d   :  { %4404 = vrot.lane.b32.xlu1 %v9076_v32, %s7602_s27  ;;  %4429 = vrot.lane.b32.xlu0 %v4427_v19, %s7588_s8 }
0x2a81   :  { %4431 = vrot.lane.b32.xlu1 %v4427_v19, %s7589_s9  ;;  %4433 = vrot.lane.b32.xlu0 %v4427_v19, %s7590_s10 }
0x2a85   :  { %4435 = vrot.lane.b32.xlu1 %v4427_v19, %s7591_s11 }
0x2aeb   :  { %v4251_v5 = vpop.permute.xlu1 %4250  ;;  %v4253_v31 = vpop.permute.xlu0 %4252 }
0x2aec   :  { %v7466_v23 = vpack.i.bf16 %v4251_v5, %v4248_v58  ;;  %v7471_v10 = vpack.i.bf16 %v4427_v19, %v4253_v31 }
0x2aee   :  { %7467 = vrot.lane.b32.xlu1 %v7466_v23, %s7631_s2 }
0x2aef   :  { %v4405_v17 = vpop.permute.xlu1 %4404  ;;  %v4430_v15 = vpop.permute.xlu0 %4429 }
0x2af0   :  { %v4407_v37 = vsel %vm2451_vm10, 0.0, %v4405_v17 }
0x2af1   :  { %v4409_v32 = vsel %vm4408_vm14, %v4407_v37, 0.0 }
0x2af2   :  { %4411 = vrot.lane.b32.xlu0 %v4409_v32, %s7588_s8  ;;  %7472 = vrot.lane.b32.xlu1 %v7471_v10, %s7631_s2 }
0x2af3   :  { %v4432_v61 = vpop.permute.xlu1 %4431  ;;  %v4434_v26 = vpop.permute.xlu0 %4433 }
0x2af4   :  { %v7476_v30 = vpack.i.bf16 %v4432_v61, %v4430_v15 }
0x2af6   :  { %4234 = vrot.lane.b32.xlu0 %v4232_v36, %s7592_s12  ;;  %7477 = vrot.lane.b32.xlu1 %v7476_v30, %s7631_s2 }
0x2af7   :  { %v4436_v43 = vpop.permute.xlu1 %4435 }
0x2afa   :  { %4237 = vrot.lane.b32.xlu0 %v4232_v36, %s7613_s5  ;;  %4417 = vrot.lane.b32.xlu1 %v4409_v32, %s7590_s10 }
0x2afe   :  { %4414 = vrot.lane.b32.xlu0 %v4409_v32, %s7589_s9  ;;  %4420 = vrot.lane.b32.xlu1 %v4409_v32, %s7591_s11 }
0x2b02   :  { %4443 = vrot.lane.b32.xlu0 %v4434_v26, %s7631_s2 }
0x2b06   :  { %4445 = vrot.lane.b32.xlu0 %v4436_v43, %s7631_s2 }
0x2b60   :  { %v7468_v3 = vpop.permute.xlu1 %7467 }
0x2b61   :  { %v7469_v8 = vunpack.i.l.bf16 %v7468_v3  ;;  %v7470_v46 = vunpack.i.h.bf16 %v7468_v3 }
0x2b63   :  { %v4263_v14 = vsel %vm3695_vm5, %v4232_v36, %v7469_v8 }
0x2b64   :  { %v7473_v4 = vpop.permute.xlu1 %7472  ;;  %v4412_v49 = vpop.permute.xlu0 %4411 }
0x2b65   :  { %v7474_v29 = vunpack.i.l.bf16 %v7473_v4  ;;  %v7475_v34 = vunpack.i.h.bf16 %v7473_v4 }
0x2b67   :  { %v4452_v21 = vsel %vm3695_vm5, %v4409_v32, %v7475_v34 }
0x2b68   :  { %v4235_v54 = vpop.permute.xlu0 %4234  ;;  %v7478_v18 = vpop.permute.xlu1 %7477 }
0x2b69   :  { %v4264_v53 = vsel %vm3695_vm5, %v4235_v54, %v7470_v46  ;;  %v7479_v59 = vunpack.i.l.bf16 %v7478_v18  ;;  %v7480_v44 = vunpack.i.h.bf16 %v7478_v18 }
0x2b6a   :  { %v4266_v60 = vpack.c.bf16 %v4264_v53, %v4263_v14 }
0x2b6b   :  { %v4453_v42 = vsel %vm3695_vm5, %v4412_v49, %v7479_v59 }
0x2b6c   :  { %5868 = vmatpush3.bf16.msra.mxu0 %v4266_v60  ;;  %v4238_v62 = vpop.permute.xlu0 %4237  ;;  %v4418_v6 = vpop.permute.xlu1 %4417  ;;  %v4457_v1 = vpack.c.bf16 %v4453_v42, %v4452_v21 }
0x2b6d   :  { %v4265_v0 = vsel %vm3695_vm5, %v4238_v62, %v7474_v29  ;;  %5869 = vmatprep.subr.bf16.mxu0 %v7600_v24 }
0x2b6e   :  { %v4267_v11 = vpack.c.bf16 %v9097_v12, %v4265_v0 }
0x2b70   :  { %v4272_v9 = vand.u32 %v4267_v11, %v9101_v33  ;;  %v4415_v28 = vpop.permute.xlu0 %4414  ;;  %v4421_v50 = vpop.permute.xlu1 %4420 }
0x2b71   :  { %v4454_v35 = vsel %vm3695_vm5, %v4415_v28, %v7480_v44 }
0x2b72   :  { %5870 = vmatpush3.bf16.msra.mxu0 %v4272_v9 }
0x2b73   :  { %5883 = vmatprep.subr.bf16.mxu0 %v7600_v24 }
0x2b74   :  { %v4444_v63 = vpop.permute.xlu0 %4443 }
0x2b75   :  { %v4455_v38 = vsel %vm3695_vm5, %v4418_v6, %v4444_v63  ;;  %5872 = vmatmul.mubr.msk.bf16.vlgmr.msra.gmra.mrb[52].mxu0 %vm3897_vm13, %v4221_v48 }
0x2b76   :  { %5884 = vmatpush3.bf16.msra.mxu0 %v4457_v1  ;;  %5889 = vmatprep.mubr.msk.bf16.mxu0 %vm7601_vm11, %v7600_v24  ;;  %v4458_v51 = vpack.c.bf16 %v4455_v38, %v4454_v35 }
0x2b77   :  { %5885 = vmatprep.subr.bf16.mxu0 %v7600_v24 }
0x2b78   :  { %v4446_v57 = vpop.permute.xlu0 %4445 }
0x2b79   :  { %v4456_v7 = vsel %vm3695_vm5, %v4421_v50, %v4446_v57 }
0x2b7a   :  { %v4459_v22 = vpack.c.bf16 %v9097_v12, %v4456_v7  ;;  %5886 = vmatpush3.bf16.msra.mxu0 %v4458_v51 }
0x2b7b   :  { %5887 = vmatprep.subr.bf16.mxu0 %v7600_v24 }
0x2b7c   :  { %v4465_v56 = vand.u32 %v4459_v22, %v9101_v33 }
0x2b7e   :  { %5888 = vmatpush3.bf16.msra.mxu0 %v4465_v56 }
0x2b7f   :  { %5903 = vmatprep.subr.bf16.mxu0 %v7600_v24 }
0x2b81   :  { %5890 = vmatmul.mubr.msk.bf16.vlgmr.msra.gmra.mrb[56].mxu0 %vm4460_vm7, %v4402_v40 }
0x2b82   :  { %5909 = vmatprep.mubr.msk.bf16.mxu0 %vm7601_vm11, %v7600_v24 }
0x2c48   :  { %v4308_v41 = vpop.f32.mrb[52].mxu0 }
0x2c49   :  { %vm4314_vm6 = vcmp.ge.f32.partialorder %v4308_v41, 0.0  ;;  %v4315_v2 = vmul.f32 0.1, %v4308_v41  ;;  %v5873_v25 = vpop.f32.mrb[53].mxu0 }
0x2c4a   :  { %v4311_v27 = vpop.f32.mrb[54].mxu0 }
0x2c4b   :  { %v5874_v52 = vpop.f32.mrb[55].mxu0  ;;  %v4316_v58 = vsel %vm4314_vm6, %v4308_v41, %v4315_v2 }
0x2c4c   :  { %4330 = vrot.lane.b32.xlu1 %v4316_v58, %s7634_s29 }
0x2c50   :  { %4318 = vrot.lane.b32.xlu1 %v4316_v58, %s7595_s15  ;;  %s7643_s15 = smov 23  }
0x2c51   :  { %s5214_s17 = sld [smem:[%s9524_s0 + %s7643_s15]]  }
0x2c54   :  { %v4501_v13 = vpop.f32.mrb[56].mxu0 }
0x2c55   :  { %vm4507_vm8 = vcmp.ge.f32.partialorder %v4501_v13, 0.0  ;;  %v4508_v19 = vmul.f32 0.1, %v4501_v13  ;;  %v5891_v20 = vpop.f32.mrb[57].mxu0 }
0x2c56   :  { %v4504_v5 = vpop.f32.mrb[58].mxu0 }
0x2c57   :  { %v5892_v23 = vpop.f32.mrb[59].mxu0  ;;  %v4509_v31 = vsel %vm4507_vm8, %v4501_v13, %v4508_v19  ;;  %v4222_v22 = vld [vmem:[%s5214_s17] sm:$0xf]  ;;  %s7648_s17 = smov 74   ;;  %vm4843_vm8 = vcmask 605184  }
0x2c58   :  { %4529 = vrot.lane.b32.xlu0 %v4509_v31, %s7642_s20 }
0x2cbe   :  { %v4331_v17 = vpop.permute.xlu1 %4330 }
0x2cbf   :  { %v4333_v10 = vsel %vm1149_vm9, 0.0, %v4331_v17 }
0x2cc0   :  { %v4334_v37 = vsel %vm1248_vm12, %v4333_v10, 0.0 }
0x2cc1   :  { %4338 = vrot.lane.b32.xlu1 %v4334_v37, %s7589_s9  ;;  %4336 = vrot.lane.b32.xlu0 %v4334_v37, %s7588_s8 }
0x2cc2   :  { %v4319_v61 = vpop.permute.xlu1 %4318 }
0x2cc3   :  { %v4321_v43 = vsel %vm1149_vm9, 0.0, %v4319_v61 }
0x2cc4   :  { %v4322_v8 = vsel %vm1248_vm12, %v4321_v43, 0.0 }
0x2cc5   :  { %4511 = vrot.lane.b32.xlu0 %v4509_v31, %s7602_s27  ;;  %v4403_v31 = vld [vmem:[%s5216_s6] sm:$0xf] }
0x2cca   :  { %v4530_v32 = vpop.permute.xlu0 %4529 }
0x2ccb   :  { %v4532_v39 = vsel %vm2451_vm10, 0.0, %v4530_v32 }
0x2ccc   :  { %v4533_v15 = vsel %vm4408_vm14, %v4532_v39, 0.0 }
0x2ccd   :  { %4537 = vrot.lane.b32.xlu0 %v4533_v15, %s7589_s9  ;;  %4535 = vrot.lane.b32.xlu1 %v4533_v15, %s7588_s8 }
0x2cd1   :  { %4541 = vrot.lane.b32.xlu0 %v4533_v15, %s7591_s11  ;;  %4539 = vrot.lane.b32.xlu1 %v4533_v15, %s7590_s10 }
0x2d33   :  { %v4337_v30 = vpop.permute.xlu0 %4336  ;;  %v4339_v26 = vpop.permute.xlu1 %4338 }
0x2d34   :  { %v7486_v36 = vpack.i.bf16 %v4337_v30, %v4334_v37  ;;  %v7491_v4 = vpack.i.bf16 %v4533_v15, %v4339_v26 }
0x2d36   :  { %7487 = vrot.lane.b32.xlu0 %v7486_v36, %s7631_s2 }
0x2d37   :  { %v4512_v3 = vpop.permute.xlu0 %4511 }
0x2d38   :  { %v4514_v49 = vsel %vm2451_vm10, 0.0, %v4512_v3 }
0x2d39   :  { %v4515_v46 = vsel %vm4408_vm14, %v4514_v49, 0.0 }
0x2d3a   :  { %7492 = vrot.lane.b32.xlu0 %v7491_v4, %s7631_s2  ;;  %v7481_v54 = vpack.i.bf16 %v4515_v46, %v4322_v8 }
0x2d3c   :  { %7482 = vrot.lane.b32.xlu1 %v7481_v54, %s7588_s8 }
0x2d3e   :  { %4520 = vrot.lane.b32.xlu0 %v4515_v46, %s7589_s9 }
0x2d3f   :  { %v4536_v14 = vpop.permute.xlu1 %4535  ;;  %v4538_v53 = vpop.permute.xlu0 %4537 }
0x2d40   :  { %4327 = vrot.lane.b32.xlu1 %v4322_v8, %s7589_s9  ;;  %v7496_v18 = vpack.i.bf16 %v4538_v53, %v4536_v14 }
0x2d43   :  { %v4540_v60 = vpop.permute.xlu1 %4539  ;;  %v4542_v29 = vpop.permute.xlu0 %4541 }
0x2d44   :  { %4549 = vrot.lane.b32.xlu0 %v4540_v60, %s7631_s2  ;;  %7497 = vrot.lane.b32.xlu1 %v7496_v18, %s7631_s2 }
0x2d48   :  { %4523 = vrot.lane.b32.xlu1 %v4515_v46, %s7590_s10  ;;  %4551 = vrot.lane.b32.xlu0 %v4542_v29, %s7631_s2 }
0x2d4c   :  { %4526 = vrot.lane.b32.xlu1 %v4515_v46, %s7591_s11 }
0x2da8   :  { %v7488_v62 = vpop.permute.xlu0 %7487 }
0x2da9   :  { %v7489_v59 = vunpack.i.l.bf16 %v7488_v62  ;;  %v7490_v34 = vunpack.i.h.bf16 %v7488_v62 }
0x2dab   :  { %v4349_v28 = vsel %vm3695_vm5, %v4322_v8, %v7489_v59 }
0x2dac   :  { %v7493_v0 = vpop.permute.xlu0 %7492 }
0x2dad   :  { %v7494_v42 = vunpack.i.l.bf16 %v7493_v0  ;;  %v7495_v38 = vunpack.i.h.bf16 %v7493_v0 }
0x2dae   :  { %v7483_v11 = vpop.permute.xlu1 %7482 }
0x2daf   :  { %v7484_v9 = vunpack.i.l.bf16 %v7483_v11  ;;  %v7485_v51 = vunpack.i.h.bf16 %v7483_v11  ;;  %v4558_v56 = vsel %vm3695_vm5, %v4515_v46, %v7495_v38 }
0x2db0   :  { %v4521_v63 = vpop.permute.xlu0 %4520 }
0x2db1   :  { %v4350_v6 = vsel %vm3695_vm5, %v7484_v9, %v7490_v34 }
0x2db2   :  { %v4352_v48 = vpack.c.bf16 %v4350_v6, %v4349_v28  ;;  %v4328_v21 = vpop.permute.xlu1 %4327 }
0x2db3   :  { %v4351_v1 = vsel %vm3695_vm5, %v4328_v21, %v7494_v42 }
0x2db4   :  { %v4353_v44 = vpack.c.bf16 %v9097_v12, %v4351_v1  ;;  %5876 = vmatpush3.bf16.msra.mxu1 %v4352_v48 }
0x2db5   :  { %5877 = vmatprep.subr.bf16.mxu1 %v7600_v24 }
0x2db6   :  { %v4358_v35 = vand.u32 %v4353_v44, %v9101_v33  ;;  %v7498_v50 = vpop.permute.xlu1 %7497  ;;  %v4550_v7 = vpop.permute.xlu0 %4549 }
0x2db7   :  { %v7499_v57 = vunpack.i.l.bf16 %v7498_v50  ;;  %v7500_v40 = vunpack.i.h.bf16 %v7498_v50 }
0x2db8   :  { %5878 = vmatpush3.bf16.msra.mxu1 %v4358_v35 }
0x2db9   :  { %v4559_v41 = vsel %vm3695_vm5, %v7485_v51, %v7499_v57  ;;  %5893 = vmatprep.subr.bf16.mxu1 %v7600_v24  ;;  %v4560_v52 = vsel %vm3695_vm5, %v4521_v63, %v7500_v40 }
0x2dba   :  { %v4563_v2 = vpack.c.bf16 %v4559_v41, %v4558_v56  ;;  %v4524_v25 = vpop.permute.xlu1 %4523  ;;  %v4552_v13 = vpop.permute.xlu0 %4551 }
0x2dbb   :  { %v4561_v27 = vsel %vm3695_vm5, %v4524_v25, %v4550_v7  ;;  %5880 = vmatmul.mubr.msk.bf16.vlgmr.msra.gmra.mrb[60].mxu1 %vm3897_vm13, %v4222_v22  ;;  %vm4624_vm13 = vcmask 572416  }
0x2dbc   :  { %5894 = vmatpush3.bf16.msra.mxu1 %v4563_v2  ;;  %5899 = vmatprep.mubr.msk.bf16.mxu1 %vm7601_vm11, %v7600_v24  ;;  %v4564_v58 = vpack.c.bf16 %v4561_v27, %v4560_v52 }
0x2dbd   :  { %5895 = vmatprep.subr.bf16.mxu1 %v7600_v24 }
0x2dbe   :  { %v4527_v19 = vpop.permute.xlu1 %4526 }
0x2dbf   :  { %v4562_v20 = vsel %vm3695_vm5, %v4527_v19, %v4552_v13 }
0x2dc0   :  { %v4565_v5 = vpack.c.bf16 %v9097_v12, %v4562_v20  ;;  %5896 = vmatpush3.bf16.msra.mxu1 %v4564_v58 }
0x2dc1   :  { %5897 = vmatprep.subr.bf16.mxu1 %v7600_v24 }
0x2dc2   :  { %v4570_v23 = vand.u32 %v4565_v5, %v9101_v33 }
0x2dc4   :  { %5898 = vmatpush3.bf16.msra.mxu1 %v4570_v23 }
0x2dc5   :  { %5913 = vmatprep.subr.bf16.mxu1 %v7600_v24 }
0x2dc7   :  { %5900 = vmatmul.mubr.msk.bf16.vlgmr.msra.gmra.mrb[64].mxu1 %vm4460_vm7, %v4403_v31 }
0x2dc8   :  { %5919 = vmatprep.mubr.msk.bf16.mxu1 %vm7601_vm11, %v7600_v24 }
0x2e8e   :  { %v9328_v17 = vpop.f32.mrb[60].mxu1 }
0x2e8f   :  { %v5881_v10 = vpop.f32.mrb[61].mxu1 }
0x2e90   :  { %v4397_v37 = vpop.f32.mrb[62].mxu1 }
0x2e91   :  { %v5882_v32 = vpop.f32.mrb[63].mxu1 }
0x2e9a   :  { %v4606_v39 = vpop.f32.mrb[64].mxu1 }
0x2e9b   :  { %v9331_v15 = vadd.f32 %v4606_v39, %v9071_v55  ;;  %v9334_v61 = vadd.f32 %v4606_v39, %v9136_v47  ;;  %v5901_v30 = vpop.f32.mrb[65].mxu1 }
0x2e9c   :  { %v4609_v36 = vpop.f32.mrb[66].mxu1 }
0x2e9d   :  { %v5902_v26 = vpop.f32.mrb[67].mxu1  ;;  %vm4639_vm9 = vcmp.ge.f32.partialorder %v9334_v61, 0.0  ;;  %v4640_v43 = vmul.f32 0.1, %v9334_v61  ;;  %vm4616_vm12 = vcmp.ge.f32.partialorder %v9331_v15, 0.0 }
0x2e9e   :  { %v4617_v3 = vmul.f32 0.1, %v9331_v15 }
0x2e9f   :  { %v4641_v4 = vsel %vm4639_vm9, %v9334_v61, %v4640_v43 }
0x2ea0   :  { %4643 = vrot.lane.b32.xlu1 %v4641_v4, %s7645_s16  ;;  %v4618_v55 = vsel %vm4616_vm12, %v9331_v15, %v4617_v3 }
0x2ea1   :  { %4620 = vrot.lane.b32.xlu0 %v4618_v55, %s7610_s24  ;;  %s7646_s24 = smov 26  }
0x2ea2   :  { %s5217_s18 = sld [smem:[%s9524_s0 + %s7646_s24]]  }
0x2ea8   :  { %v4614_v40 = vld [vmem:[%s5217_s18] sm:$0xf] }
0x2f12   :  { %v4644_v47 = vpop.permute.xlu1 %4643 }
0x2f13   :  { %v4646_v49 = vsel %vm9553_vm2, 0.0, %v4644_v47  ;;  %v4621_v46 = vpop.permute.xlu0 %4620 }
0x2f14   :  { %v4647_v8 = vsel %vm4624_vm13, %v4646_v49, 0.0  ;;  %v4623_v54 = vsel %vm9554_vm0, 0.0, %v4621_v46 }
0x2f15   :  { %4649 = vrot.lane.b32.xlu1 %v4647_v8, %s7590_s10  ;;  %4651 = vrot.lane.b32.xlu0 %v4647_v8, %s7593_s13  ;;  %v4625_v14 = vsel %vm4624_vm13, %v4623_v54, 0.0 }
0x2f19   :  { %4653 = vrot.lane.b32.xlu1 %v4647_v8, %s7620_s26  ;;  %4655 = vrot.lane.b32.xlu0 %v4647_v8, %s7621_s28 }
0x2f1d   :  { %4627 = vrot.lane.b32.xlu1 %v4625_v14, %s7590_s10 }
0x2f21   :  { %4630 = vrot.lane.b32.xlu1 %v4625_v14, %s7593_s13 }
0x2f87   :  { %v4650_v53 = vpop.permute.xlu1 %4649  ;;  %v4652_v60 = vpop.permute.xlu0 %4651 }
0x2f88   :  { %v7501_v18 = vpack.i.bf16 %v4650_v53, %v4647_v8 }
0x2f8a   :  { %7502 = vrot.lane.b32.xlu0 %v7501_v18, %s7631_s2 }
0x2f8b   :  { %v4654_v29 = vpop.permute.xlu1 %4653  ;;  %v4656_v59 = vpop.permute.xlu0 %4655 }
0x2f8c   :  { %v7506_v62 = vpack.i.bf16 %v4654_v29, %v4652_v60 }
0x2f8e   :  { %4633 = vrot.lane.b32.xlu0 %v4625_v14, %s7620_s26  ;;  %7507 = vrot.lane.b32.xlu1 %v7506_v62, %s7631_s2 }
0x2f8f   :  { %v4628_v0 = vpop.permute.xlu1 %4627 }
0x2f92   :  { %4636 = vrot.lane.b32.xlu0 %v4625_v14, %s7621_s28  ;;  %4665 = vrot.lane.b32.xlu1 %v4656_v59, %s7631_s2 }
0x2f93   :  { %v4631_v11 = vpop.permute.xlu1 %4630 }
0x2ffc   :  { %v7503_v34 = vpop.permute.xlu0 %7502 }
0x2ffd   :  { %v7505_v9 = vunpack.i.h.bf16 %v7503_v34  ;;  %v7504_v28 = vunpack.i.l.bf16 %v7503_v34 }
0x2fff   :  { %v4673_v42 = vsel %vm3695_vm5, %v4628_v0, %v7505_v9  ;;  %v4672_v6 = vsel %vm3695_vm5, %v4625_v14, %v7504_v28  ;;  %v4615_v9 = vld [vmem:[%s5218_s25] sm:$0xf] }
0x3000   :  { %v4677_v48 = vpack.c.bf16 %v4673_v42, %v4672_v6  ;;  %v7508_v21 = vpop.permute.xlu1 %7507  ;;  %v4634_v1 = vpop.permute.xlu0 %4633 }
0x3001   :  { %v7510_v63 = vunpack.i.h.bf16 %v7508_v21  ;;  %v7509_v44 = vunpack.i.l.bf16 %v7508_v21 }
0x3002   :  { %5904 = vmatpush3.bf16.msra.mxu0 %v4677_v48 }
0x3003   :  { %v4674_v38 = vsel %vm3695_vm5, %v4631_v11, %v7509_v44  ;;  %v4675_v35 = vsel %vm3695_vm5, %v4634_v1, %v7510_v63  ;;  %5905 = vmatprep.subr.bf16.mxu0 %v7600_v24 }
0x3004   :  { %v4678_v50 = vpack.c.bf16 %v4675_v35, %v4674_v38  ;;  %v4666_v51 = vpop.permute.xlu1 %4665  ;;  %v4637_v57 = vpop.permute.xlu0 %4636 }
0x3005   :  { %v4676_v7 = vsel %vm3695_vm5, %v4637_v57, %v4666_v51 }
0x3006   :  { %v4679_v22 = vpack.c.bf16 %v9097_v12, %v4676_v7  ;;  %5906 = vmatpush3.bf16.msra.mxu0 %v4678_v50 }
0x3007   :  { %5907 = vmatprep.subr.bf16.mxu0 %v7600_v24 }
0x3008   :  { %v4684_v56 = vand.u32 %v4679_v22, %v9101_v33 }
0x300a   :  { %5908 = vmatpush3.bf16.msra.mxu0 %v4684_v56 }
0x300b   :  { %5923 = vmatprep.subr.bf16.mxu0 %v7600_v24 }
0x300d   :  { %5910 = vmatmul.mubr.msk.bf16.vlgmr.msra.gmra.mrb[60].mxu0 %vm4460_vm7, %v4614_v40 }
0x300e   :  { %5929 = vmatprep.mubr.msk.bf16.mxu0 %vm7601_vm11, %v7600_v24 }
0x30e0   :  { %v4720_v41 = vpop.f32.mrb[60].mxu0 }
0x30e1   :  { %vm4726_vm15 = vcmp.ge.f32.partialorder %v4720_v41, 0.0  ;;  %v4727_v2 = vmul.f32 0.1, %v4720_v41  ;;  %v5911_v25 = vpop.f32.mrb[61].mxu0 }
0x30e2   :  { %v4723_v27 = vpop.f32.mrb[62].mxu0 }
0x30e3   :  { %v5912_v52 = vpop.f32.mrb[63].mxu0  ;;  %v4728_v58 = vsel %vm4726_vm15, %v4720_v41, %v4727_v2 }
0x30e4   :  { %4730 = vrot.lane.b32.xlu1 %v4728_v58, %s7602_s27  ;;  %4748 = vrot.lane.b32.xlu0 %v4728_v58, %s7642_s20 }
0x3156   :  { %v4749_v13 = vpop.permute.xlu0 %4748  ;;  %v4731_v5 = vpop.permute.xlu1 %4730 }
0x3157   :  { %v4751_v19 = vsel %vm2451_vm10, 0.0, %v4749_v13  ;;  %v4733_v23 = vsel %vm2451_vm10, 0.0, %v4731_v5 }
0x3158   :  { %v4752_v20 = vsel %vm4408_vm14, %v4751_v19, 0.0  ;;  %v4734_v31 = vsel %vm4408_vm14, %v4733_v23, 0.0 }
0x3159   :  { %4756 = vrot.lane.b32.xlu1 %v4752_v20, %s7589_s9  ;;  %4754 = vrot.lane.b32.xlu0 %v4752_v20, %s7588_s8 }
0x315d   :  { %4760 = vrot.lane.b32.xlu1 %v4752_v20, %s7591_s11  ;;  %4758 = vrot.lane.b32.xlu0 %v4752_v20, %s7590_s10 }
0x3161   :  { %4736 = vrot.lane.b32.xlu0 %v4734_v31, %s7588_s8 }
0x3165   :  { %4739 = vrot.lane.b32.xlu0 %v4734_v31, %s7589_s9 }
0x31cb   :  { %v4755_v10 = vpop.permute.xlu0 %4754  ;;  %v4757_v32 = vpop.permute.xlu1 %4756 }
0x31cc   :  { %v7511_v37 = vpack.i.bf16 %v4755_v10, %v4752_v20 }
0x31ce   :  { %7512 = vrot.lane.b32.xlu1 %v7511_v37, %s7631_s2 }
0x31cf   :  { %v4759_v39 = vpop.permute.xlu0 %4758  ;;  %v4761_v36 = vpop.permute.xlu1 %4760 }
0x31d0   :  { %v7516_v30 = vpack.i.bf16 %v4759_v39, %v4757_v32 }
0x31d2   :  { %4742 = vrot.lane.b32.xlu1 %v4734_v31, %s7590_s10  ;;  %7517 = vrot.lane.b32.xlu0 %v7516_v30, %s7631_s2 }
0x31d3   :  { %v4737_v26 = vpop.permute.xlu0 %4736 }
0x31d6   :  { %4745 = vrot.lane.b32.xlu1 %v4734_v31, %s7591_s11  ;;  %4770 = vrot.lane.b32.xlu0 %v4761_v36, %s7631_s2 }
0x31d7   :  { %v4740_v43 = vpop.permute.xlu0 %4739 }
0x3240   :  { %v7513_v3 = vpop.permute.xlu1 %7512 }
0x3241   :  { %v7515_v4 = vunpack.i.h.bf16 %v7513_v3  ;;  %v7514_v55 = vunpack.i.l.bf16 %v7513_v3 }
0x3243   :  { %v4777_v47 = vsel %vm3695_vm5, %v4734_v31, %v7514_v55  ;;  %v4778_v49 = vsel %vm3695_vm5, %v4737_v26, %v7515_v4 }
0x3244   :  { %v4782_v8 = vpack.c.bf16 %v4778_v49, %v4777_v47  ;;  %v4743_v46 = vpop.permute.xlu1 %4742  ;;  %v7518_v54 = vpop.permute.xlu0 %7517 }
0x3245   :  { %v7520_v14 = vunpack.i.h.bf16 %v7518_v54  ;;  %v7519_v53 = vunpack.i.l.bf16 %v7518_v54 }
0x3246   :  { %5914 = vmatpush3.bf16.msra.mxu1 %v4782_v8 }
0x3247   :  { %v4780_v18 = vsel %vm3695_vm5, %v4743_v46, %v7520_v14  ;;  %v4779_v60 = vsel %vm3695_vm5, %v4740_v43, %v7519_v53  ;;  %5915 = vmatprep.subr.bf16.mxu1 %v7600_v24 }
0x3248   :  { %v4783_v29 = vpack.c.bf16 %v4780_v18, %v4779_v60  ;;  %v4746_v62 = vpop.permute.xlu1 %4745  ;;  %v4771_v59 = vpop.permute.xlu0 %4770 }
0x3249   :  { %v4781_v0 = vsel %vm3695_vm5, %v4746_v62, %v4771_v59 }
0x324a   :  { %v4784_v11 = vpack.c.bf16 %v9097_v12, %v4781_v0  ;;  %5916 = vmatpush3.bf16.msra.mxu1 %v4783_v29 }
0x324b   :  { %5917 = vmatprep.subr.bf16.mxu1 %v7600_v24 }
0x324c   :  { %v4789_v34 = vand.u32 %v4784_v11, %v9101_v33 }
0x324e   :  { %5918 = vmatpush3.bf16.msra.mxu1 %v4789_v34 }
0x324f   :  { %5933 = vmatprep.subr.bf16.mxu1 %v7600_v24 }
0x3251   :  { %5920 = vmatmul.mubr.msk.bf16.vlgmr.msra.gmra.mrb[68].mxu1 %vm4460_vm7, %v4615_v9 }
0x3252   :  { %5939 = vmatprep.mubr.msk.bf16.mxu1 %vm7601_vm11, %v7600_v24 }
0x3324   :  { %v4825_v28 = vpop.f32.mrb[68].mxu1 }
0x3325   :  { %v9406_v42 = vadd.f32 %v4825_v28, %v9331_v15  ;;  %v9409_v6 = vadd.f32 %v4825_v28, %v9334_v61  ;;  %v5921_v48 = vpop.f32.mrb[69].mxu1 }
0x3326   :  { %v4828_v21 = vpop.f32.mrb[70].mxu1 }
0x3327   :  { %v5922_v1 = vpop.f32.mrb[71].mxu1  ;;  %vm4858_vm3 = vcmp.ge.f32.partialorder %v9409_v6, 0.0  ;;  %v4859_v63 = vmul.f32 0.1, %v9409_v6  ;;  %vm4835_vm6 = vcmp.ge.f32.partialorder %v9406_v42, 0.0 }
0x3328   :  { %v4836_v44 = vmul.f32 0.1, %v9406_v42 }
0x3329   :  { %v4860_v38 = vsel %vm4858_vm3, %v9409_v6, %v4859_v63 }
0x332a   :  { %4862 = vrot.lane.b32.xlu1 %v4860_v38, %s7648_s17  ;;  %v4837_v15 = vsel %vm4835_vm6, %v9406_v42, %v4836_v44 }
0x332b   :  { %4839 = vrot.lane.b32.xlu0 %v4837_v15, %s7615_s21 }
0x339c   :  { %v4863_v61 = vpop.permute.xlu1 %4862 }
0x339d   :  { %v4865_v35 = vsel %vm3144_vm4, 0.0, %v4863_v61  ;;  %v4840_v51 = vpop.permute.xlu0 %4839 }
0x339e   :  { %v4866_v50 = vsel %vm4843_vm8, %v4865_v35, 0.0  ;;  %v4842_v57 = vsel %vm3144_vm4, 0.0, %v4840_v51 }
0x339f   :  { %4868 = vrot.lane.b32.xlu1 %v4866_v50, %s7592_s12  ;;  %4870 = vrot.lane.b32.xlu0 %v4866_v50, %s7613_s5  ;;  %v4844_v7 = vsel %vm4843_vm8, %v4842_v57, 0.0 }
0x33a3   :  { %4872 = vrot.lane.b32.xlu1 %v4866_v50, %s7599_s23  ;;  %4874 = vrot.lane.b32.xlu0 %v4866_v50, %s7625_s30 }
0x33a7   :  { %4846 = vrot.lane.b32.xlu1 %v4844_v7, %s7592_s12 }
0x33ab   :  { %4849 = vrot.lane.b32.xlu1 %v4844_v7, %s7613_s5 }
0x3411   :  { %v4869_v22 = vpop.permute.xlu1 %4868  ;;  %v4871_v40 = vpop.permute.xlu0 %4870 }
0x3412   :  { %v7521_v56 = vpack.i.bf16 %v4869_v22, %v4866_v50 }
0x3414   :  { %7522 = vrot.lane.b32.xlu0 %v7521_v56, %s7631_s2 }
0x3415   :  { %v4873_v41 = vpop.permute.xlu1 %4872  ;;  %v4875_v25 = vpop.permute.xlu0 %4874 }
0x3416   :  { %v7526_v2 = vpack.i.bf16 %v4873_v41, %v4871_v40 }
0x3418   :  { %4852 = vrot.lane.b32.xlu0 %v4844_v7, %s7599_s23  ;;  %7527 = vrot.lane.b32.xlu1 %v7526_v2, %s7631_s2  ;;  %s7649_s23 = smov 28  }
0x3419   :  { %v4847_v27 = vpop.permute.xlu1 %4846 }
0x341c   :  { %4855 = vrot.lane.b32.xlu0 %v4844_v7, %s7625_s30  ;;  %4884 = vrot.lane.b32.xlu1 %v4875_v25, %s7631_s2  ;;  %s5219_s30 = sld [smem:[%s9524_s0 + %s7649_s23]]  }
0x341d   :  { %v4850_v52 = vpop.permute.xlu1 %4849 }
0x3422   :  { %v4833_v47 = vld [vmem:[%s5219_s30] sm:$0xf] }
0x3486   :  { %v7523_v58 = vpop.permute.xlu0 %7522 }
0x3487   :  { %v7525_v13 = vunpack.i.h.bf16 %v7523_v58  ;;  %v7524_v19 = vunpack.i.l.bf16 %v7523_v58 }
0x3489   :  { %v4892_v20 = vsel %vm3695_vm5, %v4847_v27, %v7525_v13  ;;  %v4891_v5 = vsel %vm3695_vm5, %v4844_v7, %v7524_v19 }
0x348a   :  { %v4896_v23 = vpack.c.bf16 %v4892_v20, %v4891_v5  ;;  %v7528_v31 = vpop.permute.xlu1 %7527  ;;  %v4853_v10 = vpop.permute.xlu0 %4852  ;;  %v4400_v20 = vadd.f32 %v9328_v17, %v9203_v16  ;;  %v4401_v5 = vadd.f32 %v9328_v17, %v9206_v45 }
0x348b   :  { %v7530_v37 = vunpack.i.h.bf16 %v7528_v31  ;;  %v7529_v32 = vunpack.i.l.bf16 %v7528_v31 }
0x348c   :  { %5924 = vmatpush3.bf16.msra.mxu0 %v4896_v23 }
0x348d   :  { %v4893_v39 = vsel %vm3695_vm5, %v4850_v52, %v7529_v32  ;;  %v4894_v30 = vsel %vm3695_vm5, %v4853_v10, %v7530_v37  ;;  %5925 = vmatprep.subr.bf16.mxu0 %v7600_v24 }
0x348e   :  { %v4897_v36 = vpack.c.bf16 %v4894_v30, %v4893_v39  ;;  %v4885_v26 = vpop.permute.xlu1 %4884  ;;  %v4856_v43 = vpop.permute.xlu0 %4855 }
0x348f   :  { %v4895_v3 = vsel %vm3695_vm5, %v4856_v43, %v4885_v26 }
0x3490   :  { %v4898_v4 = vpack.c.bf16 %v9097_v12, %v4895_v3  ;;  %5926 = vmatpush3.bf16.msra.mxu0 %v4897_v36 }
0x3491   :  { %5927 = vmatprep.subr.bf16.mxu0 %v7600_v24 }
0x3492   :  { %v4903_v55 = vand.u32 %v4898_v4, %v9101_v33 }
0x3494   :  { %5928 = vmatpush3.bf16.msra.mxu0 %v4903_v55 }
0x3495   :  { %5943 = vmatprep.subr.bf16.mxu0 %v7600_v24 }
0x3497   :  { %5930 = vmatmul.mubr.msk.bf16.vlgmr.msra.gmra.mrb[64].mxu0 %vm4460_vm7, %v4833_v47 }
0x3498   :  { %5951 = vmatprep.mubr.msk.bf16.mxu0 %vm7601_vm11, %v7600_v24 }
0x356a   :  { %v4939_v49 = vpop.f32.mrb[64].mxu0 }
0x356b   :  { %vm4945_vm4 = vcmp.ge.f32.partialorder %v4939_v49, 0.0  ;;  %v4946_v8 = vmul.f32 0.1, %v4939_v49  ;;  %v5931_v46 = vpop.f32.mrb[65].mxu0 }
0x356c   :  { %v4942_v54 = vpop.f32.mrb[66].mxu0 }
0x356d   :  { %v5932_v14 = vpop.f32.mrb[67].mxu0  ;;  %v4947_v53 = vsel %vm4945_vm4, %v4939_v49, %v4946_v8 }
0x356e   :  { %4949 = vrot.lane.b32.xlu1 %v4947_v53, %s7602_s27  ;;  %4967 = vrot.lane.b32.xlu0 %v4947_v53, %s7642_s20  ;;  %s7650_s27 = smov 29  }
0x356f   :  { %s5220_s3 = sld [smem:[%s9524_s0 + %s7650_s27]]  }
0x3575   :  { %v4834_v13 = vld [vmem:[%s5220_s3] sm:$0xf] }
0x35e0   :  { %v4968_v18 = vpop.permute.xlu0 %4967  ;;  %v4950_v62 = vpop.permute.xlu1 %4949 }
0x35e1   :  { %v4970_v60 = vsel %vm2451_vm10, 0.0, %v4968_v18  ;;  %v4952_v59 = vsel %vm2451_vm10, 0.0, %v4950_v62 }
0x35e2   :  { %v4971_v29 = vsel %vm4408_vm14, %v4970_v60, 0.0  ;;  %v4953_v0 = vsel %vm4408_vm14, %v4952_v59, 0.0  ;;  %vm9555_vm14 = vcmask 23552  }
0x35e3   :  { %4975 = vrot.lane.b32.xlu1 %v4971_v29, %s7589_s9  ;;  %4973 = vrot.lane.b32.xlu0 %v4971_v29, %s7588_s8 }
0x35e7   :  { %4979 = vrot.lane.b32.xlu1 %v4971_v29, %s7591_s11  ;;  %4977 = vrot.lane.b32.xlu0 %v4971_v29, %s7590_s10 }
0x35eb   :  { %4955 = vrot.lane.b32.xlu0 %v4953_v0, %s7588_s8 }
0x35ef   :  { %4958 = vrot.lane.b32.xlu0 %v4953_v0, %s7589_s9 }
0x3655   :  { %v4974_v11 = vpop.permute.xlu0 %4973  ;;  %v4976_v9 = vpop.permute.xlu1 %4975 }
0x3656   :  { %v7531_v34 = vpack.i.bf16 %v4974_v11, %v4971_v29 }
0x3658   :  { %7532 = vrot.lane.b32.xlu1 %v7531_v34, %s7631_s2 }
0x3659   :  { %v4978_v28 = vpop.permute.xlu0 %4977  ;;  %v4980_v21 = vpop.permute.xlu1 %4979 }
0x365a   :  { %v7536_v48 = vpack.i.bf16 %v4978_v28, %v4976_v9 }
0x365c   :  { %4961 = vrot.lane.b32.xlu1 %v4953_v0, %s7590_s10  ;;  %7537 = vrot.lane.b32.xlu0 %v7536_v48, %s7631_s2 }
0x365d   :  { %v4956_v1 = vpop.permute.xlu0 %4955 }
0x3660   :  { %4964 = vrot.lane.b32.xlu1 %v4953_v0, %s7591_s11  ;;  %4989 = vrot.lane.b32.xlu0 %v4980_v21, %s7631_s2 }
0x3661   :  { %v4959_v63 = vpop.permute.xlu0 %4958 }
0x36ca   :  { %v7533_v44 = vpop.permute.xlu1 %7532 }
0x36cb   :  { %v7535_v38 = vunpack.i.h.bf16 %v7533_v44  ;;  %v7534_v15 = vunpack.i.l.bf16 %v7533_v44 }
0x36cd   :  { %v4996_v61 = vsel %vm3695_vm5, %v4953_v0, %v7534_v15  ;;  %v4997_v35 = vsel %vm3695_vm5, %v4956_v1, %v7535_v38 }
0x36ce   :  { %v5001_v50 = vpack.c.bf16 %v4997_v35, %v4996_v61  ;;  %v4962_v51 = vpop.permute.xlu1 %4961  ;;  %v7538_v57 = vpop.permute.xlu0 %7537 }
0x36cf   :  { %v7540_v7 = vunpack.i.h.bf16 %v7538_v57  ;;  %v7539_v22 = vunpack.i.l.bf16 %v7538_v57 }
0x36d0   :  { %5934 = vmatpush3.bf16.msra.mxu1 %v5001_v50 }
0x36d1   :  { %v4999_v56 = vsel %vm3695_vm5, %v4962_v51, %v7540_v7  ;;  %v4998_v40 = vsel %vm3695_vm5, %v4959_v63, %v7539_v22  ;;  %5935 = vmatprep.subr.bf16.mxu1 %v7600_v24 }
0x36d2   :  { %v5002_v41 = vpack.c.bf16 %v4999_v56, %v4998_v40  ;;  %v4965_v2 = vpop.permute.xlu1 %4964  ;;  %v4990_v25 = vpop.permute.xlu0 %4989 }
0x36d3   :  { %v5000_v27 = vsel %vm3695_vm5, %v4965_v2, %v4990_v25 }
0x36d4   :  { %v5003_v52 = vpack.c.bf16 %v9097_v12, %v5000_v27  ;;  %5936 = vmatpush3.bf16.msra.mxu1 %v5002_v41 }
0x36d5   :  { %5937 = vmatprep.subr.bf16.mxu1 %v7600_v24 }
0x36d6   :  { %v5008_v58 = vand.u32 %v5003_v52, %v9101_v33 }
0x36d8   :  { %5938 = vmatpush3.bf16.msra.mxu1 %v5008_v58 }
0x36db   :  { %5940 = vmatmul.mubr.msk.bf16.vlgmr.msra.gmra.mrb[72].mxu1 %vm4460_vm7, %v4834_v13  ;;  %vm9556_vm7 = vmmov %vm9555_vm14 }
0x37ae   :  { %v5044_v19 = vpop.f32.mrb[72].mxu1 }
0x37af   :  { %v5050_v23 = vadd.f32 %v5044_v19, %v9406_v42  ;;  %v5051_v31 = vadd.f32 %v5044_v19, %v9409_v6  ;;  %v5941_v10 = vpop.f32.mrb[73].mxu1 }
0x37b0   :  { %v5047_v37 = vpop.f32.mrb[74].mxu1 }
0x37b1   :  { %v5052_v32 = vadd.f32 %v5050_v23, %v4400_v20  ;;  %v5053_v39 = vadd.f32 %v5051_v31, %v4401_v5  ;;  %v5942_v30 = vpop.f32.mrb[75].mxu1 }
0x37b3   :  { %v5054_v36 = vmul.f32 0.5, %v5052_v32  ;;  %v5055_v26 = vmul.f32 0.5, %v5053_v39 }
0x37b5   :  { %vm5085_vm11 = vcmp.ge.f32.partialorder %v5055_v26, 0.0  ;;  %v5086_v43 = vmul.f32 0.1, %v5055_v26  ;;  %vm5057_vm10 = vcmp.ge.f32.partialorder %v5054_v36, 0.0  ;;  %v5058_v3 = vmul.f32 0.1, %v5054_v36 }
0x37b7   :  { %v5087_v4 = vsel %vm5085_vm11, %v5055_v26, %v5086_v43  ;;  %v5059_v16 = vsel %vm5057_vm10, %v5054_v36, %v5058_v3 }
0x37b8   :  { %5089 = vrot.lane.b32.xlu1 %v5087_v4, %s7636_s1  ;;  %5061 = vrot.lane.b32.xlu0 %v5059_v16, %s7587_s7  ;;  %s7651_s7 = smov 30  }
0x382a   :  { %v5090_v45 = vpop.permute.xlu1 %5089  ;;  %v5062_v6 = vpop.permute.xlu0 %5061 }
0x382b   :  { %v5092_v17 = vsel %vm9555_vm14, 0.0, %v5090_v45  ;;  %v5064_v55 = vsel %vm9556_vm7, 0.0, %v5062_v6 }
0x382c   :  { %v5093_v42 = vsel %vm4050_vm1, %v5092_v17, 0.0  ;;  %v5065_v47 = vsel %vm4050_vm1, %v5064_v55, 0.0  ;;  %vm5139_vm1 = vcmask 465920  }
0x382d   :  { %5095 = vrot.lane.b32.xlu1 %v5093_v42, %s7588_s8  ;;  %5097 = vrot.lane.b32.xlu0 %v5093_v42, %s7589_s9 }
0x3831   :  { %5099 = vrot.lane.b32.xlu1 %v5093_v42, %s7590_s10  ;;  %5101 = vrot.lane.b32.xlu0 %v5093_v42, %s7591_s11 }
0x3835   :  { %5103 = vrot.lane.b32.xlu1 %v5093_v42, %s7592_s12  ;;  %5105 = vrot.lane.b32.xlu0 %v5093_v42, %s7593_s13 }
0x3839   :  { %5073 = vrot.lane.b32.xlu0 %v5065_v47, %s7590_s10  ;;  %5067 = vrot.lane.b32.xlu1 %v5065_v47, %s7588_s8  ;;  %s5221_s10 = sld [smem:[%s9524_s0 + %s7651_s7]]  }
0x383d   :  { %5070 = vrot.lane.b32.xlu1 %v5065_v47, %s7589_s9 }
0x383f   :  { %v5056_v58 = vld [vmem:[%s5221_s10] sm:$0x1] }
0x389f   :  { %v5096_v49 = vpop.permute.xlu1 %5095  ;;  %v5098_v46 = vpop.permute.xlu0 %5097 }
0x38a0   :  { %v7541_v8 = vpack.i.bf16 %v5096_v49, %v5093_v42 }
0x38a2   :  { %7542 = vrot.lane.b32.xlu0 %v7541_v8, %s7631_s2 }
0x38a3   :  { %v5100_v54 = vpop.permute.xlu1 %5099  ;;  %v5102_v53 = vpop.permute.xlu0 %5101 }
0x38a4   :  { %v7546_v14 = vpack.i.bf16 %v5100_v54, %v5098_v46 }
0x38a6   :  { %5076 = vrot.lane.b32.xlu0 %v5065_v47, %s7591_s11  ;;  %7547 = vrot.lane.b32.xlu1 %v7546_v14, %s7631_s2 }
0x38a7   :  { %v5104_v18 = vpop.permute.xlu1 %5103  ;;  %v5106_v29 = vpop.permute.xlu0 %5105 }
0x38a8   :  { %v7551_v60 = vpack.i.bf16 %v5104_v18, %v5102_v53 }
0x38aa   :  { %5079 = vrot.lane.b32.xlu1 %v5065_v47, %s7592_s12  ;;  %7552 = vrot.lane.b32.xlu0 %v7551_v60, %s7631_s2 }
0x38ab   :  { %v5068_v62 = vpop.permute.xlu1 %5067  ;;  %v5074_v59 = vpop.permute.xlu0 %5073 }
0x38ae   :  { %5082 = vrot.lane.b32.xlu1 %v5065_v47, %s7593_s13  ;;  %5119 = vrot.lane.b32.xlu0 %v5106_v29, %s7631_s2  ;;  %s5222_s13 = sld [smem:[%s9524_s0 + %s7627_s22]]  }
0x38af   :  { %v5071_v0 = vpop.permute.xlu1 %5070 }
0x3914   :  { %v7543_v11 = vpop.permute.xlu0 %7542 }
0x3915   :  { %v7545_v34 = vunpack.i.h.bf16 %v7543_v11  ;;  %v7544_v9 = vunpack.i.l.bf16 %v7543_v11 }
0x3917   :  { %v5129_v28 = vsel %vm3695_vm5, %v5068_v62, %v7545_v34  ;;  %v5128_v48 = vsel %vm3695_vm5, %v5065_v47, %v7544_v9 }
0x3918   :  { %v5135_v21 = vpack.c.bf16 %v5129_v28, %v5128_v48  ;;  %v7548_v1 = vpop.permute.xlu1 %7547  ;;  %v5077_v63 = vpop.permute.xlu0 %5076 }
0x3919   :  { %v7550_v44 = vunpack.i.h.bf16 %v7548_v1  ;;  %v7549_v38 = vunpack.i.l.bf16 %v7548_v1 }
0x391a   :  { %5944 = vmatpush3.bf16.msra.mxu0 %v5135_v21 }
0x391b   :  { %v5130_v15 = vsel %vm3695_vm5, %v5071_v0, %v7549_v38  ;;  %v5131_v61 = vsel %vm3695_vm5, %v5074_v59, %v7550_v44  ;;  %5945 = vmatprep.subr.bf16.mxu0 %v7600_v24 }
0x391c   :  { %v5136_v35 = vpack.c.bf16 %v5131_v61, %v5130_v15  ;;  %v5080_v50 = vpop.permute.xlu1 %5079  ;;  %v7553_v51 = vpop.permute.xlu0 %7552 }
0x391d   :  { %v7555_v57 = vunpack.i.h.bf16 %v7553_v51  ;;  %v7554_v7 = vunpack.i.l.bf16 %v7553_v51 }
0x391e   :  { %5946 = vmatpush3.bf16.msra.mxu0 %v5136_v35 }
0x391f   :  { %v5133_v22 = vsel %vm3695_vm5, %v5080_v50, %v7555_v57  ;;  %v5132_v56 = vsel %vm3695_vm5, %v5077_v63, %v7554_v7  ;;  %5947 = vmatprep.subr.bf16.mxu0 %v7600_v24 }
0x3920   :  { %v5137_v40 = vpack.c.bf16 %v5133_v22, %v5132_v56  ;;  %v5083_v41 = vpop.permute.xlu1 %5082  ;;  %v5120_v2 = vpop.permute.xlu0 %5119 }
0x3921   :  { %v5134_v25 = vsel %vm3695_vm5, %v5083_v41, %v5120_v2 }
0x3922   :  { %v5138_v27 = vpack.c.bf16 %v9097_v12, %v5134_v25  ;;  %5948 = vmatpush3.bf16.msra.mxu0 %v5137_v40 }
0x3923   :  { %5949 = vmatprep.subr.bf16.mxu0 %v7600_v24 }
0x3924   :  { %v5144_v52 = vand.u32 %v5138_v27, %v9101_v33 }
0x3926   :  { %5950 = vmatpush3.bf16.msra.mxu0 %v5144_v52 }
0x3929   :  { %5952 = vmatmul.mubr.msk.bf16.vlgmr.msra.gmra.mrb[68].mxu0 %vm5139_vm1, %v5056_v58 }
0x39fc   :  { %v5180_v13 = vpop.f32.mrb[68].mxu0 }
0x39fd   :  { %7584 = vtanh.f32 %v5180_v13  ;;  %v5953_v19 = vpop.f32.mrb[69].mxu0 }
0x39fe   :  { %v5183_v20 = vpop.f32.mrb[70].mxu0 }
0x39ff   :  { %v5954_v5 = vpop.f32.mrb[71].mxu0 }
0x3a07   :  { %v7585_v12 = vpop.eup %7584 }
0x3a08   :  { %5187 = vst [vmem:[%s5222_s13] sm:$0x1] %v7585_v12 }

</bundles_post_ra>
